<compile_context>
chip_gen: v6e
topology: v6e:2x2x1
jax: 0.10.0
libtpu: 0.0.40
codegen_flags: <defaults>
</compile_context>

<pallas_src>
import functools

import jax
import jax.numpy as jnp
from jax.experimental import pallas as pl
from jax.experimental.pallas import tpu as pltpu


# -----------------------------------------------------------------------------
# Pass 1 (single grid step): x pre-activations of all three gates.
#   res = [Wx_u; Wx_r; Wx_o | b] @ [im2col(x); 1]   (one lane-dense matmul)
#   out[t] = res[:, t-th (B*H*W)-wide lane slab]
# -----------------------------------------------------------------------------
def _xpre_kernel(xcols_ref, wxb_ref, out_ref, *, T, NB):
    res = jnp.dot(wxb_ref[...], xcols_ref[...],
                  preferred_element_type=jnp.float32)       # (3Ch, T*B*HW)
    for t in range(T):                                       # T lane-dense stores
        out_ref[t] = res[:, t * NB:(t + 1) * NB]


# -----------------------------------------------------------------------------
# Pass 2: the serial recurrence.  One grid step handles `bpg` batch elements
# folded into the lane dimension (lanes = L = bpg * H * W).
# -----------------------------------------------------------------------------
def _gru_kernel(xpre_ref, mask_ref, wur_ref, wo_ref, cts_ref, hfin_ref,
                *, T, H, W, Ch, K, bpg, pad_rows):
    HW = H * W
    L = bpg * HW
    P = K // 2
    offsets = [(ky - P, kx - P) for ky in range(K) for kx in range(K)]
    # Roll so that rolled[:, p] == v[:, p + dy*W + dx] (circular over L lanes).
    # The combined mask zeroes every wrapped tap: row wrap, image-edge wrap AND
    # the wrap between batch elements sharing the lane axis.
    shifts = [(-(dy * W + dx)) % L for dy, dx in offsets]

    wur = wur_ref[...]      # (2Ch, KKCh+pad) bf16: update & reset h-weights, stacked
    wo = wo_ref[...]        # (Ch,  KKCh+pad) bf16: out-gate h-weights
    zpad = jnp.zeros((pad_rows, L), jnp.float32) if pad_rows else None

    def make_cols(v):
        # im2col rows of the (implicitly zero-padded) hidden plane(s): 9 XLU
        # rolls, one wide VMEM-resident mask multiply, one bf16 cast.
        taps = [v if s == 0 else pltpu.roll(v, s, axis=1) for s in shifts]
        if pad_rows:
            taps.append(zpad)
        cols = jnp.concatenate(taps, axis=0) * mask_ref[...]
        return cols.astype(jnp.bfloat16)                     # (KKCh+pad, L)

    h = jnp.zeros((Ch, L), jnp.float32)
    for t in range(T):            # fully unrolled (small T); fori_loop for big T
        xpre = xpre_ref[t]                                   # (3Ch, L) f32

        # Fused update + reset gates: one MXU matmul with N = L lanes.
        ur = (jnp.dot(wur, make_cols(h), preferred_element_type=jnp.float32)
              + xpre[:2 * Ch])                               # (2Ch, L)
        update = jax.nn.sigmoid(ur[:Ch])
        reset = jax.nn.sigmoid(ur[Ch:])

        # Out gate: roll(h*reset) reuses the same shifts; out-of-plane taps are
        # zeroed by the same mask (the conv's zero padding).
        out = jnp.tanh(
            jnp.dot(wo, make_cols(h * reset), preferred_element_type=jnp.float32)
            + xpre[2 * Ch:])                                 # (Ch, L)

        h = h * (1.0 - update) + out * update
        cts_ref[t] = h                                       # lane-dense (Ch, L) store

    hfin_ref[...] = h                                        # written once per group


# -----------------------------------------------------------------------------
# Wrapper
# -----------------------------------------------------------------------------
def _batch_fold(B):
    """Batch elements folded into lanes per grid step of the recurrence.

    v7x has two TensorCores -> keep a multi-step "parallel" grid so both cores
    work, folding the per-core remainder of B into lanes.  Single-TC chips
    (v5e / v6e / others) fold all of B into lanes (grid of 1).
    """
    try:
        kind = jax.devices()[0].device_kind.lower()
    except Exception:
        kind = ""
    if ("v7" in kind or "7x" in kind) and B >= 2 and B % 2 == 0:
        return B // 2
    return B


def convgru1_forward(x, params, *, kernel_size=3):
    """x: (B, T, C, H, W) float32 (PyTorch layout).

    Returns (c_ts, h_ts) exactly like ConvGRU_1.forward in eval mode:
      c_ts: (B, T, hidden, H, W), h_ts: (num_layers=1, B, hidden, H, W).
    """
    B, T, Cx, H, W = x.shape
    K = kernel_size
    P = K // 2
    Ch = params["wo"].shape[0]
    KKCh_pad = params["wo"].shape[1]          # contraction dim incl. zero pad
    HW = H * W
    KKCx = K * K * Cx
    KKCh = K * K * Ch
    pad_rows = KKCh_pad - KKCh

    if HW % 128 != 0:
        raise ValueError("H*W must be a multiple of 128 for the lane-dense layout.")

    bpg = _batch_fold(B)                      # batch elements per grid step
    n_groups = B // bpg
    L = bpg * HW                              # lane width of the recurrence
    NB = B * HW                               # lane width of one xpre time slab
    N = T * NB                                # lane width of pass 1

    # ---- host-side layout prep (cheap XLA ops) ------------------------------
    # im2col of x with contraction order (c, ky, kx) matching params["wxb"];
    # lanes ordered (t, b, hw); appended ones row folds the bias into the matmul.
    # TODO(synk): build the x taps in-kernel with the same roll+mask trick to
    # avoid the 9x im2col HBM expansion once B*T*H*W becomes HBM-relevant.
    xp = jnp.pad(x, ((0, 0), (0, 0), (0, 0), (P, P), (P, P)))
    x_taps = [xp[:, :, :, ky:ky + H, kx:kx + W]
              for ky in range(K) for kx in range(K)]
    xcols = jnp.stack(x_taps, axis=3).reshape(B, T, KKCx, HW)
    xcols = jnp.transpose(xcols, (2, 1, 0, 3)).reshape(KKCx, N)
    xcols = jnp.concatenate([xcols, jnp.ones((1, N), x.dtype)], axis=0)

    # Combined tap-validity mask (implements the conv's zero padding and zeroes
    # roll wrap-around between batch elements sharing the lane axis).
    offsets = [(ky - P, kx - P) for ky in range(K) for kx in range(K)]
    p = jnp.arange(L) % HW
    yy, xx = p // W, p % W
    tap_masks = [
        jnp.broadcast_to(
            (((yy + dy) >= 0) & ((yy + dy) < H)
             & ((xx + dx) >= 0) & ((xx + dx) < W)).astype(jnp.float32)[None, :],
            (Ch, L))
        for dy, dx in offsets]
    if pad_rows:
        tap_masks.append(jnp.zeros((pad_rows, L), jnp.float32))
    mask = jnp.concatenate(tap_masks, axis=0)                # (KKCh_pad, L)

    # ---- pass 1: one lane-dense matmul for all x pre-activations ------------
    xpre = pl.pallas_call(
        functools.partial(_xpre_kernel, T=T, NB=NB),
        out_shape=jax.ShapeDtypeStruct((T, 3 * Ch, NB), jnp.float32),
        grid=(1,),
        in_specs=[
            pl.BlockSpec((KKCx + 1, N), lambda i: (0, 0)),
            pl.BlockSpec((3 * Ch, KKCx + 1), lambda i: (0, 0)),
        ],
        out_specs=pl.BlockSpec((T, 3 * Ch, NB), lambda i: (0, 0, 0)),
        compiler_params=pltpu.CompilerParams(
            dimension_semantics=("arbitrary",)),
        cost_estimate=pl.CostEstimate(
            flops=2 * 3 * Ch * (KKCx + 1) * N,
            transcendentals=0,
            bytes_accessed=4 * ((KKCx + 1) * N + 3 * Ch * N
                                + 3 * Ch * (KKCx + 1))),
    )(xcols, params["wxb"])

    # ---- pass 2: the recurrence ---------------------------------------------
    kernel = functools.partial(_gru_kernel, T=T, H=H, W=W, Ch=Ch, K=K,
                               bpg=bpg, pad_rows=pad_rows)
    c_flat, h_flat = pl.pallas_call(
        kernel,
        out_shape=(
            jax.ShapeDtypeStruct((T, Ch, B * HW), jnp.float32),
            jax.ShapeDtypeStruct((Ch, B * HW), jnp.float32),
        ),
        grid=(n_groups,),
        in_specs=[
            pl.BlockSpec((T, 3 * Ch, L), lambda g: (0, 0, g)),
            pl.BlockSpec((KKCh_pad, L), lambda g: (0, 0)),
            pl.BlockSpec((2 * Ch, KKCh_pad), lambda g: (0, 0)),
            pl.BlockSpec((Ch, KKCh_pad), lambda g: (0, 0)),
        ],
        out_specs=(
            pl.BlockSpec((T, Ch, L), lambda g: (0, 0, g)),
            pl.BlockSpec((Ch, L), lambda g: (0, g)),
        ),
        compiler_params=pltpu.CompilerParams(
            dimension_semantics=("parallel",)),
        cost_estimate=pl.CostEstimate(
            flops=2 * B * T * HW * KKCh_pad * 3 * Ch + 12 * B * T * HW * Ch,
            transcendentals=3 * B * T * HW * Ch,
            bytes_accessed=4 * (B * T * 3 * Ch * HW + B * T * Ch * HW
                                + B * Ch * HW + n_groups * KKCh_pad * L)
                           + 2 * 3 * Ch * KKCh_pad),
    )(xpre, mask, params["wur"], params["wo"])

    # Lane layout is (b, hw); time-major on the first axis -> reorder on host.
    c_ts = jnp.transpose(c_flat.reshape(T, Ch, B, H, W), (2, 0, 1, 3, 4))
    h_ts = jnp.transpose(h_flat.reshape(Ch, B, H, W), (1, 0, 2, 3))[None]
    return c_ts, h_ts


# -----------------------------------------------------------------------------
# Parameters (torch layout + conversion to the kernels' matmul layouts)
# -----------------------------------------------------------------------------
def init_convgru1_params(key, input_size, hidden_size, kernel_size=3):
    """Torch-layout params, mimicking ConvGRUCell init (orthogonal W, zero b)."""
    c_in = input_size + hidden_size

    def ortho(k):
        w = jax.nn.initializers.orthogonal()(
            k, (hidden_size, c_in * kernel_size * kernel_size), jnp.float32)
        return w.reshape(hidden_size, c_in, kernel_size, kernel_size)

    k_u, k_r, k_o = jax.random.split(key, 3)
    zeros = jnp.zeros((hidden_size,), jnp.float32)
    return dict(Wu=ortho(k_u), Wr=ortho(k_r), Wo=ortho(k_o),
                bu=zeros, br=zeros, bo=zeros)


def prepare_params(torch_params, input_size, kernel_size=3):
    """(Cout, Cin, K, K) torch weights -> fused matmul layouts for the kernels."""
    Cx = input_size
    K = kernel_size
    Wu, Wr, Wo = torch_params["Wu"], torch_params["Wr"], torch_params["Wo"]
    Ch = Wu.shape[0]
    KKCh = K * K * Ch
    pad_rows = (-KKCh) % 16        # pad bf16 contraction dim to 16-sublane multiple

    def x_part(w):   # (Ch, Cx, K, K) -> (Ch, Cx*K*K), contraction order (c, ky, kx)
        return w[:, :Cx].reshape(Ch, Cx * K * K)

    def h_part(w):   # (Ch, Ch, K, K) -> (Ch, K*K*Ch + pad), contraction (ky, kx, c)
        hp = jnp.transpose(w[:, Cx:], (0, 2, 3, 1)).reshape(Ch, KKCh)
        return jnp.pad(hp, ((0, 0), (0, pad_rows)))

    wx = jnp.concatenate([x_part(Wu), x_part(Wr), x_part(Wo)], axis=0)  # (3Ch, KKCx)
    bx = jnp.concatenate([torch_params["bu"], torch_params["br"],
                          torch_params["bo"]])[:, None]                 # (3Ch, 1)
    wxb = jnp.concatenate([wx, bx], axis=1)                             # (3Ch, KKCx+1)
    wur = jnp.concatenate([h_part(Wu), h_part(Wr)],
                          axis=0).astype(jnp.bfloat16)                  # (2Ch, KKCh+pad)
    wo = h_part(Wo).astype(jnp.bfloat16)                                # (Ch,  KKCh+pad)
    return dict(wxb=wxb, wur=wur, wo=wo)


# -----------------------------------------------------------------------------
# Pure-JAX reference (mirrors the PyTorch module, eval mode) for validation.
# -----------------------------------------------------------------------------
def convgru1_reference(x, torch_params):
    B, T, Cx, H, W = x.shape
    Ch = torch_params["Wu"].shape[0]
    dn = ("NCHW", "OIHW", "NCHW")

    def conv(inp, w, b):
        out = jax.lax.conv_general_dilated(inp, w, (1, 1), "SAME",
                                           dimension_numbers=dn)
        return out + b[None, :, None, None]

    h = jnp.zeros((B, Ch, H, W), jnp.float32)
    cs = []
    for t in range(T):
        xt = x[:, t]
        comb = jnp.concatenate([xt, h], axis=1)
        u = jax.nn.sigmoid(conv(comb, torch_params["Wu"], torch_params["bu"]))
        r = jax.nn.sigmoid(conv(comb, torch_params["Wr"], torch_params["br"]))
        o = jnp.tanh(conv(jnp.concatenate([xt, h * r], axis=1),
                          torch_params["Wo"], torch_params["bo"]))
        h = h * (1.0 - u) + o * u
        cs.append(h)
    return jnp.stack(cs, axis=1), h[None]


if __name__ == "__main__":
    # Shapes implied by the forward: x is (B, T, C, H, W).
    B, T, Cx, H, W = 2, 8, 4, 16, 16
    hidden_size = 8
    kernel_size = 3

    key = jax.random.PRNGKey(0)
    k_x, k_w = jax.random.split(key)
    x = jax.random.normal(k_x, (B, T, Cx, H, W), jnp.float32)
    torch_params = init_convgru1_params(k_w, Cx, hidden_size, kernel_size)
    params = prepare_params(torch_params, Cx, kernel_size)

    # NOTE: nn.Dropout(p=0.1) is identity in eval mode; eval-mode semantics are
    # implemented.  # TODO(synk): add stochastic dropout via pltpu.prng_* if train mode is needed.
    fwd = jax.jit(functools.partial(convgru1_forward, kernel_size=kernel_size))
    c_ts, h_ts = fwd(x, params)
    jax.block_until_ready((c_ts, h_ts))

    assert c_ts.shape == (B, T, hidden_size, H, W)
    assert h_ts.shape == (1, B, hidden_size, H, W)

    # Sanity check against the f32 reference.  The recurrent matmuls use bf16
    # MXU operands (f32 accumulation), so allow O(1e-2) noise over T=8 steps;
    # a layout / roll / mask bug would show up as O(1) error.
    c_ref, h_ref = convgru1_reference(x, torch_params)
    err_c = float(jnp.max(jnp.abs(c_ts - c_ref)))
    err_h = float(jnp.max(jnp.abs(h_ts - h_ref)))
    assert err_c < 1e-1 and err_h < 1e-1, (err_c, err_h)
    print("KERNEL_OK")
</pallas_src>

<mosaic_0001>
module attributes {stable_mosaic.version = 11 : i64} {
  func.func @_xpre_kernel(%arg0: i32, %arg1: memref<37x4096xf32, #tpu.memory_space<vmem>>, %arg2: memref<24x37xf32, #tpu.memory_space<vmem>>, %arg3: memref<8x24x512xf32, #tpu.memory_space<vmem>>) attributes {dimension_semantics = [#tpu.dimension_semantics<arbitrary>], iteration_bounds = array<i64: 1>, scalar_prefetch = 0 : i64, scratch_operands = 0 : i64, tpu.core_type = #tpu.core_type<tc>, window_params = [{pipeline_mode = #tpu.pipeline_mode<synchronous>, transform_indices = @transform_0, window_bounds = array<i64: 37, 4096>}, {pipeline_mode = #tpu.pipeline_mode<synchronous>, transform_indices = @transform_1, window_bounds = array<i64: 24, 37>}, {pipeline_mode = #tpu.pipeline_mode<synchronous>, transform_indices = @transform_2, window_bounds = array<i64: 8, 24, 512>}]} {
    %c0 = arith.constant 0 : index
    %c0_0 = arith.constant 0 : index
    %0 = vector.load %arg2[%c0, %c0_0] : memref<24x37xf32, #tpu.memory_space<vmem>>, vector<24x37xf32>
    %c0_1 = arith.constant 0 : index
    %c0_2 = arith.constant 0 : index
    %1 = vector.load %arg1[%c0_1, %c0_2] : memref<37x4096xf32, #tpu.memory_space<vmem>>, vector<37x4096xf32>
    %cst = arith.constant dense<0.000000e+00> : vector<24x4096xf32>
    %2 = tpu.matmul %0, %1, %cst {dimension_numbers = #tpu.dot_dimension_numbers<[1], [0], [0], [1], [0, 0, 1, 1], [], []>} : vector<24x37xf32>, vector<37x4096xf32>, vector<24x4096xf32> -> vector<24x4096xf32>
    %3 = vector.extract_strided_slice %2 {offsets = [0, 0], sizes = [24, 512], strides = [1, 1]} : vector<24x4096xf32> to vector<24x512xf32>
    %c0_3 = arith.constant 0 : index
    %c0_4 = arith.constant 0 : index
    %c0_5 = arith.constant 0 : index
    %4 = vector.load %arg3[%c0_3, %c0_4, %c0_5] : memref<8x24x512xf32, #tpu.memory_space<vmem>>, vector<1x24x512xf32>
    %5 = vector.shape_cast %4 : vector<1x24x512xf32> to vector<24x512xf32>
    %6 = vector.shape_cast %3 : vector<24x512xf32> to vector<1x24x512xf32>
    tpu.vector_store %arg3[%c0_3, %c0_4, %c0_5], %6 {strides = array<i32>} : memref<8x24x512xf32, #tpu.memory_space<vmem>>, vector<1x24x512xf32>,
    %7 = vector.extract_strided_slice %2 {offsets = [0, 512], sizes = [24, 512], strides = [1, 1]} : vector<24x4096xf32> to vector<24x512xf32>
    %c1 = arith.constant 1 : index
    %c0_6 = arith.constant 0 : index
    %c0_7 = arith.constant 0 : index
    %8 = vector.load %arg3[%c1, %c0_6, %c0_7] : memref<8x24x512xf32, #tpu.memory_space<vmem>>, vector<1x24x512xf32>
    %9 = vector.shape_cast %8 : vector<1x24x512xf32> to vector<24x512xf32>
    %10 = vector.shape_cast %7 : vector<24x512xf32> to vector<1x24x512xf32>
    tpu.vector_store %arg3[%c1, %c0_6, %c0_7], %10 {strides = array<i32>} : memref<8x24x512xf32, #tpu.memory_space<vmem>>, vector<1x24x512xf32>,
    %11 = vector.extract_strided_slice %2 {offsets = [0, 1024], sizes = [24, 512], strides = [1, 1]} : vector<24x4096xf32> to vector<24x512xf32>
    %c2 = arith.constant 2 : index
    %c0_8 = arith.constant 0 : index
    %c0_9 = arith.constant 0 : index
    %12 = vector.load %arg3[%c2, %c0_8, %c0_9] : memref<8x24x512xf32, #tpu.memory_space<vmem>>, vector<1x24x512xf32>
    %13 = vector.shape_cast %12 : vector<1x24x512xf32> to vector<24x512xf32>
    %14 = vector.shape_cast %11 : vector<24x512xf32> to vector<1x24x512xf32>
    tpu.vector_store %arg3[%c2, %c0_8, %c0_9], %14 {strides = array<i32>} : memref<8x24x512xf32, #tpu.memory_space<vmem>>, vector<1x24x512xf32>,
    %15 = vector.extract_strided_slice %2 {offsets = [0, 1536], sizes = [24, 512], strides = [1, 1]} : vector<24x4096xf32> to vector<24x512xf32>
    %c3 = arith.constant 3 : index
    %c0_10 = arith.constant 0 : index
    %c0_11 = arith.constant 0 : index
    %16 = vector.load %arg3[%c3, %c0_10, %c0_11] : memref<8x24x512xf32, #tpu.memory_space<vmem>>, vector<1x24x512xf32>
    %17 = vector.shape_cast %16 : vector<1x24x512xf32> to vector<24x512xf32>
    %18 = vector.shape_cast %15 : vector<24x512xf32> to vector<1x24x512xf32>
    tpu.vector_store %arg3[%c3, %c0_10, %c0_11], %18 {strides = array<i32>} : memref<8x24x512xf32, #tpu.memory_space<vmem>>, vector<1x24x512xf32>,
    %19 = vector.extract_strided_slice %2 {offsets = [0, 2048], sizes = [24, 512], strides = [1, 1]} : vector<24x4096xf32> to vector<24x512xf32>
    %c4 = arith.constant 4 : index
    %c0_12 = arith.constant 0 : index
    %c0_13 = arith.constant 0 : index
    %20 = vector.load %arg3[%c4, %c0_12, %c0_13] : memref<8x24x512xf32, #tpu.memory_space<vmem>>, vector<1x24x512xf32>
    %21 = vector.shape_cast %20 : vector<1x24x512xf32> to vector<24x512xf32>
    %22 = vector.shape_cast %19 : vector<24x512xf32> to vector<1x24x512xf32>
    tpu.vector_store %arg3[%c4, %c0_12, %c0_13], %22 {strides = array<i32>} : memref<8x24x512xf32, #tpu.memory_space<vmem>>, vector<1x24x512xf32>,
    %23 = vector.extract_strided_slice %2 {offsets = [0, 2560], sizes = [24, 512], strides = [1, 1]} : vector<24x4096xf32> to vector<24x512xf32>
    %c5 = arith.constant 5 : index
    %c0_14 = arith.constant 0 : index
    %c0_15 = arith.constant 0 : index
    %24 = vector.load %arg3[%c5, %c0_14, %c0_15] : memref<8x24x512xf32, #tpu.memory_space<vmem>>, vector<1x24x512xf32>
    %25 = vector.shape_cast %24 : vector<1x24x512xf32> to vector<24x512xf32>
    %26 = vector.shape_cast %23 : vector<24x512xf32> to vector<1x24x512xf32>
    tpu.vector_store %arg3[%c5, %c0_14, %c0_15], %26 {strides = array<i32>} : memref<8x24x512xf32, #tpu.memory_space<vmem>>, vector<1x24x512xf32>,
    %27 = vector.extract_strided_slice %2 {offsets = [0, 3072], sizes = [24, 512], strides = [1, 1]} : vector<24x4096xf32> to vector<24x512xf32>
    %c6 = arith.constant 6 : index
    %c0_16 = arith.constant 0 : index
    %c0_17 = arith.constant 0 : index
    %28 = vector.load %arg3[%c6, %c0_16, %c0_17] : memref<8x24x512xf32, #tpu.memory_space<vmem>>, vector<1x24x512xf32>
    %29 = vector.shape_cast %28 : vector<1x24x512xf32> to vector<24x512xf32>
    %30 = vector.shape_cast %27 : vector<24x512xf32> to vector<1x24x512xf32>
    tpu.vector_store %arg3[%c6, %c0_16, %c0_17], %30 {strides = array<i32>} : memref<8x24x512xf32, #tpu.memory_space<vmem>>, vector<1x24x512xf32>,
    %31 = vector.extract_strided_slice %2 {offsets = [0, 3584], sizes = [24, 512], strides = [1, 1]} : vector<24x4096xf32> to vector<24x512xf32>
    %c7 = arith.constant 7 : index
    %c0_18 = arith.constant 0 : index
    %c0_19 = arith.constant 0 : index
    %32 = vector.load %arg3[%c7, %c0_18, %c0_19] : memref<8x24x512xf32, #tpu.memory_space<vmem>>, vector<1x24x512xf32>
    %33 = vector.shape_cast %32 : vector<1x24x512xf32> to vector<24x512xf32>
    %34 = vector.shape_cast %31 : vector<24x512xf32> to vector<1x24x512xf32>
    tpu.vector_store %arg3[%c7, %c0_18, %c0_19], %34 {strides = array<i32>} : memref<8x24x512xf32, #tpu.memory_space<vmem>>, vector<1x24x512xf32>,
    return
  }
  func.func @transform_0(%arg0: i32) -> (i32, i32) {
    %c0_i32 = arith.constant 0 : i32
    %c0_i32_0 = arith.constant 0 : i32
    %c0_i32_1 = arith.constant 0 : i32
    return %c0_i32, %c0_i32_0 : i32, i32
  }
  func.func @transform_1(%arg0: i32) -> (i32, i32) {
    %c0_i32 = arith.constant 0 : i32
    %c0_i32_0 = arith.constant 0 : i32
    %c0_i32_1 = arith.constant 0 : i32
    return %c0_i32, %c0_i32_0 : i32, i32
  }
  func.func @transform_2(%arg0: i32) -> (i32, i32, i32) {
    %c0_i32 = arith.constant 0 : i32
    %c0_i32_0 = arith.constant 0 : i32
    %c0_i32_1 = arith.constant 0 : i32
    %c0_i32_2 = arith.constant 0 : i32
    return %c0_i32, %c0_i32_0, %c0_i32_1 : i32, i32, i32
  }
}

module attributes {stable_mosaic.version = 11 : i64} {
  func.func @_gru_kernel(%arg0: i32, %arg1: memref<8x24x512xf32, #tpu.memory_space<vmem>>, %arg2: memref<80x512xf32, #tpu.memory_space<vmem>>, %arg3: memref<16x80xbf16, #tpu.memory_space<vmem>>, %arg4: memref<8x80xbf16, #tpu.memory_space<vmem>>, %arg5: memref<8x8x512xf32, #tpu.memory_space<vmem>>, %arg6: memref<8x512xf32, #tpu.memory_space<vmem>>) attributes {dimension_semantics = [#tpu.dimension_semantics<parallel>], iteration_bounds = array<i64: 1>, scalar_prefetch = 0 : i64, scratch_operands = 0 : i64, tpu.core_type = #tpu.core_type<tc>, window_params = [{transform_indices = @transform_0, window_bounds = array<i64: 8, 24, 512>}, {pipeline_mode = #tpu.pipeline_mode<synchronous>, transform_indices = @transform_1, window_bounds = array<i64: 80, 512>}, {pipeline_mode = #tpu.pipeline_mode<synchronous>, transform_indices = @transform_2, window_bounds = array<i64: 16, 80>}, {pipeline_mode = #tpu.pipeline_mode<synchronous>, transform_indices = @transform_3, window_bounds = array<i64: 8, 80>}, {transform_indices = @transform_4, window_bounds = array<i64: 8, 8, 512>}, {transform_indices = @transform_5, window_bounds = array<i64: 8, 512>}]} {
    %c0 = arith.constant 0 : index
    %c0_0 = arith.constant 0 : index
    %0 = vector.load %arg3[%c0, %c0_0] : memref<16x80xbf16, #tpu.memory_space<vmem>>, vector<16x80xbf16>
    %c0_1 = arith.constant 0 : index
    %c0_2 = arith.constant 0 : index
    %1 = vector.load %arg4[%c0_1, %c0_2] : memref<8x80xbf16, #tpu.memory_space<vmem>>, vector<8x80xbf16>
    %cst = arith.constant 0.000000e+00 : f32
    %2 = vector.broadcast %cst : f32 to vector<8x512xf32>
    %cst_3 = arith.constant 0.000000e+00 : f32
    %3 = vector.broadcast %cst_3 : f32 to vector<8x512xf32>
    %c0_4 = arith.constant 0 : index
    %c0_5 = arith.constant 0 : index
    %c0_6 = arith.constant 0 : index
    %4 = vector.load %arg1[%c0_4, %c0_5, %c0_6] : memref<8x24x512xf32, #tpu.memory_space<vmem>>, vector<1x24x512xf32>
    %5 = vector.shape_cast %4 : vector<1x24x512xf32> to vector<24x512xf32>
    %c17_i32 = arith.constant 17 : i32
    %6 = tpu.dynamic_rotate %3 by %c17_i32 dim 1 : vector<8x512xf32>, i32 -> vector<8x512xf32>
    %c16_i32 = arith.constant 16 : i32
    %7 = tpu.dynamic_rotate %3 by %c16_i32 dim 1 : vector<8x512xf32>, i32 -> vector<8x512xf32>
    %c15_i32 = arith.constant 15 : i32
    %8 = tpu.dynamic_rotate %3 by %c15_i32 dim 1 : vector<8x512xf32>, i32 -> vector<8x512xf32>
    %c1_i32 = arith.constant 1 : i32
    %9 = tpu.dynamic_rotate %3 by %c1_i32 dim 1 : vector<8x512xf32>, i32 -> vector<8x512xf32>
    %c511_i32 = arith.constant 511 : i32
    %10 = tpu.dynamic_rotate %3 by %c511_i32 dim 1 : vector<8x512xf32>, i32 -> vector<8x512xf32>
    %c497_i32 = arith.constant 497 : i32
    %11 = tpu.dynamic_rotate %3 by %c497_i32 dim 1 : vector<8x512xf32>, i32 -> vector<8x512xf32>
    %c496_i32 = arith.constant 496 : i32
    %12 = tpu.dynamic_rotate %3 by %c496_i32 dim 1 : vector<8x512xf32>, i32 -> vector<8x512xf32>
    %c495_i32 = arith.constant 495 : i32
    %13 = tpu.dynamic_rotate %3 by %c495_i32 dim 1 : vector<8x512xf32>, i32 -> vector<8x512xf32>
    %14 = tpu.concatenate %6, %7, %8, %9, %3, %10, %11, %12, %13, %2 in 0 : vector<8x512xf32>, vector<8x512xf32>, vector<8x512xf32>, vector<8x512xf32>, vector<8x512xf32>, vector<8x512xf32>, vector<8x512xf32>, vector<8x512xf32>, vector<8x512xf32>, vector<8x512xf32> -> vector<80x512xf32>
    %c0_7 = arith.constant 0 : index
    %c0_8 = arith.constant 0 : index
    %15 = vector.load %arg2[%c0_7, %c0_8] : memref<80x512xf32, #tpu.memory_space<vmem>>, vector<80x512xf32>
    %16 = arith.mulf %14, %15 : vector<80x512xf32>
    %17 = arith.truncf %16 : vector<80x512xf32> to vector<80x512xbf16>
    %cst_9 = arith.constant dense<0.000000e+00> : vector<16x512xf32>
    %18 = tpu.matmul %0, %17, %cst_9 {dimension_numbers = #tpu.dot_dimension_numbers<[1], [0], [0], [1], [0, 0, 1, 1], [], []>} : vector<16x80xbf16>, vector<80x512xbf16>, vector<16x512xf32> -> vector<16x512xf32>
    %19 = vector.extract_strided_slice %5 {offsets = [0, 0], sizes = [16, 512], strides = [1, 1]} : vector<24x512xf32> to vector<16x512xf32>
    %20 = arith.addf %18, %19 : vector<16x512xf32>
    %21 = vector.extract_strided_slice %20 {offsets = [0, 0], sizes = [8, 512], strides = [1, 1]} : vector<16x512xf32> to vector<8x512xf32>
    %22 = arith.negf %21 : vector<8x512xf32>
    %23 = math.exp %22 : vector<8x512xf32>
    %cst_10 = arith.constant 1.000000e+00 : f32
    %24 = vector.broadcast %cst_10 : f32 to vector<8x512xf32>
    %25 = arith.addf %24, %23 : vector<8x512xf32>
    %26 = arith.divf %24, %25 : vector<8x512xf32>
    %27 = vector.extract_strided_slice %20 {offsets = [8, 0], sizes = [8, 512], strides = [1, 1]} : vector<16x512xf32> to vector<8x512xf32>
    %28 = arith.negf %27 : vector<8x512xf32>
    %29 = math.exp %28 : vector<8x512xf32>
    %cst_11 = arith.constant 1.000000e+00 : f32
    %30 = vector.broadcast %cst_11 : f32 to vector<8x512xf32>
    %31 = arith.addf %30, %29 : vector<8x512xf32>
    %32 = arith.divf %30, %31 : vector<8x512xf32>
    %33 = arith.mulf %3, %32 : vector<8x512xf32>
    %c17_i32_12 = arith.constant 17 : i32
    %34 = tpu.dynamic_rotate %33 by %c17_i32_12 dim 1 : vector<8x512xf32>, i32 -> vector<8x512xf32>
    %c16_i32_13 = arith.constant 16 : i32
    %35 = tpu.dynamic_rotate %33 by %c16_i32_13 dim 1 : vector<8x512xf32>, i32 -> vector<8x512xf32>
    %c15_i32_14 = arith.constant 15 : i32
    %36 = tpu.dynamic_rotate %33 by %c15_i32_14 dim 1 : vector<8x512xf32>, i32 -> vector<8x512xf32>
    %c1_i32_15 = arith.constant 1 : i32
    %37 = tpu.dynamic_rotate %33 by %c1_i32_15 dim 1 : vector<8x512xf32>, i32 -> vector<8x512xf32>
    %c511_i32_16 = arith.constant 511 : i32
    %38 = tpu.dynamic_rotate %33 by %c511_i32_16 dim 1 : vector<8x512xf32>, i32 -> vector<8x512xf32>
    %c497_i32_17 = arith.constant 497 : i32
    %39 = tpu.dynamic_rotate %33 by %c497_i32_17 dim 1 : vector<8x512xf32>, i32 -> vector<8x512xf32>
    %c496_i32_18 = arith.constant 496 : i32
    %40 = tpu.dynamic_rotate %33 by %c496_i32_18 dim 1 : vector<8x512xf32>, i32 -> vector<8x512xf32>
    %c495_i32_19 = arith.constant 495 : i32
    %41 = tpu.dynamic_rotate %33 by %c495_i32_19 dim 1 : vector<8x512xf32>, i32 -> vector<8x512xf32>
    %42 = tpu.concatenate %34, %35, %36, %37, %33, %38, %39, %40, %41, %2 in 0 : vector<8x512xf32>, vector<8x512xf32>, vector<8x512xf32>, vector<8x512xf32>, vector<8x512xf32>, vector<8x512xf32>, vector<8x512xf32>, vector<8x512xf32>, vector<8x512xf32>, vector<8x512xf32> -> vector<80x512xf32>
    %c0_20 = arith.constant 0 : index
    %c0_21 = arith.constant 0 : index
    %43 = vector.load %arg2[%c0_20, %c0_21] : memref<80x512xf32, #tpu.memory_space<vmem>>, vector<80x512xf32>
    %44 = arith.mulf %42, %43 : vector<80x512xf32>
    %45 = arith.truncf %44 : vector<80x512xf32> to vector<80x512xbf16>
    %cst_22 = arith.constant dense<0.000000e+00> : vector<8x512xf32>
    %46 = tpu.matmul %1, %45, %cst_22 {dimension_numbers = #tpu.dot_dimension_numbers<[1], [0], [0], [1], [0, 0, 1, 1], [], []>} : vector<8x80xbf16>, vector<80x512xbf16>, vector<8x512xf32> -> vector<8x512xf32>
    %47 = vector.extract_strided_slice %5 {offsets = [16, 0], sizes = [8, 512], strides = [1, 1]} : vector<24x512xf32> to vector<8x512xf32>
    %48 = arith.addf %46, %47 : vector<8x512xf32>
    %49 = math.tanh %48 : vector<8x512xf32>
    %cst_23 = arith.constant 1.000000e+00 : f32
    %50 = vector.broadcast %cst_23 : f32 to vector<8x512xf32>
    %51 = arith.subf %50, %26 : vector<8x512xf32>
    %52 = arith.mulf %3, %51 : vector<8x512xf32>
    %53 = arith.mulf %49, %26 : vector<8x512xf32>
    %54 = arith.addf %52, %53 : vector<8x512xf32>
    %c0_24 = arith.constant 0 : index
    %c0_25 = arith.constant 0 : index
    %c0_26 = arith.constant 0 : index
    %55 = vector.load %arg5[%c0_24, %c0_25, %c0_26] : memref<8x8x512xf32, #tpu.memory_space<vmem>>, vector<1x8x512xf32>
    %56 = vector.shape_cast %55 : vector<1x8x512xf32> to vector<8x512xf32>
    %57 = vector.shape_cast %54 : vector<8x512xf32> to vector<1x8x512xf32>
    tpu.vector_store %arg5[%c0_24, %c0_25, %c0_26], %57 {strides = array<i32>} : memref<8x8x512xf32, #tpu.memory_space<vmem>>, vector<1x8x512xf32>,
    %c1 = arith.constant 1 : index
    %c0_27 = arith.constant 0 : index
    %c0_28 = arith.constant 0 : index
    %58 = vector.load %arg1[%c1, %c0_27, %c0_28] : memref<8x24x512xf32, #tpu.memory_space<vmem>>, vector<1x24x512xf32>
    %59 = vector.shape_cast %58 : vector<1x24x512xf32> to vector<24x512xf32>
    %c17_i32_29 = arith.constant 17 : i32
    %60 = tpu.dynamic_rotate %54 by %c17_i32_29 dim 1 : vector<8x512xf32>, i32 -> vector<8x512xf32>
    %c16_i32_30 = arith.constant 16 : i32
    %61 = tpu.dynamic_rotate %54 by %c16_i32_30 dim 1 : vector<8x512xf32>, i32 -> vector<8x512xf32>
    %c15_i32_31 = arith.constant 15 : i32
    %62 = tpu.dynamic_rotate %54 by %c15_i32_31 dim 1 : vector<8x512xf32>, i32 -> vector<8x512xf32>
    %c1_i32_32 = arith.constant 1 : i32
    %63 = tpu.dynamic_rotate %54 by %c1_i32_32 dim 1 : vector<8x512xf32>, i32 -> vector<8x512xf32>
    %c511_i32_33 = arith.constant 511 : i32
    %64 = tpu.dynamic_rotate %54 by %c511_i32_33 dim 1 : vector<8x512xf32>, i32 -> vector<8x512xf32>
    %c497_i32_34 = arith.constant 497 : i32
    %65 = tpu.dynamic_rotate %54 by %c497_i32_34 dim 1 : vector<8x512xf32>, i32 -> vector<8x512xf32>
    %c496_i32_35 = arith.constant 496 : i32
    %66 = tpu.dynamic_rotate %54 by %c496_i32_35 dim 1 : vector<8x512xf32>, i32 -> vector<8x512xf32>
    %c495_i32_36 = arith.constant 495 : i32
    %67 = tpu.dynamic_rotate %54 by %c495_i32_36 dim 1 : vector<8x512xf32>, i32 -> vector<8x512xf32>
    %68 = tpu.concatenate %60, %61, %62, %63, %54, %64, %65, %66, %67, %2 in 0 : vector<8x512xf32>, vector<8x512xf32>, vector<8x512xf32>, vector<8x512xf32>, vector<8x512xf32>, vector<8x512xf32>, vector<8x512xf32>, vector<8x512xf32>, vector<8x512xf32>, vector<8x512xf32> -> vector<80x512xf32>
    %c0_37 = arith.constant 0 : index
    %c0_38 = arith.constant 0 : index
    %69 = vector.load %arg2[%c0_37, %c0_38] : memref<80x512xf32, #tpu.memory_space<vmem>>, vector<80x512xf32>
    %70 = arith.mulf %68, %69 : vector<80x512xf32>
    %71 = arith.truncf %70 : vector<80x512xf32> to vector<80x512xbf16>
    %cst_39 = arith.constant dense<0.000000e+00> : vector<16x512xf32>
    %72 = tpu.matmul %0, %71, %cst_39 {dimension_numbers = #tpu.dot_dimension_numbers<[1], [0], [0], [1], [0, 0, 1, 1], [], []>} : vector<16x80xbf16>, vector<80x512xbf16>, vector<16x512xf32> -> vector<16x512xf32>
    %73 = vector.extract_strided_slice %59 {offsets = [0, 0], sizes = [16, 512], strides = [1, 1]} : vector<24x512xf32> to vector<16x512xf32>
    %74 = arith.addf %72, %73 : vector<16x512xf32>
    %75 = vector.extract_strided_slice %74 {offsets = [0, 0], sizes = [8, 512], strides = [1, 1]} : vector<16x512xf32> to vector<8x512xf32>
    %76 = arith.negf %75 : vector<8x512xf32>
    %77 = math.exp %76 : vector<8x512xf32>
    %cst_40 = arith.constant 1.000000e+00 : f32
    %78 = vector.broadcast %cst_40 : f32 to vector<8x512xf32>
    %79 = arith.addf %78, %77 : vector<8x512xf32>
    %80 = arith.divf %78, %79 : vector<8x512xf32>
    %81 = vector.extract_strided_slice %74 {offsets = [8, 0], sizes = [8, 512], strides = [1, 1]} : vector<16x512xf32> to vector<8x512xf32>
    %82 = arith.negf %81 : vector<8x512xf32>
    %83 = math.exp %82 : vector<8x512xf32>
    %cst_41 = arith.constant 1.000000e+00 : f32
    %84 = vector.broadcast %cst_41 : f32 to vector<8x512xf32>
    %85 = arith.addf %84, %83 : vector<8x512xf32>
    %86 = arith.divf %84, %85 : vector<8x512xf32>
    %87 = arith.mulf %54, %86 : vector<8x512xf32>
    %c17_i32_42 = arith.constant 17 : i32
    %88 = tpu.dynamic_rotate %87 by %c17_i32_42 dim 1 : vector<8x512xf32>, i32 -> vector<8x512xf32>
    %c16_i32_43 = arith.constant 16 : i32
    %89 = tpu.dynamic_rotate %87 by %c16_i32_43 dim 1 : vector<8x512xf32>, i32 -> vector<8x512xf32>
    %c15_i32_44 = arith.constant 15 : i32
    %90 = tpu.dynamic_rotate %87 by %c15_i32_44 dim 1 : vector<8x512xf32>, i32 -> vector<8x512xf32>
    %c1_i32_45 = arith.constant 1 : i32
    %91 = tpu.dynamic_rotate %87 by %c1_i32_45 dim 1 : vector<8x512xf32>, i32 -> vector<8x512xf32>
    %c511_i32_46 = arith.constant 511 : i32
    %92 = tpu.dynamic_rotate %87 by %c511_i32_46 dim 1 : vector<8x512xf32>, i32 -> vector<8x512xf32>
    %c497_i32_47 = arith.constant 497 : i32
    %93 = tpu.dynamic_rotate %87 by %c497_i32_47 dim 1 : vector<8x512xf32>, i32 -> vector<8x512xf32>
    %c496_i32_48 = arith.constant 496 : i32
    %94 = tpu.dynamic_rotate %87 by %c496_i32_48 dim 1 : vector<8x512xf32>, i32 -> vector<8x512xf32>
    %c495_i32_49 = arith.constant 495 : i32
    %95 = tpu.dynamic_rotate %87 by %c495_i32_49 dim 1 : vector<8x512xf32>, i32 -> vector<8x512xf32>
    %96 = tpu.concatenate %88, %89, %90, %91, %87, %92, %93, %94, %95, %2 in 0 : vector<8x512xf32>, vector<8x512xf32>, vector<8x512xf32>, vector<8x512xf32>, vector<8x512xf32>, vector<8x512xf32>, vector<8x512xf32>, vector<8x512xf32>, vector<8x512xf32>, vector<8x512xf32> -> vector<80x512xf32>
    %c0_50 = arith.constant 0 : index
    %c0_51 = arith.constant 0 : index
    %97 = vector.load %arg2[%c0_50, %c0_51] : memref<80x512xf32, #tpu.memory_space<vmem>>, vector<80x512xf32>
    %98 = arith.mulf %96, %97 : vector<80x512xf32>
    %99 = arith.truncf %98 : vector<80x512xf32> to vector<80x512xbf16>
    %cst_52 = arith.constant dense<0.000000e+00> : vector<8x512xf32>
    %100 = tpu.matmul %1, %99, %cst_52 {dimension_numbers = #tpu.dot_dimension_numbers<[1], [0], [0], [1], [0, 0, 1, 1], [], []>} : vector<8x80xbf16>, vector<80x512xbf16>, vector<8x512xf32> -> vector<8x512xf32>
    %101 = vector.extract_strided_slice %59 {offsets = [16, 0], sizes = [8, 512], strides = [1, 1]} : vector<24x512xf32> to vector<8x512xf32>
    %102 = arith.addf %100, %101 : vector<8x512xf32>
    %103 = math.tanh %102 : vector<8x512xf32>
    %cst_53 = arith.constant 1.000000e+00 : f32
    %104 = vector.broadcast %cst_53 : f32 to vector<8x512xf32>
    %105 = arith.subf %104, %80 : vector<8x512xf32>
    %106 = arith.mulf %54, %105 : vector<8x512xf32>
    %107 = arith.mulf %103, %80 : vector<8x512xf32>
    %108 = arith.addf %106, %107 : vector<8x512xf32>
    %c1_54 = arith.constant 1 : index
    %c0_55 = arith.constant 0 : index
    %c0_56 = arith.constant 0 : index
    %109 = vector.load %arg5[%c1_54, %c0_55, %c0_56] : memref<8x8x512xf32, #tpu.memory_space<vmem>>, vector<1x8x512xf32>
    %110 = vector.shape_cast %109 : vector<1x8x512xf32> to vector<8x512xf32>
    %111 = vector.shape_cast %108 : vector<8x512xf32> to vector<1x8x512xf32>
    tpu.vector_store %arg5[%c1_54, %c0_55, %c0_56], %111 {strides = array<i32>} : memref<8x8x512xf32, #tpu.memory_space<vmem>>, vector<1x8x512xf32>,
    %c2 = arith.constant 2 : index
    %c0_57 = arith.constant 0 : index
    %c0_58 = arith.constant 0 : index
    %112 = vector.load %arg1[%c2, %c0_57, %c0_58] : memref<8x24x512xf32, #tpu.memory_space<vmem>>, vector<1x24x512xf32>
    %113 = vector.shape_cast %112 : vector<1x24x512xf32> to vector<24x512xf32>
    %c17_i32_59 = arith.constant 17 : i32
    %114 = tpu.dynamic_rotate %108 by %c17_i32_59 dim 1 : vector<8x512xf32>, i32 -> vector<8x512xf32>
    %c16_i32_60 = arith.constant 16 : i32
    %115 = tpu.dynamic_rotate %108 by %c16_i32_60 dim 1 : vector<8x512xf32>, i32 -> vector<8x512xf32>
    %c15_i32_61 = arith.constant 15 : i32
    %116 = tpu.dynamic_rotate %108 by %c15_i32_61 dim 1 : vector<8x512xf32>, i32 -> vector<8x512xf32>
    %c1_i32_62 = arith.constant 1 : i32
    %117 = tpu.dynamic_rotate %108 by %c1_i32_62 dim 1 : vector<8x512xf32>, i32 -> vector<8x512xf32>
    %c511_i32_63 = arith.constant 511 : i32
    %118 = tpu.dynamic_rotate %108 by %c511_i32_63 dim 1 : vector<8x512xf32>, i32 -> vector<8x512xf32>
    %c497_i32_64 = arith.constant 497 : i32
    %119 = tpu.dynamic_rotate %108 by %c497_i32_64 dim 1 : vector<8x512xf32>, i32 -> vector<8x512xf32>
    %c496_i32_65 = arith.constant 496 : i32
    %120 = tpu.dynamic_rotate %108 by %c496_i32_65 dim 1 : vector<8x512xf32>, i32 -> vector<8x512xf32>
    %c495_i32_66 = arith.constant 495 : i32
    %121 = tpu.dynamic_rotate %108 by %c495_i32_66 dim 1 : vector<8x512xf32>, i32 -> vector<8x512xf32>
    %122 = tpu.concatenate %114, %115, %116, %117, %108, %118, %119, %120, %121, %2 in 0 : vector<8x512xf32>, vector<8x512xf32>, vector<8x512xf32>, vector<8x512xf32>, vector<8x512xf32>, vector<8x512xf32>, vector<8x512xf32>, vector<8x512xf32>, vector<8x512xf32>, vector<8x512xf32> -> vector<80x512xf32>
    %c0_67 = arith.constant 0 : index
    %c0_68 = arith.constant 0 : index
    %123 = vector.load %arg2[%c0_67, %c0_68] : memref<80x512xf32, #tpu.memory_space<vmem>>, vector<80x512xf32>
    %124 = arith.mulf %122, %123 : vector<80x512xf32>
    %125 = arith.truncf %124 : vector<80x512xf32> to vector<80x512xbf16>
    %cst_69 = arith.constant dense<0.000000e+00> : vector<16x512xf32>
    %126 = tpu.matmul %0, %125, %cst_69 {dimension_numbers = #tpu.dot_dimension_numbers<[1], [0], [0], [1], [0, 0, 1, 1], [], []>} : vector<16x80xbf16>, vector<80x512xbf16>, vector<16x512xf32> -> vector<16x512xf32>
    %127 = vector.extract_strided_slice %113 {offsets = [0, 0], sizes = [16, 512], strides = [1, 1]} : vector<24x512xf32> to vector<16x512xf32>
    %128 = arith.addf %126, %127 : vector<16x512xf32>
    %129 = vector.extract_strided_slice %128 {offsets = [0, 0], sizes = [8, 512], strides = [1, 1]} : vector<16x512xf32> to vector<8x512xf32>
    %130 = arith.negf %129 : vector<8x512xf32>
    %131 = math.exp %130 : vector<8x512xf32>
    %cst_70 = arith.constant 1.000000e+00 : f32
    %132 = vector.broadcast %cst_70 : f32 to vector<8x512xf32>
    %133 = arith.addf %132, %131 : vector<8x512xf32>
    %134 = arith.divf %132, %133 : vector<8x512xf32>
    %135 = vector.extract_strided_slice %128 {offsets = [8, 0], sizes = [8, 512], strides = [1, 1]} : vector<16x512xf32> to vector<8x512xf32>
    %136 = arith.negf %135 : vector<8x512xf32>
    %137 = math.exp %136 : vector<8x512xf32>
    %cst_71 = arith.constant 1.000000e+00 : f32
    %138 = vector.broadcast %cst_71 : f32 to vector<8x512xf32>
    %139 = arith.addf %138, %137 : vector<8x512xf32>
    %140 = arith.divf %138, %139 : vector<8x512xf32>
    %141 = arith.mulf %108, %140 : vector<8x512xf32>
    %c17_i32_72 = arith.constant 17 : i32
    %142 = tpu.dynamic_rotate %141 by %c17_i32_72 dim 1 : vector<8x512xf32>, i32 -> vector<8x512xf32>
    %c16_i32_73 = arith.constant 16 : i32
    %143 = tpu.dynamic_rotate %141 by %c16_i32_73 dim 1 : vector<8x512xf32>, i32 -> vector<8x512xf32>
    %c15_i32_74 = arith.constant 15 : i32
    %144 = tpu.dynamic_rotate %141 by %c15_i32_74 dim 1 : vector<8x512xf32>, i32 -> vector<8x512xf32>
    %c1_i32_75 = arith.constant 1 : i32
    %145 = tpu.dynamic_rotate %141 by %c1_i32_75 dim 1 : vector<8x512xf32>, i32 -> vector<8x512xf32>
    %c511_i32_76 = arith.constant 511 : i32
    %146 = tpu.dynamic_rotate %141 by %c511_i32_76 dim 1 : vector<8x512xf32>, i32 -> vector<8x512xf32>
    %c497_i32_77 = arith.constant 497 : i32
    %147 = tpu.dynamic_rotate %141 by %c497_i32_77 dim 1 : vector<8x512xf32>, i32 -> vector<8x512xf32>
    %c496_i32_78 = arith.constant 496 : i32
    %148 = tpu.dynamic_rotate %141 by %c496_i32_78 dim 1 : vector<8x512xf32>, i32 -> vector<8x512xf32>
    %c495_i32_79 = arith.constant 495 : i32
    %149 = tpu.dynamic_rotate %141 by %c495_i32_79 dim 1 : vector<8x512xf32>, i32 -> vector<8x512xf32>
    %150 = tpu.concatenate %142, %143, %144, %145, %141, %146, %147, %148, %149, %2 in 0 : vector<8x512xf32>, vector<8x512xf32>, vector<8x512xf32>, vector<8x512xf32>, vector<8x512xf32>, vector<8x512xf32>, vector<8x512xf32>, vector<8x512xf32>, vector<8x512xf32>, vector<8x512xf32> -> vector<80x512xf32>
    %c0_80 = arith.constant 0 : index
    %c0_81 = arith.constant 0 : index
    %151 = vector.load %arg2[%c0_80, %c0_81] : memref<80x512xf32, #tpu.memory_space<vmem>>, vector<80x512xf32>
    %152 = arith.mulf %150, %151 : vector<80x512xf32>
    %153 = arith.truncf %152 : vector<80x512xf32> to vector<80x512xbf16>
    %cst_82 = arith.constant dense<0.000000e+00> : vector<8x512xf32>
    %154 = tpu.matmul %1, %153, %cst_82 {dimension_numbers = #tpu.dot_dimension_numbers<[1], [0], [0], [1], [0, 0, 1, 1], [], []>} : vector<8x80xbf16>, vector<80x512xbf16>, vector<8x512xf32> -> vector<8x512xf32>
    %155 = vector.extract_strided_slice %113 {offsets = [16, 0], sizes = [8, 512], strides = [1, 1]} : vector<24x512xf32> to vector<8x512xf32>
    %156 = arith.addf %154, %155 : vector<8x512xf32>
    %157 = math.tanh %156 : vector<8x512xf32>
    %cst_83 = arith.constant 1.000000e+00 : f32
    %158 = vector.broadcast %cst_83 : f32 to vector<8x512xf32>
    %159 = arith.subf %158, %134 : vector<8x512xf32>
    %160 = arith.mulf %108, %159 : vector<8x512xf32>
    %161 = arith.mulf %157, %134 : vector<8x512xf32>
    %162 = arith.addf %160, %161 : vector<8x512xf32>
    %c2_84 = arith.constant 2 : index
    %c0_85 = arith.constant 0 : index
    %c0_86 = arith.constant 0 : index
    %163 = vector.load %arg5[%c2_84, %c0_85, %c0_86] : memref<8x8x512xf32, #tpu.memory_space<vmem>>, vector<1x8x512xf32>
    %164 = vector.shape_cast %163 : vector<1x8x512xf32> to vector<8x512xf32>
    %165 = vector.shape_cast %162 : vector<8x512xf32> to vector<1x8x512xf32>
    tpu.vector_store %arg5[%c2_84, %c0_85, %c0_86], %165 {strides = array<i32>} : memref<8x8x512xf32, #tpu.memory_space<vmem>>, vector<1x8x512xf32>,
    %c3 = arith.constant 3 : index
    %c0_87 = arith.constant 0 : index
    %c0_88 = arith.constant 0 : index
    %166 = vector.load %arg1[%c3, %c0_87, %c0_88] : memref<8x24x512xf32, #tpu.memory_space<vmem>>, vector<1x24x512xf32>
    %167 = vector.shape_cast %166 : vector<1x24x512xf32> to vector<24x512xf32>
    %c17_i32_89 = arith.constant 17 : i32
    %168 = tpu.dynamic_rotate %162 by %c17_i32_89 dim 1 : vector<8x512xf32>, i32 -> vector<8x512xf32>
    %c16_i32_90 = arith.constant 16 : i32
    %169 = tpu.dynamic_rotate %162 by %c16_i32_90 dim 1 : vector<8x512xf32>, i32 -> vector<8x512xf32>
    %c15_i32_91 = arith.constant 15 : i32
    %170 = tpu.dynamic_rotate %162 by %c15_i32_91 dim 1 : vector<8x512xf32>, i32 -> vector<8x512xf32>
    %c1_i32_92 = arith.constant 1 : i32
    %171 = tpu.dynamic_rotate %162 by %c1_i32_92 dim 1 : vector<8x512xf32>, i32 -> vector<8x512xf32>
    %c511_i32_93 = arith.constant 511 : i32
    %172 = tpu.dynamic_rotate %162 by %c511_i32_93 dim 1 : vector<8x512xf32>, i32 -> vector<8x512xf32>
    %c497_i32_94 = arith.constant 497 : i32
    %173 = tpu.dynamic_rotate %162 by %c497_i32_94 dim 1 : vector<8x512xf32>, i32 -> vector<8x512xf32>
    %c496_i32_95 = arith.constant 496 : i32
    %174 = tpu.dynamic_rotate %162 by %c496_i32_95 dim 1 : vector<8x512xf32>, i32 -> vector<8x512xf32>
    %c495_i32_96 = arith.constant 495 : i32
    %175 = tpu.dynamic_rotate %162 by %c495_i32_96 dim 1 : vector<8x512xf32>, i32 -> vector<8x512xf32>
    %176 = tpu.concatenate %168, %169, %170, %171, %162, %172, %173, %174, %175, %2 in 0 : vector<8x512xf32>, vector<8x512xf32>, vector<8x512xf32>, vector<8x512xf32>, vector<8x512xf32>, vector<8x512xf32>, vector<8x512xf32>, vector<8x512xf32>, vector<8x512xf32>, vector<8x512xf32> -> vector<80x512xf32>
    %c0_97 = arith.constant 0 : index
    %c0_98 = arith.constant 0 : index
    %177 = vector.load %arg2[%c0_97, %c0_98] : memref<80x512xf32, #tpu.memory_space<vmem>>, vector<80x512xf32>
    %178 = arith.mulf %176, %177 : vector<80x512xf32>
    %179 = arith.truncf %178 : vector<80x512xf32> to vector<80x512xbf16>
    %cst_99 = arith.constant dense<0.000000e+00> : vector<16x512xf32>
    %180 = tpu.matmul %0, %179, %cst_99 {dimension_numbers = #tpu.dot_dimension_numbers<[1], [0], [0], [1], [0, 0, 1, 1], [], []>} : vector<16x80xbf16>, vector<80x512xbf16>, vector<16x512xf32> -> vector<16x512xf32>
    %181 = vector.extract_strided_slice %167 {offsets = [0, 0], sizes = [16, 512], strides = [1, 1]} : vector<24x512xf32> to vector<16x512xf32>
    %182 = arith.addf %180, %181 : vector<16x512xf32>
    %183 = vector.extract_strided_slice %182 {offsets = [0, 0], sizes = [8, 512], strides = [1, 1]} : vector<16x512xf32> to vector<8x512xf32>
    %184 = arith.negf %183 : vector<8x512xf32>
    %185 = math.exp %184 : vector<8x512xf32>
    %cst_100 = arith.constant 1.000000e+00 : f32
    %186 = vector.broadcast %cst_100 : f32 to vector<8x512xf32>
    %187 = arith.addf %186, %185 : vector<8x512xf32>
    %188 = arith.divf %186, %187 : vector<8x512xf32>
    %189 = vector.extract_strided_slice %182 {offsets = [8, 0], sizes = [8, 512], strides = [1, 1]} : vector<16x512xf32> to vector<8x512xf32>
    %190 = arith.negf %189 : vector<8x512xf32>
    %191 = math.exp %190 : vector<8x512xf32>
    %cst_101 = arith.constant 1.000000e+00 : f32
    %192 = vector.broadcast %cst_101 : f32 to vector<8x512xf32>
    %193 = arith.addf %192, %191 : vector<8x512xf32>
    %194 = arith.divf %192, %193 : vector<8x512xf32>
    %195 = arith.mulf %162, %194 : vector<8x512xf32>
    %c17_i32_102 = arith.constant 17 : i32
    %196 = tpu.dynamic_rotate %195 by %c17_i32_102 dim 1 : vector<8x512xf32>, i32 -> vector<8x512xf32>
    %c16_i32_103 = arith.constant 16 : i32
    %197 = tpu.dynamic_rotate %195 by %c16_i32_103 dim 1 : vector<8x512xf32>, i32 -> vector<8x512xf32>
    %c15_i32_104 = arith.constant 15 : i32
    %198 = tpu.dynamic_rotate %195 by %c15_i32_104 dim 1 : vector<8x512xf32>, i32 -> vector<8x512xf32>
    %c1_i32_105 = arith.constant 1 : i32
    %199 = tpu.dynamic_rotate %195 by %c1_i32_105 dim 1 : vector<8x512xf32>, i32 -> vector<8x512xf32>
    %c511_i32_106 = arith.constant 511 : i32
    %200 = tpu.dynamic_rotate %195 by %c511_i32_106 dim 1 : vector<8x512xf32>, i32 -> vector<8x512xf32>
    %c497_i32_107 = arith.constant 497 : i32
    %201 = tpu.dynamic_rotate %195 by %c497_i32_107 dim 1 : vector<8x512xf32>, i32 -> vector<8x512xf32>
    %c496_i32_108 = arith.constant 496 : i32
    %202 = tpu.dynamic_rotate %195 by %c496_i32_108 dim 1 : vector<8x512xf32>, i32 -> vector<8x512xf32>
    %c495_i32_109 = arith.constant 495 : i32
    %203 = tpu.dynamic_rotate %195 by %c495_i32_109 dim 1 : vector<8x512xf32>, i32 -> vector<8x512xf32>
    %204 = tpu.concatenate %196, %197, %198, %199, %195, %200, %201, %202, %203, %2 in 0 : vector<8x512xf32>, vector<8x512xf32>, vector<8x512xf32>, vector<8x512xf32>, vector<8x512xf32>, vector<8x512xf32>, vector<8x512xf32>, vector<8x512xf32>, vector<8x512xf32>, vector<8x512xf32> -> vector<80x512xf32>
    %c0_110 = arith.constant 0 : index
    %c0_111 = arith.constant 0 : index
    %205 = vector.load %arg2[%c0_110, %c0_111] : memref<80x512xf32, #tpu.memory_space<vmem>>, vector<80x512xf32>
    %206 = arith.mulf %204, %205 : vector<80x512xf32>
    %207 = arith.truncf %206 : vector<80x512xf32> to vector<80x512xbf16>
    %cst_112 = arith.constant dense<0.000000e+00> : vector<8x512xf32>
    %208 = tpu.matmul %1, %207, %cst_112 {dimension_numbers = #tpu.dot_dimension_numbers<[1], [0], [0], [1], [0, 0, 1, 1], [], []>} : vector<8x80xbf16>, vector<80x512xbf16>, vector<8x512xf32> -> vector<8x512xf32>
    %209 = vector.extract_strided_slice %167 {offsets = [16, 0], sizes = [8, 512], strides = [1, 1]} : vector<24x512xf32> to vector<8x512xf32>
    %210 = arith.addf %208, %209 : vector<8x512xf32>
    %211 = math.tanh %210 : vector<8x512xf32>
    %cst_113 = arith.constant 1.000000e+00 : f32
    %212 = vector.broadcast %cst_113 : f32 to vector<8x512xf32>
    %213 = arith.subf %212, %188 : vector<8x512xf32>
    %214 = arith.mulf %162, %213 : vector<8x512xf32>
    %215 = arith.mulf %211, %188 : vector<8x512xf32>
    %216 = arith.addf %214, %215 : vector<8x512xf32>
    %c3_114 = arith.constant 3 : index
    %c0_115 = arith.constant 0 : index
    %c0_116 = arith.constant 0 : index
    %217 = vector.load %arg5[%c3_114, %c0_115, %c0_116] : memref<8x8x512xf32, #tpu.memory_space<vmem>>, vector<1x8x512xf32>
    %218 = vector.shape_cast %217 : vector<1x8x512xf32> to vector<8x512xf32>
    %219 = vector.shape_cast %216 : vector<8x512xf32> to vector<1x8x512xf32>
    tpu.vector_store %arg5[%c3_114, %c0_115, %c0_116], %219 {strides = array<i32>} : memref<8x8x512xf32, #tpu.memory_space<vmem>>, vector<1x8x512xf32>,
    %c4 = arith.constant 4 : index
    %c0_117 = arith.constant 0 : index
    %c0_118 = arith.constant 0 : index
    %220 = vector.load %arg1[%c4, %c0_117, %c0_118] : memref<8x24x512xf32, #tpu.memory_space<vmem>>, vector<1x24x512xf32>
    %221 = vector.shape_cast %220 : vector<1x24x512xf32> to vector<24x512xf32>
    %c17_i32_119 = arith.constant 17 : i32
    %222 = tpu.dynamic_rotate %216 by %c17_i32_119 dim 1 : vector<8x512xf32>, i32 -> vector<8x512xf32>
    %c16_i32_120 = arith.constant 16 : i32
    %223 = tpu.dynamic_rotate %216 by %c16_i32_120 dim 1 : vector<8x512xf32>, i32 -> vector<8x512xf32>
    %c15_i32_121 = arith.constant 15 : i32
    %224 = tpu.dynamic_rotate %216 by %c15_i32_121 dim 1 : vector<8x512xf32>, i32 -> vector<8x512xf32>
    %c1_i32_122 = arith.constant 1 : i32
    %225 = tpu.dynamic_rotate %216 by %c1_i32_122 dim 1 : vector<8x512xf32>, i32 -> vector<8x512xf32>
    %c511_i32_123 = arith.constant 511 : i32
    %226 = tpu.dynamic_rotate %216 by %c511_i32_123 dim 1 : vector<8x512xf32>, i32 -> vector<8x512xf32>
    %c497_i32_124 = arith.constant 497 : i32
    %227 = tpu.dynamic_rotate %216 by %c497_i32_124 dim 1 : vector<8x512xf32>, i32 -> vector<8x512xf32>
    %c496_i32_125 = arith.constant 496 : i32
    %228 = tpu.dynamic_rotate %216 by %c496_i32_125 dim 1 : vector<8x512xf32>, i32 -> vector<8x512xf32>
    %c495_i32_126 = arith.constant 495 : i32
    %229 = tpu.dynamic_rotate %216 by %c495_i32_126 dim 1 : vector<8x512xf32>, i32 -> vector<8x512xf32>
    %230 = tpu.concatenate %222, %223, %224, %225, %216, %226, %227, %228, %229, %2 in 0 : vector<8x512xf32>, vector<8x512xf32>, vector<8x512xf32>, vector<8x512xf32>, vector<8x512xf32>, vector<8x512xf32>, vector<8x512xf32>, vector<8x512xf32>, vector<8x512xf32>, vector<8x512xf32> -> vector<80x512xf32>
    %c0_127 = arith.constant 0 : index
    %c0_128 = arith.constant 0 : index
    %231 = vector.load %arg2[%c0_127, %c0_128] : memref<80x512xf32, #tpu.memory_space<vmem>>, vector<80x512xf32>
    %232 = arith.mulf %230, %231 : vector<80x512xf32>
    %233 = arith.truncf %232 : vector<80x512xf32> to vector<80x512xbf16>
    %cst_129 = arith.constant dense<0.000000e+00> : vector<16x512xf32>
    %234 = tpu.matmul %0, %233, %cst_129 {dimension_numbers = #tpu.dot_dimension_numbers<[1], [0], [0], [1], [0, 0, 1, 1], [], []>} : vector<16x80xbf16>, vector<80x512xbf16>, vector<16x512xf32> -> vector<16x512xf32>
    %235 = vector.extract_strided_slice %221 {offsets = [0, 0], sizes = [16, 512], strides = [1, 1]} : vector<24x512xf32> to vector<16x512xf32>
    %236 = arith.addf %234, %235 : vector<16x512xf32>
    %237 = vector.extract_strided_slice %236 {offsets = [0, 0], sizes = [8, 512], strides = [1, 1]} : vector<16x512xf32> to vector<8x512xf32>
    %238 = arith.negf %237 : vector<8x512xf32>
    %239 = math.exp %238 : vector<8x512xf32>
    %cst_130 = arith.constant 1.000000e+00 : f32
    %240 = vector.broadcast %cst_130 : f32 to vector<8x512xf32>
    %241 = arith.addf %240, %239 : vector<8x512xf32>
    %242 = arith.divf %240, %241 : vector<8x512xf32>
    %243 = vector.extract_strided_slice %236 {offsets = [8, 0], sizes = [8, 512], strides = [1, 1]} : vector<16x512xf32> to vector<8x512xf32>
    %244 = arith.negf %243 : vector<8x512xf32>
    %245 = math.exp %244 : vector<8x512xf32>
    %cst_131 = arith.constant 1.000000e+00 : f32
    %246 = vector.broadcast %cst_131 : f32 to vector<8x512xf32>
    %247 = arith.addf %246, %245 : vector<8x512xf32>
    %248 = arith.divf %246, %247 : vector<8x512xf32>
    %249 = arith.mulf %216, %248 : vector<8x512xf32>
    %c17_i32_132 = arith.constant 17 : i32
    %250 = tpu.dynamic_rotate %249 by %c17_i32_132 dim 1 : vector<8x512xf32>, i32 -> vector<8x512xf32>
    %c16_i32_133 = arith.constant 16 : i32
    %251 = tpu.dynamic_rotate %249 by %c16_i32_133 dim 1 : vector<8x512xf32>, i32 -> vector<8x512xf32>
    %c15_i32_134 = arith.constant 15 : i32
    %252 = tpu.dynamic_rotate %249 by %c15_i32_134 dim 1 : vector<8x512xf32>, i32 -> vector<8x512xf32>
    %c1_i32_135 = arith.constant 1 : i32
    %253 = tpu.dynamic_rotate %249 by %c1_i32_135 dim 1 : vector<8x512xf32>, i32 -> vector<8x512xf32>
    %c511_i32_136 = arith.constant 511 : i32
    %254 = tpu.dynamic_rotate %249 by %c511_i32_136 dim 1 : vector<8x512xf32>, i32 -> vector<8x512xf32>
    %c497_i32_137 = arith.constant 497 : i32
    %255 = tpu.dynamic_rotate %249 by %c497_i32_137 dim 1 : vector<8x512xf32>, i32 -> vector<8x512xf32>
    %c496_i32_138 = arith.constant 496 : i32
    %256 = tpu.dynamic_rotate %249 by %c496_i32_138 dim 1 : vector<8x512xf32>, i32 -> vector<8x512xf32>
    %c495_i32_139 = arith.constant 495 : i32
    %257 = tpu.dynamic_rotate %249 by %c495_i32_139 dim 1 : vector<8x512xf32>, i32 -> vector<8x512xf32>
    %258 = tpu.concatenate %250, %251, %252, %253, %249, %254, %255, %256, %257, %2 in 0 : vector<8x512xf32>, vector<8x512xf32>, vector<8x512xf32>, vector<8x512xf32>, vector<8x512xf32>, vector<8x512xf32>, vector<8x512xf32>, vector<8x512xf32>, vector<8x512xf32>, vector<8x512xf32> -> vector<80x512xf32>
    %c0_140 = arith.constant 0 : index
    %c0_141 = arith.constant 0 : index
    %259 = vector.load %arg2[%c0_140, %c0_141] : memref<80x512xf32, #tpu.memory_space<vmem>>, vector<80x512xf32>
    %260 = arith.mulf %258, %259 : vector<80x512xf32>
    %261 = arith.truncf %260 : vector<80x512xf32> to vector<80x512xbf16>
    %cst_142 = arith.constant dense<0.000000e+00> : vector<8x512xf32>
    %262 = tpu.matmul %1, %261, %cst_142 {dimension_numbers = #tpu.dot_dimension_numbers<[1], [0], [0], [1], [0, 0, 1, 1], [], []>} : vector<8x80xbf16>, vector<80x512xbf16>, vector<8x512xf32> -> vector<8x512xf32>
    %263 = vector.extract_strided_slice %221 {offsets = [16, 0], sizes = [8, 512], strides = [1, 1]} : vector<24x512xf32> to vector<8x512xf32>
    %264 = arith.addf %262, %263 : vector<8x512xf32>
    %265 = math.tanh %264 : vector<8x512xf32>
    %cst_143 = arith.constant 1.000000e+00 : f32
    %266 = vector.broadcast %cst_143 : f32 to vector<8x512xf32>
    %267 = arith.subf %266, %242 : vector<8x512xf32>
    %268 = arith.mulf %216, %267 : vector<8x512xf32>
    %269 = arith.mulf %265, %242 : vector<8x512xf32>
    %270 = arith.addf %268, %269 : vector<8x512xf32>
    %c4_144 = arith.constant 4 : index
    %c0_145 = arith.constant 0 : index
    %c0_146 = arith.constant 0 : index
    %271 = vector.load %arg5[%c4_144, %c0_145, %c0_146] : memref<8x8x512xf32, #tpu.memory_space<vmem>>, vector<1x8x512xf32>
    %272 = vector.shape_cast %271 : vector<1x8x512xf32> to vector<8x512xf32>
    %273 = vector.shape_cast %270 : vector<8x512xf32> to vector<1x8x512xf32>
    tpu.vector_store %arg5[%c4_144, %c0_145, %c0_146], %273 {strides = array<i32>} : memref<8x8x512xf32, #tpu.memory_space<vmem>>, vector<1x8x512xf32>,
    %c5 = arith.constant 5 : index
    %c0_147 = arith.constant 0 : index
    %c0_148 = arith.constant 0 : index
    %274 = vector.load %arg1[%c5, %c0_147, %c0_148] : memref<8x24x512xf32, #tpu.memory_space<vmem>>, vector<1x24x512xf32>
    %275 = vector.shape_cast %274 : vector<1x24x512xf32> to vector<24x512xf32>
    %c17_i32_149 = arith.constant 17 : i32
    %276 = tpu.dynamic_rotate %270 by %c17_i32_149 dim 1 : vector<8x512xf32>, i32 -> vector<8x512xf32>
    %c16_i32_150 = arith.constant 16 : i32
    %277 = tpu.dynamic_rotate %270 by %c16_i32_150 dim 1 : vector<8x512xf32>, i32 -> vector<8x512xf32>
    %c15_i32_151 = arith.constant 15 : i32
    %278 = tpu.dynamic_rotate %270 by %c15_i32_151 dim 1 : vector<8x512xf32>, i32 -> vector<8x512xf32>
    %c1_i32_152 = arith.constant 1 : i32
    %279 = tpu.dynamic_rotate %270 by %c1_i32_152 dim 1 : vector<8x512xf32>, i32 -> vector<8x512xf32>
    %c511_i32_153 = arith.constant 511 : i32
    %280 = tpu.dynamic_rotate %270 by %c511_i32_153 dim 1 : vector<8x512xf32>, i32 -> vector<8x512xf32>
    %c497_i32_154 = arith.constant 497 : i32
    %281 = tpu.dynamic_rotate %270 by %c497_i32_154 dim 1 : vector<8x512xf32>, i32 -> vector<8x512xf32>
    %c496_i32_155 = arith.constant 496 : i32
    %282 = tpu.dynamic_rotate %270 by %c496_i32_155 dim 1 : vector<8x512xf32>, i32 -> vector<8x512xf32>
    %c495_i32_156 = arith.constant 495 : i32
    %283 = tpu.dynamic_rotate %270 by %c495_i32_156 dim 1 : vector<8x512xf32>, i32 -> vector<8x512xf32>
    %284 = tpu.concatenate %276, %277, %278, %279, %270, %280, %281, %282, %283, %2 in 0 : vector<8x512xf32>, vector<8x512xf32>, vector<8x512xf32>, vector<8x512xf32>, vector<8x512xf32>, vector<8x512xf32>, vector<8x512xf32>, vector<8x512xf32>, vector<8x512xf32>, vector<8x512xf32> -> vector<80x512xf32>
    %c0_157 = arith.constant 0 : index
    %c0_158 = arith.constant 0 : index
    %285 = vector.load %arg2[%c0_157, %c0_158] : memref<80x512xf32, #tpu.memory_space<vmem>>, vector<80x512xf32>
    %286 = arith.mulf %284, %285 : vector<80x512xf32>
    %287 = arith.truncf %286 : vector<80x512xf32> to vector<80x512xbf16>
    %cst_159 = arith.constant dense<0.000000e+00> : vector<16x512xf32>
    %288 = tpu.matmul %0, %287, %cst_159 {dimension_numbers = #tpu.dot_dimension_numbers<[1], [0], [0], [1], [0, 0, 1, 1], [], []>} : vector<16x80xbf16>, vector<80x512xbf16>, vector<16x512xf32> -> vector<16x512xf32>
    %289 = vector.extract_strided_slice %275 {offsets = [0, 0], sizes = [16, 512], strides = [1, 1]} : vector<24x512xf32> to vector<16x512xf32>
    %290 = arith.addf %288, %289 : vector<16x512xf32>
    %291 = vector.extract_strided_slice %290 {offsets = [0, 0], sizes = [8, 512], strides = [1, 1]} : vector<16x512xf32> to vector<8x512xf32>
    %292 = arith.negf %291 : vector<8x512xf32>
    %293 = math.exp %292 : vector<8x512xf32>
    %cst_160 = arith.constant 1.000000e+00 : f32
    %294 = vector.broadcast %cst_160 : f32 to vector<8x512xf32>
    %295 = arith.addf %294, %293 : vector<8x512xf32>
    %296 = arith.divf %294, %295 : vector<8x512xf32>
    %297 = vector.extract_strided_slice %290 {offsets = [8, 0], sizes = [8, 512], strides = [1, 1]} : vector<16x512xf32> to vector<8x512xf32>
    %298 = arith.negf %297 : vector<8x512xf32>
    %299 = math.exp %298 : vector<8x512xf32>
    %cst_161 = arith.constant 1.000000e+00 : f32
    %300 = vector.broadcast %cst_161 : f32 to vector<8x512xf32>
    %301 = arith.addf %300, %299 : vector<8x512xf32>
    %302 = arith.divf %300, %301 : vector<8x512xf32>
    %303 = arith.mulf %270, %302 : vector<8x512xf32>
    %c17_i32_162 = arith.constant 17 : i32
    %304 = tpu.dynamic_rotate %303 by %c17_i32_162 dim 1 : vector<8x512xf32>, i32 -> vector<8x512xf32>
    %c16_i32_163 = arith.constant 16 : i32
    %305 = tpu.dynamic_rotate %303 by %c16_i32_163 dim 1 : vector<8x512xf32>, i32 -> vector<8x512xf32>
    %c15_i32_164 = arith.constant 15 : i32
    %306 = tpu.dynamic_rotate %303 by %c15_i32_164 dim 1 : vector<8x512xf32>, i32 -> vector<8x512xf32>
    %c1_i32_165 = arith.constant 1 : i32
    %307 = tpu.dynamic_rotate %303 by %c1_i32_165 dim 1 : vector<8x512xf32>, i32 -> vector<8x512xf32>
    %c511_i32_166 = arith.constant 511 : i32
    %308 = tpu.dynamic_rotate %303 by %c511_i32_166 dim 1 : vector<8x512xf32>, i32 -> vector<8x512xf32>
    %c497_i32_167 = arith.constant 497 : i32
    %309 = tpu.dynamic_rotate %303 by %c497_i32_167 dim 1 : vector<8x512xf32>, i32 -> vector<8x512xf32>
    %c496_i32_168 = arith.constant 496 : i32
    %310 = tpu.dynamic_rotate %303 by %c496_i32_168 dim 1 : vector<8x512xf32>, i32 -> vector<8x512xf32>
    %c495_i32_169 = arith.constant 495 : i32
    %311 = tpu.dynamic_rotate %303 by %c495_i32_169 dim 1 : vector<8x512xf32>, i32 -> vector<8x512xf32>
    %312 = tpu.concatenate %304, %305, %306, %307, %303, %308, %309, %310, %311, %2 in 0 : vector<8x512xf32>, vector<8x512xf32>, vector<8x512xf32>, vector<8x512xf32>, vector<8x512xf32>, vector<8x512xf32>, vector<8x512xf32>, vector<8x512xf32>, vector<8x512xf32>, vector<8x512xf32> -> vector<80x512xf32>
    %c0_170 = arith.constant 0 : index
    %c0_171 = arith.constant 0 : index
    %313 = vector.load %arg2[%c0_170, %c0_171] : memref<80x512xf32, #tpu.memory_space<vmem>>, vector<80x512xf32>
    %314 = arith.mulf %312, %313 : vector<80x512xf32>
    %315 = arith.truncf %314 : vector<80x512xf32> to vector<80x512xbf16>
    %cst_172 = arith.constant dense<0.000000e+00> : vector<8x512xf32>
    %316 = tpu.matmul %1, %315, %cst_172 {dimension_numbers = #tpu.dot_dimension_numbers<[1], [0], [0], [1], [0, 0, 1, 1], [], []>} : vector<8x80xbf16>, vector<80x512xbf16>, vector<8x512xf32> -> vector<8x512xf32>
    %317 = vector.extract_strided_slice %275 {offsets = [16, 0], sizes = [8, 512], strides = [1, 1]} : vector<24x512xf32> to vector<8x512xf32>
    %318 = arith.addf %316, %317 : vector<8x512xf32>
    %319 = math.tanh %318 : vector<8x512xf32>
    %cst_173 = arith.constant 1.000000e+00 : f32
    %320 = vector.broadcast %cst_173 : f32 to vector<8x512xf32>
    %321 = arith.subf %320, %296 : vector<8x512xf32>
    %322 = arith.mulf %270, %321 : vector<8x512xf32>
    %323 = arith.mulf %319, %296 : vector<8x512xf32>
    %324 = arith.addf %322, %323 : vector<8x512xf32>
    %c5_174 = arith.constant 5 : index
    %c0_175 = arith.constant 0 : index
    %c0_176 = arith.constant 0 : index
    %325 = vector.load %arg5[%c5_174, %c0_175, %c0_176] : memref<8x8x512xf32, #tpu.memory_space<vmem>>, vector<1x8x512xf32>
    %326 = vector.shape_cast %325 : vector<1x8x512xf32> to vector<8x512xf32>
    %327 = vector.shape_cast %324 : vector<8x512xf32> to vector<1x8x512xf32>
    tpu.vector_store %arg5[%c5_174, %c0_175, %c0_176], %327 {strides = array<i32>} : memref<8x8x512xf32, #tpu.memory_space<vmem>>, vector<1x8x512xf32>,
    %c6 = arith.constant 6 : index
    %c0_177 = arith.constant 0 : index
    %c0_178 = arith.constant 0 : index
    %328 = vector.load %arg1[%c6, %c0_177, %c0_178] : memref<8x24x512xf32, #tpu.memory_space<vmem>>, vector<1x24x512xf32>
    %329 = vector.shape_cast %328 : vector<1x24x512xf32> to vector<24x512xf32>
    %c17_i32_179 = arith.constant 17 : i32
    %330 = tpu.dynamic_rotate %324 by %c17_i32_179 dim 1 : vector<8x512xf32>, i32 -> vector<8x512xf32>
    %c16_i32_180 = arith.constant 16 : i32
    %331 = tpu.dynamic_rotate %324 by %c16_i32_180 dim 1 : vector<8x512xf32>, i32 -> vector<8x512xf32>
    %c15_i32_181 = arith.constant 15 : i32
    %332 = tpu.dynamic_rotate %324 by %c15_i32_181 dim 1 : vector<8x512xf32>, i32 -> vector<8x512xf32>
    %c1_i32_182 = arith.constant 1 : i32
    %333 = tpu.dynamic_rotate %324 by %c1_i32_182 dim 1 : vector<8x512xf32>, i32 -> vector<8x512xf32>
    %c511_i32_183 = arith.constant 511 : i32
    %334 = tpu.dynamic_rotate %324 by %c511_i32_183 dim 1 : vector<8x512xf32>, i32 -> vector<8x512xf32>
    %c497_i32_184 = arith.constant 497 : i32
    %335 = tpu.dynamic_rotate %324 by %c497_i32_184 dim 1 : vector<8x512xf32>, i32 -> vector<8x512xf32>
    %c496_i32_185 = arith.constant 496 : i32
    %336 = tpu.dynamic_rotate %324 by %c496_i32_185 dim 1 : vector<8x512xf32>, i32 -> vector<8x512xf32>
    %c495_i32_186 = arith.constant 495 : i32
    %337 = tpu.dynamic_rotate %324 by %c495_i32_186 dim 1 : vector<8x512xf32>, i32 -> vector<8x512xf32>
    %338 = tpu.concatenate %330, %331, %332, %333, %324, %334, %335, %336, %337, %2 in 0 : vector<8x512xf32>, vector<8x512xf32>, vector<8x512xf32>, vector<8x512xf32>, vector<8x512xf32>, vector<8x512xf32>, vector<8x512xf32>, vector<8x512xf32>, vector<8x512xf32>, vector<8x512xf32> -> vector<80x512xf32>
    %c0_187 = arith.constant 0 : index
    %c0_188 = arith.constant 0 : index
    %339 = vector.load %arg2[%c0_187, %c0_188] : memref<80x512xf32, #tpu.memory_space<vmem>>, vector<80x512xf32>
    %340 = arith.mulf %338, %339 : vector<80x512xf32>
    %341 = arith.truncf %340 : vector<80x512xf32> to vector<80x512xbf16>
    %cst_189 = arith.constant dense<0.000000e+00> : vector<16x512xf32>
    %342 = tpu.matmul %0, %341, %cst_189 {dimension_numbers = #tpu.dot_dimension_numbers<[1], [0], [0], [1], [0, 0, 1, 1], [], []>} : vector<16x80xbf16>, vector<80x512xbf16>, vector<16x512xf32> -> vector<16x512xf32>
    %343 = vector.extract_strided_slice %329 {offsets = [0, 0], sizes = [16, 512], strides = [1, 1]} : vector<24x512xf32> to vector<16x512xf32>
    %344 = arith.addf %342, %343 : vector<16x512xf32>
    %345 = vector.extract_strided_slice %344 {offsets = [0, 0], sizes = [8, 512], strides = [1, 1]} : vector<16x512xf32> to vector<8x512xf32>
    %346 = arith.negf %345 : vector<8x512xf32>
    %347 = math.exp %346 : vector<8x512xf32>
    %cst_190 = arith.constant 1.000000e+00 : f32
    %348 = vector.broadcast %cst_190 : f32 to vector<8x512xf32>
    %349 = arith.addf %348, %347 : vector<8x512xf32>
    %350 = arith.divf %348, %349 : vector<8x512xf32>
    %351 = vector.extract_strided_slice %344 {offsets = [8, 0], sizes = [8, 512], strides = [1, 1]} : vector<16x512xf32> to vector<8x512xf32>
    %352 = arith.negf %351 : vector<8x512xf32>
    %353 = math.exp %352 : vector<8x512xf32>
    %cst_191 = arith.constant 1.000000e+00 : f32
    %354 = vector.broadcast %cst_191 : f32 to vector<8x512xf32>
    %355 = arith.addf %354, %353 : vector<8x512xf32>
    %356 = arith.divf %354, %355 : vector<8x512xf32>
    %357 = arith.mulf %324, %356 : vector<8x512xf32>
    %c17_i32_192 = arith.constant 17 : i32
    %358 = tpu.dynamic_rotate %357 by %c17_i32_192 dim 1 : vector<8x512xf32>, i32 -> vector<8x512xf32>
    %c16_i32_193 = arith.constant 16 : i32
    %359 = tpu.dynamic_rotate %357 by %c16_i32_193 dim 1 : vector<8x512xf32>, i32 -> vector<8x512xf32>
    %c15_i32_194 = arith.constant 15 : i32
    %360 = tpu.dynamic_rotate %357 by %c15_i32_194 dim 1 : vector<8x512xf32>, i32 -> vector<8x512xf32>
    %c1_i32_195 = arith.constant 1 : i32
    %361 = tpu.dynamic_rotate %357 by %c1_i32_195 dim 1 : vector<8x512xf32>, i32 -> vector<8x512xf32>
    %c511_i32_196 = arith.constant 511 : i32
    %362 = tpu.dynamic_rotate %357 by %c511_i32_196 dim 1 : vector<8x512xf32>, i32 -> vector<8x512xf32>
    %c497_i32_197 = arith.constant 497 : i32
    %363 = tpu.dynamic_rotate %357 by %c497_i32_197 dim 1 : vector<8x512xf32>, i32 -> vector<8x512xf32>
    %c496_i32_198 = arith.constant 496 : i32
    %364 = tpu.dynamic_rotate %357 by %c496_i32_198 dim 1 : vector<8x512xf32>, i32 -> vector<8x512xf32>
    %c495_i32_199 = arith.constant 495 : i32
    %365 = tpu.dynamic_rotate %357 by %c495_i32_199 dim 1 : vector<8x512xf32>, i32 -> vector<8x512xf32>
    %366 = tpu.concatenate %358, %359, %360, %361, %357, %362, %363, %364, %365, %2 in 0 : vector<8x512xf32>, vector<8x512xf32>, vector<8x512xf32>, vector<8x512xf32>, vector<8x512xf32>, vector<8x512xf32>, vector<8x512xf32>, vector<8x512xf32>, vector<8x512xf32>, vector<8x512xf32> -> vector<80x512xf32>
    %c0_200 = arith.constant 0 : index
    %c0_201 = arith.constant 0 : index
    %367 = vector.load %arg2[%c0_200, %c0_201] : memref<80x512xf32, #tpu.memory_space<vmem>>, vector<80x512xf32>
    %368 = arith.mulf %366, %367 : vector<80x512xf32>
    %369 = arith.truncf %368 : vector<80x512xf32> to vector<80x512xbf16>
    %cst_202 = arith.constant dense<0.000000e+00> : vector<8x512xf32>
    %370 = tpu.matmul %1, %369, %cst_202 {dimension_numbers = #tpu.dot_dimension_numbers<[1], [0], [0], [1], [0, 0, 1, 1], [], []>} : vector<8x80xbf16>, vector<80x512xbf16>, vector<8x512xf32> -> vector<8x512xf32>
    %371 = vector.extract_strided_slice %329 {offsets = [16, 0], sizes = [8, 512], strides = [1, 1]} : vector<24x512xf32> to vector<8x512xf32>
    %372 = arith.addf %370, %371 : vector<8x512xf32>
    %373 = math.tanh %372 : vector<8x512xf32>
    %cst_203 = arith.constant 1.000000e+00 : f32
    %374 = vector.broadcast %cst_203 : f32 to vector<8x512xf32>
    %375 = arith.subf %374, %350 : vector<8x512xf32>
    %376 = arith.mulf %324, %375 : vector<8x512xf32>
    %377 = arith.mulf %373, %350 : vector<8x512xf32>
    %378 = arith.addf %376, %377 : vector<8x512xf32>
    %c6_204 = arith.constant 6 : index
    %c0_205 = arith.constant 0 : index
    %c0_206 = arith.constant 0 : index
    %379 = vector.load %arg5[%c6_204, %c0_205, %c0_206] : memref<8x8x512xf32, #tpu.memory_space<vmem>>, vector<1x8x512xf32>
    %380 = vector.shape_cast %379 : vector<1x8x512xf32> to vector<8x512xf32>
    %381 = vector.shape_cast %378 : vector<8x512xf32> to vector<1x8x512xf32>
    tpu.vector_store %arg5[%c6_204, %c0_205, %c0_206], %381 {strides = array<i32>} : memref<8x8x512xf32, #tpu.memory_space<vmem>>, vector<1x8x512xf32>,
    %c7 = arith.constant 7 : index
    %c0_207 = arith.constant 0 : index
    %c0_208 = arith.constant 0 : index
    %382 = vector.load %arg1[%c7, %c0_207, %c0_208] : memref<8x24x512xf32, #tpu.memory_space<vmem>>, vector<1x24x512xf32>
    %383 = vector.shape_cast %382 : vector<1x24x512xf32> to vector<24x512xf32>
    %c17_i32_209 = arith.constant 17 : i32
    %384 = tpu.dynamic_rotate %378 by %c17_i32_209 dim 1 : vector<8x512xf32>, i32 -> vector<8x512xf32>
    %c16_i32_210 = arith.constant 16 : i32
    %385 = tpu.dynamic_rotate %378 by %c16_i32_210 dim 1 : vector<8x512xf32>, i32 -> vector<8x512xf32>
    %c15_i32_211 = arith.constant 15 : i32
    %386 = tpu.dynamic_rotate %378 by %c15_i32_211 dim 1 : vector<8x512xf32>, i32 -> vector<8x512xf32>
    %c1_i32_212 = arith.constant 1 : i32
    %387 = tpu.dynamic_rotate %378 by %c1_i32_212 dim 1 : vector<8x512xf32>, i32 -> vector<8x512xf32>
    %c511_i32_213 = arith.constant 511 : i32
    %388 = tpu.dynamic_rotate %378 by %c511_i32_213 dim 1 : vector<8x512xf32>, i32 -> vector<8x512xf32>
    %c497_i32_214 = arith.constant 497 : i32
    %389 = tpu.dynamic_rotate %378 by %c497_i32_214 dim 1 : vector<8x512xf32>, i32 -> vector<8x512xf32>
    %c496_i32_215 = arith.constant 496 : i32
    %390 = tpu.dynamic_rotate %378 by %c496_i32_215 dim 1 : vector<8x512xf32>, i32 -> vector<8x512xf32>
    %c495_i32_216 = arith.constant 495 : i32
    %391 = tpu.dynamic_rotate %378 by %c495_i32_216 dim 1 : vector<8x512xf32>, i32 -> vector<8x512xf32>
    %392 = tpu.concatenate %384, %385, %386, %387, %378, %388, %389, %390, %391, %2 in 0 : vector<8x512xf32>, vector<8x512xf32>, vector<8x512xf32>, vector<8x512xf32>, vector<8x512xf32>, vector<8x512xf32>, vector<8x512xf32>, vector<8x512xf32>, vector<8x512xf32>, vector<8x512xf32> -> vector<80x512xf32>
    %c0_217 = arith.constant 0 : index
    %c0_218 = arith.constant 0 : index
    %393 = vector.load %arg2[%c0_217, %c0_218] : memref<80x512xf32, #tpu.memory_space<vmem>>, vector<80x512xf32>
    %394 = arith.mulf %392, %393 : vector<80x512xf32>
    %395 = arith.truncf %394 : vector<80x512xf32> to vector<80x512xbf16>
    %cst_219 = arith.constant dense<0.000000e+00> : vector<16x512xf32>
    %396 = tpu.matmul %0, %395, %cst_219 {dimension_numbers = #tpu.dot_dimension_numbers<[1], [0], [0], [1], [0, 0, 1, 1], [], []>} : vector<16x80xbf16>, vector<80x512xbf16>, vector<16x512xf32> -> vector<16x512xf32>
    %397 = vector.extract_strided_slice %383 {offsets = [0, 0], sizes = [16, 512], strides = [1, 1]} : vector<24x512xf32> to vector<16x512xf32>
    %398 = arith.addf %396, %397 : vector<16x512xf32>
    %399 = vector.extract_strided_slice %398 {offsets = [0, 0], sizes = [8, 512], strides = [1, 1]} : vector<16x512xf32> to vector<8x512xf32>
    %400 = arith.negf %399 : vector<8x512xf32>
    %401 = math.exp %400 : vector<8x512xf32>
    %cst_220 = arith.constant 1.000000e+00 : f32
    %402 = vector.broadcast %cst_220 : f32 to vector<8x512xf32>
    %403 = arith.addf %402, %401 : vector<8x512xf32>
    %404 = arith.divf %402, %403 : vector<8x512xf32>
    %405 = vector.extract_strided_slice %398 {offsets = [8, 0], sizes = [8, 512], strides = [1, 1]} : vector<16x512xf32> to vector<8x512xf32>
    %406 = arith.negf %405 : vector<8x512xf32>
    %407 = math.exp %406 : vector<8x512xf32>
    %cst_221 = arith.constant 1.000000e+00 : f32
    %408 = vector.broadcast %cst_221 : f32 to vector<8x512xf32>
    %409 = arith.addf %408, %407 : vector<8x512xf32>
    %410 = arith.divf %408, %409 : vector<8x512xf32>
    %411 = arith.mulf %378, %410 : vector<8x512xf32>
    %c17_i32_222 = arith.constant 17 : i32
    %412 = tpu.dynamic_rotate %411 by %c17_i32_222 dim 1 : vector<8x512xf32>, i32 -> vector<8x512xf32>
    %c16_i32_223 = arith.constant 16 : i32
    %413 = tpu.dynamic_rotate %411 by %c16_i32_223 dim 1 : vector<8x512xf32>, i32 -> vector<8x512xf32>
    %c15_i32_224 = arith.constant 15 : i32
    %414 = tpu.dynamic_rotate %411 by %c15_i32_224 dim 1 : vector<8x512xf32>, i32 -> vector<8x512xf32>
    %c1_i32_225 = arith.constant 1 : i32
    %415 = tpu.dynamic_rotate %411 by %c1_i32_225 dim 1 : vector<8x512xf32>, i32 -> vector<8x512xf32>
    %c511_i32_226 = arith.constant 511 : i32
    %416 = tpu.dynamic_rotate %411 by %c511_i32_226 dim 1 : vector<8x512xf32>, i32 -> vector<8x512xf32>
    %c497_i32_227 = arith.constant 497 : i32
    %417 = tpu.dynamic_rotate %411 by %c497_i32_227 dim 1 : vector<8x512xf32>, i32 -> vector<8x512xf32>
    %c496_i32_228 = arith.constant 496 : i32
    %418 = tpu.dynamic_rotate %411 by %c496_i32_228 dim 1 : vector<8x512xf32>, i32 -> vector<8x512xf32>
    %c495_i32_229 = arith.constant 495 : i32
    %419 = tpu.dynamic_rotate %411 by %c495_i32_229 dim 1 : vector<8x512xf32>, i32 -> vector<8x512xf32>
    %420 = tpu.concatenate %412, %413, %414, %415, %411, %416, %417, %418, %419, %2 in 0 : vector<8x512xf32>, vector<8x512xf32>, vector<8x512xf32>, vector<8x512xf32>, vector<8x512xf32>, vector<8x512xf32>, vector<8x512xf32>, vector<8x512xf32>, vector<8x512xf32>, vector<8x512xf32> -> vector<80x512xf32>
    %c0_230 = arith.constant 0 : index
    %c0_231 = arith.constant 0 : index
    %421 = vector.load %arg2[%c0_230, %c0_231] : memref<80x512xf32, #tpu.memory_space<vmem>>, vector<80x512xf32>
    %422 = arith.mulf %420, %421 : vector<80x512xf32>
    %423 = arith.truncf %422 : vector<80x512xf32> to vector<80x512xbf16>
    %cst_232 = arith.constant dense<0.000000e+00> : vector<8x512xf32>
    %424 = tpu.matmul %1, %423, %cst_232 {dimension_numbers = #tpu.dot_dimension_numbers<[1], [0], [0], [1], [0, 0, 1, 1], [], []>} : vector<8x80xbf16>, vector<80x512xbf16>, vector<8x512xf32> -> vector<8x512xf32>
    %425 = vector.extract_strided_slice %383 {offsets = [16, 0], sizes = [8, 512], strides = [1, 1]} : vector<24x512xf32> to vector<8x512xf32>
    %426 = arith.addf %424, %425 : vector<8x512xf32>
    %427 = math.tanh %426 : vector<8x512xf32>
    %cst_233 = arith.constant 1.000000e+00 : f32
    %428 = vector.broadcast %cst_233 : f32 to vector<8x512xf32>
    %429 = arith.subf %428, %404 : vector<8x512xf32>
    %430 = arith.mulf %378, %429 : vector<8x512xf32>
    %431 = arith.mulf %427, %404 : vector<8x512xf32>
    %432 = arith.addf %430, %431 : vector<8x512xf32>
    %c7_234 = arith.constant 7 : index
    %c0_235 = arith.constant 0 : index
    %c0_236 = arith.constant 0 : index
    %433 = vector.load %arg5[%c7_234, %c0_235, %c0_236] : memref<8x8x512xf32, #tpu.memory_space<vmem>>, vector<1x8x512xf32>
    %434 = vector.shape_cast %433 : vector<1x8x512xf32> to vector<8x512xf32>
    %435 = vector.shape_cast %432 : vector<8x512xf32> to vector<1x8x512xf32>
    tpu.vector_store %arg5[%c7_234, %c0_235, %c0_236], %435 {strides = array<i32>} : memref<8x8x512xf32, #tpu.memory_space<vmem>>, vector<1x8x512xf32>,
    %c0_237 = arith.constant 0 : index
    %c0_238 = arith.constant 0 : index
    %436 = vector.load %arg6[%c0_237, %c0_238] : memref<8x512xf32, #tpu.memory_space<vmem>>, vector<8x512xf32>
    tpu.vector_store %arg6[%c0_237, %c0_238], %432 {strides = array<i32>} : memref<8x512xf32, #tpu.memory_space<vmem>>, vector<8x512xf32>,
    return
  }
  func.func @transform_0(%arg0: i32) -> (i32, i32, i32) {
    %c0_i32 = arith.constant 0 : i32
    %c0_i32_0 = arith.constant 0 : i32
    %c0_i32_1 = arith.constant 0 : i32
    return %c0_i32, %c0_i32_0, %arg0 : i32, i32, i32
  }
  func.func @transform_1(%arg0: i32) -> (i32, i32) {
    %c0_i32 = arith.constant 0 : i32
    %c0_i32_0 = arith.constant 0 : i32
    %c0_i32_1 = arith.constant 0 : i32
    return %c0_i32, %c0_i32_0 : i32, i32
  }
  func.func @transform_2(%arg0: i32) -> (i32, i32) {
    %c0_i32 = arith.constant 0 : i32
    %c0_i32_0 = arith.constant 0 : i32
    %c0_i32_1 = arith.constant 0 : i32
    return %c0_i32, %c0_i32_0 : i32, i32
  }
  func.func @transform_3(%arg0: i32) -> (i32, i32) {
    %c0_i32 = arith.constant 0 : i32
    %c0_i32_0 = arith.constant 0 : i32
    %c0_i32_1 = arith.constant 0 : i32
    return %c0_i32, %c0_i32_0 : i32, i32
  }
  func.func @transform_4(%arg0: i32) -> (i32, i32, i32) {
    %c0_i32 = arith.constant 0 : i32
    %c0_i32_0 = arith.constant 0 : i32
    %c0_i32_1 = arith.constant 0 : i32
    return %c0_i32, %c0_i32_0, %arg0 : i32, i32, i32
  }
  func.func @transform_5(%arg0: i32) -> (i32, i32) {
    %c0_i32 = arith.constant 0 : i32
    %c0_i32_0 = arith.constant 0 : i32
    return %c0_i32, %arg0 : i32, i32
  }
}

</mosaic_0001>

<bundles_post_ra>
// kernel: convgru1_forward.2
= control target key start
LH: loop header
LB: loop body
LE: loop exit
PB: predicated region body
PF: predicated region fallthrough
CT: control target
= control target key end

     0   :  { %vm184_vm0 = vcmask 1044480   ;;  %v1881_v3 = vmov 0.0   ;;  %vm174_vm1 = vcmask 302080   ;;  %s2856_s0 = inlined_call_operand.vmem [shape: f32[37,4096], index: 0, kind: input, shape index: {}]   ;;  %s2857_s1 = inlined_call_operand.vmem [shape: f32[24,37], index: 1, kind: input, shape index: {}]   ;;  %s2858_s2 = inlined_call_operand.vmem [shape: f32[8,24,512], index: 2, kind: output, shape index: {}]  }
   0x1   :  { %v143_v0 = vld [vmem:[%s2856_s0 + $0x408] sm:$0x1f]  ;;  %v145_v1 = vld [vmem:[%s2856_s0 + $0x418] sm:$0x1f]  ;;  %v142_v2 = vld [vmem:[%s2856_s0 + $0x400] sm:$0x1f]  ;;  %345 = vmatprep.mubr.f32.mxu0 %v1881_v3  ;;  %428 = vmatprep.mubr.f32.mxu1 %v1881_v3 }
   0x2   :  { %1716 = vmatprep.subr.msk.mxu0 %vm184_vm0, %v143_v0  ;;  %1721 = vmatprep.subr.msk.mxu1 %vm184_vm0, %v145_v1  ;;  %v144_v4 = vld [vmem:[%s2856_s0 + $0x410] sm:$0x1f]  ;;  %v111_v5 = vld [vmem:[%s2856_s0 + $0x308] sm:$0xff]  ;;  %v113_v6 = vld [vmem:[%s2856_s0 + $0x318] sm:$0xff] }
   0x3   :  { %1717 = vmatpush1.msk.msra.mxu0 %vm184_vm0, %v142_v2  ;;  %1722 = vmatpush1.msk.msra.mxu1 %vm184_vm0, %v144_v4  ;;  %v110_v7 = vld [vmem:[%s2856_s0 + $0x300] sm:$0xff]  ;;  %v112_v8 = vld [vmem:[%s2856_s0 + $0x310] sm:$0xff]  ;;  %v79_v9 = vld [vmem:[%s2856_s0 + $0x208] sm:$0xff] }
   0x4   :  { %305 = vmatprep.subr.mxu0 %v111_v5  ;;  %388 = vmatprep.subr.mxu1 %v113_v6  ;;  %v81_v10 = vld [vmem:[%s2856_s0 + $0x218] sm:$0xff]  ;;  %v78_v11 = vld [vmem:[%s2856_s0 + $0x200] sm:$0xff]  ;;  %v80_v12 = vld [vmem:[%s2856_s0 + $0x210] sm:$0xff] }
   0x5   :  { %306 = vmatpush1.msra.mxu0 %v110_v7  ;;  %389 = vmatpush1.msra.mxu1 %v112_v8  ;;  %v47_v13 = vld [vmem:[%s2856_s0 + $0x108] sm:$0xff]  ;;  %v49_v14 = vld [vmem:[%s2856_s0 + $0x118] sm:$0xff]  ;;  %v46_v15 = vld [vmem:[%s2856_s0 + $0x100] sm:$0xff] }
   0x6   :  { %307 = vmatprep.subr.mxu0 %v79_v9  ;;  %390 = vmatprep.subr.mxu1 %v81_v10  ;;  %v48_v16 = vld [vmem:[%s2856_s0 + $0x110] sm:$0xff]  ;;  %v15_v17 = vld [vmem:[%s2856_s0 + $0x8] sm:$0xff]  ;;  %v17_v18 = vld [vmem:[%s2856_s0 + $0x18] sm:$0xff] }
   0x7   :  { %308 = vmatpush1.msra.mxu0 %v78_v11  ;;  %391 = vmatpush1.msra.mxu1 %v80_v12  ;;  %v14_v19 = vld [vmem:[%s2856_s0] sm:$0xff]  ;;  %v16_v20 = vld [vmem:[%s2856_s0 + $0x10] sm:$0xff]  ;;  %v147_v22 = vld [vmem:[%s2856_s0 + $0x428] sm:$0x1f] }
   0x8   :  { %309 = vmatprep.subr.mxu0 %v47_v13  ;;  %392 = vmatprep.subr.mxu1 %v49_v14  ;;  %v1966_v21 = vld [vmem:[%s2857_s1] sm:$0xff]  ;;  %v149_v23 = vld [vmem:[%s2856_s0 + $0x438] sm:$0x1f]  ;;  %v148_v25 = vld [vmem:[%s2856_s0 + $0x430] sm:$0x1f] }
   0x9   :  { %310 = vmatpush1.msra.mxu0 %v46_v15  ;;  %393 = vmatpush1.msra.mxu1 %v48_v16  ;;  %v146_v24 = vld [vmem:[%s2856_s0 + $0x420] sm:$0x1f]  ;;  %v115_v26 = vld [vmem:[%s2856_s0 + $0x328] sm:$0xff]  ;;  %v117_v27 = vld [vmem:[%s2856_s0 + $0x338] sm:$0xff] }
   0xa   :  { %311 = vmatprep.subr.mxu0 %v15_v17  ;;  %394 = vmatprep.subr.mxu1 %v17_v18  ;;  %v1997_v28 = vld [vmem:[%s2857_s1 + $0x8] sm:$0xff]  ;;  %v114_v29 = vld [vmem:[%s2856_s0 + $0x320] sm:$0xff]  ;;  %v116_v30 = vld [vmem:[%s2856_s0 + $0x330] sm:$0xff] }
   0xb   :  { %312 = vmatpush1.msra.mxu0 %v14_v19  ;;  %395 = vmatpush1.msra.mxu1 %v16_v20  ;;  %v83_v31 = vld [vmem:[%s2856_s0 + $0x228] sm:$0xff]  ;;  %v85_v32 = vld [vmem:[%s2856_s0 + $0x238] sm:$0xff]  ;;  %v82_v33 = vld [vmem:[%s2856_s0 + $0x220] sm:$0xff] }
   0xc   :  { %1718 = vmatmul.mubr.msk.f32.vlgmr.msra.gmra.mxu0 %vm174_vm1, %v1966_v21  ;;  %1723 = vmatmul.mubr.msk.f32.vlgmr.msra.gmra.mxu1 %vm174_vm1, %v1966_v21  ;;  %v84_v34 = vld [vmem:[%s2856_s0 + $0x230] sm:$0xff]  ;;  %v51_v36 = vld [vmem:[%s2856_s0 + $0x128] sm:$0xff]  ;;  %v53_v37 = vld [vmem:[%s2856_s0 + $0x138] sm:$0xff] }
   0xd   :  { %1726 = vmatprep.subr.msk.mxu0 %vm184_vm0, %v147_v22  ;;  %1731 = vmatprep.subr.msk.mxu1 %vm184_vm0, %v149_v23  ;;  %v2026_v35 = vld [vmem:[%s2857_s1 + $0x10] sm:$0xff]  ;;  %v50_v38 = vld [vmem:[%s2856_s0 + $0x120] sm:$0xff]  ;;  %v19_v40 = vld [vmem:[%s2856_s0 + $0x28] sm:$0xff] }
   0xe   :  { %1727 = vmatpush1.msk.msra.mxu0 %vm184_vm0, %v146_v24  ;;  %1732 = vmatpush1.msk.msra.mxu1 %vm184_vm0, %v148_v25  ;;  %v52_v39 = vld [vmem:[%s2856_s0 + $0x130] sm:$0xff]  ;;  %v21_v41 = vld [vmem:[%s2856_s0 + $0x38] sm:$0xff]  ;;  %v18_v42 = vld [vmem:[%s2856_s0 + $0x20] sm:$0xff] }
   0xf   :  { %351 = vmatprep.mubr.f32.mxu0 %v1881_v3  ;;  %434 = vmatprep.mubr.f32.mxu1 %v1881_v3  ;;  %v20_v43 = vld [vmem:[%s2856_s0 + $0x30] sm:$0xff]  ;;  %v151_v44 = vld [vmem:[%s2856_s0 + $0x448] sm:$0x1f]  ;;  %v153_v45 = vld [vmem:[%s2856_s0 + $0x458] sm:$0x1f] }
  0x10   :  { %471 = vmatprep.subr.mxu0 %v115_v26  ;;  %554 = vmatprep.subr.mxu1 %v117_v27  ;;  %v150_v46 = vld [vmem:[%s2856_s0 + $0x440] sm:$0x1f]  ;;  %v152_v47 = vld [vmem:[%s2856_s0 + $0x450] sm:$0x1f]  ;;  %v119_v48 = vld [vmem:[%s2856_s0 + $0x348] sm:$0xff] }
  0x11   :  { %1719 = vmatmul.mubr.msk.f32.gmra.mxu0 %vm174_vm1, %v1997_v28  ;;  %1724 = vmatmul.mubr.msk.f32.gmra.mxu1 %vm174_vm1, %v1997_v28  ;;  %v121_v49 = vld [vmem:[%s2856_s0 + $0x358] sm:$0xff]  ;;  %v118_v50 = vld [vmem:[%s2856_s0 + $0x340] sm:$0xff]  ;;  %v120_v51 = vld [vmem:[%s2856_s0 + $0x350] sm:$0xff] }
  0x12   :  { %472 = vmatpush1.msra.mxu0 %v114_v29  ;;  %555 = vmatpush1.msra.mxu1 %v116_v30  ;;  %v87_v52 = vld [vmem:[%s2856_s0 + $0x248] sm:$0xff]  ;;  %v89_v53 = vld [vmem:[%s2856_s0 + $0x258] sm:$0xff]  ;;  %v86_v54 = vld [vmem:[%s2856_s0 + $0x240] sm:$0xff] }
  0x13   :  { %473 = vmatprep.subr.mxu0 %v83_v31  ;;  %556 = vmatprep.subr.mxu1 %v85_v32  ;;  %v88_v55 = vld [vmem:[%s2856_s0 + $0x250] sm:$0xff]  ;;  %v55_v56 = vld [vmem:[%s2856_s0 + $0x148] sm:$0xff]  ;;  %v57_v57 = vld [vmem:[%s2856_s0 + $0x158] sm:$0xff] }
  0x14   :  { %474 = vmatpush1.msra.mxu0 %v82_v33  ;;  %557 = vmatpush1.msra.mxu1 %v84_v34  ;;  %v54_v58 = vld [vmem:[%s2856_s0 + $0x140] sm:$0xff]  ;;  %v56_v59 = vld [vmem:[%s2856_s0 + $0x150] sm:$0xff]  ;;  %v23_v60 = vld [vmem:[%s2856_s0 + $0x48] sm:$0xff] }
  0x15   :  { %357 = vmatprep.mubr.f32.mxu0 %v1881_v3  ;;  %440 = vmatprep.mubr.f32.mxu1 %v1881_v3  ;;  %v25_v61 = vld [vmem:[%s2856_s0 + $0x58] sm:$0xff]  ;;  %v22_v62 = vld [vmem:[%s2856_s0 + $0x40] sm:$0xff]  ;;  %v24_v63 = vld [vmem:[%s2856_s0 + $0x50] sm:$0xff] }
  0x16   :  { %1720 = vmatmul.mubr.msk.f32.gmra.mxu0 %vm174_vm1, %v2026_v35  ;;  %1725 = vmatmul.mubr.msk.f32.gmra.mxu1 %vm174_vm1, %v2026_v35  ;;  %v155_v0 = vld [vmem:[%s2856_s0 + $0x468] sm:$0x1f]  ;;  %v157_v1 = vld [vmem:[%s2856_s0 + $0x478] sm:$0x1f]  ;;  %v154_v2 = vld [vmem:[%s2856_s0 + $0x460] sm:$0x1f] }
  0x17   :  { %475 = vmatprep.subr.mxu0 %v51_v36  ;;  %558 = vmatprep.subr.mxu1 %v53_v37  ;;  %v156_v4 = vld [vmem:[%s2856_s0 + $0x470] sm:$0x1f]  ;;  %v123_v5 = vld [vmem:[%s2856_s0 + $0x368] sm:$0xff]  ;;  %v125_v6 = vld [vmem:[%s2856_s0 + $0x378] sm:$0xff] }
  0x18   :  { %476 = vmatpush1.msra.mxu0 %v50_v38  ;;  %559 = vmatpush1.msra.mxu1 %v52_v39  ;;  %v122_v7 = vld [vmem:[%s2856_s0 + $0x360] sm:$0xff]  ;;  %v124_v8 = vld [vmem:[%s2856_s0 + $0x370] sm:$0xff]  ;;  %v91_v9 = vld [vmem:[%s2856_s0 + $0x268] sm:$0xff] }
  0x19   :  { %477 = vmatprep.subr.mxu0 %v19_v40  ;;  %560 = vmatprep.subr.mxu1 %v21_v41  ;;  %v93_v10 = vld [vmem:[%s2856_s0 + $0x278] sm:$0xff]  ;;  %v90_v11 = vld [vmem:[%s2856_s0 + $0x260] sm:$0xff]  ;;  %v92_v12 = vld [vmem:[%s2856_s0 + $0x270] sm:$0xff] }
  0x1a   :  { %478 = vmatpush1.msra.mxu0 %v18_v42  ;;  %511 = vmatprep.mubr.f32.mxu0 %v1881_v3  ;;  %v59_v13 = vld [vmem:[%s2856_s0 + $0x168] sm:$0xff]  ;;  %v61_v14 = vld [vmem:[%s2856_s0 + $0x178] sm:$0xff]  ;;  %v58_v15 = vld [vmem:[%s2856_s0 + $0x160] sm:$0xff] }
  0x1b   :  { %561 = vmatpush1.msra.mxu1 %v20_v43  ;;  %594 = vmatprep.mubr.f32.mxu1 %v1881_v3  ;;  %v60_v16 = vld [vmem:[%s2856_s0 + $0x170] sm:$0xff]  ;;  %v27_v17 = vld [vmem:[%s2856_s0 + $0x68] sm:$0xff]  ;;  %v29_v18 = vld [vmem:[%s2856_s0 + $0x78] sm:$0xff] }
  0x1c   :  { %1728 = vmatmul.mubr.msk.f32.vlgmr.msra.gmra.mxu0 %vm174_vm1, %v1966_v21  ;;  %1733 = vmatmul.mubr.msk.f32.vlgmr.msra.gmra.mxu1 %vm174_vm1, %v1966_v21  ;;  %v26_v19 = vld [vmem:[%s2856_s0 + $0x60] sm:$0xff]  ;;  %v28_v20 = vld [vmem:[%s2856_s0 + $0x70] sm:$0xff]  ;;  %v159_v22 = vld [vmem:[%s2856_s0 + $0x488] sm:$0x1f] }
  0x1d   :  { %1736 = vmatprep.subr.msk.mxu0 %vm184_vm0, %v151_v44  ;;  %1741 = vmatprep.subr.msk.mxu1 %vm184_vm0, %v153_v45  ;;  %v161_v23 = vld [vmem:[%s2856_s0 + $0x498] sm:$0x1f]  ;;  %v158_v24 = vld [vmem:[%s2856_s0 + $0x480] sm:$0x1f]  ;;  %v160_v25 = vld [vmem:[%s2856_s0 + $0x490] sm:$0x1f] }
  0x1e   :  { %1737 = vmatpush1.msk.msra.mxu0 %vm184_vm0, %v150_v46  ;;  %1742 = vmatpush1.msk.msra.mxu1 %vm184_vm0, %v152_v47  ;;  %v127_v26 = vld [vmem:[%s2856_s0 + $0x388] sm:$0xff]  ;;  %v129_v27 = vld [vmem:[%s2856_s0 + $0x398] sm:$0xff]  ;;  %v126_v29 = vld [vmem:[%s2856_s0 + $0x380] sm:$0xff] }
  0x1f   :  { %517 = vmatprep.mubr.f32.mxu0 %v1881_v3  ;;  %600 = vmatprep.mubr.f32.mxu1 %v1881_v3  ;;  %v128_v30 = vld [vmem:[%s2856_s0 + $0x390] sm:$0xff]  ;;  %v95_v31 = vld [vmem:[%s2856_s0 + $0x288] sm:$0xff]  ;;  %v97_v32 = vld [vmem:[%s2856_s0 + $0x298] sm:$0xff] }
  0x20   :  { %637 = vmatprep.subr.mxu0 %v119_v48  ;;  %720 = vmatprep.subr.mxu1 %v121_v49  ;;  %v94_v33 = vld [vmem:[%s2856_s0 + $0x280] sm:$0xff]  ;;  %v96_v34 = vld [vmem:[%s2856_s0 + $0x290] sm:$0xff]  ;;  %v63_v36 = vld [vmem:[%s2856_s0 + $0x188] sm:$0xff] }
  0x21   :  { %1729 = vmatmul.mubr.msk.f32.gmra.mxu0 %vm174_vm1, %v1997_v28  ;;  %1734 = vmatmul.mubr.msk.f32.gmra.mxu1 %vm174_vm1, %v1997_v28  ;;  %v65_v37 = vld [vmem:[%s2856_s0 + $0x198] sm:$0xff]  ;;  %v62_v38 = vld [vmem:[%s2856_s0 + $0x180] sm:$0xff]  ;;  %v64_v39 = vld [vmem:[%s2856_s0 + $0x190] sm:$0xff] }
  0x22   :  { %638 = vmatpush1.msra.mxu0 %v118_v50  ;;  %721 = vmatpush1.msra.mxu1 %v120_v51  ;;  %v31_v40 = vld [vmem:[%s2856_s0 + $0x88] sm:$0xff]  ;;  %v33_v41 = vld [vmem:[%s2856_s0 + $0x98] sm:$0xff]  ;;  %v30_v42 = vld [vmem:[%s2856_s0 + $0x80] sm:$0xff] }
  0x23   :  { %639 = vmatprep.subr.mxu0 %v87_v52  ;;  %722 = vmatprep.subr.mxu1 %v89_v53  ;;  %v32_v43 = vld [vmem:[%s2856_s0 + $0x90] sm:$0xff]  ;;  %v163_v44 = vld [vmem:[%s2856_s0 + $0x4a8] sm:$0x1f]  ;;  %v165_v45 = vld [vmem:[%s2856_s0 + $0x4b8] sm:$0x1f] }
  0x24   :  { %640 = vmatpush1.msra.mxu0 %v86_v54  ;;  %723 = vmatpush1.msra.mxu1 %v88_v55  ;;  %v162_v46 = vld [vmem:[%s2856_s0 + $0x4a0] sm:$0x1f]  ;;  %v164_v47 = vld [vmem:[%s2856_s0 + $0x4b0] sm:$0x1f]  ;;  %v131_v48 = vld [vmem:[%s2856_s0 + $0x3a8] sm:$0xff] }
  0x25   :  { %523 = vmatprep.mubr.f32.mxu0 %v1881_v3  ;;  %606 = vmatprep.mubr.f32.mxu1 %v1881_v3  ;;  %v133_v49 = vld [vmem:[%s2856_s0 + $0x3b8] sm:$0xff]  ;;  %v130_v50 = vld [vmem:[%s2856_s0 + $0x3a0] sm:$0xff]  ;;  %v132_v51 = vld [vmem:[%s2856_s0 + $0x3b0] sm:$0xff] }
  0x26   :  { %1730 = vmatmul.mubr.msk.f32.gmra.mxu0 %vm174_vm1, %v2026_v35  ;;  %1735 = vmatmul.mubr.msk.f32.gmra.mxu1 %vm174_vm1, %v2026_v35  ;;  %v99_v52 = vld [vmem:[%s2856_s0 + $0x2a8] sm:$0xff]  ;;  %v101_v53 = vld [vmem:[%s2856_s0 + $0x2b8] sm:$0xff]  ;;  %v98_v54 = vld [vmem:[%s2856_s0 + $0x2a0] sm:$0xff] }
  0x27   :  { %641 = vmatprep.subr.mxu0 %v55_v56  ;;  %724 = vmatprep.subr.mxu1 %v57_v57  ;;  %v100_v55 = vld [vmem:[%s2856_s0 + $0x2b0] sm:$0xff]  ;;  %v67_v56 = vld [vmem:[%s2856_s0 + $0x1a8] sm:$0xff]  ;;  %v69_v57 = vld [vmem:[%s2856_s0 + $0x1b8] sm:$0xff] }
  0x28   :  { %642 = vmatpush1.msra.mxu0 %v54_v58  ;;  %725 = vmatpush1.msra.mxu1 %v56_v59  ;;  %v66_v58 = vld [vmem:[%s2856_s0 + $0x1a0] sm:$0xff]  ;;  %v68_v59 = vld [vmem:[%s2856_s0 + $0x1b0] sm:$0xff] }
  0x29   :  { %643 = vmatprep.subr.mxu0 %v23_v60  ;;  %726 = vmatprep.subr.mxu1 %v25_v61  ;;  %v35_v60 = vld [vmem:[%s2856_s0 + $0xa8] sm:$0xff]  ;;  %v37_v61 = vld [vmem:[%s2856_s0 + $0xb8] sm:$0xff] }
  0x2a   :  { %644 = vmatpush1.msra.mxu0 %v22_v62  ;;  %677 = vmatprep.mubr.f32.mxu0 %v1881_v3  ;;  %v34_v62 = vld [vmem:[%s2856_s0 + $0xa0] sm:$0xff] }
  0x2b   :  { %727 = vmatpush1.msra.mxu1 %v24_v63  ;;  %760 = vmatprep.mubr.f32.mxu1 %v1881_v3  ;;  %v36_v63 = vld [vmem:[%s2856_s0 + $0xb0] sm:$0xff] }
  0x2c   :  { %1738 = vmatmul.mubr.msk.f32.vlgmr.msra.gmra.mxu0 %vm174_vm1, %v1966_v21  ;;  %1743 = vmatmul.mubr.msk.f32.vlgmr.msra.gmra.mxu1 %vm174_vm1, %v1966_v21 }
  0x2d   :  { %1746 = vmatprep.subr.msk.mxu0 %vm184_vm0, %v155_v0  ;;  %1751 = vmatprep.subr.msk.mxu1 %vm184_vm0, %v157_v1  ;;  %v167_v0 = vld [vmem:[%s2856_s0 + $0x4c8] sm:$0x1f]  ;;  %v169_v1 = vld [vmem:[%s2856_s0 + $0x4d8] sm:$0x1f] }
  0x2e   :  { %1747 = vmatpush1.msk.msra.mxu0 %vm184_vm0, %v154_v2  ;;  %1752 = vmatpush1.msk.msra.mxu1 %vm184_vm0, %v156_v4  ;;  %v166_v2 = vld [vmem:[%s2856_s0 + $0x4c0] sm:$0x1f]  ;;  %v168_v4 = vld [vmem:[%s2856_s0 + $0x4d0] sm:$0x1f] }
  0x2f   :  { %683 = vmatprep.mubr.f32.mxu0 %v1881_v3  ;;  %766 = vmatprep.mubr.f32.mxu1 %v1881_v3 }
  0x30   :  { %803 = vmatprep.subr.mxu0 %v123_v5  ;;  %886 = vmatprep.subr.mxu1 %v125_v6  ;;  %v135_v5 = vld [vmem:[%s2856_s0 + $0x3c8] sm:$0xff]  ;;  %v137_v6 = vld [vmem:[%s2856_s0 + $0x3d8] sm:$0xff] }
  0x31   :  { %1739 = vmatmul.mubr.msk.f32.gmra.mxu0 %vm174_vm1, %v1997_v28  ;;  %1744 = vmatmul.mubr.msk.f32.gmra.mxu1 %vm174_vm1, %v1997_v28 }
  0x32   :  { %804 = vmatpush1.msra.mxu0 %v122_v7  ;;  %887 = vmatpush1.msra.mxu1 %v124_v8  ;;  %v134_v7 = vld [vmem:[%s2856_s0 + $0x3c0] sm:$0xff]  ;;  %v136_v8 = vld [vmem:[%s2856_s0 + $0x3d0] sm:$0xff] }
  0x33   :  { %805 = vmatprep.subr.mxu0 %v91_v9  ;;  %888 = vmatprep.subr.mxu1 %v93_v10  ;;  %v103_v9 = vld [vmem:[%s2856_s0 + $0x2c8] sm:$0xff]  ;;  %v105_v10 = vld [vmem:[%s2856_s0 + $0x2d8] sm:$0xff] }
  0x34   :  { %806 = vmatpush1.msra.mxu0 %v90_v11  ;;  %889 = vmatpush1.msra.mxu1 %v92_v12  ;;  %v102_v11 = vld [vmem:[%s2856_s0 + $0x2c0] sm:$0xff]  ;;  %v104_v12 = vld [vmem:[%s2856_s0 + $0x2d0] sm:$0xff] }
  0x35   :  { %689 = vmatprep.mubr.f32.mxu0 %v1881_v3  ;;  %772 = vmatprep.mubr.f32.mxu1 %v1881_v3 }
  0x36   :  { %1740 = vmatmul.mubr.msk.f32.gmra.mxu0 %vm174_vm1, %v2026_v35  ;;  %1745 = vmatmul.mubr.msk.f32.gmra.mxu1 %vm174_vm1, %v2026_v35 }
  0x37   :  { %807 = vmatprep.subr.mxu0 %v59_v13  ;;  %890 = vmatprep.subr.mxu1 %v61_v14  ;;  %v71_v13 = vld [vmem:[%s2856_s0 + $0x1c8] sm:$0xff]  ;;  %v73_v14 = vld [vmem:[%s2856_s0 + $0x1d8] sm:$0xff] }
  0x38   :  { %808 = vmatpush1.msra.mxu0 %v58_v15  ;;  %891 = vmatpush1.msra.mxu1 %v60_v16  ;;  %v70_v15 = vld [vmem:[%s2856_s0 + $0x1c0] sm:$0xff]  ;;  %v72_v16 = vld [vmem:[%s2856_s0 + $0x1d0] sm:$0xff] }
  0x39   :  { %809 = vmatprep.subr.mxu0 %v27_v17  ;;  %892 = vmatprep.subr.mxu1 %v29_v18  ;;  %v39_v17 = vld [vmem:[%s2856_s0 + $0xc8] sm:$0xff]  ;;  %v41_v18 = vld [vmem:[%s2856_s0 + $0xd8] sm:$0xff] }
  0x3a   :  { %810 = vmatpush1.msra.mxu0 %v26_v19  ;;  %843 = vmatprep.mubr.f32.mxu0 %v1881_v3  ;;  %v38_v19 = vld [vmem:[%s2856_s0 + $0xc0] sm:$0xff] }
  0x3b   :  { %893 = vmatpush1.msra.mxu1 %v28_v20  ;;  %926 = vmatprep.mubr.f32.mxu1 %v1881_v3  ;;  %v40_v20 = vld [vmem:[%s2856_s0 + $0xd0] sm:$0xff] }
  0x3c   :  { %1748 = vmatmul.mubr.msk.f32.vlgmr.msra.gmra.mxu0 %vm174_vm1, %v1966_v21  ;;  %1753 = vmatmul.mubr.msk.f32.vlgmr.msra.gmra.mxu1 %vm174_vm1, %v1966_v21 }
  0x3d   :  { %1756 = vmatprep.subr.msk.mxu0 %vm184_vm0, %v159_v22  ;;  %1761 = vmatprep.subr.msk.mxu1 %vm184_vm0, %v161_v23  ;;  %v171_v22 = vld [vmem:[%s2856_s0 + $0x4e8] sm:$0x1f]  ;;  %v173_v23 = vld [vmem:[%s2856_s0 + $0x4f8] sm:$0x1f] }
  0x3e   :  { %1757 = vmatpush1.msk.msra.mxu0 %vm184_vm0, %v158_v24  ;;  %1762 = vmatpush1.msk.msra.mxu1 %vm184_vm0, %v160_v25  ;;  %v170_v24 = vld [vmem:[%s2856_s0 + $0x4e0] sm:$0x1f]  ;;  %v172_v25 = vld [vmem:[%s2856_s0 + $0x4f0] sm:$0x1f] }
  0x3f   :  { %849 = vmatprep.mubr.f32.mxu0 %v1881_v3  ;;  %932 = vmatprep.mubr.f32.mxu1 %v1881_v3 }
  0x40   :  { %969 = vmatprep.subr.mxu0 %v127_v26  ;;  %1052 = vmatprep.subr.mxu1 %v129_v27  ;;  %v139_v26 = vld [vmem:[%s2856_s0 + $0x3e8] sm:$0xff]  ;;  %v141_v27 = vld [vmem:[%s2856_s0 + $0x3f8] sm:$0xff] }
  0x41   :  { %1749 = vmatmul.mubr.msk.f32.gmra.mxu0 %vm174_vm1, %v1997_v28  ;;  %1754 = vmatmul.mubr.msk.f32.gmra.mxu1 %vm174_vm1, %v1997_v28 }
  0x42   :  { %970 = vmatpush1.msra.mxu0 %v126_v29  ;;  %1053 = vmatpush1.msra.mxu1 %v128_v30  ;;  %v138_v29 = vld [vmem:[%s2856_s0 + $0x3e0] sm:$0xff]  ;;  %v140_v30 = vld [vmem:[%s2856_s0 + $0x3f0] sm:$0xff] }
  0x43   :  { %971 = vmatprep.subr.mxu0 %v95_v31  ;;  %1054 = vmatprep.subr.mxu1 %v97_v32  ;;  %v107_v31 = vld [vmem:[%s2856_s0 + $0x2e8] sm:$0xff]  ;;  %v109_v32 = vld [vmem:[%s2856_s0 + $0x2f8] sm:$0xff] }
  0x44   :  { %972 = vmatpush1.msra.mxu0 %v94_v33  ;;  %1055 = vmatpush1.msra.mxu1 %v96_v34  ;;  %v106_v33 = vld [vmem:[%s2856_s0 + $0x2e0] sm:$0xff]  ;;  %v108_v34 = vld [vmem:[%s2856_s0 + $0x2f0] sm:$0xff] }
  0x45   :  { %855 = vmatprep.mubr.f32.mxu0 %v1881_v3  ;;  %938 = vmatprep.mubr.f32.mxu1 %v1881_v3 }
  0x46   :  { %1750 = vmatmul.mubr.msk.f32.gmra.mxu0 %vm174_vm1, %v2026_v35  ;;  %1755 = vmatmul.mubr.msk.f32.gmra.mxu1 %vm174_vm1, %v2026_v35 }
  0x47   :  { %973 = vmatprep.subr.mxu0 %v63_v36  ;;  %1056 = vmatprep.subr.mxu1 %v65_v37  ;;  %v75_v36 = vld [vmem:[%s2856_s0 + $0x1e8] sm:$0xff]  ;;  %v77_v37 = vld [vmem:[%s2856_s0 + $0x1f8] sm:$0xff] }
  0x48   :  { %974 = vmatpush1.msra.mxu0 %v62_v38  ;;  %1057 = vmatpush1.msra.mxu1 %v64_v39  ;;  %v74_v38 = vld [vmem:[%s2856_s0 + $0x1e0] sm:$0xff]  ;;  %v76_v39 = vld [vmem:[%s2856_s0 + $0x1f0] sm:$0xff] }
  0x49   :  { %975 = vmatprep.subr.mxu0 %v31_v40  ;;  %1058 = vmatprep.subr.mxu1 %v33_v41  ;;  %v43_v40 = vld [vmem:[%s2856_s0 + $0xe8] sm:$0xff]  ;;  %v45_v41 = vld [vmem:[%s2856_s0 + $0xf8] sm:$0xff] }
  0x4a   :  { %976 = vmatpush1.msra.mxu0 %v30_v42  ;;  %1009 = vmatprep.mubr.f32.mxu0 %v1881_v3  ;;  %v42_v42 = vld [vmem:[%s2856_s0 + $0xe0] sm:$0xff] }
  0x4b   :  { %1059 = vmatpush1.msra.mxu1 %v32_v43  ;;  %1092 = vmatprep.mubr.f32.mxu1 %v1881_v3  ;;  %v44_v43 = vld [vmem:[%s2856_s0 + $0xf0] sm:$0xff] }
  0x4c   :  { %1758 = vmatmul.mubr.msk.f32.vlgmr.msra.gmra.mxu0 %vm174_vm1, %v1966_v21  ;;  %1763 = vmatmul.mubr.msk.f32.vlgmr.msra.gmra.mxu1 %vm174_vm1, %v1966_v21 }
  0x4d   :  { %1766 = vmatprep.subr.msk.mxu0 %vm184_vm0, %v163_v44  ;;  %1771 = vmatprep.subr.msk.mxu1 %vm184_vm0, %v165_v45 }
  0x4e   :  { %1767 = vmatpush1.msk.msra.mxu0 %vm184_vm0, %v162_v46  ;;  %1772 = vmatpush1.msk.msra.mxu1 %vm184_vm0, %v164_v47 }
  0x4f   :  { %1015 = vmatprep.mubr.f32.mxu0 %v1881_v3  ;;  %1098 = vmatprep.mubr.f32.mxu1 %v1881_v3 }
  0x50   :  { %1135 = vmatprep.subr.mxu0 %v131_v48  ;;  %1218 = vmatprep.subr.mxu1 %v133_v49 }
  0x51   :  { %1759 = vmatmul.mubr.msk.f32.gmra.mxu0 %vm174_vm1, %v1997_v28  ;;  %1764 = vmatmul.mubr.msk.f32.gmra.mxu1 %vm174_vm1, %v1997_v28 }
  0x52   :  { %1136 = vmatpush1.msra.mxu0 %v130_v50  ;;  %1219 = vmatpush1.msra.mxu1 %v132_v51 }
  0x53   :  { %1137 = vmatprep.subr.mxu0 %v99_v52  ;;  %1220 = vmatprep.subr.mxu1 %v101_v53 }
  0x54   :  { %1138 = vmatpush1.msra.mxu0 %v98_v54  ;;  %1221 = vmatpush1.msra.mxu1 %v100_v55 }
  0x55   :  { %1021 = vmatprep.mubr.f32.mxu0 %v1881_v3  ;;  %1104 = vmatprep.mubr.f32.mxu1 %v1881_v3 }
  0x56   :  { %1760 = vmatmul.mubr.msk.f32.gmra.mxu0 %vm174_vm1, %v2026_v35  ;;  %1765 = vmatmul.mubr.msk.f32.gmra.mxu1 %vm174_vm1, %v2026_v35 }
  0x57   :  { %1139 = vmatprep.subr.mxu0 %v67_v56  ;;  %1222 = vmatprep.subr.mxu1 %v69_v57 }
  0x58   :  { %1140 = vmatpush1.msra.mxu0 %v66_v58  ;;  %1223 = vmatpush1.msra.mxu1 %v68_v59 }
  0x59   :  { %1141 = vmatprep.subr.mxu0 %v35_v60  ;;  %1224 = vmatprep.subr.mxu1 %v37_v61 }
  0x5a   :  { %1142 = vmatpush1.msra.mxu0 %v34_v62  ;;  %1175 = vmatprep.mubr.f32.mxu0 %v1881_v3 }
  0x5b   :  { %1225 = vmatpush1.msra.mxu1 %v36_v63  ;;  %1258 = vmatprep.mubr.f32.mxu1 %v1881_v3 }
  0x5c   :  { %1768 = vmatmul.mubr.msk.f32.vlgmr.msra.gmra.mxu0 %vm174_vm1, %v1966_v21  ;;  %1773 = vmatmul.mubr.msk.f32.vlgmr.msra.gmra.mxu1 %vm174_vm1, %v1966_v21 }
  0x5d   :  { %1776 = vmatprep.subr.msk.mxu0 %vm184_vm0, %v167_v0  ;;  %1781 = vmatprep.subr.msk.mxu1 %vm184_vm0, %v169_v1 }
  0x5e   :  { %1777 = vmatpush1.msk.msra.mxu0 %vm184_vm0, %v166_v2  ;;  %1782 = vmatpush1.msk.msra.mxu1 %vm184_vm0, %v168_v4 }
  0x5f   :  { %1181 = vmatprep.mubr.f32.mxu0 %v1881_v3  ;;  %1264 = vmatprep.mubr.f32.mxu1 %v1881_v3 }
  0x60   :  { %1301 = vmatprep.subr.mxu0 %v135_v5  ;;  %1384 = vmatprep.subr.mxu1 %v137_v6 }
  0x61   :  { %1769 = vmatmul.mubr.msk.f32.gmra.mxu0 %vm174_vm1, %v1997_v28  ;;  %1774 = vmatmul.mubr.msk.f32.gmra.mxu1 %vm174_vm1, %v1997_v28 }
  0x62   :  { %1302 = vmatpush1.msra.mxu0 %v134_v7  ;;  %1385 = vmatpush1.msra.mxu1 %v136_v8 }
  0x63   :  { %1303 = vmatprep.subr.mxu0 %v103_v9  ;;  %1386 = vmatprep.subr.mxu1 %v105_v10 }
  0x64   :  { %1304 = vmatpush1.msra.mxu0 %v102_v11  ;;  %1387 = vmatpush1.msra.mxu1 %v104_v12 }
  0x65   :  { %1187 = vmatprep.mubr.f32.mxu0 %v1881_v3  ;;  %1270 = vmatprep.mubr.f32.mxu1 %v1881_v3 }
  0x66   :  { %1770 = vmatmul.mubr.msk.f32.gmra.mxu0 %vm174_vm1, %v2026_v35  ;;  %1775 = vmatmul.mubr.msk.f32.gmra.mxu1 %vm174_vm1, %v2026_v35 }
  0x67   :  { %1305 = vmatprep.subr.mxu0 %v71_v13  ;;  %1388 = vmatprep.subr.mxu1 %v73_v14 }
  0x68   :  { %1306 = vmatpush1.msra.mxu0 %v70_v15  ;;  %1389 = vmatpush1.msra.mxu1 %v72_v16 }
  0x69   :  { %1307 = vmatprep.subr.mxu0 %v39_v17  ;;  %1390 = vmatprep.subr.mxu1 %v41_v18 }
  0x6a   :  { %1308 = vmatpush1.msra.mxu0 %v38_v19  ;;  %1341 = vmatprep.mubr.f32.mxu0 %v1881_v3 }
  0x6b   :  { %1391 = vmatpush1.msra.mxu1 %v40_v20  ;;  %1424 = vmatprep.mubr.f32.mxu1 %v1881_v3 }
  0x6c   :  { %1778 = vmatmul.mubr.msk.f32.vlgmr.msra.gmra.mxu0 %vm174_vm1, %v1966_v21  ;;  %1783 = vmatmul.mubr.msk.f32.vlgmr.msra.gmra.mxu1 %vm174_vm1, %v1966_v21 }
  0x6d   :  { %1786 = vmatprep.subr.msk.mxu0 %vm184_vm0, %v171_v22  ;;  %1791 = vmatprep.subr.msk.mxu1 %vm184_vm0, %v173_v23 }
  0x6e   :  { %1787 = vmatpush1.msk.msra.mxu0 %vm184_vm0, %v170_v24  ;;  %1792 = vmatpush1.msk.msra.mxu1 %vm184_vm0, %v172_v25 }
  0x6f   :  { %1347 = vmatprep.mubr.f32.mxu0 %v1881_v3  ;;  %1430 = vmatprep.mubr.f32.mxu1 %v1881_v3 }
  0x70   :  { %1467 = vmatprep.subr.mxu0 %v139_v26  ;;  %1550 = vmatprep.subr.mxu1 %v141_v27 }
  0x71   :  { %1779 = vmatmul.mubr.msk.f32.gmra.mxu0 %vm174_vm1, %v1997_v28  ;;  %1784 = vmatmul.mubr.msk.f32.gmra.mxu1 %vm174_vm1, %v1997_v28 }
  0x72   :  { %1468 = vmatpush1.msra.mxu0 %v138_v29  ;;  %1551 = vmatpush1.msra.mxu1 %v140_v30 }
  0x73   :  { %1469 = vmatprep.subr.mxu0 %v107_v31  ;;  %1552 = vmatprep.subr.mxu1 %v109_v32 }
  0x74   :  { %1470 = vmatpush1.msra.mxu0 %v106_v33  ;;  %1553 = vmatpush1.msra.mxu1 %v108_v34 }
  0x75   :  { %1353 = vmatprep.mubr.f32.mxu0 %v1881_v3  ;;  %1436 = vmatprep.mubr.f32.mxu1 %v1881_v3 }
  0x76   :  { %1780 = vmatmul.mubr.msk.f32.gmra.mxu0 %vm174_vm1, %v2026_v35  ;;  %1785 = vmatmul.mubr.msk.f32.gmra.mxu1 %vm174_vm1, %v2026_v35 }
  0x77   :  { %1471 = vmatprep.subr.mxu0 %v75_v36  ;;  %1554 = vmatprep.subr.mxu1 %v77_v37 }
  0x78   :  { %1472 = vmatpush1.msra.mxu0 %v74_v38  ;;  %1555 = vmatpush1.msra.mxu1 %v76_v39 }
  0x79   :  { %1473 = vmatprep.subr.mxu0 %v43_v40  ;;  %1556 = vmatprep.subr.mxu1 %v45_v41 }
  0x7a   :  { %1474 = vmatpush1.msra.mxu0 %v42_v42  ;;  %1507 = vmatprep.mubr.f32.mxu0 %v1881_v3 }
  0x7b   :  { %1557 = vmatpush1.msra.mxu1 %v44_v43  ;;  %1590 = vmatprep.mubr.f32.mxu1 %v1881_v3 }
  0x7c   :  { %1788 = vmatmul.mubr.msk.f32.vlgmr.msra.gmra.mxu0 %vm174_vm1, %v1966_v21  ;;  %1793 = vmatmul.mubr.msk.f32.vlgmr.msra.gmra.mxu1 %vm174_vm1, %v1966_v21 }
  0x7d   :  { %1513 = vmatprep.mubr.f32.mxu0 %v1881_v3  ;;  %1596 = vmatprep.mubr.f32.mxu1 %v1881_v3 }
  0x80   :  { %1789 = vmatmul.mubr.msk.f32.gmra.mxu0 %vm174_vm1, %v1997_v28  ;;  %1794 = vmatmul.mubr.msk.f32.gmra.mxu1 %vm174_vm1, %v1997_v28 }
  0x81   :  { %1519 = vmatprep.mubr.f32.mxu0 %v1881_v3  ;;  %1602 = vmatprep.mubr.f32.mxu1 %v1881_v3 }
  0x84   :  { %1790 = vmatmul.mubr.msk.f32.gmra.mxu0 %vm174_vm1, %v2026_v35  ;;  %1795 = vmatmul.mubr.msk.f32.gmra.mxu1 %vm174_vm1, %v2026_v35 }
  0xcc   :  { %v347_v21 = vpop.f32.mrf.mxu0  ;;  %v430_v44 = vpop.f32.mrf.mxu1 }
  0xcd   :  { %1609 = vst [vmem:[%s2858_s2] sm:$0xff] %v347_v21  ;;  %1611 = vst [vmem:[%s2858_s2 + $0x10] sm:$0xff] %v430_v44 }
  0xce   :  { %v349_v28 = vpop.f32.mrf.mxu0  ;;  %v432_v45 = vpop.f32.mrf.mxu1 }
  0xcf   :  { %1610 = vst [vmem:[%s2858_s2 + $0x8] sm:$0xff] %v349_v28  ;;  %1612 = vst [vmem:[%s2858_s2 + $0x18] sm:$0xff] %v432_v45 }
  0xd1   :  { %v353_v3 = vpop.f32.mrf.mxu0  ;;  %v436_v35 = vpop.f32.mrf.mxu1 }
  0xd2   :  { %1613 = vst [vmem:[%s2858_s2 + $0x20] sm:$0xff] %v353_v3  ;;  %1615 = vst [vmem:[%s2858_s2 + $0x30] sm:$0xff] %v436_v35 }
  0xd3   :  { %v355_v46 = vpop.f32.mrf.mxu0  ;;  %v438_v47 = vpop.f32.mrf.mxu1 }
  0xd4   :  { %1614 = vst [vmem:[%s2858_s2 + $0x28] sm:$0xff] %v355_v46  ;;  %1616 = vst [vmem:[%s2858_s2 + $0x38] sm:$0xff] %v438_v47 }
  0xd6   :  { %v359_v48 = vpop.f32.mrf.mxu0  ;;  %v442_v49 = vpop.f32.mrf.mxu1 }
  0xd7   :  { %1617 = vst [vmem:[%s2858_s2 + $0x40] sm:$0xff] %v359_v48  ;;  %1619 = vst [vmem:[%s2858_s2 + $0x50] sm:$0xff] %v442_v49 }
  0xd8   :  { %v361_v50 = vpop.f32.mrf.mxu0  ;;  %v444_v51 = vpop.f32.mrf.mxu1 }
  0xd9   :  { %1618 = vst [vmem:[%s2858_s2 + $0x48] sm:$0xff] %v361_v50  ;;  %1620 = vst [vmem:[%s2858_s2 + $0x58] sm:$0xff] %v444_v51 }
  0xdc   :  { %v513_v52 = vpop.f32.mrf.mxu0  ;;  %v596_v53 = vpop.f32.mrf.mxu1 }
  0xdd   :  { %1796 = vst [vmem:[%s2858_s2 + $0x60] sm:$0xff] %v513_v52  ;;  %1798 = vst [vmem:[%s2858_s2 + $0x70] sm:$0xff] %v596_v53 }
  0xde   :  { %v515_v54 = vpop.f32.mrf.mxu0  ;;  %v598_v55 = vpop.f32.mrf.mxu1 }
  0xdf   :  { %1797 = vst [vmem:[%s2858_s2 + $0x68] sm:$0xff] %v515_v54  ;;  %1799 = vst [vmem:[%s2858_s2 + $0x78] sm:$0xff] %v598_v55 }
  0xe1   :  { %v519_v56 = vpop.f32.mrf.mxu0  ;;  %v602_v57 = vpop.f32.mrf.mxu1 }
  0xe2   :  { %1800 = vst [vmem:[%s2858_s2 + $0x80] sm:$0xff] %v519_v56  ;;  %1802 = vst [vmem:[%s2858_s2 + $0x90] sm:$0xff] %v602_v57 }
  0xe3   :  { %v521_v58 = vpop.f32.mrf.mxu0  ;;  %v604_v59 = vpop.f32.mrf.mxu1 }
  0xe4   :  { %1801 = vst [vmem:[%s2858_s2 + $0x88] sm:$0xff] %v521_v58  ;;  %1803 = vst [vmem:[%s2858_s2 + $0x98] sm:$0xff] %v604_v59 }
  0xe6   :  { %v525_v60 = vpop.f32.mrf.mxu0  ;;  %v608_v61 = vpop.f32.mrf.mxu1 }
  0xe7   :  { %1804 = vst [vmem:[%s2858_s2 + $0xa0] sm:$0xff] %v525_v60  ;;  %1806 = vst [vmem:[%s2858_s2 + $0xb0] sm:$0xff] %v608_v61 }
  0xe8   :  { %v527_v62 = vpop.f32.mrf.mxu0  ;;  %v610_v63 = vpop.f32.mrf.mxu1 }
  0xe9   :  { %1805 = vst [vmem:[%s2858_s2 + $0xa8] sm:$0xff] %v527_v62  ;;  %1807 = vst [vmem:[%s2858_s2 + $0xb8] sm:$0xff] %v610_v63 }
  0xec   :  { %v679_v0 = vpop.f32.mrf.mxu0  ;;  %v762_v1 = vpop.f32.mrf.mxu1 }
  0xed   :  { %1808 = vst [vmem:[%s2858_s2 + $0xc0] sm:$0xff] %v679_v0  ;;  %1810 = vst [vmem:[%s2858_s2 + $0xd0] sm:$0xff] %v762_v1 }
  0xee   :  { %v681_v2 = vpop.f32.mrf.mxu0  ;;  %v764_v4 = vpop.f32.mrf.mxu1 }
  0xef   :  { %1809 = vst [vmem:[%s2858_s2 + $0xc8] sm:$0xff] %v681_v2  ;;  %1811 = vst [vmem:[%s2858_s2 + $0xd8] sm:$0xff] %v764_v4 }
  0xf1   :  { %v685_v5 = vpop.f32.mrf.mxu0  ;;  %v768_v6 = vpop.f32.mrf.mxu1 }
  0xf2   :  { %1812 = vst [vmem:[%s2858_s2 + $0xe0] sm:$0xff] %v685_v5  ;;  %1814 = vst [vmem:[%s2858_s2 + $0xf0] sm:$0xff] %v768_v6 }
  0xf3   :  { %v687_v7 = vpop.f32.mrf.mxu0  ;;  %v770_v8 = vpop.f32.mrf.mxu1 }
  0xf4   :  { %1813 = vst [vmem:[%s2858_s2 + $0xe8] sm:$0xff] %v687_v7  ;;  %1815 = vst [vmem:[%s2858_s2 + $0xf8] sm:$0xff] %v770_v8 }
  0xf6   :  { %v691_v9 = vpop.f32.mrf.mxu0  ;;  %v774_v10 = vpop.f32.mrf.mxu1 }
  0xf7   :  { %1816 = vst [vmem:[%s2858_s2 + $0x100] sm:$0xff] %v691_v9  ;;  %1818 = vst [vmem:[%s2858_s2 + $0x110] sm:$0xff] %v774_v10 }
  0xf8   :  { %v693_v11 = vpop.f32.mrf.mxu0  ;;  %v776_v12 = vpop.f32.mrf.mxu1 }
  0xf9   :  { %1817 = vst [vmem:[%s2858_s2 + $0x108] sm:$0xff] %v693_v11  ;;  %1819 = vst [vmem:[%s2858_s2 + $0x118] sm:$0xff] %v776_v12 }
  0xfc   :  { %v845_v13 = vpop.f32.mrf.mxu0  ;;  %v928_v14 = vpop.f32.mrf.mxu1 }
  0xfd   :  { %1820 = vst [vmem:[%s2858_s2 + $0x120] sm:$0xff] %v845_v13  ;;  %1822 = vst [vmem:[%s2858_s2 + $0x130] sm:$0xff] %v928_v14 }
  0xfe   :  { %v847_v15 = vpop.f32.mrf.mxu0  ;;  %v930_v16 = vpop.f32.mrf.mxu1 }
  0xff   :  { %1821 = vst [vmem:[%s2858_s2 + $0x128] sm:$0xff] %v847_v15  ;;  %1823 = vst [vmem:[%s2858_s2 + $0x138] sm:$0xff] %v930_v16 }
 0x101   :  { %v851_v17 = vpop.f32.mrf.mxu0  ;;  %v934_v18 = vpop.f32.mrf.mxu1 }
 0x102   :  { %1824 = vst [vmem:[%s2858_s2 + $0x140] sm:$0xff] %v851_v17  ;;  %1826 = vst [vmem:[%s2858_s2 + $0x150] sm:$0xff] %v934_v18 }
 0x103   :  { %v853_v19 = vpop.f32.mrf.mxu0  ;;  %v936_v20 = vpop.f32.mrf.mxu1 }
 0x104   :  { %1825 = vst [vmem:[%s2858_s2 + $0x148] sm:$0xff] %v853_v19  ;;  %1827 = vst [vmem:[%s2858_s2 + $0x158] sm:$0xff] %v936_v20 }
 0x106   :  { %v857_v22 = vpop.f32.mrf.mxu0  ;;  %v940_v23 = vpop.f32.mrf.mxu1 }
 0x107   :  { %1828 = vst [vmem:[%s2858_s2 + $0x160] sm:$0xff] %v857_v22  ;;  %1830 = vst [vmem:[%s2858_s2 + $0x170] sm:$0xff] %v940_v23 }
 0x108   :  { %v859_v24 = vpop.f32.mrf.mxu0  ;;  %v942_v25 = vpop.f32.mrf.mxu1 }
 0x109   :  { %1829 = vst [vmem:[%s2858_s2 + $0x168] sm:$0xff] %v859_v24  ;;  %1831 = vst [vmem:[%s2858_s2 + $0x178] sm:$0xff] %v942_v25 }
 0x10c   :  { %v1011_v26 = vpop.f32.mrf.mxu0  ;;  %v1094_v27 = vpop.f32.mrf.mxu1 }
 0x10d   :  { %1832 = vst [vmem:[%s2858_s2 + $0x180] sm:$0xff] %v1011_v26  ;;  %1834 = vst [vmem:[%s2858_s2 + $0x190] sm:$0xff] %v1094_v27 }
 0x10e   :  { %v1013_v29 = vpop.f32.mrf.mxu0  ;;  %v1096_v30 = vpop.f32.mrf.mxu1 }
 0x10f   :  { %1833 = vst [vmem:[%s2858_s2 + $0x188] sm:$0xff] %v1013_v29  ;;  %1835 = vst [vmem:[%s2858_s2 + $0x198] sm:$0xff] %v1096_v30 }
 0x111   :  { %v1017_v31 = vpop.f32.mrf.mxu0  ;;  %v1100_v32 = vpop.f32.mrf.mxu1 }
 0x112   :  { %1836 = vst [vmem:[%s2858_s2 + $0x1a0] sm:$0xff] %v1017_v31  ;;  %1838 = vst [vmem:[%s2858_s2 + $0x1b0] sm:$0xff] %v1100_v32 }
 0x113   :  { %v1019_v33 = vpop.f32.mrf.mxu0  ;;  %v1102_v34 = vpop.f32.mrf.mxu1 }
 0x114   :  { %1837 = vst [vmem:[%s2858_s2 + $0x1a8] sm:$0xff] %v1019_v33  ;;  %1839 = vst [vmem:[%s2858_s2 + $0x1b8] sm:$0xff] %v1102_v34 }
 0x116   :  { %v1023_v36 = vpop.f32.mrf.mxu0  ;;  %v1106_v37 = vpop.f32.mrf.mxu1 }
 0x117   :  { %1840 = vst [vmem:[%s2858_s2 + $0x1c0] sm:$0xff] %v1023_v36  ;;  %1842 = vst [vmem:[%s2858_s2 + $0x1d0] sm:$0xff] %v1106_v37 }
 0x118   :  { %v1025_v38 = vpop.f32.mrf.mxu0  ;;  %v1108_v39 = vpop.f32.mrf.mxu1 }
 0x119   :  { %1841 = vst [vmem:[%s2858_s2 + $0x1c8] sm:$0xff] %v1025_v38  ;;  %1843 = vst [vmem:[%s2858_s2 + $0x1d8] sm:$0xff] %v1108_v39 }
 0x11c   :  { %v1177_v40 = vpop.f32.mrf.mxu0  ;;  %v1260_v41 = vpop.f32.mrf.mxu1 }
 0x11d   :  { %1844 = vst [vmem:[%s2858_s2 + $0x1e0] sm:$0xff] %v1177_v40  ;;  %1846 = vst [vmem:[%s2858_s2 + $0x1f0] sm:$0xff] %v1260_v41 }
 0x11e   :  { %v1179_v42 = vpop.f32.mrf.mxu0  ;;  %v1262_v43 = vpop.f32.mrf.mxu1 }
 0x11f   :  { %1845 = vst [vmem:[%s2858_s2 + $0x1e8] sm:$0xff] %v1179_v42  ;;  %1847 = vst [vmem:[%s2858_s2 + $0x1f8] sm:$0xff] %v1262_v43 }
 0x121   :  { %v1183_v21 = vpop.f32.mrf.mxu0  ;;  %v1266_v44 = vpop.f32.mrf.mxu1 }
 0x122   :  { %1848 = vst [vmem:[%s2858_s2 + $0x200] sm:$0xff] %v1183_v21  ;;  %1850 = vst [vmem:[%s2858_s2 + $0x210] sm:$0xff] %v1266_v44 }
 0x123   :  { %v1185_v28 = vpop.f32.mrf.mxu0  ;;  %v1268_v45 = vpop.f32.mrf.mxu1 }
 0x124   :  { %1849 = vst [vmem:[%s2858_s2 + $0x208] sm:$0xff] %v1185_v28  ;;  %1851 = vst [vmem:[%s2858_s2 + $0x218] sm:$0xff] %v1268_v45 }
 0x126   :  { %v1189_v3 = vpop.f32.mrf.mxu0  ;;  %v1272_v35 = vpop.f32.mrf.mxu1 }
 0x127   :  { %1852 = vst [vmem:[%s2858_s2 + $0x220] sm:$0xff] %v1189_v3  ;;  %1854 = vst [vmem:[%s2858_s2 + $0x230] sm:$0xff] %v1272_v35 }
 0x128   :  { %v1191_v46 = vpop.f32.mrf.mxu0  ;;  %v1274_v47 = vpop.f32.mrf.mxu1 }
 0x129   :  { %1853 = vst [vmem:[%s2858_s2 + $0x228] sm:$0xff] %v1191_v46  ;;  %1855 = vst [vmem:[%s2858_s2 + $0x238] sm:$0xff] %v1274_v47 }
 0x12c   :  { %v1343_v48 = vpop.f32.mrf.mxu0  ;;  %v1426_v49 = vpop.f32.mrf.mxu1 }
 0x12d   :  { %1856 = vst [vmem:[%s2858_s2 + $0x240] sm:$0xff] %v1343_v48  ;;  %1858 = vst [vmem:[%s2858_s2 + $0x250] sm:$0xff] %v1426_v49 }
 0x12e   :  { %v1345_v50 = vpop.f32.mrf.mxu0  ;;  %v1428_v51 = vpop.f32.mrf.mxu1 }
 0x12f   :  { %1857 = vst [vmem:[%s2858_s2 + $0x248] sm:$0xff] %v1345_v50  ;;  %1859 = vst [vmem:[%s2858_s2 + $0x258] sm:$0xff] %v1428_v51 }
 0x131   :  { %v1349_v52 = vpop.f32.mrf.mxu0  ;;  %v1432_v53 = vpop.f32.mrf.mxu1 }
 0x132   :  { %1860 = vst [vmem:[%s2858_s2 + $0x260] sm:$0xff] %v1349_v52  ;;  %1862 = vst [vmem:[%s2858_s2 + $0x270] sm:$0xff] %v1432_v53 }
 0x133   :  { %v1351_v54 = vpop.f32.mrf.mxu0  ;;  %v1434_v55 = vpop.f32.mrf.mxu1 }
 0x134   :  { %1861 = vst [vmem:[%s2858_s2 + $0x268] sm:$0xff] %v1351_v54  ;;  %1863 = vst [vmem:[%s2858_s2 + $0x278] sm:$0xff] %v1434_v55 }
 0x136   :  { %v1355_v56 = vpop.f32.mrf.mxu0  ;;  %v1438_v57 = vpop.f32.mrf.mxu1 }
 0x137   :  { %1864 = vst [vmem:[%s2858_s2 + $0x280] sm:$0xff] %v1355_v56  ;;  %1866 = vst [vmem:[%s2858_s2 + $0x290] sm:$0xff] %v1438_v57 }
 0x138   :  { %v1357_v58 = vpop.f32.mrf.mxu0  ;;  %v1440_v59 = vpop.f32.mrf.mxu1 }
 0x139   :  { %1865 = vst [vmem:[%s2858_s2 + $0x288] sm:$0xff] %v1357_v58  ;;  %1867 = vst [vmem:[%s2858_s2 + $0x298] sm:$0xff] %v1440_v59 }
 0x13c   :  { %v1509_v60 = vpop.f32.mrf.mxu0  ;;  %v1592_v61 = vpop.f32.mrf.mxu1 }
 0x13d   :  { %1868 = vst [vmem:[%s2858_s2 + $0x2a0] sm:$0xff] %v1509_v60  ;;  %1870 = vst [vmem:[%s2858_s2 + $0x2b0] sm:$0xff] %v1592_v61 }
 0x13e   :  { %v1511_v62 = vpop.f32.mrf.mxu0  ;;  %v1594_v63 = vpop.f32.mrf.mxu1 }
 0x13f   :  { %1869 = vst [vmem:[%s2858_s2 + $0x2a8] sm:$0xff] %v1511_v62  ;;  %1871 = vst [vmem:[%s2858_s2 + $0x2b8] sm:$0xff] %v1594_v63 }
 0x140   :  { %v1515_v0 = vpop.f32.mrf.mxu0  ;;  %v1598_v1 = vpop.f32.mrf.mxu1 }
 0x141   :  { %1872 = vst [vmem:[%s2858_s2 + $0x2c0] sm:$0xff] %v1515_v0  ;;  %1874 = vst [vmem:[%s2858_s2 + $0x2d0] sm:$0xff] %v1598_v1 }
 0x142   :  { %v1517_v2 = vpop.f32.mrf.mxu0  ;;  %v1600_v4 = vpop.f32.mrf.mxu1 }
 0x143   :  { %1873 = vst [vmem:[%s2858_s2 + $0x2c8] sm:$0xff] %v1517_v2  ;;  %1875 = vst [vmem:[%s2858_s2 + $0x2d8] sm:$0xff] %v1600_v4 }
 0x144   :  { %v1521_v5 = vpop.f32.mrf.mxu0  ;;  %v1604_v6 = vpop.f32.mrf.mxu1 }
 0x145   :  { %1876 = vst [vmem:[%s2858_s2 + $0x2e0] sm:$0xff] %v1521_v5  ;;  %1878 = vst [vmem:[%s2858_s2 + $0x2f0] sm:$0xff] %v1604_v6 }
 0x146   :  { %v1523_v7 = vpop.f32.mrf.mxu0  ;;  %v1606_v8 = vpop.f32.mrf.mxu1 }
 0x147   :  { %1877 = vst [vmem:[%s2858_s2 + $0x2e8] sm:$0xff] %v1523_v7  ;;  %1879 = vst [vmem:[%s2858_s2 + $0x2f8] sm:$0xff] %v1606_v8 }

// kernel: convgru1_forward.3
= control target key start
LH: loop header
LB: loop body
LE: loop exit
PB: predicated region body
PF: predicated region fallthrough
CT: control target
= control target key end

     0   :  { %v5510_v0 = vmov 0.0   ;;  %s5511_s18 = smov 111   ;;  %s5512_s19 = smov 112   ;;  %v10180_v1 = vmov 0   ;;  %vm166_vm0 = vcmask 654336   ;;  %s10174_s2 = inlined_call_operand.vmem [shape: bf16[16,80], index: 2, kind: input, shape index: {}]   ;;  %s10175_s1 = inlined_call_operand.vmem [shape: f32[80,512], index: 1, kind: input, shape index: {}]   ;;  %s10176_s0 = inlined_call_operand.vmem [shape: f32[8,24,512], index: 0, kind: input, shape index: {}]   ;;  %s10177_s3 = inlined_call_operand.vmem [shape: bf16[8,80], index: 3, kind: input, shape index: {}]   ;;  %s10178_s4 = inlined_call_operand.vmem [shape: f32[8,8,512], index: 4, kind: output, shape index: {0}]   ;;  %s10179_s5 = inlined_call_operand.vmem [shape: f32[8,512], index: 5, kind: output, shape index: {1}]  }
   0x1   :  { %58 = vrot.lane.b32.xlu0 %v5510_v0, %s5511_s18  ;;  %55 = vrot.lane.b32.xlu1 %v5510_v0, %s5512_s19  ;;  %s5513_s20 = smov 113   ;;  %s5514_s21 = smov 127   ;;  %v98_v2 = vld [vmem:[%s10175_s1 + $0x128] sm:$0xff]  ;;  %v100_v3 = vld [vmem:[%s10175_s1 + $0x138] sm:$0xff] }
   0x2   :  { %s5515_s22 = smov 1   ;;  %s5516_s23 = smov 15   ;;  %202 = vmatprep.mubr.bf16.mxu0 %v10180_v1  ;;  %245 = vmatprep.mubr.bf16.mxu1 %v10180_v1  ;;  %v97_v4 = vld [vmem:[%s10175_s1 + $0x120] sm:$0xff]  ;;  %v99_v5 = vld [vmem:[%s10175_s1 + $0x130] sm:$0xff]  ;;  %v5575_v6 = vld [vmem:[%s10175_s1 + $0x108] sm:$0xff]  ;;  %v5577_v7 = vmul.f32 0.0, %v98_v2 }
   0x3   :  { %s5518_s24 = smov 16   ;;  %s5519_s25 = smov 17   ;;  %v5582_v8 = vld [vmem:[%s10175_s1 + $0x118] sm:$0xff]  ;;  %v5587_v9 = vld [vmem:[%s10175_s1 + $0x100] sm:$0xff]  ;;  %v5592_v10 = vld [vmem:[%s10175_s1 + $0x110] sm:$0xff]  ;;  %v5594_v11 = vmul.f32 0.0, %v100_v3 }
   0x4   :  { %v5596_v12 = vmul.f32 0.0, %v97_v4  ;;  %v5598_v13 = vmul.f32 0.0, %v99_v5  ;;  %v5603_v14 = vld [vmem:[%s10175_s1 + $0xe8] sm:$0xff]  ;;  %v5608_v15 = vld [vmem:[%s10175_s1 + $0xf8] sm:$0xff]  ;;  %v5613_v16 = vld [vmem:[%s10175_s1 + $0xe0] sm:$0xff] }
   0x5   :  { %52 = vrot.lane.b32.xlu0 %v5510_v0, %s5513_s20  ;;  %49 = vrot.lane.b32.xlu1 %v5510_v0, %s5514_s21  ;;  %10213 = vst [vmem:[#allocation2_spill] sm:$0xff] %v5594_v11  ;;  %10214 = vst [vmem:[#allocation3_spill] sm:$0xff] %v5603_v14  ;;  %v5618_v19 = vld [vmem:[%s10175_s1 + $0xc8] sm:$0xff]  ;;  %v5623_v20 = vld [vmem:[%s10175_s1 + $0xd8] sm:$0xff] }
   0x6   :  { %10215 = vst [vmem:[#allocation4_spill] sm:$0xff] %v5613_v16  ;;  %10216 = vst [vmem:[#allocation5_spill] sm:$0xff] %v5618_v19  ;;  %v5632_v25 = vld [vmem:[%s10175_s1 + $0xf0] sm:$0xff]  ;;  %v5637_v26 = vld [vmem:[%s10175_s1 + $0x88] sm:$0xff] }
   0x7   :  { %v5642_v27 = vld [vmem:[%s10175_s1 + $0x98] sm:$0xff]  ;;  %v5649_v30 = vld [vmem:[%s10175_s1 + $0xc0] sm:$0xff]  ;;  %v5655_v32 = vld [vmem:[%s10175_s1 + $0xd0] sm:$0xff]  ;;  %v118_v44 = vmul.f32 0.0, %v5637_v26 }
   0x8   :  { %v5660_v33 = vld [vmem:[%s10175_s1 + $0x80] sm:$0xff]  ;;  %v5669_v38 = vld [vmem:[%s10175_s1 + $0xa8] sm:$0xff]  ;;  %v5674_v39 = vld [vmem:[%s10175_s1 + $0xb8] sm:$0xff]  ;;  %v120_v45 = vmul.f32 0.0, %v5642_v27 }
   0x9   :  { %46 = vrot.lane.b32.xlu1 %v5510_v0, %s5515_s22  ;;  %43 = vrot.lane.b32.xlu0 %v5510_v0, %s5516_s23  ;;  %v5679_v40 = vld [vmem:[%s10175_s1 + $0x90] sm:$0xff]  ;;  %v5687_v46 = vld [vmem:[%s10175_s1 + $0xa0] sm:$0xff]  ;;  %v117_v50 = vmul.f32 0.0, %v5660_v33 }
   0xa   :  { %v5696_v51 = vld [vmem:[%s10175_s1 + $0xb0] sm:$0xff]  ;;  %v119_v55 = vmul.f32 0.0, %v5679_v40  ;;  %v5705_v56 = vld [vmem:[%s10175_s1 + $0x48] sm:$0xff]  ;;  %v5716_v62 = vld [vmem:[%s10175_s1 + $0x58] sm:$0xff] }
   0xb   :  { %v5710_v57 = vld [vmem:[%s10175_s1 + $0x68] sm:$0xff]  ;;  %v5721_v63 = vld [vmem:[%s10175_s1 + $0x78] sm:$0xff] }
   0xd   :  { %40 = vrot.lane.b32.xlu1 %v5510_v0, %s5518_s24  ;;  %35 = vrot.lane.b32.xlu0 %v5510_v0, %s5519_s25 }
  0x73   :  { %v59_v17 = vpop.permute.xlu0 %58  ;;  %v56_v18 = vpop.permute.xlu1 %55 }
  0x74   :  { %v134_v21 = vmul.f32 %v5575_v6, %v59_v17  ;;  %v136_v22 = vmul.f32 %v5582_v8, %v59_v17  ;;  %v133_v23 = vmul.f32 %v5587_v9, %v59_v17  ;;  %v135_v24 = vmul.f32 %v5592_v10, %v59_v17 }
  0x75   :  { %v130_v28 = vmul.f32 %v5603_v14, %v56_v18  ;;  %v132_v29 = vmul.f32 %v5608_v15, %v56_v18  ;;  %v129_v31 = vmul.f32 %v5613_v16, %v56_v18  ;;  %v131_v43 = vmul.f32 %v5632_v25, %v56_v18  ;;  %v5727_v18 = vld [vmem:[%s10175_s1 + $0x40] sm:$0xff] }
  0x76   :  { %v158_v34 = vpack.c.bf16 %v5577_v7, %v134_v21  ;;  %v160_v35 = vpack.c.bf16 %v5594_v11, %v136_v22  ;;  %v157_v36 = vpack.c.bf16 %v5596_v12, %v133_v23  ;;  %v159_v37 = vpack.c.bf16 %v5598_v13, %v135_v24  ;;  %v5732_v21 = vld [vmem:[%s10175_s1 + $0x60] sm:$0xff] }
  0x77   :  { %v53_v41 = vpop.permute.xlu0 %52  ;;  %v50_v42 = vpop.permute.xlu1 %49 }
  0x78   :  { %176 = vmatprep.subr.bf16.mxu0 %v158_v34  ;;  %219 = vmatprep.subr.bf16.mxu1 %v160_v35  ;;  %v126_v47 = vmul.f32 %v5618_v19, %v53_v41  ;;  %v128_v48 = vmul.f32 %v5623_v20, %v53_v41  ;;  %v125_v49 = vmul.f32 %v5649_v30, %v53_v41 }
  0x79   :  { %177 = vmatpush1.bf16.msra.mxu0 %v157_v36  ;;  %220 = vmatpush1.bf16.msra.mxu1 %v159_v37  ;;  %v127_v52 = vmul.f32 %v5655_v32, %v53_v41  ;;  %v122_v53 = vmul.f32 %v5669_v38, %v50_v42  ;;  %v124_v54 = vmul.f32 %v5674_v39, %v50_v42  ;;  %v5751_v36 = vld [vmem:[%s10175_s1 + $0x8] sm:$0xff]  ;;  %v5761_v41 = vld [vmem:[%s10175_s1 + $0x18] sm:$0xff] }
  0x7a   :  { %v154_v58 = vpack.c.bf16 %v130_v28, %v126_v47  ;;  %v156_v59 = vpack.c.bf16 %v132_v29, %v128_v48  ;;  %v153_v60 = vpack.c.bf16 %v129_v31, %v125_v49  ;;  %v121_v61 = vmul.f32 %v5687_v46, %v50_v42  ;;  %v5739_v28 = vld [vmem:[%s10175_s1 + $0x50] sm:$0xff]  ;;  %v5756_v37 = vld [vmem:[%s10175_s1 + $0x28] sm:$0xff]  ;;  %v5773_v47 = vld [vmem:[%s10175_s1] sm:$0xff] }
  0x7b   :  { %v155_v0 = vpack.c.bf16 %v131_v43, %v127_v52  ;;  %v47_v2 = vpop.permute.xlu1 %46  ;;  %v44_v3 = vpop.permute.xlu0 %43  ;;  %v150_v4 = vpack.c.bf16 %v122_v53, %v118_v44  ;;  %v152_v5 = vpack.c.bf16 %v124_v54, %v120_v45  ;;  %v123_v17 = vmul.f32 %v5696_v51, %v50_v42  ;;  %v5744_v29 = vld [vmem:[%s10175_s1 + $0x70] sm:$0xff]  ;;  %v5768_v45 = vld [vmem:[%s10175_s1 + $0x38] sm:$0xff]  ;;  %v5780_v54 = vld [vmem:[%s10175_s1 + $0x20] sm:$0xff] }
  0x7c   :  { %178 = vmatprep.subr.bf16.mxu0 %v154_v58  ;;  %221 = vmatprep.subr.bf16.mxu1 %v156_v59  ;;  %v149_v22 = vpack.c.bf16 %v121_v61, %v117_v50  ;;  %v110_v23 = vmul.f32 %v5705_v56, %v44_v3  ;;  %v114_v24 = vmul.f32 %v5710_v57, %v47_v2 }
  0x7d   :  { %179 = vmatpush1.bf16.msra.mxu0 %v153_v60  ;;  %222 = vmatpush1.bf16.msra.mxu1 %v155_v0  ;;  %v151_v31 = vpack.c.bf16 %v123_v17, %v119_v55  ;;  %v112_v34 = vmul.f32 %v5716_v62, %v44_v3  ;;  %v116_v35 = vmul.f32 %v5721_v63, %v47_v2  ;;  %v5785_v55 = vld [vmem:[%s10175_s1 + $0x10] sm:$0xff] }
  0x7e   :  { %180 = vmatprep.subr.bf16.mxu0 %v150_v4  ;;  %223 = vmatprep.subr.bf16.mxu1 %v152_v5  ;;  %v146_v42 = vpack.c.bf16 %v114_v24, %v110_v23  ;;  %v109_v43 = vmul.f32 %v5727_v18, %v44_v3  ;;  %v113_v44 = vmul.f32 %v5732_v21, %v47_v2  ;;  %v5793_v0 = vld [vmem:[%s10175_s1 + $0x30] sm:$0xff] }
  0x7f   :  { %v41_v48 = vpop.permute.xlu1 %40  ;;  %v36_v49 = vpop.permute.xlu0 %35  ;;  %v148_v50 = vpack.c.bf16 %v116_v35, %v112_v34  ;;  %v111_v52 = vmul.f32 %v5739_v28, %v44_v3  ;;  %v115_v53 = vmul.f32 %v5744_v29, %v47_v2 }
  0x80   :  { %v145_v58 = vpack.c.bf16 %v113_v44, %v109_v43  ;;  %v102_v59 = vmul.f32 %v5751_v36, %v36_v49  ;;  %v106_v60 = vmul.f32 %v5756_v37, %v41_v48  ;;  %v104_v61 = vmul.f32 %v5761_v41, %v36_v49 }
  0x81   :  { %181 = vmatpush1.bf16.msra.mxu0 %v149_v22  ;;  %224 = vmatpush1.bf16.msra.mxu1 %v151_v31  ;;  %v147_v2 = vpack.c.bf16 %v115_v53, %v111_v52  ;;  %v108_v3 = vmul.f32 %v5768_v45, %v41_v48  ;;  %v101_v4 = vmul.f32 %v5773_v47, %v36_v49  ;;  %v5803_v31 = vld [vmem:[%s10174_s2] sm:$0xff]  }
  0x82   :  { %182 = vmatprep.subr.bf16.mxu0 %v146_v42  ;;  %225 = vmatprep.subr.bf16.mxu1 %v148_v50  ;;  %v142_v5 = vpack.c.bf16 %v106_v60, %v102_v59  ;;  %v105_v17 = vmul.f32 %v5780_v54, %v41_v48  ;;  %v103_v23 = vmul.f32 %v5785_v55, %v36_v49  ;;  %v27_v49 = vld [vmem:[%s10176_s0 + $0x20] sm:$0xff]  ;;  %v29_v50 = vld [vmem:[%s10176_s0 + $0x30] sm:$0xff]  ;;  %v30_v59 = vld [vmem:[%s10176_s0 + $0x38] sm:$0xff] }
  0x83   :  { %v144_v24 = vpack.c.bf16 %v108_v3, %v104_v61  ;;  %v107_v34 = vmul.f32 %v5793_v0, %v41_v48  ;;  %10217 = vst [vmem:[#allocation6_spill] sm:$0xff] %v5803_v31 }
  0x84   :  { %v141_v35 = vpack.c.bf16 %v105_v17, %v101_v4 }
  0x85   :  { %183 = vmatpush1.bf16.msra.mxu0 %v145_v58  ;;  %226 = vmatpush1.bf16.msra.mxu1 %v147_v2  ;;  %v143_v22 = vpack.c.bf16 %v107_v34, %v103_v23  ;;  %v28_v58 = vld [vmem:[%s10176_s0 + $0x28] sm:$0xff] }
  0x86   :  { %184 = vmatprep.subr.bf16.mxu0 %v142_v5  ;;  %227 = vmatprep.subr.bf16.mxu1 %v144_v24 }
  0x89   :  { %185 = vmatpush1.bf16.msra.mxu0 %v141_v35  ;;  %228 = vmatpush1.bf16.msra.mxu1 %v143_v22 }
  0x8c   :  { %4824 = vmatmul.mubr.msk.bf16.vlgmr.msra.gmra.mxu0 %vm166_vm0, %v5803_v31  ;;  %4825 = vmatmul.mubr.msk.bf16.vlgmr.msra.gmra.mxu1 %vm166_vm0, %v5803_v31 }
  0x8d   :  { %495 = vmatprep.mubr.bf16.mxu0 %v10180_v1  ;;  %536 = vmatprep.mubr.bf16.mxu1 %v10180_v1 }
 0x14c   :  { %v5811_v42 = vpop.f32.mrf.mxu0  ;;  %v5813_v43 = vpop.f32.mrf.mxu1 }
 0x14e   :  { %v5815_v44 = vpop.f32.mrf.mxu0  ;;  %v5817_v48 = vpop.f32.mrf.mxu1 }
 0x14f   :  { %10218 = vst [vmem:[#allocation7_spill] sm:$0xff] %v5815_v44  ;;  %10219 = vst [vmem:[#allocation8_spill] sm:$0xff] %v5817_v48 }
 0x150   :  { %v208_v52 = vpop.f32.mrf.mxu0  ;;  %v251_v53 = vpop.f32.mrf.mxu1 }
 0x151   :  { %v209_v60 = vadd.f32 %v208_v52, %v27_v49  ;;  %v252_v61 = vadd.f32 %v251_v53, %v29_v50 }
 0x152   :  { %v210_v2 = vpop.f32.mrf.mxu0  ;;  %v253_v3 = vpop.f32.mrf.mxu1 }
 0x153   :  { %v4830_v4 = vmul.f32 -1.442695, %v209_v60  ;;  %v211_v5 = vadd.f32 %v210_v2, %v28_v58  ;;  %v254_v17 = vadd.f32 %v253_v3, %v30_v59  ;;  %v4832_v23 = vmul.f32 -1.442695, %v252_v61 }
 0x155   :  { %5043 = vpow2.f32 %v4830_v4  ;;  %v4831_v24 = vmul.f32 -1.442695, %v211_v5  ;;  %v4833_v34 = vmul.f32 -1.442695, %v254_v17 }
 0x156   :  { %5045 = vpow2.f32 %v4832_v23 }
 0x157   :  { %5047 = vpow2.f32 %v4831_v24 }
 0x158   :  { %5049 = vpow2.f32 %v4833_v34 }
 0x162   :  { %v5044_v35 = vpop.eup %5043 }
 0x163   :  { %v5046_v22 = vpop.eup %5045  ;;  %v292_v1 = vadd.f32 1.0, %v5044_v35 }
 0x164   :  { %v5048_v31 = vpop.eup %5047  ;;  %v294_v48 = vadd.f32 1.0, %v5046_v22 }
 0x165   :  { %v5050_v44 = vpop.eup %5049  ;;  %5051 = vrcp.f32 %v292_v1  ;;  %v293_v49 = vadd.f32 1.0, %v5048_v31  ;;  %v37_v31 = vlaneseq }
 0x166   :  { %5053 = vrcp.f32 %v294_v48  ;;  %v295_v50 = vadd.f32 1.0, %v5050_v44 }
 0x167   :  { %5055 = vrcp.f32 %v293_v49  ;;  %v5903_v44 = vand.u32 127, %v37_v31 }
 0x168   :  { %5057 = vrcp.f32 %v295_v50 }
 0x169   :  { %vm60_vm1 = vcmp.lt.s32.totalorder %v5903_v44, 111  ;;  %vm57_vm2 = vcmp.lt.s32.totalorder %v5903_v44, 112  ;;  %vm54_vm3 = vcmp.lt.s32.totalorder %v5903_v44, 113  ;;  %vm51_vm4 = vcmp.lt.s32.totalorder %v5903_v44, 127 }
 0x16a   :  { %vm45_vm5 = vcmp.lt.s32.totalorder %v5903_v44, 15  ;;  %vm48_vm6 = vcmp.lt.s32.totalorder %v5903_v44, 1  ;;  %vm39_vm7 = vcmp.lt.s32.totalorder %v5903_v44, 17  ;;  %vm42_vm8 = vcmp.lt.s32.totalorder %v5903_v44, 16  ;;  %v5509_v44 = vld [vmem:[%s10175_s1 + $0x10] sm:$0xff] }
 0x172   :  { %v5052_v52 = vpop.eup %5051 }
 0x173   :  { %v5054_v53 = vpop.eup %5053  ;;  %v5831_v58 = vmul.f32 0.0, %v5052_v52 }
 0x174   :  { %v5056_v59 = vpop.eup %5055  ;;  %v5837_v2 = vmul.f32 0.0, %v5054_v53 }
 0x175   :  { %v5833_v60 = vmul.f32 0.0, %v5056_v59  ;;  %392 = vrot.lane.b32.xlu0 %v5831_v58, %s5511_s18  ;;  %v5058_v61 = vpop.eup %5057 }
 0x176   :  { %v5841_v1 = vmul.f32 0.0, %v5058_v61 }
 0x177   :  { %394 = vrot.lane.b32.xlu1 %v5833_v60, %s5511_s18 }
 0x179   :  { %396 = vrot.lane.b32.xlu0 %v5837_v2, %s5511_s18 }
 0x17b   :  { %398 = vrot.lane.b32.xlu1 %v5841_v1, %s5511_s18 }
 0x17d   :  { %368 = vrot.lane.b32.xlu0 %v5831_v58, %s5513_s20 }
 0x17f   :  { %370 = vrot.lane.b32.xlu1 %v5833_v60, %s5513_s20 }
 0x181   :  { %372 = vrot.lane.b32.xlu0 %v5837_v2, %s5513_s20 }
 0x183   :  { %374 = vrot.lane.b32.xlu1 %v5841_v1, %s5513_s20 }
 0x185   :  { %380 = vrot.lane.b32.xlu0 %v5831_v58, %s5512_s19 }
 0x187   :  { %382 = vrot.lane.b32.xlu1 %v5833_v60, %s5512_s19 }
 0x189   :  { %384 = vrot.lane.b32.xlu0 %v5837_v2, %s5512_s19 }
 0x18b   :  { %386 = vrot.lane.b32.xlu1 %v5841_v1, %s5512_s19 }
 0x18d   :  { %356 = vrot.lane.b32.xlu0 %v5831_v58, %s5514_s21 }
 0x18f   :  { %358 = vrot.lane.b32.xlu1 %v5833_v60, %s5514_s21 }
 0x191   :  { %360 = vrot.lane.b32.xlu0 %v5837_v2, %s5514_s21 }
 0x193   :  { %362 = vrot.lane.b32.xlu1 %v5841_v1, %s5514_s21 }
 0x195   :  { %332 = vrot.lane.b32.xlu0 %v5831_v58, %s5516_s23 }
 0x197   :  { %334 = vrot.lane.b32.xlu1 %v5833_v60, %s5516_s23 }
 0x199   :  { %336 = vrot.lane.b32.xlu0 %v5837_v2, %s5516_s23 }
 0x19b   :  { %338 = vrot.lane.b32.xlu1 %v5841_v1, %s5516_s23 }
 0x19d   :  { %344 = vrot.lane.b32.xlu0 %v5831_v58, %s5515_s22 }
 0x19f   :  { %346 = vrot.lane.b32.xlu1 %v5833_v60, %s5515_s22 }
 0x1a1   :  { %348 = vrot.lane.b32.xlu0 %v5837_v2, %s5515_s22 }
 0x1a3   :  { %350 = vrot.lane.b32.xlu1 %v5841_v1, %s5515_s22 }
 0x1a5   :  { %308 = vrot.lane.b32.xlu0 %v5831_v58, %s5519_s25 }
 0x1a7   :  { %310 = vrot.lane.b32.xlu1 %v5833_v60, %s5519_s25 }
 0x1a9   :  { %312 = vrot.lane.b32.xlu0 %v5837_v2, %s5519_s25 }
 0x1ab   :  { %314 = vrot.lane.b32.xlu1 %v5841_v1, %s5519_s25 }
 0x1ad   :  { %320 = vrot.lane.b32.xlu0 %v5831_v58, %s5518_s24 }
 0x1af   :  { %322 = vrot.lane.b32.xlu1 %v5833_v60, %s5518_s24 }
 0x1b1   :  { %324 = vrot.lane.b32.xlu0 %v5837_v2, %s5518_s24 }
 0x1b3   :  { %326 = vrot.lane.b32.xlu1 %v5841_v1, %s5518_s24 }
 0x1e7   :  { %v393_v48 = vpop.permute.xlu0 %392 }
 0x1e9   :  { %v395_v3 = vpop.permute.xlu1 %394 }
 0x1ea   :  { %v402_v4 = vsel %vm60_vm1, %v393_v48, %v395_v3 }
 0x1eb   :  { %v397_v5 = vpop.permute.xlu0 %396  ;;  %v436_v17 = vmul.f32 %v402_v4, %v5587_v9 }
 0x1ec   :  { %v401_v23 = vsel %vm60_vm1, %v395_v3, %v397_v5 }
 0x1ed   :  { %v437_v24 = vmul.f32 %v401_v23, %v5575_v6  ;;  %v399_v34 = vpop.permute.xlu1 %398  ;;  %v456_v59 = vpack.c.bf16 %v5596_v12, %v436_v17 }
 0x1ee   :  { %v400_v35 = vsel %vm60_vm1, %v397_v5, %v399_v34  ;;  %v403_v22 = vsel %vm60_vm1, %v399_v34, %v393_v48 }
 0x1ef   :  { %v438_v49 = vmul.f32 %v400_v35, %v5592_v10  ;;  %v439_v50 = vmul.f32 %v403_v22, %v5582_v8  ;;  %v369_v52 = vpop.permute.xlu0 %368  ;;  %v457_v53 = vpack.c.bf16 %v5577_v7, %v437_v24 }
 0x1f1   :  { %v458_v61 = vpack.c.bf16 %v5598_v13, %v438_v49  ;;  %v371_v31 = vpop.permute.xlu1 %370  ;;  %469 = vmatprep.subr.bf16.mxu0 %v457_v53  ;;  %v459_v3 = vpack.c.bf16 %v5594_v11, %v439_v50 }
 0x1f2   :  { %470 = vmatpush1.bf16.msra.mxu0 %v456_v59  ;;  %v378_v34 = vsel %vm54_vm3, %v369_v52, %v371_v31 }
 0x1f3   :  { %510 = vmatprep.subr.bf16.mxu1 %v459_v3  ;;  %v373_v4 = vpop.permute.xlu0 %372 }
 0x1f4   :  { %511 = vmatpush1.bf16.msra.mxu1 %v458_v61  ;;  %v377_v17 = vsel %vm54_vm3, %v371_v31, %v373_v4  ;;  %v428_v31 = vmul.f32 %v378_v34, %v5649_v30 }
 0x1f5   :  { %v375_v48 = vpop.permute.xlu1 %374  ;;  %v429_v59 = vmul.f32 %v377_v17, %v5618_v19 }
 0x1f6   :  { %v376_v35 = vsel %vm54_vm3, %v373_v4, %v375_v48  ;;  %v379_v49 = vsel %vm54_vm3, %v375_v48, %v369_v52 }
 0x1f7   :  { %v381_v5 = vpop.permute.xlu0 %380  ;;  %v430_v4 = vmul.f32 %v376_v35, %v5655_v32  ;;  %v431_v48 = vmul.f32 %v379_v49, %v5623_v20 }
 0x1f9   :  { %v383_v23 = vpop.permute.xlu1 %382 }
 0x1fa   :  { %v390_v24 = vsel %vm57_vm2, %v381_v5, %v383_v23 }
 0x1fb   :  { %v385_v22 = vpop.permute.xlu0 %384  ;;  %v432_v50 = vmul.f32 %v390_v24, %v5613_v16 }
 0x1fc   :  { %v389_v53 = vsel %vm57_vm2, %v383_v23, %v385_v22 }
 0x1fd   :  { %v433_v61 = vmul.f32 %v389_v53, %v5603_v14  ;;  %v387_v3 = vpop.permute.xlu1 %386  ;;  %v452_v14 = vpack.c.bf16 %v432_v50, %v428_v31  ;;  %v421_v50 = vmul.f32 %v5833_v60, %v5637_v26  ;;  %v423_v26 = vmul.f32 %v5841_v1, %v5642_v27 }
 0x1fe   :  { %v388_v11 = vsel %vm57_vm2, %v385_v22, %v387_v3  ;;  %v391_v52 = vsel %vm57_vm2, %v387_v3, %v381_v5 }
 0x1ff   :  { %v434_v23 = vmul.f32 %v388_v11, %v5632_v25  ;;  %v435_v17 = vmul.f32 %v391_v52, %v5608_v15  ;;  %v357_v24 = vpop.permute.xlu0 %356  ;;  %v453_v53 = vpack.c.bf16 %v433_v61, %v429_v59  ;;  %v420_v61 = vmul.f32 %v5831_v58, %v5660_v33 }
 0x201   :  { %v454_v19 = vpack.c.bf16 %v434_v23, %v430_v4  ;;  %v359_v16 = vpop.permute.xlu1 %358  ;;  %471 = vmatprep.subr.bf16.mxu0 %v453_v53  ;;  %v455_v34 = vpack.c.bf16 %v435_v17, %v431_v48 }
 0x202   :  { %v366_v35 = vsel %vm51_vm4, %v357_v24, %v359_v16  ;;  %472 = vmatpush1.bf16.msra.mxu0 %v452_v14  ;;  %v422_v14 = vmul.f32 %v5837_v2, %v5679_v40 }
 0x203   :  { %512 = vmatprep.subr.bf16.mxu1 %v455_v34  ;;  %v361_v22 = vpop.permute.xlu0 %360  ;;  %v424_v5 = vmul.f32 %v366_v35, %v5687_v46 }
 0x204   :  { %v365_v11 = vsel %vm51_vm4, %v359_v16, %v361_v22  ;;  %513 = vmatpush1.bf16.msra.mxu1 %v454_v19 }
 0x205   :  { %v425_v49 = vmul.f32 %v365_v11, %v5669_v38  ;;  %v363_v59 = vpop.permute.xlu1 %362  ;;  %v448_v60 = vpack.c.bf16 %v424_v5, %v420_v61 }
 0x206   :  { %v364_v3 = vsel %vm51_vm4, %v361_v22, %v363_v59  ;;  %v367_v31 = vsel %vm51_vm4, %v363_v59, %v357_v24 }
 0x207   :  { %v426_v16 = vmul.f32 %v364_v3, %v5696_v51  ;;  %v427_v19 = vmul.f32 %v367_v31, %v5674_v39  ;;  %v333_v4 = vpop.permute.xlu0 %332  ;;  %v449_v52 = vpack.c.bf16 %v425_v49, %v421_v50 }
 0x209   :  { %v450_v58 = vpack.c.bf16 %v426_v16, %v422_v14  ;;  %v335_v48 = vpop.permute.xlu1 %334  ;;  %473 = vmatprep.subr.bf16.mxu0 %v449_v52  ;;  %v451_v2 = vpack.c.bf16 %v427_v19, %v423_v26 }
 0x20a   :  { %474 = vmatpush1.bf16.msra.mxu0 %v448_v60  ;;  %v342_v53 = vsel %vm45_vm5, %v333_v4, %v335_v48 }
 0x20b   :  { %514 = vmatprep.subr.bf16.mxu1 %v451_v2  ;;  %v337_v23 = vpop.permute.xlu0 %336  ;;  %v413_v1 = vmul.f32 %v342_v53, %v5705_v56 }
 0x20c   :  { %515 = vmatpush1.bf16.msra.mxu1 %v450_v58  ;;  %v341_v59 = vsel %vm45_vm5, %v335_v48, %v337_v23 }
 0x20d   :  { %v339_v17 = vpop.permute.xlu1 %338  ;;  %v414_v60 = vmul.f32 %v341_v59, %v5739_v28 }
 0x20e   :  { %v340_v5 = vsel %vm45_vm5, %v337_v23, %v339_v17  ;;  %v343_v11 = vsel %vm45_vm5, %v339_v17, %v333_v4 }
 0x20f   :  { %v345_v24 = vpop.permute.xlu0 %344  ;;  %v412_v16 = vmul.f32 %v343_v11, %v5727_v18  ;;  %v415_v19 = vmul.f32 %v340_v5, %v5716_v62 }
 0x211   :  { %v347_v34 = vpop.permute.xlu1 %346 }
 0x212   :  { %v354_v27 = vsel %vm48_vm6, %v345_v24, %v347_v34 }
 0x213   :  { %v417_v35 = vmul.f32 %v354_v27, %v5710_v57  ;;  %v349_v22 = vpop.permute.xlu0 %348 }
 0x214   :  { %v353_v49 = vsel %vm48_vm6, %v347_v34, %v349_v22 }
 0x215   :  { %v351_v50 = vpop.permute.xlu1 %350  ;;  %v445_v61 = vpack.c.bf16 %v417_v35, %v413_v1  ;;  %v418_v14 = vmul.f32 %v353_v49, %v5744_v29 }
 0x216   :  { %v352_v3 = vsel %vm48_vm6, %v349_v22, %v351_v50  ;;  %v355_v31 = vsel %vm48_vm6, %v351_v50, %v345_v24 }
 0x217   :  { %v416_v4 = vmul.f32 %v355_v31, %v5732_v21  ;;  %v419_v52 = vmul.f32 %v352_v3, %v5721_v63  ;;  %v309_v26 = vpop.permute.xlu0 %308  ;;  %475 = vmatprep.subr.bf16.mxu0 %v445_v61  ;;  %v446_v23 = vpack.c.bf16 %v418_v14, %v414_v60 }
 0x219   :  { %v444_v58 = vpack.c.bf16 %v416_v4, %v412_v16  ;;  %v311_v48 = vpop.permute.xlu1 %310  ;;  %v447_v2 = vpack.c.bf16 %v419_v52, %v415_v19 }
 0x21a   :  { %v318_v34 = vsel %vm39_vm7, %v309_v26, %v311_v48 }
 0x21b   :  { %516 = vmatprep.subr.bf16.mxu1 %v447_v2  ;;  %v313_v17 = vpop.permute.xlu0 %312  ;;  %476 = vmatpush1.bf16.msra.mxu0 %v444_v58  ;;  %v405_v35 = vmul.f32 %v318_v34, %v5751_v36  ;;  %v6024_v2 = vld [vmem:[%s10177_s3] sm:$0xf] }
 0x21c   :  { %517 = vmatpush1.bf16.msra.mxu1 %v446_v23  ;;  %v317_v50 = vsel %vm39_vm7, %v311_v48, %v313_v17 }
 0x21d   :  { %v315_v24 = vpop.permute.xlu1 %314 }
 0x21e   :  { %v316_v11 = vsel %vm39_vm7, %v313_v17, %v315_v24  ;;  %v319_v49 = vsel %vm39_vm7, %v315_v24, %v309_v26  ;;  %v406_v26 = vmul.f32 %v317_v50, %v5785_v55  ;;  %v26_v17 = vld [vmem:[%s10176_s0 + $0x18] sm:$0xff] }
 0x21f   :  { %v321_v53 = vpop.permute.xlu0 %320  ;;  %v404_v16 = vmul.f32 %v319_v49, %v5773_v47  ;;  %v407_v19 = vmul.f32 %v316_v11, %v5761_v41  ;;  %v10220_v41 = vmov 0   ;;  %v25_v47 = vld [vmem:[%s10176_s0 + $0x10] sm:$0xff] }
 0x220   :  { %v248_v24 = vadd.f32 %v5813_v43, %v25_v47 }
 0x221   :  { %v323_v27 = vpop.permute.xlu1 %322 }
 0x222   :  { %v330_v1 = vsel %vm42_vm8, %v321_v53, %v323_v27 }
 0x223   :  { %v409_v22 = vmul.f32 %v330_v1, %v5756_v37  ;;  %v325_v5 = vpop.permute.xlu0 %324 }
 0x224   :  { %v329_v59 = vsel %vm42_vm8, %v323_v27, %v325_v5  ;;  %v10222_v27 = vld [vmem:[#allocation8_spill] sm:$0xff] }
 0x225   :  { %v327_v61 = vpop.permute.xlu1 %326  ;;  %v441_v14 = vpack.c.bf16 %v409_v22, %v405_v35  ;;  %v410_v3 = vmul.f32 %v329_v59, %v5793_v0  ;;  %v250_v1 = vadd.f32 %v10222_v27, %v26_v17  ;;  %v4828_v22 = vmul.f32 -1.442695, %v248_v24 }
 0x226   :  { %v328_v37 = vsel %vm42_vm8, %v325_v5, %v327_v61  ;;  %v331_v31 = vsel %vm42_vm8, %v327_v61, %v321_v53  ;;  %v10221_v53 = vld [vmem:[#allocation7_spill] sm:$0xff] }
 0x227   :  { %v408_v4 = vmul.f32 %v331_v31, %v5780_v54  ;;  %v411_v52 = vmul.f32 %v328_v37, %v5768_v45  ;;  %477 = vmatprep.subr.bf16.mxu0 %v441_v14  ;;  %v442_v48 = vpack.c.bf16 %v410_v3, %v406_v26  ;;  %v23_v45 = vld [vmem:[%s10176_s0] sm:$0xff]  ;;  %v24_v54 = vld [vmem:[%s10176_s0 + $0x8] sm:$0xff]  ;;  %v4829_v11 = vmul.f32 -1.442695, %v250_v1  ;;  %v33_v31 = vld [vmem:[%s10176_s0 + $0x50] sm:$0xff] }
 0x228   :  { %v205_v23 = vadd.f32 %v5811_v42, %v23_v45  ;;  %v207_v34 = vadd.f32 %v10221_v53, %v24_v54  ;;  %v31_v37 = vld [vmem:[%s10176_s0 + $0x40] sm:$0xff]  ;;  %v34_v26 = vld [vmem:[%s10176_s0 + $0x58] sm:$0xff] }
 0x229   :  { %v440_v60 = vpack.c.bf16 %v408_v4, %v404_v16  ;;  %v443_v58 = vpack.c.bf16 %v411_v52, %v407_v19  ;;  %v32_v19 = vld [vmem:[%s10176_s0 + $0x48] sm:$0xff] }
 0x22a   :  { %v4826_v35 = vmul.f32 -1.442695, %v205_v23  ;;  %v4827_v5 = vmul.f32 -1.442695, %v207_v34 }
 0x22b   :  { %478 = vmatpush1.bf16.msra.mxu0 %v440_v60  ;;  %518 = vmatprep.subr.bf16.mxu1 %v443_v58 }
 0x22c   :  { %519 = vmatpush1.bf16.msra.mxu1 %v442_v48  ;;  %5059 = vpow2.f32 %v4826_v35 }
 0x22d   :  { %5061 = vpow2.f32 %v4828_v22 }
 0x22e   :  { %4834 = vmatmul.mubr.msk.bf16.vlgmr.msra.gmra.mxu0 %vm166_vm0, %v6024_v2  ;;  %5063 = vpow2.f32 %v4827_v5 }
 0x22f   :  { %4835 = vmatmul.mubr.msk.bf16.vlgmr.msra.gmra.mxu1 %vm166_vm0, %v6024_v2  ;;  %810 = vmatprep.mubr.bf16.mxu0 %v10220_v41  ;;  %5065 = vpow2.f32 %v4829_v11 }
 0x230   :  { %853 = vmatprep.mubr.bf16.mxu1 %v10220_v41 }
 0x239   :  { %v5060_v49 = vpop.eup %5059 }
 0x23a   :  { %v5062_v42 = vpop.eup %5061  ;;  %v268_v61 = vadd.f32 1.0, %v5060_v49 }
 0x23b   :  { %v5064_v59 = vpop.eup %5063  ;;  %v270_v14 = vadd.f32 1.0, %v5062_v42 }
 0x23c   :  { %v5066_v50 = vpop.eup %5065  ;;  %v269_v3 = vadd.f32 1.0, %v5064_v59  ;;  %5067 = vrcp.f32 %v268_v61 }
 0x23d   :  { %v271_v43 = vadd.f32 1.0, %v5066_v50  ;;  %5069 = vrcp.f32 %v270_v14 }
 0x23e   :  { %5071 = vrcp.f32 %v269_v3 }
 0x23f   :  { %5073 = vrcp.f32 %v271_v43 }
 0x249   :  { %v5068_v53 = vpop.eup %5067 }
 0x24a   :  { %v5070_v34 = vpop.eup %5069  ;;  %v549_v35 = vsub.f32 1.0, %v5068_v53 }
 0x24b   :  { %v5072_v27 = vpop.eup %5071  ;;  %v551_v22 = vsub.f32 1.0, %v5070_v34 }
 0x24c   :  { %v5074_v1 = vpop.eup %5073  ;;  %v550_v5 = vsub.f32 1.0, %v5072_v27  ;;  %v553_v59 = vmul.f32 0.0, %v549_v35 }
 0x24d   :  { %v552_v49 = vsub.f32 1.0, %v5074_v1  ;;  %v555_v14 = vmul.f32 0.0, %v551_v22 }
 0x2ee   :  { %v497_v16 = vpop.f32.mrf.mxu0 }
 0x2ef   :  { %v498_v4 = vadd.f32 %v497_v16, %v31_v37  ;;  %v538_v52 = vpop.f32.mrf.mxu1 }
 0x2f0   :  { %v539_v60 = vadd.f32 %v538_v52, %v33_v31  ;;  %v499_v58 = vpop.f32.mrf.mxu0  ;;  %v554_v31 = vmul.f32 0.0, %v550_v5 }
 0x2f1   :  { %5075 = vtanh.f32 %v498_v4  ;;  %v500_v48 = vadd.f32 %v499_v58, %v32_v19  ;;  %v540_v45 = vpop.f32.mrf.mxu1  ;;  %v556_v4 = vmul.f32 0.0, %v552_v49 }
 0x2f2   :  { %5077 = vtanh.f32 %v539_v60  ;;  %v541_v47 = vadd.f32 %v540_v45, %v34_v26  ;;  %v501_v54 = vpop.f32.mrf.mxu0 }
 0x2f3   :  { %5079 = vtanh.f32 %v500_v48  ;;  %v542_v23 = vpop.f32.mrf.mxu1 }
 0x2f4   :  { %5081 = vtanh.f32 %v541_v47  ;;  %v502_v17 = vpop.f32.mrf.mxu0 }
 0x2f5   :  { %v543_v24 = vpop.f32.mrf.mxu1 }
 0x2fe   :  { %v5076_v11 = vpop.eup %5075 }
 0x2ff   :  { %v5078_v42 = vpop.eup %5077  ;;  %v557_v50 = vmul.f32 %v5076_v11, %v5068_v53 }
 0x300   :  { %v5080_v61 = vpop.eup %5079  ;;  %v559_v3 = vmul.f32 %v5078_v42, %v5070_v34 }
 0x301   :  { %v5082_v43 = vpop.eup %5081  ;;  %v6060_v37 = vadd.f32 %v557_v50, %v553_v59  ;;  %v558_v16 = vmul.f32 %v5080_v61, %v5072_v27 }
 0x302   :  { %v6062_v19 = vadd.f32 %v559_v3, %v555_v14  ;;  %v560_v52 = vmul.f32 %v5082_v43, %v5074_v1 }
 0x303   :  { %565 = vst [vmem:[%s10178_s4] sm:$0xff] %v6060_v37  ;;  %v6068_v26 = vadd.f32 %v558_v16, %v554_v31  ;;  %666 = vrot.lane.b32.xlu0 %v6060_v37, %s5511_s18  ;;  %v10224_v16 = vld [vmem:[#allocation4_spill] sm:$0xff] }
 0x304   :  { %567 = vst [vmem:[%s10178_s4 + $0x10] sm:$0xff] %v6062_v19  ;;  %v6076_v60 = vadd.f32 %v560_v52, %v556_v4 }
 0x305   :  { %566 = vst [vmem:[%s10178_s4 + $0x8] sm:$0xff] %v6068_v26  ;;  %668 = vrot.lane.b32.xlu1 %v6068_v26, %s5511_s18 }
 0x306   :  { %568 = vst [vmem:[%s10178_s4 + $0x18] sm:$0xff] %v6076_v60 }
 0x307   :  { %670 = vrot.lane.b32.xlu0 %v6062_v19, %s5511_s18 }
 0x309   :  { %672 = vrot.lane.b32.xlu1 %v6076_v60, %s5511_s18 }
 0x30b   :  { %642 = vrot.lane.b32.xlu0 %v6060_v37, %s5513_s20 }
 0x30d   :  { %644 = vrot.lane.b32.xlu1 %v6068_v26, %s5513_s20 }
 0x30f   :  { %646 = vrot.lane.b32.xlu0 %v6062_v19, %s5513_s20 }
 0x311   :  { %648 = vrot.lane.b32.xlu1 %v6076_v60, %s5513_s20 }
 0x313   :  { %654 = vrot.lane.b32.xlu0 %v6060_v37, %s5512_s19 }
 0x315   :  { %656 = vrot.lane.b32.xlu1 %v6068_v26, %s5512_s19 }
 0x317   :  { %658 = vrot.lane.b32.xlu0 %v6062_v19, %s5512_s19 }
 0x319   :  { %660 = vrot.lane.b32.xlu1 %v6076_v60, %s5512_s19 }
 0x31b   :  { %630 = vrot.lane.b32.xlu0 %v6060_v37, %s5514_s21 }
 0x31d   :  { %632 = vrot.lane.b32.xlu1 %v6068_v26, %s5514_s21 }
 0x31f   :  { %634 = vrot.lane.b32.xlu0 %v6062_v19, %s5514_s21 }
 0x321   :  { %636 = vrot.lane.b32.xlu1 %v6076_v60, %s5514_s21 }
 0x323   :  { %606 = vrot.lane.b32.xlu0 %v6060_v37, %s5516_s23 }
 0x325   :  { %608 = vrot.lane.b32.xlu1 %v6068_v26, %s5516_s23 }
 0x327   :  { %610 = vrot.lane.b32.xlu0 %v6062_v19, %s5516_s23 }
 0x329   :  { %612 = vrot.lane.b32.xlu1 %v6076_v60, %s5516_s23 }
 0x32b   :  { %618 = vrot.lane.b32.xlu0 %v6060_v37, %s5515_s22 }
 0x32d   :  { %620 = vrot.lane.b32.xlu1 %v6068_v26, %s5515_s22 }
 0x32f   :  { %622 = vrot.lane.b32.xlu0 %v6062_v19, %s5515_s22 }
 0x331   :  { %624 = vrot.lane.b32.xlu1 %v6076_v60, %s5515_s22 }
 0x333   :  { %582 = vrot.lane.b32.xlu0 %v6060_v37, %s5519_s25 }
 0x335   :  { %584 = vrot.lane.b32.xlu1 %v6068_v26, %s5519_s25 }
 0x337   :  { %586 = vrot.lane.b32.xlu0 %v6062_v19, %s5519_s25 }
 0x339   :  { %588 = vrot.lane.b32.xlu1 %v6076_v60, %s5519_s25 }
 0x33b   :  { %594 = vrot.lane.b32.xlu0 %v6060_v37, %s5518_s24 }
 0x33d   :  { %596 = vrot.lane.b32.xlu1 %v6068_v26, %s5518_s24 }
 0x33f   :  { %598 = vrot.lane.b32.xlu0 %v6062_v19, %s5518_s24 }
 0x341   :  { %600 = vrot.lane.b32.xlu1 %v6076_v60, %s5518_s24 }
 0x375   :  { %v667_v58 = vpop.permute.xlu0 %666 }
 0x377   :  { %v669_v48 = vpop.permute.xlu1 %668 }
 0x378   :  { %v676_v45 = vsel %vm60_vm1, %v667_v58, %v669_v48 }
 0x379   :  { %v671_v47 = vpop.permute.xlu0 %670  ;;  %v750_v54 = vmul.f32 %v676_v45, %v5587_v9  ;;  %v10226_v45 = vld [vmem:[#allocation3_spill] sm:$0xff] }
 0x37a   :  { %v675_v23 = vsel %vm60_vm1, %v669_v48, %v671_v47 }
 0x37b   :  { %v751_v17 = vmul.f32 %v675_v23, %v5575_v6  ;;  %v673_v24 = vpop.permute.xlu1 %672  ;;  %v774_v9 = vpack.c.bf16 %v5596_v12, %v750_v54  ;;  %v10223_v6 = vld [vmem:[#allocation2_spill] sm:$0xff] }
 0x37c   :  { %v674_v53 = vsel %vm60_vm1, %v671_v47, %v673_v24  ;;  %v677_v34 = vsel %vm60_vm1, %v673_v24, %v667_v58  ;;  %v10225_v58 = vld [vmem:[#allocation5_spill] sm:$0xff] }
 0x37d   :  { %v752_v27 = vmul.f32 %v674_v53, %v5592_v10  ;;  %v753_v1 = vmul.f32 %v677_v34, %v5582_v8  ;;  %v643_v35 = vpop.permute.xlu0 %642  ;;  %v775_v22 = vpack.c.bf16 %v5577_v7, %v751_v17 }
 0x37f   :  { %v776_v5 = vpack.c.bf16 %v5598_v13, %v752_v27  ;;  %v645_v11 = vpop.permute.xlu1 %644  ;;  %784 = vmatprep.subr.bf16.mxu0 %v775_v22  ;;  %v777_v49 = vpack.c.bf16 %v10223_v6, %v753_v1 }
 0x380   :  { %785 = vmatpush1.bf16.msra.mxu0 %v774_v9  ;;  %v652_v14 = vsel %vm54_vm3, %v643_v35, %v645_v11 }
 0x381   :  { %827 = vmatprep.subr.bf16.mxu1 %v777_v49  ;;  %v647_v42 = vpop.permute.xlu0 %646  ;;  %v742_v23 = vmul.f32 %v652_v14, %v5649_v30 }
 0x382   :  { %828 = vmatpush1.bf16.msra.mxu1 %v776_v5  ;;  %v651_v8 = vsel %vm54_vm3, %v645_v11, %v647_v42 }
 0x383   :  { %v649_v59 = vpop.permute.xlu1 %648  ;;  %v743_v48 = vmul.f32 %v651_v8, %v10225_v58 }
 0x384   :  { %v650_v3 = vsel %vm54_vm3, %v647_v42, %v649_v59  ;;  %v653_v31 = vsel %vm54_vm3, %v649_v59, %v643_v35  ;;  %v6197_v59 = vld [vmem:[%s10175_s1 + $0x88] sm:$0xff] }
 0x385   :  { %v655_v50 = vpop.permute.xlu0 %654  ;;  %v744_v17 = vmul.f32 %v650_v3, %v5655_v32  ;;  %v745_v34 = vmul.f32 %v653_v31, %v5623_v20  ;;  %v6214_v31 = vld [vmem:[%s10175_s1 + $0x98] sm:$0xff] }
 0x387   :  { %v657_v10 = vpop.permute.xlu1 %656 }
 0x388   :  { %v664_v61 = vsel %vm57_vm2, %v655_v50, %v657_v10 }
 0x389   :  { %v659_v43 = vpop.permute.xlu0 %658  ;;  %v746_v4 = vmul.f32 %v664_v61, %v10224_v16 }
 0x38a   :  { %v663_v52 = vsel %vm57_vm2, %v657_v10, %v659_v43  ;;  %v734_v10 = vmul.f32 %v6060_v37, %v5660_v33  ;;  %v737_v33 = vmul.f32 %v6214_v31, %v6076_v60 }
 0x38b   :  { %v747_v47 = vmul.f32 %v663_v52, %v10226_v45  ;;  %v661_v54 = vpop.permute.xlu1 %660  ;;  %v770_v9 = vpack.c.bf16 %v746_v4, %v742_v23 }
 0x38c   :  { %v662_v24 = vsel %vm57_vm2, %v659_v43, %v661_v54  ;;  %v665_v53 = vsel %vm57_vm2, %v661_v54, %v655_v50  ;;  %v735_v50 = vmul.f32 %v6197_v59, %v6068_v26 }
 0x38d   :  { %v748_v27 = vmul.f32 %v662_v24, %v5632_v25  ;;  %v749_v1 = vmul.f32 %v665_v53, %v5608_v15  ;;  %v631_v35 = vpop.permute.xlu0 %630  ;;  %v771_v22 = vpack.c.bf16 %v747_v47, %v743_v48 }
 0x38f   :  { %v772_v5 = vpack.c.bf16 %v748_v27, %v744_v17  ;;  %v633_v11 = vpop.permute.xlu1 %632  ;;  %786 = vmatprep.subr.bf16.mxu0 %v771_v22  ;;  %v773_v30 = vpack.c.bf16 %v749_v1, %v745_v34 }
 0x390   :  { %v640_v32 = vsel %vm51_vm4, %v631_v35, %v633_v11  ;;  %787 = vmatpush1.bf16.msra.mxu0 %v770_v9 }
 0x391   :  { %829 = vmatprep.subr.bf16.mxu1 %v773_v30  ;;  %v635_v49 = vpop.permute.xlu0 %634  ;;  %v738_v42 = vmul.f32 %v640_v32, %v5687_v46  ;;  %v736_v46 = vmul.f32 %v6062_v19, %v5679_v40 }
 0x392   :  { %v639_v20 = vsel %vm51_vm4, %v633_v11, %v635_v49  ;;  %830 = vmatpush1.bf16.msra.mxu1 %v772_v5 }
 0x393   :  { %v739_v15 = vmul.f32 %v639_v20, %v5669_v38  ;;  %v637_v25 = vpop.permute.xlu1 %636  ;;  %v766_v40 = vpack.c.bf16 %v738_v42, %v734_v10 }
 0x394   :  { %v638_v8 = vsel %vm51_vm4, %v635_v49, %v637_v25  ;;  %v641_v38 = vsel %vm51_vm4, %v637_v25, %v631_v35 }
 0x395   :  { %v740_v61 = vmul.f32 %v638_v8, %v5696_v51  ;;  %v741_v14 = vmul.f32 %v641_v38, %v5674_v39  ;;  %v607_v3 = vpop.permute.xlu0 %606  ;;  %v767_v43 = vpack.c.bf16 %v739_v15, %v735_v50 }
 0x397   :  { %v768_v16 = vpack.c.bf16 %v740_v61, %v736_v46  ;;  %v609_v4 = vpop.permute.xlu1 %608  ;;  %788 = vmatprep.subr.bf16.mxu0 %v767_v43  ;;  %v769_v52 = vpack.c.bf16 %v741_v14, %v737_v33 }
 0x398   :  { %789 = vmatpush1.bf16.msra.mxu0 %v766_v40  ;;  %v616_v48 = vsel %vm45_vm5, %v607_v3, %v609_v4 }
 0x399   :  { %831 = vmatprep.subr.bf16.mxu1 %v769_v52  ;;  %v611_v51 = vpop.permute.xlu0 %610  ;;  %v727_v54 = vmul.f32 %v616_v48, %v5705_v56 }
 0x39a   :  { %832 = vmatpush1.bf16.msra.mxu1 %v768_v16  ;;  %v615_v27 = vsel %vm45_vm5, %v609_v4, %v611_v51 }
 0x39b   :  { %v613_v39 = vpop.permute.xlu1 %612  ;;  %v728_v49 = vmul.f32 %v615_v27, %v5739_v28  ;;  %v4840_v27 = vld [vmem:[%s10176_s0 + $0x80] sm:$0xff] }
 0x39c   :  { %v614_v24 = vsel %vm45_vm5, %v611_v51, %v613_v39  ;;  %v617_v53 = vsel %vm45_vm5, %v613_v39, %v607_v3  ;;  %v6262_v3 = vld [vmem:[%s10175_s1 + $0x20] sm:$0xff] }
 0x39d   :  { %v619_v58 = vpop.permute.xlu0 %618  ;;  %v726_v9 = vmul.f32 %v617_v53, %v5727_v18  ;;  %v729_v5 = vmul.f32 %v614_v24, %v5716_v62  ;;  %v6279_v51 = vld [vmem:[%s10175_s1] sm:$0xff] }
 0x39e   :  { %v10227_v24 = vld [vmem:[#allocation6_spill] sm:$0xff] }
 0x39f   :  { %v621_v45 = vpop.permute.xlu1 %620 }
 0x3a0   :  { %v628_v47 = vsel %vm48_vm6, %v619_v58, %v621_v45 }
 0x3a1   :  { %v731_v23 = vmul.f32 %v628_v47, %v5710_v57  ;;  %v623_v17 = vpop.permute.xlu0 %622 }
 0x3a2   :  { %v627_v34 = vsel %vm48_vm6, %v621_v45, %v623_v17 }
 0x3a3   :  { %v625_v1 = vpop.permute.xlu1 %624  ;;  %v763_v35 = vpack.c.bf16 %v731_v23, %v727_v54  ;;  %v732_v22 = vmul.f32 %v627_v34, %v5744_v29 }
 0x3a4   :  { %v626_v56 = vsel %vm48_vm6, %v623_v17, %v625_v1  ;;  %v629_v57 = vsel %vm48_vm6, %v625_v1, %v619_v58  ;;  %v6285_v58 = vld [vmem:[%s10175_s1 + $0x18] sm:$0xff] }
 0x3a5   :  { %v730_v11 = vmul.f32 %v629_v57, %v5732_v21  ;;  %v733_v30 = vmul.f32 %v626_v56, %v5721_v63  ;;  %v583_v32 = vpop.permute.xlu0 %582  ;;  %790 = vmatprep.subr.bf16.mxu0 %v763_v35  ;;  %v764_v15 = vpack.c.bf16 %v732_v22, %v728_v49  ;;  %v6247_v63 = vld [vmem:[%s10175_s1 + $0x28] sm:$0xff]  ;;  %v4842_v35 = vld [vmem:[%s10176_s0 + $0x90] sm:$0xff] }
 0x3a6   :  { %v4841_v56 = vld [vmem:[%s10176_s0 + $0x88] sm:$0xff] }
 0x3a7   :  { %v762_v42 = vpack.c.bf16 %v730_v11, %v726_v9  ;;  %v585_v29 = vpop.permute.xlu1 %584  ;;  %v765_v20 = vpack.c.bf16 %v733_v30, %v729_v5  ;;  %v4843_v5 = vld [vmem:[%s10176_s0 + $0x98] sm:$0xff] }
 0x3a8   :  { %v592_v62 = vsel %vm39_vm7, %v583_v32, %v585_v29 }
 0x3a9   :  { %833 = vmatprep.subr.bf16.mxu1 %v765_v20  ;;  %v587_v25 = vpop.permute.xlu0 %586  ;;  %791 = vmatpush1.bf16.msra.mxu0 %v762_v42  ;;  %v719_v10 = vmul.f32 %v592_v62, %v5751_v36  ;;  %v6267_v36 = vld [vmem:[%s10175_s1 + $0x38] sm:$0xff] }
 0x3aa   :  { %834 = vmatpush1.bf16.msra.mxu1 %v764_v15  ;;  %v591_v43 = vsel %vm39_vm7, %v585_v29, %v587_v25 }
 0x3ab   :  { %v589_v50 = vpop.permute.xlu1 %588  ;;  %v720_v47 = vmul.f32 %v591_v43, %v5785_v55 }
 0x3ac   :  { %v590_v38 = vsel %vm39_vm7, %v587_v25, %v589_v50  ;;  %v593_v61 = vsel %vm39_vm7, %v589_v50, %v583_v32 }
 0x3ad   :  { %v595_v18 = vpop.permute.xlu0 %594  ;;  %v718_v39 = vmul.f32 %v6279_v51, %v593_v61 }
 0x3af   :  { %v597_v21 = vpop.permute.xlu1 %596 }
 0x3b0   :  { %v604_v28 = vsel %vm42_vm8, %v595_v18, %v597_v21 }
 0x3b1   :  { %v723_v46 = vmul.f32 %v6247_v63, %v604_v28  ;;  %v599_v8 = vpop.permute.xlu0 %598 }
 0x3b2   :  { %v603_v14 = vsel %vm42_vm8, %v597_v21, %v599_v8 }
 0x3b3   :  { %v601_v33 = vpop.permute.xlu1 %600  ;;  %v759_v40 = vpack.c.bf16 %v723_v46, %v719_v10  ;;  %v724_v16 = vmul.f32 %v603_v14, %v5793_v0  ;;  %v721_v0 = vmul.f32 %v6285_v58, %v590_v38 }
 0x3b4   :  { %v602_v4 = vsel %vm42_vm8, %v599_v8, %v601_v33  ;;  %v605_v52 = vsel %vm42_vm8, %v601_v33, %v595_v18 }
 0x3b5   :  { %v722_v48 = vmul.f32 %v6262_v3, %v605_v52  ;;  %v725_v45 = vmul.f32 %v6267_v36, %v602_v4  ;;  %792 = vmatprep.subr.bf16.mxu0 %v759_v40  ;;  %v760_v17 = vpack.c.bf16 %v724_v16, %v720_v47 }
 0x3b7   :  { %v758_v54 = vpack.c.bf16 %v722_v48, %v718_v39  ;;  %v761_v23 = vpack.c.bf16 %v725_v45, %v721_v0  ;;  %v5367_v45 = vld [vmem:[%s10175_s1 + $0x100] sm:$0xff] }
 0x3b9   :  { %793 = vmatpush1.bf16.msra.mxu0 %v758_v54  ;;  %835 = vmatprep.subr.bf16.mxu1 %v761_v23  ;;  %v5368_v23 = vld [vmem:[%s10175_s1 + $0x108] sm:$0xff] }
 0x3ba   :  { %836 = vmatpush1.bf16.msra.mxu1 %v760_v17 }
 0x3bc   :  { %4848 = vmatmul.mubr.msk.bf16.vlgmr.msra.gmra.mxu0 %vm166_vm0, %v10227_v24 }
 0x3bd   :  { %4849 = vmatmul.mubr.msk.bf16.vlgmr.msra.gmra.mxu1 %vm166_vm0, %v10227_v24  ;;  %1100 = vmatprep.mubr.bf16.mxu0 %v10220_v41 }
 0x3be   :  { %1141 = vmatprep.mubr.bf16.mxu1 %v10220_v41 }
 0x47c   :  { %v6297_v53 = vpop.f32.mrf.mxu0 }
 0x47d   :  { %v6299_v34 = vpop.f32.mrf.mxu1 }
 0x47e   :  { %v6301_v55 = vpop.f32.mrf.mxu0 }
 0x47f   :  { %v6306_v1 = vpop.f32.mrf.mxu1 }
 0x480   :  { %v816_v22 = vpop.f32.mrf.mxu0 }
 0x481   :  { %v817_v57 = vadd.f32 %v4840_v27, %v816_v22  ;;  %v859_v9 = vpop.f32.mrf.mxu1  ;;  %v5369_v22 = vld [vmem:[%s10175_s1 + $0x110] sm:$0xff] }
 0x482   :  { %v860_v11 = vadd.f32 %v4842_v35, %v859_v9  ;;  %v818_v30 = vpop.f32.mrf.mxu0 }
 0x483   :  { %v4854_v32 = vmul.f32 -1.442695, %v817_v57  ;;  %v819_v49 = vadd.f32 %v4841_v56, %v818_v30  ;;  %v861_v42 = vpop.f32.mrf.mxu1  ;;  %v5370_v57 = vld [vmem:[%s10175_s1 + $0x118] sm:$0xff] }
 0x484   :  { %v4856_v29 = vmul.f32 -1.442695, %v860_v11  ;;  %v862_v20 = vadd.f32 %v4843_v5, %v861_v42 }
 0x485   :  { %5083 = vpow2.f32 %v4854_v32  ;;  %v4855_v15 = vmul.f32 -1.442695, %v819_v49 }
 0x486   :  { %5085 = vpow2.f32 %v4856_v29  ;;  %v4857_v25 = vmul.f32 -1.442695, %v862_v20 }
 0x487   :  { %5087 = vpow2.f32 %v4855_v15 }
 0x488   :  { %5089 = vpow2.f32 %v4857_v25 }
 0x492   :  { %v5084_v50 = vpop.eup %5083 }
 0x493   :  { %v5086_v18 = vpop.eup %5085  ;;  %v900_v62 = vadd.f32 1.0, %v5084_v50 }
 0x494   :  { %v5088_v21 = vpop.eup %5087  ;;  %v902_v28 = vadd.f32 1.0, %v5086_v18 }
 0x495   :  { %v5090_v10 = vpop.eup %5089  ;;  %5091 = vrcp.f32 %v900_v62  ;;  %v901_v46 = vadd.f32 1.0, %v5088_v21  ;;  %v5371_v62 = vld [vmem:[%s10175_s1 + $0xe0] sm:$0xff] }
 0x496   :  { %5093 = vrcp.f32 %v902_v28  ;;  %v903_v8 = vadd.f32 1.0, %v5090_v10  ;;  %v5372_v10 = vld [vmem:[%s10175_s1 + $0xc8] sm:$0xff] }
 0x497   :  { %5095 = vrcp.f32 %v901_v46 }
 0x498   :  { %5097 = vrcp.f32 %v903_v8  ;;  %v5373_v8 = vld [vmem:[%s10175_s1 + $0xe8] sm:$0xff] }
 0x4a2   :  { %v5092_v38 = vpop.eup %5091 }
 0x4a3   :  { %v5094_v61 = vpop.eup %5093  ;;  %v6318_v14 = vmul.f32 %v5092_v38, %v6060_v37 }
 0x4a4   :  { %v5096_v43 = vpop.eup %5095  ;;  %v6326_v16 = vmul.f32 %v5094_v61, %v6062_v19 }
 0x4a5   :  { %v6321_v33 = vmul.f32 %v5096_v43, %v6068_v26  ;;  %1000 = vrot.lane.b32.xlu0 %v6318_v14, %s5511_s18  ;;  %v5098_v40 = vpop.eup %5097  ;;  %v5374_v43 = vld [vmem:[%s10175_s1 + $0xc0] sm:$0xff] }
 0x4a6   :  { %v6331_v4 = vmul.f32 %v5098_v40, %v6076_v60 }
 0x4a7   :  { %1002 = vrot.lane.b32.xlu1 %v6321_v33, %s5511_s18 }
 0x4a9   :  { %1004 = vrot.lane.b32.xlu0 %v6326_v16, %s5511_s18 }
 0x4ab   :  { %1006 = vrot.lane.b32.xlu1 %v6331_v4, %s5511_s18 }
 0x4ad   :  { %976 = vrot.lane.b32.xlu0 %v6318_v14, %s5513_s20 }
 0x4af   :  { %978 = vrot.lane.b32.xlu1 %v6321_v33, %s5513_s20 }
 0x4b1   :  { %980 = vrot.lane.b32.xlu0 %v6326_v16, %s5513_s20 }
 0x4b3   :  { %982 = vrot.lane.b32.xlu1 %v6331_v4, %s5513_s20 }
 0x4b5   :  { %988 = vrot.lane.b32.xlu0 %v6318_v14, %s5512_s19 }
 0x4b7   :  { %990 = vrot.lane.b32.xlu1 %v6321_v33, %s5512_s19 }
 0x4b9   :  { %992 = vrot.lane.b32.xlu0 %v6326_v16, %s5512_s19 }
 0x4bb   :  { %994 = vrot.lane.b32.xlu1 %v6331_v4, %s5512_s19 }
 0x4bd   :  { %964 = vrot.lane.b32.xlu0 %v6318_v14, %s5514_s21 }
 0x4bf   :  { %966 = vrot.lane.b32.xlu1 %v6321_v33, %s5514_s21 }
 0x4c1   :  { %968 = vrot.lane.b32.xlu0 %v6326_v16, %s5514_s21 }
 0x4c3   :  { %970 = vrot.lane.b32.xlu1 %v6331_v4, %s5514_s21 }
 0x4c5   :  { %940 = vrot.lane.b32.xlu0 %v6318_v14, %s5516_s23 }
 0x4c7   :  { %942 = vrot.lane.b32.xlu1 %v6321_v33, %s5516_s23 }
 0x4c9   :  { %944 = vrot.lane.b32.xlu0 %v6326_v16, %s5516_s23 }
 0x4cb   :  { %946 = vrot.lane.b32.xlu1 %v6331_v4, %s5516_s23 }
 0x4cd   :  { %952 = vrot.lane.b32.xlu0 %v6318_v14, %s5515_s22 }
 0x4cf   :  { %954 = vrot.lane.b32.xlu1 %v6321_v33, %s5515_s22 }
 0x4d1   :  { %956 = vrot.lane.b32.xlu0 %v6326_v16, %s5515_s22 }
 0x4d3   :  { %958 = vrot.lane.b32.xlu1 %v6331_v4, %s5515_s22 }
 0x4d5   :  { %916 = vrot.lane.b32.xlu0 %v6318_v14, %s5519_s25 }
 0x4d7   :  { %918 = vrot.lane.b32.xlu1 %v6321_v33, %s5519_s25 }
 0x4d9   :  { %920 = vrot.lane.b32.xlu0 %v6326_v16, %s5519_s25 }
 0x4db   :  { %922 = vrot.lane.b32.xlu1 %v6331_v4, %s5519_s25 }
 0x4dd   :  { %928 = vrot.lane.b32.xlu0 %v6318_v14, %s5518_s24 }
 0x4df   :  { %930 = vrot.lane.b32.xlu1 %v6321_v33, %s5518_s24 }
 0x4e1   :  { %932 = vrot.lane.b32.xlu0 %v6326_v16, %s5518_s24 }
 0x4e3   :  { %934 = vrot.lane.b32.xlu1 %v6331_v4, %s5518_s24 }
 0x517   :  { %v1001_v52 = vpop.permute.xlu0 %1000 }
 0x519   :  { %v1003_v39 = vpop.permute.xlu1 %1002 }
 0x51a   :  { %v1010_v0 = vsel %vm60_vm1, %v1001_v52, %v1003_v39 }
 0x51b   :  { %v1005_v48 = vpop.permute.xlu0 %1004  ;;  %v1044_v47 = vmul.f32 %v5367_v45, %v1010_v0  ;;  %v5376_v45 = vld [vmem:[%s10175_s1 + $0xd8] sm:$0xff] }
 0x51c   :  { %v1009_v54 = vsel %vm60_vm1, %v1003_v39, %v1005_v48 }
 0x51d   :  { %v1045_v17 = vmul.f32 %v5368_v23, %v1009_v54  ;;  %v1007_v24 = vpop.permute.xlu1 %1006  ;;  %v1064_v30 = vpack.c.bf16 %v5596_v12, %v1044_v47  ;;  %v5377_v54 = vld [vmem:[%s10175_s1 + $0xf0] sm:$0xff] }
 0x51e   :  { %v1008_v27 = vsel %vm60_vm1, %v1005_v48, %v1007_v24  ;;  %v1011_v35 = vsel %vm60_vm1, %v1007_v24, %v1001_v52  ;;  %v5375_v52 = vld [vmem:[%s10175_s1 + $0xd0] sm:$0xff] }
 0x51f   :  { %v1046_v56 = vmul.f32 %v5369_v22, %v1008_v27  ;;  %v1047_v9 = vmul.f32 %v5370_v57, %v1011_v35  ;;  %v977_v5 = vpop.permute.xlu0 %976  ;;  %v1065_v11 = vpack.c.bf16 %v5577_v7, %v1045_v17  ;;  %v5378_v17 = vld [vmem:[%s10175_s1 + $0xf8] sm:$0xff] }
 0x521   :  { %v1066_v32 = vpack.c.bf16 %v5598_v13, %v1046_v56  ;;  %v979_v49 = vpop.permute.xlu1 %978  ;;  %1074 = vmatprep.subr.bf16.mxu0 %v1065_v11  ;;  %v1067_v42 = vpack.c.bf16 %v10223_v6, %v1047_v9 }
 0x522   :  { %1075 = vmatpush1.bf16.msra.mxu0 %v1064_v30  ;;  %v986_v12 = vsel %vm54_vm3, %v977_v5, %v979_v49  ;;  %v5379_v30 = vld [vmem:[%s10175_s1 + $0xa0] sm:$0xff] }
 0x523   :  { %1115 = vmatprep.subr.bf16.mxu1 %v1067_v42  ;;  %v981_v29 = vpop.permute.xlu0 %980  ;;  %v1036_v40 = vmul.f32 %v5374_v43, %v986_v12  ;;  %v5380_v42 = vld [vmem:[%s10175_s1 + $0xa8] sm:$0xff] }
 0x524   :  { %1116 = vmatpush1.bf16.msra.mxu1 %v1066_v32  ;;  %v985_v50 = vsel %vm54_vm3, %v979_v49, %v981_v29 }
 0x525   :  { %v983_v20 = vpop.permute.xlu1 %982  ;;  %v1037_v46 = vmul.f32 %v5372_v10, %v985_v50 }
 0x526   :  { %v984_v13 = vsel %vm54_vm3, %v981_v29, %v983_v20  ;;  %v987_v18 = vsel %vm54_vm3, %v983_v20, %v977_v5 }
 0x527   :  { %v989_v15 = vpop.permute.xlu0 %988  ;;  %v1038_v39 = vmul.f32 %v5375_v52, %v984_v13  ;;  %v1039_v47 = vmul.f32 %v5376_v45, %v987_v18 }
 0x529   :  { %v991_v25 = vpop.permute.xlu1 %990 }
 0x52a   :  { %v998_v7 = vsel %vm57_vm2, %v989_v15, %v991_v25 }
 0x52b   :  { %v993_v6 = vpop.permute.xlu0 %992  ;;  %v1040_v21 = vmul.f32 %v5371_v62, %v998_v7  ;;  %v5382_v7 = vld [vmem:[%s10175_s1 + $0x90] sm:$0xff] }
 0x52c   :  { %v997_v28 = vsel %vm57_vm2, %v991_v25, %v993_v6  ;;  %v5381_v25 = vld [vmem:[%s10175_s1 + $0x80] sm:$0xff]  ;;  %v1030_v12 = vmul.f32 %v5382_v7, %v6326_v16  ;;  %v1031_v16 = vmul.f32 %v6214_v31, %v6331_v4  ;;  %v5385_v31 = vld [vmem:[%s10175_s1 + $0x48] sm:$0xff] }
 0x52d   :  { %v1041_v38 = vmul.f32 %v5373_v8, %v997_v28  ;;  %v995_v61 = vpop.permute.xlu1 %994  ;;  %v1060_v22 = vpack.c.bf16 %v1040_v21, %v1036_v40  ;;  %v1028_v50 = vmul.f32 %v5381_v25, %v6318_v14  ;;  %v5384_v14 = vld [vmem:[%s10175_s1 + $0xb8] sm:$0xff] }
 0x52e   :  { %v996_v0 = vsel %vm57_vm2, %v993_v6, %v995_v61  ;;  %v999_v48 = vsel %vm57_vm2, %v995_v61, %v989_v15  ;;  %v1029_v15 = vmul.f32 %v6197_v59, %v6321_v33  ;;  %v5383_v59 = vld [vmem:[%s10175_s1 + $0xb0] sm:$0xff] }
 0x52f   :  { %v1042_v23 = vmul.f32 %v5377_v54, %v996_v0  ;;  %v1043_v24 = vmul.f32 %v5378_v17, %v999_v48  ;;  %v965_v27 = vpop.permute.xlu0 %964  ;;  %v1061_v35 = vpack.c.bf16 %v1041_v38, %v1037_v46  ;;  %v5386_v0 = vld [vmem:[%s10175_s1 + $0x68] sm:$0xff] }
 0x531   :  { %v1062_v56 = vpack.c.bf16 %v1042_v23, %v1038_v39  ;;  %v967_v57 = vpop.permute.xlu1 %966  ;;  %1076 = vmatprep.subr.bf16.mxu0 %v1061_v35  ;;  %v1063_v9 = vpack.c.bf16 %v1043_v24, %v1039_v47  ;;  %v5387_v35 = vld [vmem:[%s10175_s1 + $0x70] sm:$0xff] }
 0x532   :  { %v974_v5 = vsel %vm51_vm4, %v965_v27, %v967_v57  ;;  %1077 = vmatpush1.bf16.msra.mxu0 %v1060_v22 }
 0x533   :  { %1117 = vmatprep.subr.bf16.mxu1 %v1063_v9  ;;  %v969_v11 = vpop.permute.xlu0 %968  ;;  %v1032_v32 = vmul.f32 %v5379_v30, %v974_v5  ;;  %v5388_v9 = vld [vmem:[%s10175_s1 + $0x40] sm:$0xff] }
 0x534   :  { %v973_v49 = vsel %vm51_vm4, %v967_v57, %v969_v11  ;;  %1118 = vmatpush1.bf16.msra.mxu1 %v1062_v56 }
 0x535   :  { %v1033_v29 = vmul.f32 %v5380_v42, %v973_v49  ;;  %v971_v20 = vpop.permute.xlu1 %970  ;;  %v1056_v28 = vpack.c.bf16 %v1032_v32, %v1028_v50  ;;  %v5390_v32 = vld [vmem:[%s10175_s1 + $0x60] sm:$0xff]  ;;  %v5391_v42 = vld [vmem:[%s10175_s1 + $0x78] sm:$0xff] }
 0x536   :  { %v972_v13 = vsel %vm51_vm4, %v969_v11, %v971_v20  ;;  %v975_v6 = vsel %vm51_vm4, %v971_v20, %v965_v27  ;;  %v5389_v11 = vld [vmem:[%s10175_s1 + $0x58] sm:$0xff] }
 0x537   :  { %v1034_v33 = vmul.f32 %v5383_v59, %v972_v13  ;;  %v1035_v18 = vmul.f32 %v5384_v14, %v975_v6  ;;  %v941_v62 = vpop.permute.xlu0 %940  ;;  %v1057_v21 = vpack.c.bf16 %v1033_v29, %v1029_v15  ;;  %v5392_v15 = vld [vmem:[%s10175_s1 + $0x50] sm:$0xff] }
 0x539   :  { %v1058_v10 = vpack.c.bf16 %v1034_v33, %v1030_v12  ;;  %v943_v46 = vpop.permute.xlu1 %942  ;;  %1078 = vmatprep.subr.bf16.mxu0 %v1057_v21  ;;  %v1059_v8 = vpack.c.bf16 %v1035_v18, %v1031_v16  ;;  %v5393_v21 = vld [vmem:[%s10175_s1 + $0x8] sm:$0xff] }
 0x53a   :  { %1079 = vmatpush1.bf16.msra.mxu0 %v1056_v28  ;;  %v950_v40 = vsel %vm45_vm5, %v941_v62, %v943_v46 }
 0x53b   :  { %1119 = vmatprep.subr.bf16.mxu1 %v1059_v8  ;;  %v945_v38 = vpop.permute.xlu0 %944  ;;  %v1021_v4 = vmul.f32 %v5385_v31, %v950_v40 }
 0x53c   :  { %1120 = vmatpush1.bf16.msra.mxu1 %v1058_v10  ;;  %v949_v17 = vsel %vm45_vm5, %v943_v46, %v945_v38 }
 0x53d   :  { %v947_v61 = vpop.permute.xlu1 %946  ;;  %v1022_v25 = vmul.f32 %v5392_v15, %v949_v17  ;;  %v4845_v15 = vld [vmem:[%s10176_s0 + $0xa8] sm:$0xff] }
 0x53e   :  { %v948_v47 = vsel %vm45_vm5, %v945_v38, %v947_v61  ;;  %v951_v54 = vsel %vm45_vm5, %v947_v61, %v941_v62 }
 0x53f   :  { %v953_v43 = vpop.permute.xlu0 %952  ;;  %v1020_v5 = vmul.f32 %v5388_v9, %v951_v54  ;;  %v1023_v30 = vmul.f32 %v5389_v11, %v948_v47  ;;  %v5395_v47 = vld [vmem:[%s10175_s1 + $0x10] sm:$0xff] }
 0x541   :  { %v955_v52 = vpop.permute.xlu1 %954 }
 0x542   :  { %v962_v39 = vsel %vm48_vm6, %v953_v43, %v955_v52 }
 0x543   :  { %v1025_v48 = vmul.f32 %v5386_v0, %v962_v39  ;;  %v957_v45 = vpop.permute.xlu0 %956 }
 0x544   :  { %v961_v23 = vsel %vm48_vm6, %v955_v52, %v957_v45  ;;  %v5394_v52 = vld [vmem:[%s10175_s1 + $0x30] sm:$0xff] }
 0x545   :  { %v959_v24 = vpop.permute.xlu1 %958  ;;  %v1053_v27 = vpack.c.bf16 %v1025_v48, %v1021_v4  ;;  %v1026_v22 = vmul.f32 %v5387_v35, %v961_v23 }
 0x546   :  { %v960_v56 = vsel %vm48_vm6, %v957_v45, %v959_v24  ;;  %v963_v57 = vsel %vm48_vm6, %v959_v24, %v953_v43 }
 0x547   :  { %v1024_v49 = vmul.f32 %v5390_v32, %v963_v57  ;;  %v1027_v29 = vmul.f32 %v5391_v42, %v960_v56  ;;  %v917_v20 = vpop.permute.xlu0 %916  ;;  %1080 = vmatprep.subr.bf16.mxu0 %v1053_v27  ;;  %v1054_v13 = vpack.c.bf16 %v1026_v22, %v1022_v25 }
 0x549   :  { %v1052_v50 = vpack.c.bf16 %v1024_v49, %v1020_v5  ;;  %v919_v7 = vpop.permute.xlu1 %918  ;;  %v1055_v12 = vpack.c.bf16 %v1027_v29, %v1023_v30 }
 0x54a   :  { %v926_v14 = vsel %vm39_vm7, %v917_v20, %v919_v7 }
 0x54b   :  { %1121 = vmatprep.subr.bf16.mxu1 %v1055_v12  ;;  %v921_v6 = vpop.permute.xlu0 %920  ;;  %1081 = vmatpush1.bf16.msra.mxu0 %v1052_v50  ;;  %v1013_v16 = vmul.f32 %v5393_v21, %v926_v14 }
 0x54c   :  { %1122 = vmatpush1.bf16.msra.mxu1 %v1054_v13  ;;  %v925_v61 = vsel %vm39_vm7, %v919_v7, %v921_v6  ;;  %v4847_v7 = vld [vmem:[%s10176_s0 + $0xb8] sm:$0xff] }
 0x54d   :  { %v923_v59 = vpop.permute.xlu1 %922  ;;  %v1014_v54 = vmul.f32 %v5395_v47, %v925_v61 }
 0x54e   :  { %v924_v46 = vsel %vm39_vm7, %v921_v6, %v923_v59  ;;  %v927_v8 = vsel %vm39_vm7, %v923_v59, %v917_v20 }
 0x54f   :  { %v929_v33 = vpop.permute.xlu0 %928  ;;  %v1012_v4 = vmul.f32 %v6279_v51, %v927_v8  ;;  %v1015_v0 = vmul.f32 %v6285_v58, %v924_v46  ;;  %v4837_v51 = vld [vmem:[%s10176_s0 + $0x68] sm:$0xff] }
 0x550   :  { %v815_v35 = vadd.f32 %v4837_v51, %v6301_v55  ;;  %v4844_v55 = vld [vmem:[%s10176_s0 + $0xa0] sm:$0xff] }
 0x551   :  { %v931_v18 = vpop.permute.xlu1 %930 }
 0x552   :  { %v938_v62 = vsel %vm42_vm8, %v929_v33, %v931_v18  ;;  %v4851_v9 = vmul.f32 -1.442695, %v815_v35  ;;  %v1323_v35 = vld [vmem:[%s10175_s1 + $0x138] sm:$0xff] }
 0x553   :  { %v1017_v28 = vmul.f32 %v938_v62, %v6247_v63  ;;  %v933_v10 = vpop.permute.xlu0 %932 }
 0x554   :  { %v937_v38 = vsel %vm42_vm8, %v931_v18, %v933_v10 }
 0x555   :  { %v935_v43 = vpop.permute.xlu1 %934  ;;  %v1049_v40 = vpack.c.bf16 %v1017_v28, %v1013_v16  ;;  %v1018_v63 = vmul.f32 %v5394_v52, %v937_v38 }
 0x556   :  { %v936_v39 = vsel %vm42_vm8, %v933_v10, %v935_v43  ;;  %v939_v31 = vsel %vm42_vm8, %v935_v43, %v929_v33 }
 0x557   :  { %v1016_v48 = vmul.f32 %v939_v31, %v6262_v3  ;;  %v1019_v45 = vmul.f32 %v936_v39, %v6267_v36  ;;  %1082 = vmatprep.subr.bf16.mxu0 %v1049_v40  ;;  %v1050_v24 = vpack.c.bf16 %v1018_v63, %v1014_v54  ;;  %v4836_v3 = vld [vmem:[%s10176_s0 + $0x60] sm:$0xff]  ;;  %v4838_v36 = vld [vmem:[%s10176_s0 + $0x70] sm:$0xff] }
 0x558   :  { %v813_v58 = vadd.f32 %v4836_v3, %v6297_v53  ;;  %v856_v27 = vadd.f32 %v4838_v36, %v6299_v34  ;;  %v6691_v3 = vld [vmem:[%s10175_s1 + $0x100] sm:$0xff] }
 0x559   :  { %v1048_v23 = vpack.c.bf16 %v1016_v48, %v1012_v4  ;;  %v1051_v17 = vpack.c.bf16 %v1019_v45, %v1015_v0  ;;  %v1320_v36 = vld [vmem:[%s10175_s1 + $0x120] sm:$0xff] }
 0x55a   :  { %v4850_v56 = vmul.f32 -1.442695, %v813_v58  ;;  %v4852_v57 = vmul.f32 -1.442695, %v856_v27  ;;  %v1322_v27 = vld [vmem:[%s10175_s1 + $0x130] sm:$0xff] }
 0x55b   :  { %1083 = vmatpush1.bf16.msra.mxu0 %v1048_v23  ;;  %1123 = vmatprep.subr.bf16.mxu1 %v1051_v17 }
 0x55c   :  { %1124 = vmatpush1.bf16.msra.mxu1 %v1050_v24  ;;  %5099 = vpow2.f32 %v4850_v56 }
 0x55d   :  { %5101 = vpow2.f32 %v4852_v57  ;;  %v6711_v57 = vmul.f32 0.0, %v1320_v36 }
 0x55e   :  { %4858 = vmatmul.mubr.msk.bf16.vlgmr.msra.gmra.mxu0 %vm166_vm0, %v6024_v2  ;;  %5103 = vpow2.f32 %v4851_v9 }
 0x55f   :  { %4859 = vmatmul.mubr.msk.bf16.vlgmr.msra.gmra.mxu1 %vm166_vm0, %v6024_v2  ;;  %1416 = vmatprep.mubr.bf16.mxu0 %v10220_v41  ;;  %v4839_v2 = vld [vmem:[%s10176_s0 + $0x78] sm:$0xff] }
 0x560   :  { %1459 = vmatprep.mubr.bf16.mxu1 %v10220_v41  ;;  %v858_v22 = vadd.f32 %v4839_v2, %v6306_v1  ;;  %v4846_v1 = vld [vmem:[%s10176_s0 + $0xb0] sm:$0xff]  ;;  %v6701_v2 = vld [vmem:[%s10175_s1 + $0x108] sm:$0xff] }
 0x562   :  { %v4853_v5 = vmul.f32 -1.442695, %v858_v22 }
 0x564   :  { %5105 = vpow2.f32 %v4853_v5 }
 0x569   :  { %v5100_v11 = vpop.eup %5099 }
 0x56a   :  { %v5102_v53 = vpop.eup %5101  ;;  %v876_v49 = vadd.f32 1.0, %v5100_v11  ;;  %v6719_v11 = vld [vmem:[%s10175_s1 + $0x110] sm:$0xff] }
 0x56b   :  { %v5104_v30 = vpop.eup %5103  ;;  %v878_v42 = vadd.f32 1.0, %v5102_v53  ;;  %v6724_v53 = vld [vmem:[%s10175_s1 + $0x118] sm:$0xff] }
 0x56c   :  { %v877_v29 = vadd.f32 1.0, %v5104_v30  ;;  %5107 = vrcp.f32 %v876_v49 }
 0x56d   :  { %5109 = vrcp.f32 %v878_v42  ;;  %v6729_v42 = vmul.f32 0.0, %v1323_v35  ;;  %v6808_v35 = vld [vmem:[%s10175_s1 + $0xa0] sm:$0xff] }
 0x56e   :  { %5111 = vrcp.f32 %v877_v29 }
 0x571   :  { %v5106_v32 = vpop.eup %5105 }
 0x572   :  { %v879_v34 = vadd.f32 1.0, %v5106_v32  ;;  %v6727_v32 = vmul.f32 0.0, %v1322_v27 }
 0x574   :  { %5113 = vrcp.f32 %v879_v34 }
 0x579   :  { %v5108_v16 = vpop.eup %5107 }
 0x57a   :  { %v5110_v28 = vpop.eup %5109  ;;  %v1154_v8 = vsub.f32 1.0, %v5108_v16 }
 0x57b   :  { %v5112_v10 = vpop.eup %5111  ;;  %v1156_v38 = vsub.f32 1.0, %v5110_v28 }
 0x57c   :  { %v1155_v61 = vsub.f32 1.0, %v5112_v10  ;;  %v1158_v63 = vmul.f32 %v1154_v8, %v6060_v37 }
 0x57d   :  { %v1160_v4 = vmul.f32 %v1156_v38, %v6062_v19 }
 0x57e   :  { %v1159_v47 = vmul.f32 %v1155_v61, %v6068_v26  ;;  %v6777_v61 = vld [vmem:[%s10175_s1 + $0xd8] sm:$0xff] }
 0x581   :  { %v5114_v46 = vpop.eup %5113 }
 0x582   :  { %v1157_v40 = vsub.f32 1.0, %v5114_v46 }
 0x584   :  { %v1161_v17 = vmul.f32 %v1157_v40, %v6076_v60  ;;  %v1321_v60 = vld [vmem:[%s10175_s1 + $0x128] sm:$0xff] }
 0x585   :  { %v6709_v56 = vmul.f32 0.0, %v1321_v60 }
 0x61e   :  { %v1102_v20 = vpop.f32.mrf.mxu0 }
 0x61f   :  { %v1103_v25 = vadd.f32 %v4844_v55, %v1102_v20  ;;  %v1143_v50 = vpop.f32.mrf.mxu1 }
 0x620   :  { %v1144_v12 = vadd.f32 %v4846_v1, %v1143_v50  ;;  %v1104_v13 = vpop.f32.mrf.mxu0 }
 0x621   :  { %5115 = vtanh.f32 %v1103_v25  ;;  %v1105_v6 = vadd.f32 %v4845_v15, %v1104_v13  ;;  %v1145_v59 = vpop.f32.mrf.mxu1 }
 0x622   :  { %5117 = vtanh.f32 %v1144_v12  ;;  %v1146_v33 = vadd.f32 %v4847_v7, %v1145_v59  ;;  %v1106_v14 = vpop.f32.mrf.mxu0 }
 0x623   :  { %5119 = vtanh.f32 %v1105_v6  ;;  %v1147_v18 = vpop.f32.mrf.mxu1 }
 0x624   :  { %5121 = vtanh.f32 %v1146_v33  ;;  %v1107_v62 = vpop.f32.mrf.mxu0  ;;  %v6744_v33 = vld [vmem:[%s10175_s1 + $0xe0] sm:$0xff]  ;;  %v6749_v18 = vld [vmem:[%s10175_s1 + $0xc8] sm:$0xff] }
 0x625   :  { %v1148_v21 = vpop.f32.mrf.mxu1  ;;  %10228 = vst [vmem:[#allocation7_spill] sm:$0xff] %v6744_v33  ;;  %10229 = vst [vmem:[#allocation8_spill] sm:$0xff] %v6749_v18 }
 0x62e   :  { %v5116_v43 = vpop.eup %5115 }
 0x62f   :  { %v5118_v52 = vpop.eup %5117  ;;  %v1162_v39 = vmul.f32 %v5116_v43, %v5108_v16  ;;  %v6758_v16 = vld [vmem:[%s10175_s1 + $0xe8] sm:$0xff] }
 0x630   :  { %v5120_v31 = vpop.eup %5119  ;;  %v1164_v0 = vmul.f32 %v5118_v52, %v5110_v28  ;;  %10230 = vst [vmem:[#allocation2_spill] sm:$0xff] %v6758_v16  ;;  %v6763_v28 = vld [vmem:[%s10175_s1 + $0xc0] sm:$0xff] }
 0x631   :  { %v5122_v48 = vpop.eup %5121  ;;  %v6595_v45 = vadd.f32 %v1162_v39, %v1158_v63  ;;  %v1163_v54 = vmul.f32 %v5120_v31, %v5112_v10  ;;  %v6787_v63 = vld [vmem:[%s10175_s1 + $0xf0] sm:$0xff]  ;;  %v6792_v39 = vld [vmem:[%s10175_s1 + $0xf8] sm:$0xff] }
 0x632   :  { %v6598_v23 = vadd.f32 %v1164_v0, %v1160_v4  ;;  %v1165_v24 = vmul.f32 %v5122_v48, %v5114_v46  ;;  %v6770_v46 = vld [vmem:[%s10175_s1 + $0xd0] sm:$0xff] }
 0x633   :  { %4860 = vst [vmem:[%s10178_s4 + $0x20] sm:$0xff] %v6595_v45  ;;  %v6605_v37 = vadd.f32 %v1163_v54, %v1159_v47  ;;  %1272 = vrot.lane.b32.xlu0 %v6595_v45, %s5511_s18 }
 0x634   :  { %4862 = vst [vmem:[%s10178_s4 + $0x30] sm:$0xff] %v6598_v23  ;;  %v6613_v19 = vadd.f32 %v1165_v24, %v1161_v17 }
 0x635   :  { %4861 = vst [vmem:[%s10178_s4 + $0x28] sm:$0xff] %v6605_v37  ;;  %1274 = vrot.lane.b32.xlu1 %v6605_v37, %s5511_s18 }
 0x636   :  { %4863 = vst [vmem:[%s10178_s4 + $0x38] sm:$0xff] %v6613_v19 }
 0x637   :  { %1276 = vrot.lane.b32.xlu0 %v6598_v23, %s5511_s18 }
 0x639   :  { %1278 = vrot.lane.b32.xlu1 %v6613_v19, %s5511_s18 }
 0x63b   :  { %1248 = vrot.lane.b32.xlu0 %v6595_v45, %s5513_s20 }
 0x63d   :  { %1250 = vrot.lane.b32.xlu1 %v6605_v37, %s5513_s20 }
 0x63f   :  { %1252 = vrot.lane.b32.xlu0 %v6598_v23, %s5513_s20 }
 0x641   :  { %1254 = vrot.lane.b32.xlu1 %v6613_v19, %s5513_s20 }
 0x643   :  { %1260 = vrot.lane.b32.xlu0 %v6595_v45, %s5512_s19 }
 0x645   :  { %1262 = vrot.lane.b32.xlu1 %v6605_v37, %s5512_s19 }
 0x647   :  { %1264 = vrot.lane.b32.xlu0 %v6598_v23, %s5512_s19 }
 0x649   :  { %1266 = vrot.lane.b32.xlu1 %v6613_v19, %s5512_s19 }
 0x64b   :  { %1236 = vrot.lane.b32.xlu0 %v6595_v45, %s5514_s21 }
 0x64d   :  { %1238 = vrot.lane.b32.xlu1 %v6605_v37, %s5514_s21 }
 0x64f   :  { %1240 = vrot.lane.b32.xlu0 %v6598_v23, %s5514_s21 }
 0x651   :  { %1242 = vrot.lane.b32.xlu1 %v6613_v19, %s5514_s21 }
 0x653   :  { %1212 = vrot.lane.b32.xlu0 %v6595_v45, %s5516_s23 }
 0x655   :  { %1214 = vrot.lane.b32.xlu1 %v6605_v37, %s5516_s23 }
 0x657   :  { %1216 = vrot.lane.b32.xlu0 %v6598_v23, %s5516_s23 }
 0x659   :  { %1218 = vrot.lane.b32.xlu1 %v6613_v19, %s5516_s23 }
 0x65b   :  { %1224 = vrot.lane.b32.xlu0 %v6595_v45, %s5515_s22 }
 0x65d   :  { %1226 = vrot.lane.b32.xlu1 %v6605_v37, %s5515_s22 }
 0x65f   :  { %1228 = vrot.lane.b32.xlu0 %v6598_v23, %s5515_s22 }
 0x661   :  { %1230 = vrot.lane.b32.xlu1 %v6613_v19, %s5515_s22 }
 0x663   :  { %1188 = vrot.lane.b32.xlu0 %v6595_v45, %s5519_s25 }
 0x665   :  { %1190 = vrot.lane.b32.xlu1 %v6605_v37, %s5519_s25 }
 0x667   :  { %1192 = vrot.lane.b32.xlu0 %v6598_v23, %s5519_s25 }
 0x669   :  { %1194 = vrot.lane.b32.xlu1 %v6613_v19, %s5519_s25 }
 0x66b   :  { %1200 = vrot.lane.b32.xlu0 %v6595_v45, %s5518_s24 }
 0x66d   :  { %1202 = vrot.lane.b32.xlu1 %v6605_v37, %s5518_s24 }
 0x66f   :  { %1204 = vrot.lane.b32.xlu0 %v6598_v23, %s5518_s24 }
 0x671   :  { %1206 = vrot.lane.b32.xlu1 %v6613_v19, %s5518_s24 }
 0x6a5   :  { %v1273_v26 = vpop.permute.xlu0 %1272 }
 0x6a7   :  { %v1275_v51 = vpop.permute.xlu1 %1274 }
 0x6a8   :  { %v1282_v58 = vsel %vm60_vm1, %v1273_v26, %v1275_v51 }
 0x6a9   :  { %v1277_v22 = vpop.permute.xlu0 %1276  ;;  %v1356_v9 = vmul.f32 %v6691_v3, %v1282_v58 }
 0x6aa   :  { %v1281_v5 = vsel %vm60_vm1, %v1275_v51, %v1277_v22 }
 0x6ab   :  { %v1357_v30 = vmul.f32 %v6701_v2, %v1281_v5  ;;  %v1279_v49 = vpop.permute.xlu1 %1278  ;;  %v1380_v25 = vpack.c.bf16 %v6711_v57, %v1356_v9 }
 0x6ac   :  { %v1280_v29 = vsel %vm60_vm1, %v1277_v22, %v1279_v49  ;;  %v1283_v34 = vsel %vm60_vm1, %v1279_v49, %v1273_v26  ;;  %v6820_v49 = vld [vmem:[%s10175_s1 + $0x88] sm:$0xff] }
 0x6ad   :  { %v1358_v55 = vmul.f32 %v6719_v11, %v1280_v29  ;;  %v1359_v1 = vmul.f32 %v6724_v53, %v1283_v34  ;;  %v1249_v20 = vpop.permute.xlu0 %1248  ;;  %v1381_v15 = vpack.c.bf16 %v6709_v56, %v1357_v30  ;;  %v6815_v30 = vld [vmem:[%s10175_s1 + $0xa8] sm:$0xff]  ;;  %v6825_v29 = vld [vmem:[%s10175_s1 + $0x80] sm:$0xff] }
 0x6af   :  { %v1382_v50 = vpack.c.bf16 %v6727_v32, %v1358_v55  ;;  %v1251_v7 = vpop.permute.xlu1 %1250  ;;  %1390 = vmatprep.subr.bf16.mxu0 %v1381_v15  ;;  %v1383_v12 = vpack.c.bf16 %v6729_v42, %v1359_v1  ;;  %v6830_v55 = vld [vmem:[%s10175_s1 + $0x90] sm:$0xff] }
 0x6b0   :  { %1391 = vmatpush1.bf16.msra.mxu0 %v1380_v25  ;;  %v1258_v10 = vsel %vm54_vm3, %v1249_v20, %v1251_v7  ;;  %v6838_v15 = vld [vmem:[%s10175_s1 + $0xb0] sm:$0xff]  ;;  %v6843_v25 = vld [vmem:[%s10175_s1 + $0xb8] sm:$0xff] }
 0x6b1   :  { %1433 = vmatprep.subr.bf16.mxu1 %v1383_v12  ;;  %v1253_v13 = vpop.permute.xlu0 %1252  ;;  %v1348_v48 = vmul.f32 %v6763_v28, %v1258_v10 }
 0x6b2   :  { %1434 = vmatpush1.bf16.msra.mxu1 %v1382_v50  ;;  %v1257_v62 = vsel %vm54_vm3, %v1251_v7, %v1253_v13  ;;  %v6848_v50 = vld [vmem:[%s10175_s1 + $0x98] sm:$0xff] }
 0x6b3   :  { %v1255_v6 = vpop.permute.xlu1 %1254  ;;  %v1349_v31 = vmul.f32 %v6749_v18, %v1257_v62 }
 0x6b4   :  { %v1256_v8 = vsel %vm54_vm3, %v1253_v13, %v1255_v6  ;;  %v1259_v43 = vsel %vm54_vm3, %v1255_v6, %v1249_v20  ;;  %v1341_v13 = vmul.f32 %v6820_v49, %v6605_v37  ;;  %v1340_v6 = vmul.f32 %v6825_v29, %v6595_v45 }
 0x6b5   :  { %v1261_v59 = vpop.permute.xlu0 %1260  ;;  %v1350_v47 = vmul.f32 %v6770_v46, %v1256_v8  ;;  %v1351_v24 = vmul.f32 %v6777_v61, %v1259_v43  ;;  %v1343_v43 = vmul.f32 %v6848_v50, %v6613_v19 }
 0x6b7   :  { %v1263_v14 = vpop.permute.xlu1 %1262 }
 0x6b8   :  { %v1270_v21 = vsel %vm57_vm2, %v1261_v59, %v1263_v14 }
 0x6b9   :  { %v1265_v38 = vpop.permute.xlu0 %1264  ;;  %v1352_v40 = vmul.f32 %v6744_v33, %v1270_v21 }
 0x6ba   :  { %v1269_v52 = vsel %vm57_vm2, %v1263_v14, %v1265_v38 }
 0x6bb   :  { %v1353_v4 = vmul.f32 %v6758_v16, %v1269_v52  ;;  %v1267_v0 = vpop.permute.xlu1 %1266  ;;  %v1376_v58 = vpack.c.bf16 %v1352_v40, %v1348_v48 }
 0x6bc   :  { %v1268_v54 = vsel %vm57_vm2, %v1265_v38, %v1267_v0  ;;  %v1271_v17 = vsel %vm57_vm2, %v1267_v0, %v1261_v59  ;;  %v1342_v59 = vmul.f32 %v6830_v55, %v6598_v23 }
 0x6bd   :  { %v1354_v26 = vmul.f32 %v6787_v63, %v1268_v54  ;;  %v1355_v60 = vmul.f32 %v6792_v39, %v1271_v17  ;;  %v1237_v36 = vpop.permute.xlu0 %1236  ;;  %v1377_v51 = vpack.c.bf16 %v1353_v4, %v1349_v31  ;;  %v6868_v54 = vld [vmem:[%s10175_s1 + $0x48] sm:$0xff] }
 0x6bf   :  { %v1378_v27 = vpack.c.bf16 %v1354_v26, %v1350_v47  ;;  %v1239_v22 = vpop.permute.xlu1 %1238  ;;  %1392 = vmatprep.subr.bf16.mxu0 %v1377_v51  ;;  %v1379_v9 = vpack.c.bf16 %v1355_v60, %v1351_v24  ;;  %v6875_v24 = vld [vmem:[%s10175_s1 + $0x68] sm:$0xff]  ;;  %v6883_v51 = vld [vmem:[%s10175_s1 + $0x40] sm:$0xff] }
 0x6c0   :  { %v1246_v5 = vsel %vm51_vm4, %v1237_v36, %v1239_v22  ;;  %1393 = vmatpush1.bf16.msra.mxu0 %v1376_v58 }
 0x6c1   :  { %1435 = vmatprep.subr.bf16.mxu1 %v1379_v9  ;;  %v1241_v34 = vpop.permute.xlu0 %1240  ;;  %v1344_v1 = vmul.f32 %v6808_v35, %v1246_v5  ;;  %v6894_v9 = vld [vmem:[%s10175_s1 + $0x58] sm:$0xff] }
 0x6c2   :  { %v1245_v20 = vsel %vm51_vm4, %v1239_v22, %v1241_v34  ;;  %1436 = vmatpush1.bf16.msra.mxu1 %v1378_v27  ;;  %v6889_v27 = vld [vmem:[%s10175_s1 + $0x70] sm:$0xff] }
 0x6c3   :  { %v1345_v7 = vmul.f32 %v6815_v30, %v1245_v20  ;;  %v1243_v12 = vpop.permute.xlu1 %1242  ;;  %v1372_v40 = vpack.c.bf16 %v1344_v1, %v1340_v6  ;;  %v6905_v20 = vld [vmem:[%s10175_s1 + $0x60] sm:$0xff] }
 0x6c4   :  { %v1244_v14 = vsel %vm51_vm4, %v1241_v34, %v1243_v12  ;;  %v1247_v62 = vsel %vm51_vm4, %v1243_v12, %v1237_v36  ;;  %v6915_v12 = vld [vmem:[%s10175_s1 + $0x50] sm:$0xff] }
 0x6c5   :  { %v1346_v21 = vmul.f32 %v6838_v15, %v1244_v14  ;;  %v1347_v10 = vmul.f32 %v6843_v25, %v1247_v62  ;;  %v1213_v8 = vpop.permute.xlu0 %1212  ;;  %v1373_v38 = vpack.c.bf16 %v1345_v7, %v1341_v13  ;;  %v6910_v7 = vld [vmem:[%s10175_s1 + $0x78] sm:$0xff] }
 0x6c7   :  { %v1374_v52 = vpack.c.bf16 %v1346_v21, %v1342_v59  ;;  %v1215_v31 = vpop.permute.xlu1 %1214  ;;  %1394 = vmatprep.subr.bf16.mxu0 %v1373_v38  ;;  %v1375_v4 = vpack.c.bf16 %v1347_v10, %v1343_v43 }
 0x6c8   :  { %1395 = vmatpush1.bf16.msra.mxu0 %v1372_v40  ;;  %v1222_v17 = vsel %vm45_vm5, %v1213_v8, %v1215_v31 }
 0x6c9   :  { %1437 = vmatprep.subr.bf16.mxu1 %v1375_v4  ;;  %v1217_v0 = vpop.permute.xlu0 %1216  ;;  %v1333_v36 = vmul.f32 %v6868_v54, %v1222_v17 }
 0x6ca   :  { %1438 = vmatpush1.bf16.msra.mxu1 %v1374_v52  ;;  %v1221_v13 = vsel %vm45_vm5, %v1215_v31, %v1217_v0 }
 0x6cb   :  { %v1219_v48 = vpop.permute.xlu1 %1218  ;;  %v1334_v52 = vmul.f32 %v6915_v12, %v1221_v13  ;;  %v6948_v13 = vld [vmem:[%s10175_s1 + $0x30] sm:$0xff] }
 0x6cc   :  { %v1220_v5 = vsel %vm45_vm5, %v1217_v0, %v1219_v48  ;;  %v1223_v34 = vsel %vm45_vm5, %v1219_v48, %v1213_v8 }
 0x6cd   :  { %v1225_v47 = vpop.permute.xlu0 %1224  ;;  %v1332_v10 = vmul.f32 %v6883_v51, %v1223_v34  ;;  %v1335_v8 = vmul.f32 %v6894_v9, %v1220_v5  ;;  %v6942_v34 = vld [vmem:[%s10175_s1 + $0x28] sm:$0xff] }
 0x6cf   :  { %v1227_v26 = vpop.permute.xlu1 %1226 }
 0x6d0   :  { %v1234_v60 = vsel %vm48_vm6, %v1225_v47, %v1227_v26 }
 0x6d1   :  { %v1337_v58 = vmul.f32 %v6875_v24, %v1234_v60  ;;  %v1229_v22 = vpop.permute.xlu0 %1228  ;;  %v6932_v60 = vld [vmem:[%s10175_s1 + $0x8] sm:$0xff] }
 0x6d2   :  { %v1233_v1 = vsel %vm48_vm6, %v1227_v26, %v1229_v22 }
 0x6d3   :  { %v1231_v6 = vpop.permute.xlu1 %1230  ;;  %v1369_v59 = vpack.c.bf16 %v1337_v58, %v1333_v36  ;;  %v1338_v14 = vmul.f32 %v6889_v27, %v1233_v1 }
 0x6d4   :  { %v1232_v62 = vsel %vm48_vm6, %v1229_v22, %v1231_v6  ;;  %v1235_v21 = vsel %vm48_vm6, %v1231_v6, %v1225_v47 }
 0x6d5   :  { %v1336_v38 = vmul.f32 %v6905_v20, %v1235_v21  ;;  %v1339_v43 = vmul.f32 %v6910_v7, %v1232_v62  ;;  %v1189_v40 = vpop.permute.xlu0 %1188  ;;  %1396 = vmatprep.subr.bf16.mxu0 %v1369_v59  ;;  %v1370_v48 = vpack.c.bf16 %v1338_v14, %v1334_v52  ;;  %v6953_v59 = vld [vmem:[%s10175_s1] sm:$0xff]  ;;  %v6958_v14 = vld [vmem:[%s10175_s1 + $0x18] sm:$0xff] }
 0x6d7   :  { %v1368_v31 = vpack.c.bf16 %v1336_v38, %v1332_v10  ;;  %v1191_v4 = vpop.permute.xlu1 %1190  ;;  %v1371_v0 = vpack.c.bf16 %v1339_v43, %v1335_v8  ;;  %v6969_v8 = vld [vmem:[%s10175_s1 + $0x10] sm:$0xff] }
 0x6d8   :  { %v1198_v36 = vsel %vm39_vm7, %v1189_v40, %v1191_v4  ;;  %10231 = vst [vmem:[#allocation4_spill] sm:$0xff] %v6969_v8 }
 0x6d9   :  { %1439 = vmatprep.subr.bf16.mxu1 %v1371_v0  ;;  %v1193_v17 = vpop.permute.xlu0 %1192  ;;  %1397 = vmatpush1.bf16.msra.mxu0 %v1368_v31  ;;  %v1325_v5 = vmul.f32 %v6932_v60, %v1198_v36  ;;  %v6983_v36 = vld [vmem:[%s10175_s1 + $0x20] sm:$0xff] }
 0x6da   :  { %1440 = vmatpush1.bf16.msra.mxu1 %v1370_v48  ;;  %v1197_v38 = vsel %vm39_vm7, %v1191_v4, %v1193_v17 }
 0x6db   :  { %v1195_v47 = vpop.permute.xlu1 %1194 }
 0x6dc   :  { %v1196_v62 = vsel %vm39_vm7, %v1193_v17, %v1195_v47  ;;  %v1199_v21 = vsel %vm39_vm7, %v1195_v47, %v1189_v40  ;;  %v6989_v17 = vld [vmem:[%s10175_s1 + $0x38] sm:$0xff] }
 0x6dd   :  { %v1201_v26 = vpop.permute.xlu0 %1200  ;;  %v1324_v48 = vmul.f32 %v6953_v59, %v1199_v21  ;;  %v1327_v47 = vmul.f32 %v6958_v14, %v1196_v62 }
 0x6df   :  { %v1203_v58 = vpop.permute.xlu1 %1202 }
 0x6e0   :  { %v1210_v22 = vsel %vm42_vm8, %v1201_v26, %v1203_v58 }
 0x6e1   :  { %v1329_v1 = vmul.f32 %v6942_v34, %v1210_v22  ;;  %v1205_v6 = vpop.permute.xlu0 %1204 }
 0x6e2   :  { %v1209_v10 = vsel %vm42_vm8, %v1203_v58, %v1205_v6 }
 0x6e3   :  { %v1207_v43 = vpop.permute.xlu1 %1206  ;;  %v1365_v52 = vpack.c.bf16 %v1329_v1, %v1325_v5  ;;  %v1330_v31 = vmul.f32 %v6948_v13, %v1209_v10 }
 0x6e4   :  { %v1208_v0 = vsel %vm42_vm8, %v1205_v6, %v1207_v43  ;;  %v1211_v40 = vsel %vm42_vm8, %v1207_v43, %v1201_v26  ;;  %v1326_v26 = vmul.f32 %v6969_v8, %v1197_v38  ;;  %v6996_v6 = vld [vmem:[%s10174_s2] sm:$0xff]  }
 0x6e5   :  { %v1328_v4 = vmul.f32 %v6983_v36, %v1211_v40  ;;  %v1331_v58 = vmul.f32 %v6989_v17, %v1208_v0  ;;  %1398 = vmatprep.subr.bf16.mxu0 %v1365_v52  ;;  %10232 = vst [vmem:[#allocation5_spill] sm:$0xff] %v6996_v6  ;;  %v4868_v38 = vld [vmem:[%s10176_s0 + $0xe0] sm:$0xff]  ;;  %v4870_v52 = vld [vmem:[%s10176_s0 + $0xf0] sm:$0xff]  ;;  %v4869_v0 = vld [vmem:[%s10176_s0 + $0xe8] sm:$0xff] }
 0x6e6   :  { %v1366_v1 = vpack.c.bf16 %v1330_v31, %v1326_v26 }
 0x6e7   :  { %v1364_v22 = vpack.c.bf16 %v1328_v4, %v1324_v48  ;;  %v1367_v5 = vpack.c.bf16 %v1331_v58, %v1327_v47  ;;  %v4871_v47 = vld [vmem:[%s10176_s0 + $0xf8] sm:$0xff] }
 0x6e9   :  { %1399 = vmatpush1.bf16.msra.mxu0 %v1364_v22  ;;  %1441 = vmatprep.subr.bf16.mxu1 %v1367_v5 }
 0x6ea   :  { %1442 = vmatpush1.bf16.msra.mxu1 %v1366_v1 }
 0x6ec   :  { %4876 = vmatmul.mubr.msk.bf16.vlgmr.msra.gmra.mxu0 %vm166_vm0, %v6996_v6 }
 0x6ed   :  { %4877 = vmatmul.mubr.msk.bf16.vlgmr.msra.gmra.mxu1 %vm166_vm0, %v6996_v6  ;;  %1706 = vmatprep.mubr.bf16.mxu0 %v10220_v41 }
 0x6ee   :  { %1747 = vmatprep.mubr.bf16.mxu1 %v10220_v41 }
 0x7ac   :  { %v7004_v62 = vpop.f32.mrf.mxu0 }
 0x7ad   :  { %10233 = vst [vmem:[#allocation3_spill] sm:$0xff] %v7004_v62  ;;  %v7006_v21 = vpop.f32.mrf.mxu1 }
 0x7ae   :  { %10234 = vst [vmem:[#allocation6_spill] sm:$0xff] %v7006_v21  ;;  %v7008_v10 = vpop.f32.mrf.mxu0 }
 0x7af   :  { %10235 = vst [vmem:[#allocation9_spill] sm:$0xff] %v7008_v10  ;;  %v7013_v43 = vpop.f32.mrf.mxu1 }
 0x7b0   :  { %10236 = vst [vmem:[#allocation10_spill] sm:$0xff] %v7013_v43  ;;  %v1422_v31 = vpop.f32.mrf.mxu0 }
 0x7b1   :  { %v1423_v40 = vadd.f32 %v4868_v38, %v1422_v31  ;;  %v1465_v48 = vpop.f32.mrf.mxu1 }
 0x7b2   :  { %v1466_v4 = vadd.f32 %v4870_v52, %v1465_v48  ;;  %v1424_v58 = vpop.f32.mrf.mxu0 }
 0x7b3   :  { %v4882_v26 = vmul.f32 -1.442695, %v1423_v40  ;;  %v1425_v22 = vadd.f32 %v4869_v0, %v1424_v58  ;;  %v1467_v5 = vpop.f32.mrf.mxu1 }
 0x7b4   :  { %v4884_v1 = vmul.f32 -1.442695, %v1466_v4  ;;  %v1468_v6 = vadd.f32 %v4871_v47, %v1467_v5 }
 0x7b5   :  { %5123 = vpow2.f32 %v4882_v26  ;;  %v4883_v43 = vmul.f32 -1.442695, %v1425_v22 }
 0x7b6   :  { %5125 = vpow2.f32 %v4884_v1  ;;  %v4885_v10 = vmul.f32 -1.442695, %v1468_v6 }
 0x7b7   :  { %5127 = vpow2.f32 %v4883_v43 }
 0x7b8   :  { %5129 = vpow2.f32 %v4885_v10 }
 0x7c2   :  { %v5124_v21 = vpop.eup %5123 }
 0x7c3   :  { %v5126_v38 = vpop.eup %5125  ;;  %v1506_v31 = vadd.f32 1.0, %v5124_v21 }
 0x7c4   :  { %v5128_v62 = vpop.eup %5127  ;;  %v1508_v41 = vadd.f32 1.0, %v5126_v38 }
 0x7c5   :  { %v5130_v8 = vpop.eup %5129  ;;  %5131 = vrcp.f32 %v1506_v31  ;;  %v1507_v52 = vadd.f32 1.0, %v5128_v62 }
 0x7c6   :  { %5133 = vrcp.f32 %v1508_v41  ;;  %v1509_v40 = vadd.f32 1.0, %v5130_v8 }
 0x7c7   :  { %5135 = vrcp.f32 %v1507_v52 }
 0x7c8   :  { %5137 = vrcp.f32 %v1509_v40 }
 0x7d2   :  { %v5132_v0 = vpop.eup %5131 }
 0x7d3   :  { %v5134_v48 = vpop.eup %5133  ;;  %v7025_v47 = vmul.f32 %v5132_v0, %v6595_v45 }
 0x7d4   :  { %v5136_v6 = vpop.eup %5135  ;;  %v7033_v43 = vmul.f32 %v5134_v48, %v6598_v23 }
 0x7d5   :  { %v7028_v10 = vmul.f32 %v5136_v6, %v6605_v37  ;;  %1606 = vrot.lane.b32.xlu0 %v7025_v47, %s5511_s18  ;;  %v5138_v21 = vpop.eup %5137 }
 0x7d6   :  { %v7038_v41 = vmul.f32 %v5138_v21, %v6613_v19 }
 0x7d7   :  { %1608 = vrot.lane.b32.xlu1 %v7028_v10, %s5511_s18 }
 0x7d9   :  { %1610 = vrot.lane.b32.xlu0 %v7033_v43, %s5511_s18 }
 0x7db   :  { %1612 = vrot.lane.b32.xlu1 %v7038_v41, %s5511_s18 }
 0x7dd   :  { %1582 = vrot.lane.b32.xlu0 %v7025_v47, %s5513_s20 }
 0x7df   :  { %1584 = vrot.lane.b32.xlu1 %v7028_v10, %s5513_s20 }
 0x7e1   :  { %1586 = vrot.lane.b32.xlu0 %v7033_v43, %s5513_s20 }
 0x7e3   :  { %1588 = vrot.lane.b32.xlu1 %v7038_v41, %s5513_s20 }
 0x7e5   :  { %1594 = vrot.lane.b32.xlu0 %v7025_v47, %s5512_s19 }
 0x7e7   :  { %1596 = vrot.lane.b32.xlu1 %v7028_v10, %s5512_s19 }
 0x7e9   :  { %1598 = vrot.lane.b32.xlu0 %v7033_v43, %s5512_s19 }
 0x7eb   :  { %1600 = vrot.lane.b32.xlu1 %v7038_v41, %s5512_s19 }
 0x7ed   :  { %1570 = vrot.lane.b32.xlu0 %v7025_v47, %s5514_s21 }
 0x7ef   :  { %1572 = vrot.lane.b32.xlu1 %v7028_v10, %s5514_s21 }
 0x7f1   :  { %1574 = vrot.lane.b32.xlu0 %v7033_v43, %s5514_s21 }
 0x7f3   :  { %1576 = vrot.lane.b32.xlu1 %v7038_v41, %s5514_s21 }
 0x7f5   :  { %1546 = vrot.lane.b32.xlu0 %v7025_v47, %s5516_s23 }
 0x7f7   :  { %1548 = vrot.lane.b32.xlu1 %v7028_v10, %s5516_s23 }
 0x7f9   :  { %1550 = vrot.lane.b32.xlu0 %v7033_v43, %s5516_s23 }
 0x7fb   :  { %1552 = vrot.lane.b32.xlu1 %v7038_v41, %s5516_s23 }
 0x7fd   :  { %1558 = vrot.lane.b32.xlu0 %v7025_v47, %s5515_s22 }
 0x7ff   :  { %1560 = vrot.lane.b32.xlu1 %v7028_v10, %s5515_s22 }
 0x801   :  { %1562 = vrot.lane.b32.xlu0 %v7033_v43, %s5515_s22 }
 0x803   :  { %1564 = vrot.lane.b32.xlu1 %v7038_v41, %s5515_s22 }
 0x805   :  { %1522 = vrot.lane.b32.xlu0 %v7025_v47, %s5519_s25 }
 0x807   :  { %1524 = vrot.lane.b32.xlu1 %v7028_v10, %s5519_s25 }
 0x809   :  { %1526 = vrot.lane.b32.xlu0 %v7033_v43, %s5519_s25 }
 0x80b   :  { %1528 = vrot.lane.b32.xlu1 %v7038_v41, %s5519_s25 }
 0x80d   :  { %1534 = vrot.lane.b32.xlu0 %v7025_v47, %s5518_s24 }
 0x80f   :  { %1536 = vrot.lane.b32.xlu1 %v7028_v10, %s5518_s24 }
 0x811   :  { %1538 = vrot.lane.b32.xlu0 %v7033_v43, %s5518_s24 }
 0x813   :  { %1540 = vrot.lane.b32.xlu1 %v7038_v41, %s5518_s24 }
 0x847   :  { %v1607_v8 = vpop.permute.xlu0 %1606 }
 0x849   :  { %v1609_v62 = vpop.permute.xlu1 %1608 }
 0x84a   :  { %v1616_v4 = vsel %vm60_vm1, %v1607_v8, %v1609_v62 }
 0x84b   :  { %v1611_v58 = vpop.permute.xlu0 %1610  ;;  %v1650_v26 = vmul.f32 %v1616_v4, %v6691_v3 }
 0x84c   :  { %v1615_v22 = vsel %vm60_vm1, %v1609_v62, %v1611_v58 }
 0x84d   :  { %v1651_v5 = vmul.f32 %v1615_v22, %v6701_v2  ;;  %v1613_v1 = vpop.permute.xlu1 %1612  ;;  %v1670_v3 = vpack.c.bf16 %v6711_v57, %v1650_v26 }
 0x84e   :  { %v1614_v38 = vsel %vm60_vm1, %v1611_v58, %v1613_v1  ;;  %v1617_v31 = vsel %vm60_vm1, %v1613_v1, %v1607_v8 }
 0x84f   :  { %v1652_v52 = vmul.f32 %v1614_v38, %v6719_v11  ;;  %v1653_v40 = vmul.f32 %v1617_v31, %v6724_v53  ;;  %v1583_v0 = vpop.permute.xlu0 %1582  ;;  %v1671_v48 = vpack.c.bf16 %v6709_v56, %v1651_v5 }
 0x851   :  { %v1672_v6 = vpack.c.bf16 %v6727_v32, %v1652_v52  ;;  %v1585_v21 = vpop.permute.xlu1 %1584  ;;  %1680 = vmatprep.subr.bf16.mxu0 %v1671_v48  ;;  %v1673_v2 = vpack.c.bf16 %v6729_v42, %v1653_v40 }
 0x852   :  { %1681 = vmatpush1.bf16.msra.mxu0 %v1670_v3  ;;  %v1592_v26 = vsel %vm54_vm3, %v1583_v0, %v1585_v21 }
 0x853   :  { %1721 = vmatprep.subr.bf16.mxu1 %v1673_v2  ;;  %v1587_v62 = vpop.permute.xlu0 %1586  ;;  %v1642_v2 = vmul.f32 %v1592_v26, %v6763_v28 }
 0x854   :  { %1722 = vmatpush1.bf16.msra.mxu1 %v1672_v6  ;;  %v1591_v22 = vsel %vm54_vm3, %v1585_v21, %v1587_v62 }
 0x855   :  { %v1589_v8 = vpop.permute.xlu1 %1588  ;;  %v1643_v48 = vmul.f32 %v1591_v22, %v6749_v18 }
 0x856   :  { %v1590_v1 = vsel %vm54_vm3, %v1587_v62, %v1589_v8  ;;  %v1593_v31 = vsel %vm54_vm3, %v1589_v8, %v1583_v0 }
 0x857   :  { %v1595_v4 = vpop.permute.xlu0 %1594  ;;  %v1644_v21 = vmul.f32 %v1590_v1, %v6770_v46  ;;  %v1645_v8 = vmul.f32 %v1593_v31, %v6777_v61 }
 0x859   :  { %v1597_v58 = vpop.permute.xlu1 %1596 }
 0x85a   :  { %v1604_v5 = vsel %vm57_vm2, %v1595_v4, %v1597_v58 }
 0x85b   :  { %v1599_v38 = vpop.permute.xlu0 %1598  ;;  %v1646_v52 = vmul.f32 %v1604_v5, %v6744_v33 }
 0x85c   :  { %v1603_v40 = vsel %vm57_vm2, %v1597_v58, %v1599_v38 }
 0x85d   :  { %v1647_v3 = vmul.f32 %v1603_v40, %v6758_v16  ;;  %v1601_v6 = vpop.permute.xlu1 %1600  ;;  %v1666_v40 = vpack.c.bf16 %v1646_v52, %v1642_v2  ;;  %v1635_v52 = vmul.f32 %v7028_v10, %v6820_v49  ;;  %v1637_v10 = vmul.f32 %v7038_v41, %v6848_v50 }
 0x85e   :  { %v1602_v62 = vsel %vm57_vm2, %v1599_v38, %v1601_v6  ;;  %v1605_v0 = vsel %vm57_vm2, %v1601_v6, %v1595_v4 }
 0x85f   :  { %v1648_v5 = vmul.f32 %v1602_v62, %v6787_v63  ;;  %v1649_v58 = vmul.f32 %v1605_v0, %v6792_v39  ;;  %v1571_v22 = vpop.permute.xlu0 %1570  ;;  %v1667_v18 = vpack.c.bf16 %v1647_v3, %v1643_v48  ;;  %v1636_v3 = vmul.f32 %v7033_v43, %v6830_v55 }
 0x861   :  { %v1668_v16 = vpack.c.bf16 %v1648_v5, %v1644_v21  ;;  %v1573_v33 = vpop.permute.xlu1 %1572  ;;  %1682 = vmatprep.subr.bf16.mxu0 %v1667_v18  ;;  %v1669_v26 = vpack.c.bf16 %v1649_v58, %v1645_v8  ;;  %v1634_v18 = vmul.f32 %v7025_v47, %v6825_v29 }
 0x862   :  { %v1580_v1 = vsel %vm51_vm4, %v1571_v22, %v1573_v33  ;;  %1683 = vmatpush1.bf16.msra.mxu0 %v1666_v40 }
 0x863   :  { %1723 = vmatprep.subr.bf16.mxu1 %v1669_v26  ;;  %v1575_v38 = vpop.permute.xlu0 %1574  ;;  %v1638_v4 = vmul.f32 %v1580_v1, %v6808_v35 }
 0x864   :  { %v1579_v31 = vsel %vm51_vm4, %v1573_v33, %v1575_v38  ;;  %1724 = vmatpush1.bf16.msra.mxu1 %v1668_v16 }
 0x865   :  { %v1639_v6 = vmul.f32 %v1579_v31, %v6815_v30  ;;  %v1577_v48 = vpop.permute.xlu1 %1576  ;;  %v1662_v8 = vpack.c.bf16 %v1638_v4, %v1634_v18 }
 0x866   :  { %v1578_v2 = vsel %vm51_vm4, %v1575_v38, %v1577_v48  ;;  %v1581_v21 = vsel %vm51_vm4, %v1577_v48, %v1571_v22 }
 0x867   :  { %v1640_v33 = vmul.f32 %v1578_v2, %v6838_v15  ;;  %v1641_v16 = vmul.f32 %v1581_v21, %v6843_v25  ;;  %v1547_v62 = vpop.permute.xlu0 %1546  ;;  %v1663_v0 = vpack.c.bf16 %v1639_v6, %v1635_v52 }
 0x869   :  { %v1664_v47 = vpack.c.bf16 %v1640_v33, %v1636_v3  ;;  %v1549_v5 = vpop.permute.xlu1 %1548  ;;  %1684 = vmatprep.subr.bf16.mxu0 %v1663_v0  ;;  %v1665_v43 = vpack.c.bf16 %v1641_v16, %v1637_v10 }
 0x86a   :  { %1685 = vmatpush1.bf16.msra.mxu0 %v1662_v8  ;;  %v1556_v26 = vsel %vm45_vm5, %v1547_v62, %v1549_v5 }
 0x86b   :  { %1725 = vmatprep.subr.bf16.mxu1 %v1665_v43  ;;  %v1551_v58 = vpop.permute.xlu0 %1550  ;;  %v1627_v41 = vmul.f32 %v1556_v26, %v6868_v54 }
 0x86c   :  { %1726 = vmatpush1.bf16.msra.mxu1 %v1664_v47  ;;  %v1555_v18 = vsel %vm45_vm5, %v1549_v5, %v1551_v58 }
 0x86d   :  { %v1553_v40 = vpop.permute.xlu1 %1552  ;;  %v1628_v5 = vmul.f32 %v1555_v18, %v6915_v12 }
 0x86e   :  { %v1554_v6 = vsel %vm45_vm5, %v1551_v58, %v1553_v40  ;;  %v1557_v48 = vsel %vm45_vm5, %v1553_v40, %v1547_v62 }
 0x86f   :  { %v1559_v22 = vpop.permute.xlu0 %1558  ;;  %v1626_v0 = vmul.f32 %v1557_v48, %v6883_v51  ;;  %v1629_v62 = vmul.f32 %v1554_v6, %v6894_v9 }
 0x871   :  { %v1561_v1 = vpop.permute.xlu1 %1560 }
 0x872   :  { %v1568_v38 = vsel %vm48_vm6, %v1559_v22, %v1561_v1 }
 0x873   :  { %v1631_v4 = vmul.f32 %v1568_v38, %v6875_v24  ;;  %v1563_v31 = vpop.permute.xlu0 %1562 }
 0x874   :  { %v1567_v52 = vsel %vm48_vm6, %v1561_v1, %v1563_v31 }
 0x875   :  { %v1565_v3 = vpop.permute.xlu1 %1564  ;;  %v1659_v2 = vpack.c.bf16 %v1631_v4, %v1627_v41  ;;  %v1632_v21 = vmul.f32 %v1567_v52, %v6889_v27 }
 0x876   :  { %v1566_v33 = vsel %vm48_vm6, %v1563_v31, %v1565_v3  ;;  %v1569_v16 = vsel %vm48_vm6, %v1565_v3, %v1559_v22 }
 0x877   :  { %v1630_v10 = vmul.f32 %v1569_v16, %v6905_v20  ;;  %v1633_v8 = vmul.f32 %v1566_v33, %v6910_v7  ;;  %v1523_v47 = vpop.permute.xlu0 %1522  ;;  %1686 = vmatprep.subr.bf16.mxu0 %v1659_v2  ;;  %v1660_v26 = vpack.c.bf16 %v1632_v21, %v1628_v5 }
 0x879   :  { %v1658_v43 = vpack.c.bf16 %v1630_v10, %v1626_v0  ;;  %v1525_v58 = vpop.permute.xlu1 %1524  ;;  %v1661_v40 = vpack.c.bf16 %v1633_v8, %v1629_v62 }
 0x87a   :  { %v1532_v41 = vsel %vm39_vm7, %v1523_v47, %v1525_v58 }
 0x87b   :  { %1727 = vmatprep.subr.bf16.mxu1 %v1661_v40  ;;  %v1527_v1 = vpop.permute.xlu0 %1526  ;;  %1687 = vmatpush1.bf16.msra.mxu0 %v1658_v43  ;;  %v1619_v6 = vmul.f32 %v1532_v41, %v6932_v60  ;;  %v10237_v43 = vld [vmem:[#allocation4_spill] sm:$0xff]  ;;  %v4865_v41 = vld [vmem:[%s10176_s0 + $0xc8] sm:$0xff] }
 0x87c   :  { %1728 = vmatpush1.bf16.msra.mxu1 %v1660_v26  ;;  %v1531_v21 = vsel %vm39_vm7, %v1525_v58, %v1527_v1 }
 0x87d   :  { %v1529_v22 = vpop.permute.xlu1 %1528  ;;  %v1620_v58 = vmul.f32 %v1531_v21, %v10237_v43 }
 0x87e   :  { %v1530_v18 = vsel %vm39_vm7, %v1527_v1, %v1529_v22  ;;  %v1533_v3 = vsel %vm39_vm7, %v1529_v22, %v1523_v47  ;;  %v7211_v22 = vld [vmem:[%s10177_s3] sm:$0xf] }
 0x87f   :  { %v1535_v38 = vpop.permute.xlu0 %1534  ;;  %v1618_v10 = vmul.f32 %v1533_v3, %v6953_v59  ;;  %v1621_v8 = vmul.f32 %v1530_v18, %v6958_v14  ;;  %v10241_v18 = vld [vmem:[#allocation9_spill] sm:$0xff] }
 0x880   :  { %v1421_v3 = vadd.f32 %v4865_v41, %v10241_v18  ;;  %v4873_v41 = vld [vmem:[%s10176_s0 + $0x108] sm:$0xff] }
 0x881   :  { %v1537_v4 = vpop.permute.xlu1 %1536 }
 0x882   :  { %v1544_v31 = vsel %vm42_vm8, %v1535_v38, %v1537_v4 }
 0x883   :  { %v1623_v48 = vmul.f32 %v6942_v34, %v1544_v31  ;;  %v1539_v52 = vpop.permute.xlu0 %1538 }
 0x884   :  { %v1543_v2 = vsel %vm42_vm8, %v1537_v4, %v1539_v52  ;;  %v10239_v4 = vld [vmem:[#allocation3_spill] sm:$0xff] }
 0x885   :  { %v1541_v33 = vpop.permute.xlu1 %1540  ;;  %v1655_v16 = vpack.c.bf16 %v1623_v48, %v1619_v6  ;;  %v1624_v0 = vmul.f32 %v1543_v2, %v6948_v13  ;;  %v4867_v6 = vld [vmem:[%s10176_s0 + $0xd8] sm:$0xff]  ;;  %v10240_v48 = vld [vmem:[#allocation6_spill] sm:$0xff] }
 0x886   :  { %v1542_v34 = vsel %vm42_vm8, %v1539_v52, %v1541_v33  ;;  %v1545_v62 = vsel %vm42_vm8, %v1541_v33, %v1535_v38  ;;  %v4866_v38 = vld [vmem:[%s10176_s0 + $0xd0] sm:$0xff]  ;;  %v10242_v2 = vld [vmem:[#allocation10_spill] sm:$0xff] }
 0x887   :  { %v1622_v47 = vmul.f32 %v6983_v36, %v1545_v62  ;;  %v1625_v5 = vmul.f32 %v6989_v17, %v1542_v34  ;;  %1688 = vmatprep.subr.bf16.mxu0 %v1655_v16  ;;  %v1656_v1 = vpack.c.bf16 %v1624_v0, %v1620_v58  ;;  %v10238_v36 = vmov 0   ;;  %v4864_v17 = vld [vmem:[%s10176_s0 + $0xc0] sm:$0xff] }
 0x888   :  { %v1419_v31 = vadd.f32 %v4864_v17, %v10239_v4  ;;  %v1462_v52 = vadd.f32 %v4866_v38, %v10240_v48  ;;  %v1464_v21 = vadd.f32 %v4867_v6, %v10242_v2  ;;  %v4879_v0 = vmul.f32 -1.442695, %v1421_v3  ;;  %v4874_v17 = vld [vmem:[%s10176_s0 + $0x110] sm:$0xff]  ;;  %v4875_v6 = vld [vmem:[%s10176_s0 + $0x118] sm:$0xff] }
 0x889   :  { %v1654_v40 = vpack.c.bf16 %v1622_v47, %v1618_v10  ;;  %v1657_v26 = vpack.c.bf16 %v1625_v5, %v1621_v8 }
 0x88a   :  { %v4878_v33 = vmul.f32 -1.442695, %v1419_v31  ;;  %v4880_v16 = vmul.f32 -1.442695, %v1462_v52  ;;  %v4881_v34 = vmul.f32 -1.442695, %v1464_v21 }
 0x88b   :  { %1689 = vmatpush1.bf16.msra.mxu0 %v1654_v40  ;;  %1729 = vmatprep.subr.bf16.mxu1 %v1657_v26 }
 0x88c   :  { %1730 = vmatpush1.bf16.msra.mxu1 %v1656_v1  ;;  %5139 = vpow2.f32 %v4878_v33  ;;  %v4872_v1 = vld [vmem:[%s10176_s0 + $0x100] sm:$0xff] }
 0x88d   :  { %5141 = vpow2.f32 %v4880_v16 }
 0x88e   :  { %4886 = vmatmul.mubr.msk.bf16.vlgmr.msra.gmra.mxu0 %vm166_vm0, %v7211_v22  ;;  %5143 = vpow2.f32 %v4879_v0 }
 0x88f   :  { %4887 = vmatmul.mubr.msk.bf16.vlgmr.msra.gmra.mxu1 %vm166_vm0, %v7211_v22  ;;  %2022 = vmatprep.mubr.bf16.mxu0 %v10238_v36  ;;  %5145 = vpow2.f32 %v4881_v34 }
 0x890   :  { %2065 = vmatprep.mubr.bf16.mxu1 %v10238_v36 }
 0x899   :  { %v5140_v62 = vpop.eup %5139 }
 0x89a   :  { %v5142_v10 = vpop.eup %5141  ;;  %v1482_v5 = vadd.f32 1.0, %v5140_v62 }
 0x89b   :  { %v5144_v8 = vpop.eup %5143  ;;  %v1484_v58 = vadd.f32 1.0, %v5142_v10 }
 0x89c   :  { %v5146_v47 = vpop.eup %5145  ;;  %v1483_v40 = vadd.f32 1.0, %v5144_v8  ;;  %5147 = vrcp.f32 %v1482_v5 }
 0x89d   :  { %v1485_v26 = vadd.f32 1.0, %v5146_v47  ;;  %5149 = vrcp.f32 %v1484_v58 }
 0x89e   :  { %5151 = vrcp.f32 %v1483_v40 }
 0x89f   :  { %5153 = vrcp.f32 %v1485_v26 }
 0x8a9   :  { %v5148_v34 = vpop.eup %5147 }
 0x8aa   :  { %v5150_v62 = vpop.eup %5149  ;;  %v1760_v47 = vsub.f32 1.0, %v5148_v34 }
 0x8ab   :  { %v5152_v10 = vpop.eup %5151  ;;  %v1762_v5 = vsub.f32 1.0, %v5150_v62 }
 0x8ac   :  { %v5154_v8 = vpop.eup %5153  ;;  %v1761_v58 = vsub.f32 1.0, %v5152_v10 }
 0x8ad   :  { %v1763_v26 = vsub.f32 1.0, %v5154_v8 }
 0x94e   :  { %v1708_v38 = vpop.f32.mrf.mxu0 }
 0x94f   :  { %v1709_v4 = vadd.f32 %v4872_v1, %v1708_v38  ;;  %v1749_v31 = vpop.f32.mrf.mxu1 }
 0x950   :  { %v1750_v48 = vadd.f32 %v4874_v17, %v1749_v31  ;;  %v1710_v52 = vpop.f32.mrf.mxu0  ;;  %v1764_v17 = vmul.f32 %v1760_v47, %v6595_v45 }
 0x951   :  { %5155 = vtanh.f32 %v1709_v4  ;;  %v1711_v18 = vadd.f32 %v4873_v41, %v1710_v52  ;;  %v1751_v3 = vpop.f32.mrf.mxu1  ;;  %v1766_v4 = vmul.f32 %v1762_v5, %v6598_v23  ;;  %v1765_v52 = vmul.f32 %v1761_v58, %v6605_v37 }
 0x952   :  { %5157 = vtanh.f32 %v1750_v48  ;;  %v1752_v2 = vadd.f32 %v4875_v6, %v1751_v3  ;;  %v1712_v21 = vpop.f32.mrf.mxu0 }
 0x953   :  { %5159 = vtanh.f32 %v1711_v18  ;;  %v1753_v33 = vpop.f32.mrf.mxu1 }
 0x954   :  { %5161 = vtanh.f32 %v1752_v2  ;;  %v1713_v16 = vpop.f32.mrf.mxu0  ;;  %v1767_v2 = vmul.f32 %v1763_v26, %v6613_v19 }
 0x955   :  { %v1754_v0 = vpop.f32.mrf.mxu1 }
 0x956   :  { %v7344_v0 = vld [vmem:[%s10175_s1 + $0x100] sm:$0xff] }
 0x95e   :  { %v5156_v40 = vpop.eup %5155 }
 0x95f   :  { %v5158_v1 = vpop.eup %5157  ;;  %v1768_v38 = vmul.f32 %v5156_v40, %v5148_v34 }
 0x960   :  { %v5160_v41 = vpop.eup %5159  ;;  %v1770_v31 = vmul.f32 %v5158_v1, %v5150_v62 }
 0x961   :  { %v5162_v6 = vpop.eup %5161  ;;  %v7249_v48 = vadd.f32 %v1768_v38, %v1764_v17  ;;  %v1769_v18 = vmul.f32 %v5160_v41, %v5152_v10  ;;  %v7352_v10 = vld [vmem:[%s10175_s1 + $0x108] sm:$0xff] }
 0x962   :  { %v7252_v3 = vadd.f32 %v1770_v31, %v1766_v4  ;;  %v1771_v21 = vmul.f32 %v5162_v6, %v5154_v8 }
 0x963   :  { %4888 = vst [vmem:[%s10178_s4 + $0x40] sm:$0xff] %v7249_v48  ;;  %v7259_v45 = vadd.f32 %v1769_v18, %v1765_v52  ;;  %1878 = vrot.lane.b32.xlu0 %v7249_v48, %s5511_s18 }
 0x964   :  { %4890 = vst [vmem:[%s10178_s4 + $0x50] sm:$0xff] %v7252_v3  ;;  %v7267_v23 = vadd.f32 %v1771_v21, %v1767_v2 }
 0x965   :  { %4889 = vst [vmem:[%s10178_s4 + $0x48] sm:$0xff] %v7259_v45  ;;  %1880 = vrot.lane.b32.xlu1 %v7259_v45, %s5511_s18 }
 0x966   :  { %4891 = vst [vmem:[%s10178_s4 + $0x58] sm:$0xff] %v7267_v23 }
 0x967   :  { %1882 = vrot.lane.b32.xlu0 %v7252_v3, %s5511_s18 }
 0x969   :  { %1884 = vrot.lane.b32.xlu1 %v7267_v23, %s5511_s18 }
 0x96b   :  { %1854 = vrot.lane.b32.xlu0 %v7249_v48, %s5513_s20 }
 0x96d   :  { %1856 = vrot.lane.b32.xlu1 %v7259_v45, %s5513_s20 }
 0x96f   :  { %1858 = vrot.lane.b32.xlu0 %v7252_v3, %s5513_s20 }
 0x971   :  { %1860 = vrot.lane.b32.xlu1 %v7267_v23, %s5513_s20 }
 0x973   :  { %1866 = vrot.lane.b32.xlu0 %v7249_v48, %s5512_s19 }
 0x975   :  { %1868 = vrot.lane.b32.xlu1 %v7259_v45, %s5512_s19 }
 0x977   :  { %1870 = vrot.lane.b32.xlu0 %v7252_v3, %s5512_s19 }
 0x979   :  { %1872 = vrot.lane.b32.xlu1 %v7267_v23, %s5512_s19 }
 0x97b   :  { %1842 = vrot.lane.b32.xlu0 %v7249_v48, %s5514_s21 }
 0x97d   :  { %1844 = vrot.lane.b32.xlu1 %v7259_v45, %s5514_s21 }
 0x97f   :  { %1846 = vrot.lane.b32.xlu0 %v7252_v3, %s5514_s21 }
 0x981   :  { %1848 = vrot.lane.b32.xlu1 %v7267_v23, %s5514_s21 }
 0x983   :  { %1818 = vrot.lane.b32.xlu0 %v7249_v48, %s5516_s23 }
 0x985   :  { %1820 = vrot.lane.b32.xlu1 %v7259_v45, %s5516_s23 }
 0x987   :  { %1822 = vrot.lane.b32.xlu0 %v7252_v3, %s5516_s23 }
 0x989   :  { %1824 = vrot.lane.b32.xlu1 %v7267_v23, %s5516_s23 }
 0x98b   :  { %1830 = vrot.lane.b32.xlu0 %v7249_v48, %s5515_s22 }
 0x98d   :  { %1832 = vrot.lane.b32.xlu1 %v7259_v45, %s5515_s22 }
 0x98f   :  { %1834 = vrot.lane.b32.xlu0 %v7252_v3, %s5515_s22 }
 0x991   :  { %1836 = vrot.lane.b32.xlu1 %v7267_v23, %s5515_s22 }
 0x993   :  { %1794 = vrot.lane.b32.xlu0 %v7249_v48, %s5519_s25 }
 0x995   :  { %1796 = vrot.lane.b32.xlu1 %v7259_v45, %s5519_s25 }
 0x997   :  { %1798 = vrot.lane.b32.xlu0 %v7252_v3, %s5519_s25 }
 0x999   :  { %1800 = vrot.lane.b32.xlu1 %v7267_v23, %s5519_s25 }
 0x99b   :  { %1806 = vrot.lane.b32.xlu0 %v7249_v48, %s5518_s24 }
 0x99d   :  { %1808 = vrot.lane.b32.xlu1 %v7259_v45, %s5518_s24 }
 0x99f   :  { %1810 = vrot.lane.b32.xlu0 %v7252_v3, %s5518_s24 }
 0x9a1   :  { %1812 = vrot.lane.b32.xlu1 %v7267_v23, %s5518_s24 }
 0x9d5   :  { %v1879_v37 = vpop.permute.xlu0 %1878 }
 0x9d7   :  { %v1881_v19 = vpop.permute.xlu1 %1880 }
 0x9d8   :  { %v1888_v33 = vsel %vm60_vm1, %v1879_v37, %v1881_v19 }
 0x9d9   :  { %v1883_v16 = vpop.permute.xlu0 %1882  ;;  %v1962_v34 = vmul.f32 %v7344_v0, %v1888_v33 }
 0x9da   :  { %v1887_v62 = vsel %vm60_vm1, %v1881_v19, %v1883_v16 }
 0x9db   :  { %v1963_v8 = vmul.f32 %v7352_v10, %v1887_v62  ;;  %v1885_v47 = vpop.permute.xlu1 %1884  ;;  %v1986_v38 = vpack.c.bf16 %v6711_v57, %v1962_v34 }
 0x9dc   :  { %v1886_v5 = vsel %vm60_vm1, %v1883_v16, %v1885_v47  ;;  %v1889_v58 = vsel %vm60_vm1, %v1885_v47, %v1879_v37  ;;  %v10243_v16 = vld [vmem:[#allocation7_spill] sm:$0xff] }
 0x9dd   :  { %v1964_v40 = vmul.f32 %v1886_v5, %v6719_v11  ;;  %v1965_v26 = vmul.f32 %v1889_v58, %v6724_v53  ;;  %v1855_v1 = vpop.permute.xlu0 %1854  ;;  %v1987_v17 = vpack.c.bf16 %v6709_v56, %v1963_v8  ;;  %v10244_v8 = vld [vmem:[#allocation8_spill] sm:$0xff]  ;;  %v10245_v5 = vld [vmem:[#allocation2_spill] sm:$0xff] }
 0x9df   :  { %v1988_v41 = vpack.c.bf16 %v6727_v32, %v1964_v40  ;;  %v1857_v4 = vpop.permute.xlu1 %1856  ;;  %1996 = vmatprep.subr.bf16.mxu0 %v1987_v17  ;;  %v1989_v31 = vpack.c.bf16 %v6729_v42, %v1965_v26 }
 0x9e0   :  { %1997 = vmatpush1.bf16.msra.mxu0 %v1986_v38  ;;  %v1864_v21 = vsel %vm54_vm3, %v1855_v1, %v1857_v4 }
 0x9e1   :  { %2039 = vmatprep.subr.bf16.mxu1 %v1989_v31  ;;  %v1859_v6 = vpop.permute.xlu0 %1858  ;;  %v1954_v26 = vmul.f32 %v1864_v21, %v6763_v28 }
 0x9e2   :  { %2040 = vmatpush1.bf16.msra.mxu1 %v1988_v41  ;;  %v1863_v53 = vsel %vm54_vm3, %v1857_v4, %v1859_v6 }
 0x9e3   :  { %v1861_v52 = vpop.permute.xlu1 %1860  ;;  %v1955_v47 = vmul.f32 %v1863_v53, %v10244_v8 }
 0x9e4   :  { %v1862_v37 = vsel %vm54_vm3, %v1859_v6, %v1861_v52  ;;  %v1865_v33 = vsel %vm54_vm3, %v1861_v52, %v1855_v1 }
 0x9e5   :  { %v1867_v18 = vpop.permute.xlu0 %1866  ;;  %v1956_v17 = vmul.f32 %v1862_v37, %v6770_v46  ;;  %v1957_v41 = vmul.f32 %v1865_v33, %v6777_v61  ;;  %v1947_v37 = vmul.f32 %v7259_v45, %v6820_v49  ;;  %v1948_v33 = vmul.f32 %v7252_v3, %v6830_v55 }
 0x9e6   :  { %v1949_v49 = vmul.f32 %v7267_v23, %v6848_v50 }
 0x9e7   :  { %v1869_v11 = vpop.permute.xlu1 %1868 }
 0x9e8   :  { %v1876_v2 = vsel %vm57_vm2, %v1867_v18, %v1869_v11 }
 0x9e9   :  { %v1871_v19 = vpop.permute.xlu0 %1870  ;;  %v1958_v34 = vmul.f32 %v1876_v2, %v10243_v16 }
 0x9ea   :  { %v1875_v62 = vsel %vm57_vm2, %v1869_v11, %v1871_v19 }
 0x9eb   :  { %v1959_v58 = vmul.f32 %v1875_v62, %v10245_v5  ;;  %v1873_v40 = vpop.permute.xlu1 %1872  ;;  %v1982_v11 = vpack.c.bf16 %v1958_v34, %v1954_v26 }
 0x9ec   :  { %v1874_v38 = vsel %vm57_vm2, %v1871_v19, %v1873_v40  ;;  %v1877_v1 = vsel %vm57_vm2, %v1873_v40, %v1867_v18  ;;  %v1946_v19 = vmul.f32 %v7249_v48, %v6825_v29 }
 0x9ed   :  { %v1960_v4 = vmul.f32 %v1874_v38, %v6787_v63  ;;  %v1961_v31 = vmul.f32 %v1877_v1, %v6792_v39  ;;  %v1843_v6 = vpop.permute.xlu0 %1842  ;;  %v1983_v52 = vpack.c.bf16 %v1959_v58, %v1955_v47 }
 0x9ef   :  { %v1984_v53 = vpack.c.bf16 %v1960_v4, %v1956_v17  ;;  %v1845_v2 = vpop.permute.xlu1 %1844  ;;  %1998 = vmatprep.subr.bf16.mxu0 %v1983_v52  ;;  %v1985_v28 = vpack.c.bf16 %v1961_v31, %v1957_v41 }
 0x9f0   :  { %v1852_v46 = vsel %vm51_vm4, %v1843_v6, %v1845_v2  ;;  %1999 = vmatpush1.bf16.msra.mxu0 %v1982_v11 }
 0x9f1   :  { %2041 = vmatprep.subr.bf16.mxu1 %v1985_v28  ;;  %v1847_v21 = vpop.permute.xlu0 %1846  ;;  %v1950_v18 = vmul.f32 %v1852_v46, %v6808_v35 }
 0x9f2   :  { %v1851_v61 = vsel %vm51_vm4, %v1845_v2, %v1847_v21  ;;  %2042 = vmatpush1.bf16.msra.mxu1 %v1984_v53 }
 0x9f3   :  { %v1951_v63 = vmul.f32 %v1851_v61, %v6815_v30  ;;  %v1849_v39 = vpop.permute.xlu1 %1848  ;;  %v1978_v47 = vpack.c.bf16 %v1950_v18, %v1946_v19 }
 0x9f4   :  { %v1850_v16 = vsel %vm51_vm4, %v1847_v21, %v1849_v39  ;;  %v1853_v35 = vsel %vm51_vm4, %v1849_v39, %v1843_v6 }
 0x9f5   :  { %v1952_v34 = vmul.f32 %v1850_v16, %v6838_v15  ;;  %v1953_v30 = vmul.f32 %v1853_v35, %v6843_v25  ;;  %v1819_v62 = vpop.permute.xlu0 %1818  ;;  %v1979_v8 = vpack.c.bf16 %v1951_v63, %v1947_v37 }
 0x9f7   :  { %v1980_v29 = vpack.c.bf16 %v1952_v34, %v1948_v33  ;;  %v1821_v5 = vpop.permute.xlu1 %1820  ;;  %2000 = vmatprep.subr.bf16.mxu0 %v1979_v8  ;;  %v1981_v55 = vpack.c.bf16 %v1953_v30, %v1949_v49  ;;  %v7453_v49 = vld [vmem:[%s10175_s1 + $0x20] sm:$0xff] }
 0x9f8   :  { %2001 = vmatpush1.bf16.msra.mxu0 %v1978_v47  ;;  %v1828_v15 = vsel %vm45_vm5, %v1819_v62, %v1821_v5 }
 0x9f9   :  { %2043 = vmatprep.subr.bf16.mxu1 %v1981_v55  ;;  %v1823_v58 = vpop.permute.xlu0 %1822  ;;  %v1939_v50 = vmul.f32 %v1828_v15, %v6868_v54 }
 0x9fa   :  { %2044 = vmatpush1.bf16.msra.mxu1 %v1980_v29  ;;  %v1827_v6 = vsel %vm45_vm5, %v1821_v5, %v1823_v58 }
 0x9fb   :  { %v1825_v40 = vpop.permute.xlu1 %1824  ;;  %v1940_v61 = vmul.f32 %v1827_v6, %v6915_v12  ;;  %v4898_v6 = vld [vmem:[%s10176_s0 + $0x150] sm:$0xff] }
 0x9fc   :  { %v1826_v41 = vsel %vm45_vm5, %v1823_v58, %v1825_v40  ;;  %v1829_v4 = vsel %vm45_vm5, %v1825_v40, %v1819_v62 }
 0x9fd   :  { %v1831_v26 = vpop.permute.xlu0 %1830  ;;  %v1938_v2 = vmul.f32 %v1829_v4, %v6883_v51  ;;  %v1941_v28 = vmul.f32 %v1826_v41, %v6894_v9  ;;  %v10246_v41 = vld [vmem:[#allocation5_spill] sm:$0xff]  ;;  %v4896_v4 = vld [vmem:[%s10176_s0 + $0x140] sm:$0xff] }
 0x9ff   :  { %v1833_v25 = vpop.permute.xlu1 %1832 }
 0xa00   :  { %v1840_v17 = vsel %vm48_vm6, %v1831_v26, %v1833_v25 }
 0xa01   :  { %v1943_v38 = vmul.f32 %v1840_v17, %v6875_v24  ;;  %v1835_v1 = vpop.permute.xlu0 %1834 }
 0xa02   :  { %v1839_v31 = vsel %vm48_vm6, %v1833_v25, %v1835_v1 }
 0xa03   :  { %v1837_v52 = vpop.permute.xlu1 %1836  ;;  %v1975_v11 = vpack.c.bf16 %v1943_v38, %v1939_v50  ;;  %v1944_v53 = vmul.f32 %v1839_v31, %v6889_v27 }
 0xa04   :  { %v1838_v54 = vsel %vm48_vm6, %v1835_v1, %v1837_v52  ;;  %v1841_v24 = vsel %vm48_vm6, %v1837_v52, %v1831_v26 }
 0xa05   :  { %v1942_v46 = vmul.f32 %v1841_v24, %v6905_v20  ;;  %v1945_v21 = vmul.f32 %v1838_v54, %v6910_v7  ;;  %v1795_v18 = vpop.permute.xlu0 %1794  ;;  %2002 = vmatprep.subr.bf16.mxu0 %v1975_v11  ;;  %v1976_v37 = vpack.c.bf16 %v1944_v53, %v1940_v61  ;;  %v7438_v20 = vld [vmem:[%s10175_s1 + $0x28] sm:$0xff]  ;;  %v4899_v24 = vld [vmem:[%s10176_s0 + $0x158] sm:$0xff] }
 0xa06   :  { %v4897_v11 = vld [vmem:[%s10176_s0 + $0x148] sm:$0xff] }
 0xa07   :  { %v1974_v63 = vpack.c.bf16 %v1942_v46, %v1938_v2  ;;  %v1797_v27 = vpop.permute.xlu1 %1796  ;;  %v1977_v39 = vpack.c.bf16 %v1945_v21, %v1941_v28 }
 0xa08   :  { %v1804_v9 = vsel %vm39_vm7, %v1795_v18, %v1797_v27 }
 0xa09   :  { %2045 = vmatprep.subr.bf16.mxu1 %v1977_v39  ;;  %v1799_v19 = vpop.permute.xlu0 %1798  ;;  %2003 = vmatpush1.bf16.msra.mxu0 %v1974_v63  ;;  %v1931_v16 = vmul.f32 %v1804_v9, %v6932_v60  ;;  %v7458_v60 = vld [vmem:[%s10175_s1 + $0x38] sm:$0xff] }
 0xa0a   :  { %2046 = vmatpush1.bf16.msra.mxu1 %v1976_v37  ;;  %v1803_v47 = vsel %vm39_vm7, %v1797_v27, %v1799_v19 }
 0xa0b   :  { %v1801_v33 = vpop.permute.xlu1 %1800  ;;  %v1932_v50 = vmul.f32 %v1803_v47, %v10237_v43 }
 0xa0c   :  { %v1802_v30 = vsel %vm39_vm7, %v1799_v19, %v1801_v33  ;;  %v1805_v62 = vsel %vm39_vm7, %v1801_v33, %v1795_v18 }
 0xa0d   :  { %v1807_v51 = vpop.permute.xlu0 %1806  ;;  %v1930_v26 = vmul.f32 %v1805_v62, %v6953_v59  ;;  %v1933_v15 = vmul.f32 %v1802_v30, %v6958_v14 }
 0xa0f   :  { %v1809_v7 = vpop.permute.xlu1 %1808 }
 0xa10   :  { %v1816_v12 = vsel %vm42_vm8, %v1807_v51, %v1809_v7 }
 0xa11   :  { %v1935_v35 = vmul.f32 %v7438_v20, %v1816_v12  ;;  %v1811_v34 = vpop.permute.xlu0 %1810 }
 0xa12   :  { %v1815_v8 = vsel %vm42_vm8, %v1809_v7, %v1811_v34 }
 0xa13   :  { %v1813_v29 = vpop.permute.xlu1 %1812  ;;  %v1971_v5 = vpack.c.bf16 %v1935_v35, %v1931_v16  ;;  %v1936_v55 = vmul.f32 %v1815_v8, %v6948_v13 }
 0xa14   :  { %v1814_v58 = vsel %vm42_vm8, %v1811_v34, %v1813_v29  ;;  %v1817_v40 = vsel %vm42_vm8, %v1813_v29, %v1807_v51 }
 0xa15   :  { %v1934_v25 = vmul.f32 %v7453_v49, %v1817_v40  ;;  %v1937_v17 = vmul.f32 %v7458_v60, %v1814_v58  ;;  %2004 = vmatprep.subr.bf16.mxu0 %v1971_v5  ;;  %v1972_v13 = vpack.c.bf16 %v1936_v55, %v1932_v50 }
 0xa17   :  { %v1970_v38 = vpack.c.bf16 %v1934_v25, %v1930_v26  ;;  %v1973_v1 = vpack.c.bf16 %v1937_v17, %v1933_v15 }
 0xa19   :  { %2005 = vmatpush1.bf16.msra.mxu0 %v1970_v38  ;;  %2047 = vmatprep.subr.bf16.mxu1 %v1973_v1 }
 0xa1a   :  { %2048 = vmatpush1.bf16.msra.mxu1 %v1972_v13  ;;  %v5403_v13 = vld [vmem:[%s10175_s1 + $0x110] sm:$0xff] }
 0xa1c   :  { %4904 = vmatmul.mubr.msk.bf16.vlgmr.msra.gmra.mxu0 %vm166_vm0, %v10246_v41 }
 0xa1d   :  { %4905 = vmatmul.mubr.msk.bf16.vlgmr.msra.gmra.mxu1 %vm166_vm0, %v10246_v41  ;;  %2312 = vmatprep.mubr.bf16.mxu0 %v10238_v36 }
 0xa1e   :  { %2353 = vmatprep.mubr.bf16.mxu1 %v10238_v36 }
 0xadc   :  { %v7478_v59 = vpop.f32.mrf.mxu0 }
 0xadd   :  { %v7480_v14 = vpop.f32.mrf.mxu1 }
 0xade   :  { %v7482_v43 = vpop.f32.mrf.mxu0 }
 0xadf   :  { %v7487_v31 = vpop.f32.mrf.mxu1 }
 0xae0   :  { %v2028_v52 = vpop.f32.mrf.mxu0 }
 0xae1   :  { %v2029_v53 = vadd.f32 %v4896_v4, %v2028_v52  ;;  %v2071_v54 = vpop.f32.mrf.mxu1 }
 0xae2   :  { %v2072_v2 = vadd.f32 %v4898_v6, %v2071_v54  ;;  %v2030_v28 = vpop.f32.mrf.mxu0 }
 0xae3   :  { %v4910_v46 = vmul.f32 -1.442695, %v2029_v53  ;;  %v2031_v21 = vadd.f32 %v4897_v11, %v2030_v28  ;;  %v2073_v18 = vpop.f32.mrf.mxu1 }
 0xae4   :  { %v4912_v61 = vmul.f32 -1.442695, %v2072_v2  ;;  %v2074_v63 = vadd.f32 %v4899_v24, %v2073_v18 }
 0xae5   :  { %5163 = vpow2.f32 %v4910_v46  ;;  %v4911_v27 = vmul.f32 -1.442695, %v2031_v21 }
 0xae6   :  { %5165 = vpow2.f32 %v4912_v61  ;;  %v4913_v39 = vmul.f32 -1.442695, %v2074_v63  ;;  %v5405_v61 = vld [vmem:[%s10175_s1 + $0xe0] sm:$0xff] }
 0xae7   :  { %5167 = vpow2.f32 %v4911_v27 }
 0xae8   :  { %5169 = vpow2.f32 %v4913_v39  ;;  %v5406_v39 = vld [vmem:[%s10175_s1 + $0xc8] sm:$0xff] }
 0xaf2   :  { %v5164_v37 = vpop.eup %5163 }
 0xaf3   :  { %v5166_v19 = vpop.eup %5165  ;;  %v2112_v33 = vadd.f32 1.0, %v5164_v37 }
 0xaf4   :  { %v5168_v51 = vpop.eup %5167  ;;  %v2114_v9 = vadd.f32 1.0, %v5166_v19  ;;  %v5407_v19 = vld [vmem:[%s10175_s1 + $0xe8] sm:$0xff] }
 0xaf5   :  { %v5170_v7 = vpop.eup %5169  ;;  %5171 = vrcp.f32 %v2112_v33  ;;  %v2113_v12 = vadd.f32 1.0, %v5168_v51 }
 0xaf6   :  { %5173 = vrcp.f32 %v2114_v9  ;;  %v2115_v16 = vadd.f32 1.0, %v5170_v7  ;;  %v5408_v9 = vld [vmem:[%s10175_s1 + $0xc0] sm:$0xff] }
 0xaf7   :  { %5175 = vrcp.f32 %v2113_v12  ;;  %v5409_v12 = vld [vmem:[%s10175_s1 + $0xd0] sm:$0xff] }
 0xaf8   :  { %5177 = vrcp.f32 %v2115_v16 }
 0xb02   :  { %v5172_v35 = vpop.eup %5171 }
 0xb03   :  { %v5174_v34 = vpop.eup %5173  ;;  %v7499_v30 = vmul.f32 %v5172_v35, %v7249_v48 }
 0xb04   :  { %v5176_v62 = vpop.eup %5175  ;;  %v7507_v29 = vmul.f32 %v5174_v34, %v7252_v3 }
 0xb05   :  { %v7502_v8 = vmul.f32 %v5176_v62, %v7259_v45  ;;  %2212 = vrot.lane.b32.xlu0 %v7499_v30, %s5511_s18  ;;  %v5178_v47 = vpop.eup %5177  ;;  %v5410_v62 = vld [vmem:[%s10175_s1 + $0xd8] sm:$0xff] }
 0xb06   :  { %v7512_v5 = vmul.f32 %v5178_v47, %v7267_v23 }
 0xb07   :  { %2214 = vrot.lane.b32.xlu1 %v7502_v8, %s5511_s18 }
 0xb09   :  { %2216 = vrot.lane.b32.xlu0 %v7507_v29, %s5511_s18 }
 0xb0b   :  { %2218 = vrot.lane.b32.xlu1 %v7512_v5, %s5511_s18 }
 0xb0d   :  { %2188 = vrot.lane.b32.xlu0 %v7499_v30, %s5513_s20 }
 0xb0f   :  { %2190 = vrot.lane.b32.xlu1 %v7502_v8, %s5513_s20 }
 0xb11   :  { %2192 = vrot.lane.b32.xlu0 %v7507_v29, %s5513_s20 }
 0xb13   :  { %2194 = vrot.lane.b32.xlu1 %v7512_v5, %s5513_s20 }
 0xb15   :  { %2200 = vrot.lane.b32.xlu0 %v7499_v30, %s5512_s19 }
 0xb17   :  { %2202 = vrot.lane.b32.xlu1 %v7502_v8, %s5512_s19 }
 0xb19   :  { %2204 = vrot.lane.b32.xlu0 %v7507_v29, %s5512_s19 }
 0xb1b   :  { %2206 = vrot.lane.b32.xlu1 %v7512_v5, %s5512_s19 }
 0xb1d   :  { %2176 = vrot.lane.b32.xlu0 %v7499_v30, %s5514_s21 }
 0xb1f   :  { %2178 = vrot.lane.b32.xlu1 %v7502_v8, %s5514_s21 }
 0xb21   :  { %2180 = vrot.lane.b32.xlu0 %v7507_v29, %s5514_s21 }
 0xb23   :  { %2182 = vrot.lane.b32.xlu1 %v7512_v5, %s5514_s21 }
 0xb25   :  { %2152 = vrot.lane.b32.xlu0 %v7499_v30, %s5516_s23 }
 0xb27   :  { %2154 = vrot.lane.b32.xlu1 %v7502_v8, %s5516_s23 }
 0xb29   :  { %2156 = vrot.lane.b32.xlu0 %v7507_v29, %s5516_s23 }
 0xb2b   :  { %2158 = vrot.lane.b32.xlu1 %v7512_v5, %s5516_s23 }
 0xb2d   :  { %2164 = vrot.lane.b32.xlu0 %v7499_v30, %s5515_s22 }
 0xb2f   :  { %2166 = vrot.lane.b32.xlu1 %v7502_v8, %s5515_s22 }
 0xb31   :  { %2168 = vrot.lane.b32.xlu0 %v7507_v29, %s5515_s22 }
 0xb33   :  { %2170 = vrot.lane.b32.xlu1 %v7512_v5, %s5515_s22 }
 0xb35   :  { %2128 = vrot.lane.b32.xlu0 %v7499_v30, %s5519_s25 }
 0xb37   :  { %2130 = vrot.lane.b32.xlu1 %v7502_v8, %s5519_s25 }
 0xb39   :  { %2132 = vrot.lane.b32.xlu0 %v7507_v29, %s5519_s25 }
 0xb3b   :  { %2134 = vrot.lane.b32.xlu1 %v7512_v5, %s5519_s25 }
 0xb3d   :  { %2140 = vrot.lane.b32.xlu0 %v7499_v30, %s5518_s24 }
 0xb3f   :  { %2142 = vrot.lane.b32.xlu1 %v7502_v8, %s5518_s24 }
 0xb41   :  { %2144 = vrot.lane.b32.xlu0 %v7507_v29, %s5518_s24 }
 0xb43   :  { %2146 = vrot.lane.b32.xlu1 %v7512_v5, %s5518_s24 }
 0xb77   :  { %v2213_v55 = vpop.permute.xlu0 %2212 }
 0xb79   :  { %v2215_v58 = vpop.permute.xlu1 %2214 }
 0xb7a   :  { %v2222_v40 = vsel %vm60_vm1, %v2213_v55, %v2215_v58 }
 0xb7b   :  { %v2217_v26 = vpop.permute.xlu0 %2216  ;;  %v2256_v15 = vmul.f32 %v7344_v0, %v2222_v40  ;;  %v5404_v0 = vld [vmem:[%s10175_s1 + $0x118] sm:$0xff] }
 0xb7c   :  { %v2221_v25 = vsel %vm60_vm1, %v2215_v58, %v2217_v26  ;;  %v5412_v40 = vld [vmem:[%s10175_s1 + $0xf8] sm:$0xff] }
 0xb7d   :  { %v2257_v17 = vmul.f32 %v7352_v10, %v2221_v25  ;;  %v2219_v50 = vpop.permute.xlu1 %2218  ;;  %v2276_v52 = vpack.c.bf16 %v6711_v57, %v2256_v15 }
 0xb7e   :  { %v2220_v38 = vsel %vm60_vm1, %v2217_v26, %v2219_v50  ;;  %v2223_v1 = vsel %vm60_vm1, %v2219_v50, %v2213_v55  ;;  %v5411_v55 = vld [vmem:[%s10175_s1 + $0xf0] sm:$0xff] }
 0xb7f   :  { %v2258_v41 = vmul.f32 %v5403_v13, %v2220_v38  ;;  %v2259_v4 = vmul.f32 %v5404_v0, %v2223_v1  ;;  %v2189_v6 = vpop.permute.xlu0 %2188  ;;  %v2277_v10 = vpack.c.bf16 %v6709_v56, %v2257_v17  ;;  %v5413_v0 = vld [vmem:[%s10175_s1 + $0xa0] sm:$0xff] }
 0xb81   :  { %v2278_v11 = vpack.c.bf16 %v6727_v32, %v2258_v41  ;;  %v2191_v53 = vpop.permute.xlu1 %2190  ;;  %2286 = vmatprep.subr.bf16.mxu0 %v2277_v10  ;;  %v2279_v54 = vpack.c.bf16 %v6729_v42, %v2259_v4  ;;  %v5414_v10 = vld [vmem:[%s10175_s1 + $0xa8] sm:$0xff] }
 0xb82   :  { %2287 = vmatpush1.bf16.msra.mxu0 %v2276_v52  ;;  %v2198_v57 = vsel %vm54_vm3, %v2189_v6, %v2191_v53 }
 0xb83   :  { %2327 = vmatprep.subr.bf16.mxu1 %v2279_v54  ;;  %v2193_v24 = vpop.permute.xlu0 %2192  ;;  %v2248_v7 = vmul.f32 %v5408_v9, %v2198_v57 }
 0xb84   :  { %2328 = vmatpush1.bf16.msra.mxu1 %v2278_v11  ;;  %v2197_v21 = vsel %vm54_vm3, %v2191_v53, %v2193_v24  ;;  %v5415_v53 = vld [vmem:[%s10175_s1 + $0x88] sm:$0xff] }
 0xb85   :  { %v2195_v2 = vpop.permute.xlu1 %2194  ;;  %v2249_v37 = vmul.f32 %v5406_v39, %v2197_v21  ;;  %v2241_v54 = vmul.f32 %v5415_v53, %v7502_v8  ;;  %v5418_v8 = vld [vmem:[%s10175_s1 + $0xb0] sm:$0xff] }
 0xb86   :  { %v2196_v32 = vsel %vm54_vm3, %v2193_v24, %v2195_v2  ;;  %v2199_v18 = vsel %vm54_vm3, %v2195_v2, %v2189_v6  ;;  %v5416_v24 = vld [vmem:[%s10175_s1 + $0x80] sm:$0xff]  ;;  %v5428_v53 = vld [vmem:[%s10175_s1 + $0x50] sm:$0xff] }
 0xb87   :  { %v2201_v28 = vpop.permute.xlu0 %2200  ;;  %v2250_v16 = vmul.f32 %v5409_v12, %v2196_v32  ;;  %v2251_v47 = vmul.f32 %v5410_v62, %v2199_v18  ;;  %v2240_v2 = vmul.f32 %v5416_v24, %v7499_v30  ;;  %v5419_v30 = vld [vmem:[%s10175_s1 + $0xb8] sm:$0xff] }
 0xb89   :  { %v2203_v46 = vpop.permute.xlu1 %2202 }
 0xb8a   :  { %v2210_v56 = vsel %vm57_vm2, %v2201_v28, %v2203_v46 }
 0xb8b   :  { %v2205_v42 = vpop.permute.xlu0 %2204  ;;  %v2252_v63 = vmul.f32 %v5405_v61, %v2210_v56 }
 0xb8c   :  { %v2209_v27 = vsel %vm57_vm2, %v2203_v46, %v2205_v42 }
 0xb8d   :  { %v2253_v33 = vmul.f32 %v5407_v19, %v2209_v27  ;;  %v2207_v51 = vpop.permute.xlu1 %2206  ;;  %v2272_v17 = vpack.c.bf16 %v2252_v63, %v2248_v7 }
 0xb8e   :  { %v2208_v35 = vsel %vm57_vm2, %v2205_v42, %v2207_v51  ;;  %v2211_v34 = vsel %vm57_vm2, %v2207_v51, %v2201_v28  ;;  %v5417_v28 = vld [vmem:[%s10175_s1 + $0x90] sm:$0xff] }
 0xb8f   :  { %v2254_v58 = vmul.f32 %v5411_v55, %v2208_v35  ;;  %v2255_v26 = vmul.f32 %v5412_v40, %v2211_v34  ;;  %v2177_v15 = vpop.permute.xlu0 %2176  ;;  %v2273_v25 = vpack.c.bf16 %v2253_v33, %v2249_v37  ;;  %v2242_v46 = vmul.f32 %v5417_v28, %v7507_v29  ;;  %v5420_v29 = vld [vmem:[%s10175_s1 + $0x98] sm:$0xff]  ;;  %v5422_v35 = vld [vmem:[%s10175_s1 + $0x68] sm:$0xff] }
 0xb90   :  { %v2243_v61 = vmul.f32 %v5420_v29, %v7512_v5  ;;  %v5421_v5 = vld [vmem:[%s10175_s1 + $0x48] sm:$0xff] }
 0xb91   :  { %v2274_v50 = vpack.c.bf16 %v2254_v58, %v2250_v16  ;;  %v2179_v38 = vpop.permute.xlu1 %2178  ;;  %2288 = vmatprep.subr.bf16.mxu0 %v2273_v25  ;;  %v2275_v1 = vpack.c.bf16 %v2255_v26, %v2251_v47  ;;  %v5423_v25 = vld [vmem:[%s10175_s1 + $0x70] sm:$0xff] }
 0xb92   :  { %v2186_v13 = vsel %vm51_vm4, %v2177_v15, %v2179_v38  ;;  %2289 = vmatpush1.bf16.msra.mxu0 %v2272_v17 }
 0xb93   :  { %2329 = vmatprep.subr.bf16.mxu1 %v2275_v1  ;;  %v2181_v41 = vpop.permute.xlu0 %2180  ;;  %v2244_v4 = vmul.f32 %v5413_v0, %v2186_v13  ;;  %v5424_v1 = vld [vmem:[%s10175_s1 + $0x40] sm:$0xff] }
 0xb94   :  { %v2185_v6 = vsel %vm51_vm4, %v2179_v38, %v2181_v41  ;;  %2330 = vmatpush1.bf16.msra.mxu1 %v2274_v50 }
 0xb95   :  { %v2245_v52 = vmul.f32 %v5414_v10, %v2185_v6  ;;  %v2183_v11 = vpop.permute.xlu1 %2182  ;;  %v2268_v63 = vpack.c.bf16 %v2244_v4, %v2240_v2  ;;  %v5426_v4 = vld [vmem:[%s10175_s1 + $0x60] sm:$0xff]  ;;  %v5427_v10 = vld [vmem:[%s10175_s1 + $0x78] sm:$0xff] }
 0xb96   :  { %v2184_v21 = vsel %vm51_vm4, %v2181_v41, %v2183_v11  ;;  %v2187_v56 = vsel %vm51_vm4, %v2183_v11, %v2177_v15  ;;  %v5425_v41 = vld [vmem:[%s10175_s1 + $0x58] sm:$0xff] }
 0xb97   :  { %v2246_v57 = vmul.f32 %v5418_v8, %v2184_v21  ;;  %v2247_v32 = vmul.f32 %v5419_v30, %v2187_v56  ;;  %v2153_v42 = vpop.permute.xlu0 %2152  ;;  %v2269_v18 = vpack.c.bf16 %v2245_v52, %v2241_v54 }
 0xb99   :  { %v2270_v27 = vpack.c.bf16 %v2246_v57, %v2242_v46  ;;  %v2155_v39 = vpop.permute.xlu1 %2154  ;;  %2290 = vmatprep.subr.bf16.mxu0 %v2269_v18  ;;  %v2271_v37 = vpack.c.bf16 %v2247_v32, %v2243_v61 }
 0xb9a   :  { %2291 = vmatpush1.bf16.msra.mxu0 %v2268_v63  ;;  %v2162_v9 = vsel %vm45_vm5, %v2153_v42, %v2155_v39 }
 0xb9b   :  { %2331 = vmatprep.subr.bf16.mxu1 %v2271_v37  ;;  %v2157_v19 = vpop.permute.xlu0 %2156  ;;  %v2233_v16 = vmul.f32 %v5421_v5, %v2162_v9 }
 0xb9c   :  { %2332 = vmatpush1.bf16.msra.mxu1 %v2270_v27  ;;  %v2161_v40 = vsel %vm45_vm5, %v2155_v39, %v2157_v19 }
 0xb9d   :  { %v2159_v33 = vpop.permute.xlu1 %2158  ;;  %v2234_v54 = vmul.f32 %v5428_v53, %v2161_v40 }
 0xb9e   :  { %v2160_v47 = vsel %vm45_vm5, %v2157_v19, %v2159_v33  ;;  %v2163_v55 = vsel %vm45_vm5, %v2159_v33, %v2153_v42  ;;  %v5429_v42 = vld [vmem:[%s10175_s1 + $0x8] sm:$0xff] }
 0xb9f   :  { %v2165_v51 = vpop.permute.xlu0 %2164  ;;  %v2232_v13 = vmul.f32 %v5424_v1, %v2163_v55  ;;  %v2235_v0 = vmul.f32 %v5425_v41, %v2160_v47  ;;  %v5433_v47 = vld [vmem:[%s10175_s1 + $0x10] sm:$0xff] }
 0xba1   :  { %v2167_v7 = vpop.permute.xlu1 %2166 }
 0xba2   :  { %v2174_v12 = vsel %vm48_vm6, %v2165_v51, %v2167_v7 }
 0xba3   :  { %v2237_v34 = vmul.f32 %v5422_v35, %v2174_v12  ;;  %v2169_v62 = vpop.permute.xlu0 %2168  ;;  %v5431_v12 = vld [vmem:[%s10175_s1] sm:$0xff] }
 0xba4   :  { %v2173_v58 = vsel %vm48_vm6, %v2167_v7, %v2169_v62 }
 0xba5   :  { %v2171_v26 = vpop.permute.xlu1 %2170  ;;  %v2265_v15 = vpack.c.bf16 %v2237_v34, %v2233_v16  ;;  %v2238_v17 = vmul.f32 %v5423_v25, %v2173_v58  ;;  %v5432_v16 = vld [vmem:[%s10175_s1 + $0x18] sm:$0xff] }
 0xba6   :  { %v2172_v50 = vsel %vm48_vm6, %v2169_v62, %v2171_v26  ;;  %v2175_v38 = vsel %vm48_vm6, %v2171_v26, %v2165_v51  ;;  %v5430_v51 = vld [vmem:[%s10175_s1 + $0x30] sm:$0xff] }
 0xba7   :  { %v2236_v6 = vmul.f32 %v5426_v4, %v2175_v38  ;;  %v2239_v52 = vmul.f32 %v5427_v10, %v2172_v50  ;;  %v2129_v11 = vpop.permute.xlu0 %2128  ;;  %2292 = vmatprep.subr.bf16.mxu0 %v2265_v15  ;;  %v2266_v46 = vpack.c.bf16 %v2238_v17, %v2234_v54  ;;  %v4893_v15 = vld [vmem:[%s10176_s0 + $0x128] sm:$0xff] }
 0xba8   :  { %v2027_v50 = vadd.f32 %v4893_v15, %v7482_v43  ;;  %v4900_v43 = vld [vmem:[%s10176_s0 + $0x160] sm:$0xff] }
 0xba9   :  { %v2264_v24 = vpack.c.bf16 %v2236_v6, %v2232_v13  ;;  %v2131_v2 = vpop.permute.xlu1 %2130  ;;  %v2267_v28 = vpack.c.bf16 %v2239_v52, %v2235_v0 }
 0xbaa   :  { %v2138_v57 = vsel %vm39_vm7, %v2129_v11, %v2131_v2  ;;  %v4907_v41 = vmul.f32 -1.442695, %v2027_v50  ;;  %v2535_v50 = vld [vmem:[%s10175_s1 + $0x138] sm:$0xff] }
 0xbab   :  { %2333 = vmatprep.subr.bf16.mxu1 %v2267_v28  ;;  %v2133_v21 = vpop.permute.xlu0 %2132  ;;  %2293 = vmatpush1.bf16.msra.mxu0 %v2264_v24  ;;  %v2225_v18 = vmul.f32 %v5429_v42, %v2138_v57  ;;  %v4901_v24 = vld [vmem:[%s10176_s0 + $0x168] sm:$0xff] }
 0xbac   :  { %2334 = vmatpush1.bf16.msra.mxu1 %v2266_v46  ;;  %v2137_v37 = vsel %vm39_vm7, %v2131_v2, %v2133_v21  ;;  %v4903_v46 = vld [vmem:[%s10176_s0 + $0x178] sm:$0xff] }
 0xbad   :  { %v2135_v56 = vpop.permute.xlu1 %2134  ;;  %v2226_v55 = vmul.f32 %v5433_v47, %v2137_v37 }
 0xbae   :  { %v2136_v63 = vsel %vm39_vm7, %v2133_v21, %v2135_v56  ;;  %v2139_v27 = vsel %vm39_vm7, %v2135_v56, %v2129_v11 }
 0xbaf   :  { %v2141_v8 = vpop.permute.xlu0 %2140  ;;  %v2224_v5 = vmul.f32 %v5431_v12, %v2139_v27  ;;  %v2227_v35 = vmul.f32 %v5432_v16, %v2136_v63 }
 0xbb1   :  { %v2143_v30 = vpop.permute.xlu1 %2142 }
 0xbb2   :  { %v2150_v32 = vsel %vm42_vm8, %v2141_v8, %v2143_v30 }
 0xbb3   :  { %v2229_v29 = vmul.f32 %v2150_v32, %v7438_v20  ;;  %v2145_v61 = vpop.permute.xlu0 %2144 }
 0xbb4   :  { %v2149_v39 = vsel %vm42_vm8, %v2143_v30, %v2145_v61 }
 0xbb5   :  { %v2147_v19 = vpop.permute.xlu1 %2146  ;;  %v2261_v33 = vpack.c.bf16 %v2229_v29, %v2225_v18  ;;  %v2230_v20 = vmul.f32 %v5430_v51, %v2149_v39 }
 0xbb6   :  { %v2148_v9 = vsel %vm42_vm8, %v2145_v61, %v2147_v19  ;;  %v2151_v7 = vsel %vm42_vm8, %v2147_v19, %v2141_v8 }
 0xbb7   :  { %v2228_v34 = vmul.f32 %v2151_v7, %v7453_v49  ;;  %v2231_v62 = vmul.f32 %v2148_v9, %v7458_v60  ;;  %2294 = vmatprep.subr.bf16.mxu0 %v2261_v33  ;;  %v2262_v26 = vpack.c.bf16 %v2230_v20, %v2226_v55  ;;  %v4892_v49 = vld [vmem:[%s10176_s0 + $0x120] sm:$0xff]  ;;  %v4894_v60 = vld [vmem:[%s10176_s0 + $0x130] sm:$0xff] }
 0xbb8   :  { %v2025_v25 = vadd.f32 %v4892_v49, %v7478_v59  ;;  %v2068_v17 = vadd.f32 %v4894_v60, %v7480_v14  ;;  %v7876_v49 = vld [vmem:[%s10175_s1 + $0x100] sm:$0xff] }
 0xbb9   :  { %v2260_v58 = vpack.c.bf16 %v2228_v34, %v2224_v5  ;;  %v2263_v40 = vpack.c.bf16 %v2231_v62, %v2227_v35  ;;  %v2532_v60 = vld [vmem:[%s10175_s1 + $0x120] sm:$0xff] }
 0xbba   :  { %v4906_v1 = vmul.f32 -1.442695, %v2025_v25  ;;  %v4908_v13 = vmul.f32 -1.442695, %v2068_v17  ;;  %v2534_v17 = vld [vmem:[%s10175_s1 + $0x130] sm:$0xff] }
 0xbbb   :  { %2295 = vmatpush1.bf16.msra.mxu0 %v2260_v58  ;;  %2335 = vmatprep.subr.bf16.mxu1 %v2263_v40 }
 0xbbc   :  { %2336 = vmatpush1.bf16.msra.mxu1 %v2262_v26  ;;  %5179 = vpow2.f32 %v4906_v1 }
 0xbbd   :  { %5181 = vpow2.f32 %v4908_v13  ;;  %v7896_v13 = vmul.f32 0.0, %v2532_v60 }
 0xbbe   :  { %4914 = vmatmul.mubr.msk.bf16.vlgmr.msra.gmra.mxu0 %vm166_vm0, %v7211_v22  ;;  %5183 = vpow2.f32 %v4907_v41 }
 0xbbf   :  { %4915 = vmatmul.mubr.msk.bf16.vlgmr.msra.gmra.mxu1 %vm166_vm0, %v7211_v22  ;;  %2628 = vmatprep.mubr.bf16.mxu0 %v10238_v36  ;;  %v4895_v22 = vld [vmem:[%s10176_s0 + $0x138] sm:$0xff] }
 0xbc0   :  { %2671 = vmatprep.mubr.bf16.mxu1 %v10238_v36  ;;  %v2070_v38 = vadd.f32 %v4895_v22, %v7487_v31  ;;  %v4902_v31 = vld [vmem:[%s10176_s0 + $0x170] sm:$0xff]  ;;  %v7886_v22 = vld [vmem:[%s10175_s1 + $0x108] sm:$0xff] }
 0xbc2   :  { %v4909_v0 = vmul.f32 -1.442695, %v2070_v38 }
 0xbc4   :  { %5185 = vpow2.f32 %v4909_v0 }
 0xbc9   :  { %v5180_v4 = vpop.eup %5179 }
 0xbca   :  { %v5182_v59 = vpop.eup %5181  ;;  %v2088_v52 = vadd.f32 1.0, %v5180_v4  ;;  %v7904_v4 = vld [vmem:[%s10175_s1 + $0x110] sm:$0xff] }
 0xbcb   :  { %v5184_v6 = vpop.eup %5183  ;;  %v2090_v11 = vadd.f32 1.0, %v5182_v59  ;;  %v7909_v59 = vld [vmem:[%s10175_s1 + $0x118] sm:$0xff] }
 0xbcc   :  { %v2089_v53 = vadd.f32 1.0, %v5184_v6  ;;  %5187 = vrcp.f32 %v2088_v52 }
 0xbcd   :  { %5189 = vrcp.f32 %v2090_v11  ;;  %v7914_v11 = vmul.f32 0.0, %v2535_v50  ;;  %v7993_v50 = vld [vmem:[%s10175_s1 + $0xa0] sm:$0xff] }
 0xbce   :  { %5191 = vrcp.f32 %v2089_v53 }
 0xbd1   :  { %v5186_v10 = vpop.eup %5185 }
 0xbd2   :  { %v2091_v14 = vadd.f32 1.0, %v5186_v10  ;;  %v7912_v10 = vmul.f32 0.0, %v2534_v17 }
 0xbd4   :  { %5193 = vrcp.f32 %v2091_v14 }
 0xbd9   :  { %v5188_v61 = vpop.eup %5187 }
 0xbda   :  { %v5190_v63 = vpop.eup %5189  ;;  %v2366_v37 = vsub.f32 1.0, %v5188_v61 }
 0xbdb   :  { %v5192_v27 = vpop.eup %5191  ;;  %v2368_v19 = vsub.f32 1.0, %v5190_v63 }
 0xbdc   :  { %v2367_v33 = vsub.f32 1.0, %v5192_v27  ;;  %v2370_v7 = vmul.f32 %v2366_v37, %v7249_v48 }
 0xbdd   :  { %v2372_v16 = vmul.f32 %v2368_v19, %v7252_v3 }
 0xbde   :  { %v2371_v47 = vmul.f32 %v2367_v33, %v7259_v45  ;;  %v7962_v33 = vld [vmem:[%s10175_s1 + $0xd8] sm:$0xff] }
 0xbe1   :  { %v5194_v39 = vpop.eup %5193 }
 0xbe2   :  { %v2369_v20 = vsub.f32 1.0, %v5194_v39 }
 0xbe4   :  { %v2373_v40 = vmul.f32 %v2369_v20, %v7267_v23  ;;  %v2533_v23 = vld [vmem:[%s10175_s1 + $0x128] sm:$0xff] }
 0xbe5   :  { %v7894_v1 = vmul.f32 0.0, %v2533_v23 }
 0xc7e   :  { %v2314_v54 = vpop.f32.mrf.mxu0 }
 0xc7f   :  { %v2315_v2 = vadd.f32 %v4900_v43, %v2314_v54  ;;  %v2355_v28 = vpop.f32.mrf.mxu1 }
 0xc80   :  { %v2356_v21 = vadd.f32 %v4902_v31, %v2355_v28  ;;  %v2316_v56 = vpop.f32.mrf.mxu0 }
 0xc81   :  { %5195 = vtanh.f32 %v2315_v2  ;;  %v2317_v8 = vadd.f32 %v4901_v24, %v2316_v56  ;;  %v2357_v57 = vpop.f32.mrf.mxu1 }
 0xc82   :  { %5197 = vtanh.f32 %v2356_v21  ;;  %v2358_v30 = vadd.f32 %v4903_v46, %v2357_v57  ;;  %v2318_v32 = vpop.f32.mrf.mxu0 }
 0xc83   :  { %5199 = vtanh.f32 %v2317_v8  ;;  %v2359_v42 = vpop.f32.mrf.mxu1 }
 0xc84   :  { %5201 = vtanh.f32 %v2358_v30  ;;  %v2319_v18 = vpop.f32.mrf.mxu0  ;;  %v7929_v30 = vld [vmem:[%s10175_s1 + $0xe0] sm:$0xff]  ;;  %v7934_v42 = vld [vmem:[%s10175_s1 + $0xc8] sm:$0xff] }
 0xc85   :  { %v2360_v29 = vpop.f32.mrf.mxu1  ;;  %10247 = vst [vmem:[#allocation4_spill] sm:$0xff] %v7929_v30  ;;  %10248 = vst [vmem:[#allocation3_spill] sm:$0xff] %v7934_v42 }
 0xc8e   :  { %v5196_v51 = vpop.eup %5195 }
 0xc8f   :  { %v5198_v9 = vpop.eup %5197  ;;  %v2374_v12 = vmul.f32 %v5196_v51, %v5188_v61  ;;  %v7943_v61 = vld [vmem:[%s10175_s1 + $0xe8] sm:$0xff] }
 0xc90   :  { %v5200_v5 = vpop.eup %5199  ;;  %v2376_v35 = vmul.f32 %v5198_v9, %v5190_v63  ;;  %10249 = vst [vmem:[#allocation6_spill] sm:$0xff] %v7943_v61  ;;  %v7948_v63 = vld [vmem:[%s10175_s1 + $0xc0] sm:$0xff] }
 0xc91   :  { %v5202_v34 = vpop.eup %5201  ;;  %v7780_v62 = vadd.f32 %v2374_v12, %v2370_v7  ;;  %v2375_v55 = vmul.f32 %v5200_v5, %v5192_v27  ;;  %v7972_v7 = vld [vmem:[%s10175_s1 + $0xf0] sm:$0xff]  ;;  %v7977_v12 = vld [vmem:[%s10175_s1 + $0xf8] sm:$0xff] }
 0xc92   :  { %v7783_v58 = vadd.f32 %v2376_v35, %v2372_v16  ;;  %v2377_v26 = vmul.f32 %v5202_v34, %v5194_v39  ;;  %v7955_v39 = vld [vmem:[%s10175_s1 + $0xd0] sm:$0xff] }
 0xc93   :  { %4916 = vst [vmem:[%s10178_s4 + $0x60] sm:$0xff] %v7780_v62  ;;  %v7790_v48 = vadd.f32 %v2375_v55, %v2371_v47  ;;  %2484 = vrot.lane.b32.xlu0 %v7780_v62, %s5511_s18 }
 0xc94   :  { %4918 = vst [vmem:[%s10178_s4 + $0x70] sm:$0xff] %v7783_v58  ;;  %v7798_v3 = vadd.f32 %v2377_v26, %v2373_v40 }
 0xc95   :  { %4917 = vst [vmem:[%s10178_s4 + $0x68] sm:$0xff] %v7790_v48  ;;  %2486 = vrot.lane.b32.xlu1 %v7790_v48, %s5511_s18 }
 0xc96   :  { %4919 = vst [vmem:[%s10178_s4 + $0x78] sm:$0xff] %v7798_v3 }
 0xc97   :  { %2488 = vrot.lane.b32.xlu0 %v7783_v58, %s5511_s18 }
 0xc99   :  { %2490 = vrot.lane.b32.xlu1 %v7798_v3, %s5511_s18 }
 0xc9b   :  { %2460 = vrot.lane.b32.xlu0 %v7780_v62, %s5513_s20 }
 0xc9d   :  { %2462 = vrot.lane.b32.xlu1 %v7790_v48, %s5513_s20 }
 0xc9f   :  { %2464 = vrot.lane.b32.xlu0 %v7783_v58, %s5513_s20 }
 0xca1   :  { %2466 = vrot.lane.b32.xlu1 %v7798_v3, %s5513_s20 }
 0xca3   :  { %2472 = vrot.lane.b32.xlu0 %v7780_v62, %s5512_s19 }
 0xca5   :  { %2474 = vrot.lane.b32.xlu1 %v7790_v48, %s5512_s19 }
 0xca7   :  { %2476 = vrot.lane.b32.xlu0 %v7783_v58, %s5512_s19 }
 0xca9   :  { %2478 = vrot.lane.b32.xlu1 %v7798_v3, %s5512_s19 }
 0xcab   :  { %2448 = vrot.lane.b32.xlu0 %v7780_v62, %s5514_s21 }
 0xcad   :  { %2450 = vrot.lane.b32.xlu1 %v7790_v48, %s5514_s21 }
 0xcaf   :  { %2452 = vrot.lane.b32.xlu0 %v7783_v58, %s5514_s21 }
 0xcb1   :  { %2454 = vrot.lane.b32.xlu1 %v7798_v3, %s5514_s21 }
 0xcb3   :  { %2424 = vrot.lane.b32.xlu0 %v7780_v62, %s5516_s23 }
 0xcb5   :  { %2426 = vrot.lane.b32.xlu1 %v7790_v48, %s5516_s23 }
 0xcb7   :  { %2428 = vrot.lane.b32.xlu0 %v7783_v58, %s5516_s23 }
 0xcb9   :  { %2430 = vrot.lane.b32.xlu1 %v7798_v3, %s5516_s23 }
 0xcbb   :  { %2436 = vrot.lane.b32.xlu0 %v7780_v62, %s5515_s22 }
 0xcbd   :  { %2438 = vrot.lane.b32.xlu1 %v7790_v48, %s5515_s22 }
 0xcbf   :  { %2440 = vrot.lane.b32.xlu0 %v7783_v58, %s5515_s22 }
 0xcc1   :  { %2442 = vrot.lane.b32.xlu1 %v7798_v3, %s5515_s22 }
 0xcc3   :  { %2400 = vrot.lane.b32.xlu0 %v7780_v62, %s5519_s25 }
 0xcc5   :  { %2402 = vrot.lane.b32.xlu1 %v7790_v48, %s5519_s25 }
 0xcc7   :  { %2404 = vrot.lane.b32.xlu0 %v7783_v58, %s5519_s25 }
 0xcc9   :  { %2406 = vrot.lane.b32.xlu1 %v7798_v3, %s5519_s25 }
 0xccb   :  { %2412 = vrot.lane.b32.xlu0 %v7780_v62, %s5518_s24 }
 0xccd   :  { %2414 = vrot.lane.b32.xlu1 %v7790_v48, %s5518_s24 }
 0xccf   :  { %2416 = vrot.lane.b32.xlu0 %v7783_v58, %s5518_s24 }
 0xcd1   :  { %2418 = vrot.lane.b32.xlu1 %v7798_v3, %s5518_s24 }
 0xd05   :  { %v2485_v45 = vpop.permute.xlu0 %2484 }
 0xd07   :  { %v2487_v15 = vpop.permute.xlu1 %2486 }
 0xd08   :  { %v2494_v25 = vsel %vm60_vm1, %v2485_v45, %v2487_v15 }
 0xd09   :  { %v2489_v38 = vpop.permute.xlu0 %2488  ;;  %v2568_v41 = vmul.f32 %v7876_v49, %v2494_v25 }
 0xd0a   :  { %v2493_v0 = vsel %vm60_vm1, %v2487_v15, %v2489_v38 }
 0xd0b   :  { %v2569_v6 = vmul.f32 %v7886_v22, %v2493_v0  ;;  %v2491_v52 = vpop.permute.xlu1 %2490  ;;  %v2592_v2 = vpack.c.bf16 %v7896_v13, %v2568_v41 }
 0xd0c   :  { %v2492_v53 = vsel %vm60_vm1, %v2489_v38, %v2491_v52  ;;  %v2495_v14 = vsel %vm60_vm1, %v2491_v52, %v2485_v45  ;;  %v8005_v52 = vld [vmem:[%s10175_s1 + $0x88] sm:$0xff] }
 0xd0d   :  { %v2570_v43 = vmul.f32 %v7904_v4, %v2492_v53  ;;  %v2571_v31 = vmul.f32 %v7909_v59, %v2495_v14  ;;  %v2461_v54 = vpop.permute.xlu0 %2460  ;;  %v2593_v24 = vpack.c.bf16 %v7894_v1, %v2569_v6  ;;  %v8000_v6 = vld [vmem:[%s10175_s1 + $0xa8] sm:$0xff]  ;;  %v8010_v53 = vld [vmem:[%s10175_s1 + $0x80] sm:$0xff] }
 0xd0f   :  { %v2594_v28 = vpack.c.bf16 %v7912_v10, %v2570_v43  ;;  %v2463_v46 = vpop.permute.xlu1 %2462  ;;  %2602 = vmatprep.subr.bf16.mxu0 %v2593_v24  ;;  %v2595_v21 = vpack.c.bf16 %v7914_v11, %v2571_v31  ;;  %v8015_v43 = vld [vmem:[%s10175_s1 + $0x90] sm:$0xff] }
 0xd10   :  { %2603 = vmatpush1.bf16.msra.mxu0 %v2592_v2  ;;  %v2470_v27 = vsel %vm54_vm3, %v2461_v54, %v2463_v46  ;;  %v8023_v24 = vld [vmem:[%s10175_s1 + $0xb0] sm:$0xff]  ;;  %v8028_v2 = vld [vmem:[%s10175_s1 + $0xb8] sm:$0xff] }
 0xd11   :  { %2645 = vmatprep.subr.bf16.mxu1 %v2595_v21  ;;  %v2465_v56 = vpop.permute.xlu0 %2464  ;;  %v2560_v34 = vmul.f32 %v7948_v63, %v2470_v27 }
 0xd12   :  { %2646 = vmatpush1.bf16.msra.mxu1 %v2594_v28  ;;  %v2469_v18 = vsel %vm54_vm3, %v2463_v46, %v2465_v56  ;;  %v8033_v28 = vld [vmem:[%s10175_s1 + $0x98] sm:$0xff] }
 0xd13   :  { %v2467_v8 = vpop.permute.xlu1 %2466  ;;  %v2561_v5 = vmul.f32 %v7934_v42, %v2469_v18 }
 0xd14   :  { %v2468_v37 = vsel %vm54_vm3, %v2465_v56, %v2467_v8  ;;  %v2471_v51 = vsel %vm54_vm3, %v2467_v8, %v2461_v54  ;;  %v2553_v56 = vmul.f32 %v8005_v52, %v7790_v48  ;;  %v2552_v8 = vmul.f32 %v8010_v53, %v7780_v62 }
 0xd15   :  { %v2473_v57 = vpop.permute.xlu0 %2472  ;;  %v2562_v47 = vmul.f32 %v7955_v39, %v2468_v37  ;;  %v2563_v26 = vmul.f32 %v7962_v33, %v2471_v51  ;;  %v2555_v51 = vmul.f32 %v8033_v28, %v7798_v3 }
 0xd17   :  { %v2475_v32 = vpop.permute.xlu1 %2474 }
 0xd18   :  { %v2482_v29 = vsel %vm57_vm2, %v2473_v57, %v2475_v32 }
 0xd19   :  { %v2477_v19 = vpop.permute.xlu0 %2476  ;;  %v2564_v20 = vmul.f32 %v7929_v30, %v2482_v29 }
 0xd1a   :  { %v2481_v9 = vsel %vm57_vm2, %v2475_v32, %v2477_v19 }
 0xd1b   :  { %v2565_v16 = vmul.f32 %v7943_v61, %v2481_v9  ;;  %v2479_v35 = vpop.permute.xlu1 %2478  ;;  %v2588_v25 = vpack.c.bf16 %v2564_v20, %v2560_v34 }
 0xd1c   :  { %v2480_v55 = vsel %vm57_vm2, %v2477_v19, %v2479_v35  ;;  %v2483_v40 = vsel %vm57_vm2, %v2479_v35, %v2473_v57  ;;  %v2554_v57 = vmul.f32 %v8015_v43, %v7783_v58 }
 0xd1d   :  { %v2566_v45 = vmul.f32 %v7972_v7, %v2480_v55  ;;  %v2567_v23 = vmul.f32 %v7977_v12, %v2483_v40  ;;  %v2449_v60 = vpop.permute.xlu0 %2448  ;;  %v2589_v15 = vpack.c.bf16 %v2565_v16, %v2561_v5  ;;  %v8053_v55 = vld [vmem:[%s10175_s1 + $0x48] sm:$0xff] }
 0xd1f   :  { %v2590_v17 = vpack.c.bf16 %v2566_v45, %v2562_v47  ;;  %v2451_v38 = vpop.permute.xlu1 %2450  ;;  %2604 = vmatprep.subr.bf16.mxu0 %v2589_v15  ;;  %v2591_v41 = vpack.c.bf16 %v2567_v23, %v2563_v26  ;;  %v8060_v26 = vld [vmem:[%s10175_s1 + $0x68] sm:$0xff]  ;;  %v8068_v15 = vld [vmem:[%s10175_s1 + $0x40] sm:$0xff] }
 0xd20   :  { %v2458_v0 = vsel %vm51_vm4, %v2449_v60, %v2451_v38  ;;  %2605 = vmatpush1.bf16.msra.mxu0 %v2588_v25 }
 0xd21   :  { %2647 = vmatprep.subr.bf16.mxu1 %v2591_v41  ;;  %v2453_v14 = vpop.permute.xlu0 %2452  ;;  %v2556_v31 = vmul.f32 %v7993_v50, %v2458_v0  ;;  %v8079_v41 = vld [vmem:[%s10175_s1 + $0x58] sm:$0xff] }
 0xd22   :  { %v2457_v54 = vsel %vm51_vm4, %v2451_v38, %v2453_v14  ;;  %2648 = vmatpush1.bf16.msra.mxu1 %v2590_v17  ;;  %v8074_v17 = vld [vmem:[%s10175_s1 + $0x70] sm:$0xff] }
 0xd23   :  { %v2557_v46 = vmul.f32 %v8000_v6, %v2457_v54  ;;  %v2455_v21 = vpop.permute.xlu1 %2454  ;;  %v2584_v20 = vpack.c.bf16 %v2556_v31, %v2552_v8  ;;  %v8090_v54 = vld [vmem:[%s10175_s1 + $0x60] sm:$0xff] }
 0xd24   :  { %v2456_v32 = vsel %vm51_vm4, %v2453_v14, %v2455_v21  ;;  %v2459_v18 = vsel %vm51_vm4, %v2455_v21, %v2449_v60  ;;  %v8100_v21 = vld [vmem:[%s10175_s1 + $0x50] sm:$0xff] }
 0xd25   :  { %v2558_v29 = vmul.f32 %v8023_v24, %v2456_v32  ;;  %v2559_v27 = vmul.f32 %v8028_v2, %v2459_v18  ;;  %v2425_v37 = vpop.permute.xlu0 %2424  ;;  %v2585_v19 = vpack.c.bf16 %v2557_v46, %v2553_v56  ;;  %v8095_v46 = vld [vmem:[%s10175_s1 + $0x78] sm:$0xff] }
 0xd27   :  { %v2586_v9 = vpack.c.bf16 %v2558_v29, %v2554_v57  ;;  %v2427_v5 = vpop.permute.xlu1 %2426  ;;  %2606 = vmatprep.subr.bf16.mxu0 %v2585_v19  ;;  %v2587_v16 = vpack.c.bf16 %v2559_v27, %v2555_v51 }
 0xd28   :  { %2607 = vmatpush1.bf16.msra.mxu0 %v2584_v20  ;;  %v2434_v40 = vsel %vm45_vm5, %v2425_v37, %v2427_v5 }
 0xd29   :  { %2649 = vmatprep.subr.bf16.mxu1 %v2587_v16  ;;  %v2429_v35 = vpop.permute.xlu0 %2428  ;;  %v2545_v60 = vmul.f32 %v8053_v55, %v2434_v40 }
 0xd2a   :  { %2650 = vmatpush1.bf16.msra.mxu1 %v2586_v9  ;;  %v2433_v56 = vsel %vm45_vm5, %v2427_v5, %v2429_v35 }
 0xd2b   :  { %v2431_v34 = vpop.permute.xlu1 %2430  ;;  %v2546_v9 = vmul.f32 %v8100_v21, %v2433_v56  ;;  %v8133_v56 = vld [vmem:[%s10175_s1 + $0x30] sm:$0xff] }
 0xd2c   :  { %v2432_v0 = vsel %vm45_vm5, %v2429_v35, %v2431_v34  ;;  %v2435_v14 = vsel %vm45_vm5, %v2431_v34, %v2425_v37 }
 0xd2d   :  { %v2437_v47 = vpop.permute.xlu0 %2436  ;;  %v2544_v27 = vmul.f32 %v8068_v15, %v2435_v14  ;;  %v2547_v37 = vmul.f32 %v8079_v41, %v2432_v0  ;;  %v8127_v14 = vld [vmem:[%s10175_s1 + $0x28] sm:$0xff] }
 0xd2f   :  { %v2439_v45 = vpop.permute.xlu1 %2438 }
 0xd30   :  { %v2446_v23 = vsel %vm48_vm6, %v2437_v47, %v2439_v45 }
 0xd31   :  { %v2549_v25 = vmul.f32 %v8060_v26, %v2446_v23  ;;  %v2441_v38 = vpop.permute.xlu0 %2440  ;;  %v8117_v23 = vld [vmem:[%s10175_s1 + $0x8] sm:$0xff] }
 0xd32   :  { %v2445_v31 = vsel %vm48_vm6, %v2439_v45, %v2441_v38 }
 0xd33   :  { %v2443_v8 = vpop.permute.xlu1 %2442  ;;  %v2581_v57 = vpack.c.bf16 %v2549_v25, %v2545_v60  ;;  %v2550_v32 = vmul.f32 %v8074_v17, %v2445_v31 }
 0xd34   :  { %v2444_v18 = vsel %vm48_vm6, %v2441_v38, %v2443_v8  ;;  %v2447_v29 = vsel %vm48_vm6, %v2443_v8, %v2437_v47 }
 0xd35   :  { %v2548_v19 = vmul.f32 %v8090_v54, %v2447_v29  ;;  %v2551_v51 = vmul.f32 %v8095_v46, %v2444_v18  ;;  %v2401_v20 = vpop.permute.xlu0 %2400  ;;  %2608 = vmatprep.subr.bf16.mxu0 %v2581_v57  ;;  %v2582_v34 = vpack.c.bf16 %v2550_v32, %v2546_v9  ;;  %v8138_v57 = vld [vmem:[%s10175_s1] sm:$0xff]  ;;  %v8143_v32 = vld [vmem:[%s10175_s1 + $0x18] sm:$0xff] }
 0xd37   :  { %v2580_v5 = vpack.c.bf16 %v2548_v19, %v2544_v27  ;;  %v2403_v16 = vpop.permute.xlu1 %2402  ;;  %v2583_v35 = vpack.c.bf16 %v2551_v51, %v2547_v37  ;;  %v8154_v37 = vld [vmem:[%s10175_s1 + $0x10] sm:$0xff] }
 0xd38   :  { %v2410_v60 = vsel %vm39_vm7, %v2401_v20, %v2403_v16  ;;  %10250 = vst [vmem:[#allocation9_spill] sm:$0xff] %v8154_v37 }
 0xd39   :  { %2651 = vmatprep.subr.bf16.mxu1 %v2583_v35  ;;  %v2405_v40 = vpop.permute.xlu0 %2404  ;;  %2609 = vmatpush1.bf16.msra.mxu0 %v2580_v5  ;;  %v2537_v0 = vmul.f32 %v8117_v23, %v2410_v60  ;;  %v8168_v60 = vld [vmem:[%s10175_s1 + $0x20] sm:$0xff] }
 0xd3a   :  { %2652 = vmatpush1.bf16.msra.mxu1 %v2582_v34  ;;  %v2409_v19 = vsel %vm39_vm7, %v2403_v16, %v2405_v40 }
 0xd3b   :  { %v2407_v47 = vpop.permute.xlu1 %2406 }
 0xd3c   :  { %v2408_v18 = vsel %vm39_vm7, %v2405_v40, %v2407_v47  ;;  %v2411_v29 = vsel %vm39_vm7, %v2407_v47, %v2401_v20  ;;  %v8174_v40 = vld [vmem:[%s10175_s1 + $0x38] sm:$0xff] }
 0xd3d   :  { %v2413_v45 = vpop.permute.xlu0 %2412  ;;  %v2536_v34 = vmul.f32 %v8138_v57, %v2411_v29  ;;  %v2539_v47 = vmul.f32 %v8143_v32, %v2408_v18 }
 0xd3f   :  { %v2415_v25 = vpop.permute.xlu1 %2414 }
 0xd40   :  { %v2422_v38 = vsel %vm42_vm8, %v2413_v45, %v2415_v25 }
 0xd41   :  { %v2541_v31 = vmul.f32 %v8127_v14, %v2422_v38  ;;  %v2417_v8 = vpop.permute.xlu0 %2416 }
 0xd42   :  { %v2421_v27 = vsel %vm42_vm8, %v2415_v25, %v2417_v8 }
 0xd43   :  { %v2419_v51 = vpop.permute.xlu1 %2418  ;;  %v2577_v9 = vpack.c.bf16 %v2541_v31, %v2537_v0  ;;  %v2542_v5 = vmul.f32 %v8133_v56, %v2421_v27 }
 0xd44   :  { %v2420_v35 = vsel %vm42_vm8, %v2417_v8, %v2419_v51  ;;  %v2423_v20 = vsel %vm42_vm8, %v2419_v51, %v2413_v45  ;;  %v2538_v45 = vmul.f32 %v8154_v37, %v2409_v19  ;;  %v8181_v8 = vld [vmem:[%s10174_s2] sm:$0xff]  }
 0xd45   :  { %v2540_v16 = vmul.f32 %v8168_v60, %v2423_v20  ;;  %v2543_v25 = vmul.f32 %v8174_v40, %v2420_v35  ;;  %2610 = vmatprep.subr.bf16.mxu0 %v2577_v9  ;;  %10251 = vst [vmem:[#allocation10_spill] sm:$0xff] %v8181_v8  ;;  %v4924_v19 = vld [vmem:[%s10176_s0 + $0x1a0] sm:$0xff]  ;;  %v4926_v9 = vld [vmem:[%s10176_s0 + $0x1b0] sm:$0xff]  ;;  %v4925_v35 = vld [vmem:[%s10176_s0 + $0x1a8] sm:$0xff] }
 0xd46   :  { %v2578_v31 = vpack.c.bf16 %v2542_v5, %v2538_v45 }
 0xd47   :  { %v2576_v38 = vpack.c.bf16 %v2540_v16, %v2536_v34  ;;  %v2579_v0 = vpack.c.bf16 %v2543_v25, %v2539_v47  ;;  %v4927_v47 = vld [vmem:[%s10176_s0 + $0x1b8] sm:$0xff] }
 0xd49   :  { %2611 = vmatpush1.bf16.msra.mxu0 %v2576_v38  ;;  %2653 = vmatprep.subr.bf16.mxu1 %v2579_v0 }
 0xd4a   :  { %2654 = vmatpush1.bf16.msra.mxu1 %v2578_v31 }
 0xd4c   :  { %4932 = vmatmul.mubr.msk.bf16.vlgmr.msra.gmra.mxu0 %vm166_vm0, %v8181_v8 }
 0xd4d   :  { %4933 = vmatmul.mubr.msk.bf16.vlgmr.msra.gmra.mxu1 %vm166_vm0, %v8181_v8  ;;  %2918 = vmatprep.mubr.bf16.mxu0 %v10238_v36 }
 0xd4e   :  { %2959 = vmatprep.mubr.bf16.mxu1 %v10238_v36 }
 0xe0c   :  { %v8189_v18 = vpop.f32.mrf.mxu0 }
 0xe0d   :  { %10252 = vst [vmem:[#allocation7_spill] sm:$0xff] %v8189_v18  ;;  %v8191_v29 = vpop.f32.mrf.mxu1 }
 0xe0e   :  { %10253 = vst [vmem:[#allocation8_spill] sm:$0xff] %v8191_v29  ;;  %v8193_v27 = vpop.f32.mrf.mxu0 }
 0xe0f   :  { %10254 = vst [vmem:[#allocation2_spill] sm:$0xff] %v8193_v27  ;;  %v8198_v51 = vpop.f32.mrf.mxu1 }
 0xe10   :  { %10255 = vst [vmem:[#allocation5_spill] sm:$0xff] %v8198_v51  ;;  %v2634_v5 = vpop.f32.mrf.mxu0 }
 0xe11   :  { %v2635_v20 = vadd.f32 %v4924_v19, %v2634_v5  ;;  %v2677_v34 = vpop.f32.mrf.mxu1 }
 0xe12   :  { %v2678_v16 = vadd.f32 %v4926_v9, %v2677_v34  ;;  %v2636_v25 = vpop.f32.mrf.mxu0 }
 0xe13   :  { %v4938_v45 = vmul.f32 -1.442695, %v2635_v20  ;;  %v2637_v38 = vadd.f32 %v4925_v35, %v2636_v25  ;;  %v2679_v0 = vpop.f32.mrf.mxu1 }
 0xe14   :  { %v4940_v31 = vmul.f32 -1.442695, %v2678_v16  ;;  %v2680_v8 = vadd.f32 %v4927_v47, %v2679_v0 }
 0xe15   :  { %5203 = vpow2.f32 %v4938_v45  ;;  %v4939_v51 = vmul.f32 -1.442695, %v2637_v38 }
 0xe16   :  { %5205 = vpow2.f32 %v4940_v31  ;;  %v4941_v27 = vmul.f32 -1.442695, %v2680_v8 }
 0xe17   :  { %5207 = vpow2.f32 %v4939_v51 }
 0xe18   :  { %5209 = vpow2.f32 %v4941_v27 }
 0xe22   :  { %v5204_v29 = vpop.eup %5203 }
 0xe23   :  { %v5206_v19 = vpop.eup %5205  ;;  %v2718_v5 = vadd.f32 1.0, %v5204_v29 }
 0xe24   :  { %v5208_v18 = vpop.eup %5207  ;;  %v2720_v36 = vadd.f32 1.0, %v5206_v19 }
 0xe25   :  { %v5210_v37 = vpop.eup %5209  ;;  %5211 = vrcp.f32 %v2718_v5  ;;  %v2719_v9 = vadd.f32 1.0, %v5208_v18 }
 0xe26   :  { %5213 = vrcp.f32 %v2720_v36  ;;  %v2721_v20 = vadd.f32 1.0, %v5210_v37 }
 0xe27   :  { %5215 = vrcp.f32 %v2719_v9 }
 0xe28   :  { %5217 = vrcp.f32 %v2721_v20 }
 0xe32   :  { %v5212_v35 = vpop.eup %5211 }
 0xe33   :  { %v5214_v34 = vpop.eup %5213  ;;  %v8210_v47 = vmul.f32 %v5212_v35, %v7780_v62 }
 0xe34   :  { %v5216_v8 = vpop.eup %5215  ;;  %v8218_v51 = vmul.f32 %v5214_v34, %v7783_v58 }
 0xe35   :  { %v8213_v27 = vmul.f32 %v5216_v8, %v7790_v48  ;;  %2818 = vrot.lane.b32.xlu0 %v8210_v47, %s5511_s18  ;;  %v5218_v29 = vpop.eup %5217 }
 0xe36   :  { %v8223_v36 = vmul.f32 %v5218_v29, %v7798_v3 }
 0xe37   :  { %2820 = vrot.lane.b32.xlu1 %v8213_v27, %s5511_s18 }
 0xe39   :  { %2822 = vrot.lane.b32.xlu0 %v8218_v51, %s5511_s18 }
 0xe3b   :  { %2824 = vrot.lane.b32.xlu1 %v8223_v36, %s5511_s18 }
 0xe3d   :  { %2794 = vrot.lane.b32.xlu0 %v8210_v47, %s5513_s20 }
 0xe3f   :  { %2796 = vrot.lane.b32.xlu1 %v8213_v27, %s5513_s20 }
 0xe41   :  { %2798 = vrot.lane.b32.xlu0 %v8218_v51, %s5513_s20 }
 0xe43   :  { %2800 = vrot.lane.b32.xlu1 %v8223_v36, %s5513_s20 }
 0xe45   :  { %2806 = vrot.lane.b32.xlu0 %v8210_v47, %s5512_s19 }
 0xe47   :  { %2808 = vrot.lane.b32.xlu1 %v8213_v27, %s5512_s19 }
 0xe49   :  { %2810 = vrot.lane.b32.xlu0 %v8218_v51, %s5512_s19 }
 0xe4b   :  { %2812 = vrot.lane.b32.xlu1 %v8223_v36, %s5512_s19 }
 0xe4d   :  { %2782 = vrot.lane.b32.xlu0 %v8210_v47, %s5514_s21 }
 0xe4f   :  { %2784 = vrot.lane.b32.xlu1 %v8213_v27, %s5514_s21 }
 0xe51   :  { %2786 = vrot.lane.b32.xlu0 %v8218_v51, %s5514_s21 }
 0xe53   :  { %2788 = vrot.lane.b32.xlu1 %v8223_v36, %s5514_s21 }
 0xe55   :  { %2758 = vrot.lane.b32.xlu0 %v8210_v47, %s5516_s23 }
 0xe57   :  { %2760 = vrot.lane.b32.xlu1 %v8213_v27, %s5516_s23 }
 0xe59   :  { %2762 = vrot.lane.b32.xlu0 %v8218_v51, %s5516_s23 }
 0xe5b   :  { %2764 = vrot.lane.b32.xlu1 %v8223_v36, %s5516_s23 }
 0xe5d   :  { %2770 = vrot.lane.b32.xlu0 %v8210_v47, %s5515_s22 }
 0xe5f   :  { %2772 = vrot.lane.b32.xlu1 %v8213_v27, %s5515_s22 }
 0xe61   :  { %2774 = vrot.lane.b32.xlu0 %v8218_v51, %s5515_s22 }
 0xe63   :  { %2776 = vrot.lane.b32.xlu1 %v8223_v36, %s5515_s22 }
 0xe65   :  { %2734 = vrot.lane.b32.xlu0 %v8210_v47, %s5519_s25 }
 0xe67   :  { %2736 = vrot.lane.b32.xlu1 %v8213_v27, %s5519_s25 }
 0xe69   :  { %2738 = vrot.lane.b32.xlu0 %v8218_v51, %s5519_s25 }
 0xe6b   :  { %2740 = vrot.lane.b32.xlu1 %v8223_v36, %s5519_s25 }
 0xe6d   :  { %2746 = vrot.lane.b32.xlu0 %v8210_v47, %s5518_s24 }
 0xe6f   :  { %2748 = vrot.lane.b32.xlu1 %v8213_v27, %s5518_s24 }
 0xe71   :  { %2750 = vrot.lane.b32.xlu0 %v8218_v51, %s5518_s24 }
 0xe73   :  { %2752 = vrot.lane.b32.xlu1 %v8223_v36, %s5518_s24 }
 0xea7   :  { %v2819_v37 = vpop.permute.xlu0 %2818 }
 0xea9   :  { %v2821_v18 = vpop.permute.xlu1 %2820 }
 0xeaa   :  { %v2828_v16 = vsel %vm60_vm1, %v2819_v37, %v2821_v18 }
 0xeab   :  { %v2823_v25 = vpop.permute.xlu0 %2822  ;;  %v2862_v45 = vmul.f32 %v2828_v16, %v7876_v49 }
 0xeac   :  { %v2827_v38 = vsel %vm60_vm1, %v2821_v18, %v2823_v25 }
 0xead   :  { %v2863_v0 = vmul.f32 %v2827_v38, %v7886_v22  ;;  %v2825_v31 = vpop.permute.xlu1 %2824  ;;  %v2882_v49 = vpack.c.bf16 %v7896_v13, %v2862_v45 }
 0xeae   :  { %v2826_v19 = vsel %vm60_vm1, %v2823_v25, %v2825_v31  ;;  %v2829_v5 = vsel %vm60_vm1, %v2825_v31, %v2819_v37 }
 0xeaf   :  { %v2864_v9 = vmul.f32 %v2826_v19, %v7904_v4  ;;  %v2865_v20 = vmul.f32 %v2829_v5, %v7909_v59  ;;  %v2795_v35 = vpop.permute.xlu0 %2794  ;;  %v2883_v34 = vpack.c.bf16 %v7894_v1, %v2863_v0 }
 0xeb1   :  { %v2884_v8 = vpack.c.bf16 %v7912_v10, %v2864_v9  ;;  %v2797_v29 = vpop.permute.xlu1 %2796  ;;  %2892 = vmatprep.subr.bf16.mxu0 %v2883_v34  ;;  %v2885_v22 = vpack.c.bf16 %v7914_v11, %v2865_v20 }
 0xeb2   :  { %2893 = vmatpush1.bf16.msra.mxu0 %v2882_v49  ;;  %v2804_v45 = vsel %vm54_vm3, %v2795_v35, %v2797_v29 }
 0xeb3   :  { %2933 = vmatprep.subr.bf16.mxu1 %v2885_v22  ;;  %v2799_v18 = vpop.permute.xlu0 %2798  ;;  %v2854_v22 = vmul.f32 %v2804_v45, %v7948_v63 }
 0xeb4   :  { %2934 = vmatpush1.bf16.msra.mxu1 %v2884_v8  ;;  %v2803_v38 = vsel %vm54_vm3, %v2797_v29, %v2799_v18 }
 0xeb5   :  { %v2801_v37 = vpop.permute.xlu1 %2800  ;;  %v2855_v34 = vmul.f32 %v2803_v38, %v7934_v42 }
 0xeb6   :  { %v2802_v31 = vsel %vm54_vm3, %v2799_v18, %v2801_v37  ;;  %v2805_v5 = vsel %vm54_vm3, %v2801_v37, %v2795_v35 }
 0xeb7   :  { %v2807_v16 = vpop.permute.xlu0 %2806  ;;  %v2856_v29 = vmul.f32 %v2802_v31, %v7955_v39  ;;  %v2857_v37 = vmul.f32 %v2805_v5, %v7962_v33 }
 0xeb9   :  { %v2809_v25 = vpop.permute.xlu1 %2808 }
 0xeba   :  { %v2816_v0 = vsel %vm57_vm2, %v2807_v16, %v2809_v25 }
 0xebb   :  { %v2811_v19 = vpop.permute.xlu0 %2810  ;;  %v2858_v9 = vmul.f32 %v2816_v0, %v7929_v30 }
 0xebc   :  { %v2815_v20 = vsel %vm57_vm2, %v2809_v25, %v2811_v19 }
 0xebd   :  { %v2859_v49 = vmul.f32 %v2815_v20, %v7943_v61  ;;  %v2813_v8 = vpop.permute.xlu1 %2812  ;;  %v2878_v20 = vpack.c.bf16 %v2858_v9, %v2854_v22  ;;  %v2847_v9 = vmul.f32 %v8213_v27, %v8005_v52  ;;  %v2849_v27 = vmul.f32 %v8223_v36, %v8033_v28 }
 0xebe   :  { %v2814_v18 = vsel %vm57_vm2, %v2811_v19, %v2813_v8  ;;  %v2817_v35 = vsel %vm57_vm2, %v2813_v8, %v2807_v16 }
 0xebf   :  { %v2860_v0 = vmul.f32 %v2814_v18, %v7972_v7  ;;  %v2861_v25 = vmul.f32 %v2817_v35, %v7977_v12  ;;  %v2783_v38 = vpop.permute.xlu0 %2782  ;;  %v2879_v42 = vpack.c.bf16 %v2859_v49, %v2855_v34  ;;  %v2848_v49 = vmul.f32 %v8218_v51, %v8015_v43 }
 0xec1   :  { %v2880_v61 = vpack.c.bf16 %v2860_v0, %v2856_v29  ;;  %v2785_v30 = vpop.permute.xlu1 %2784  ;;  %2894 = vmatprep.subr.bf16.mxu0 %v2879_v42  ;;  %v2881_v45 = vpack.c.bf16 %v2861_v25, %v2857_v37  ;;  %v2846_v42 = vmul.f32 %v8210_v47, %v8010_v53 }
 0xec2   :  { %v2792_v31 = vsel %vm51_vm4, %v2783_v38, %v2785_v30  ;;  %2895 = vmatpush1.bf16.msra.mxu0 %v2878_v20 }
 0xec3   :  { %2935 = vmatprep.subr.bf16.mxu1 %v2881_v45  ;;  %v2787_v19 = vpop.permute.xlu0 %2786  ;;  %v2850_v16 = vmul.f32 %v2792_v31, %v7993_v50 }
 0xec4   :  { %v2791_v5 = vsel %vm51_vm4, %v2785_v30, %v2787_v19  ;;  %2936 = vmatpush1.bf16.msra.mxu1 %v2880_v61 }
 0xec5   :  { %v2851_v8 = vmul.f32 %v2791_v5, %v8000_v6  ;;  %v2789_v34 = vpop.permute.xlu1 %2788  ;;  %v2874_v37 = vpack.c.bf16 %v2850_v16, %v2846_v42 }
 0xec6   :  { %v2790_v22 = vsel %vm51_vm4, %v2787_v19, %v2789_v34  ;;  %v2793_v29 = vsel %vm51_vm4, %v2789_v34, %v2783_v38 }
 0xec7   :  { %v2852_v30 = vmul.f32 %v2790_v22, %v8023_v24  ;;  %v2853_v61 = vmul.f32 %v2793_v29, %v8028_v2  ;;  %v2759_v18 = vpop.permute.xlu0 %2758  ;;  %v2875_v35 = vpack.c.bf16 %v2851_v8, %v2847_v9 }
 0xec9   :  { %v2876_v47 = vpack.c.bf16 %v2852_v30, %v2848_v49  ;;  %v2761_v0 = vpop.permute.xlu1 %2760  ;;  %2896 = vmatprep.subr.bf16.mxu0 %v2875_v35  ;;  %v2877_v51 = vpack.c.bf16 %v2853_v61, %v2849_v27 }
 0xeca   :  { %2897 = vmatpush1.bf16.msra.mxu0 %v2874_v37  ;;  %v2768_v45 = vsel %vm45_vm5, %v2759_v18, %v2761_v0 }
 0xecb   :  { %2937 = vmatprep.subr.bf16.mxu1 %v2877_v51  ;;  %v2763_v25 = vpop.permute.xlu0 %2762  ;;  %v2839_v36 = vmul.f32 %v2768_v45, %v8053_v55 }
 0xecc   :  { %2938 = vmatpush1.bf16.msra.mxu1 %v2876_v47  ;;  %v2767_v42 = vsel %vm45_vm5, %v2761_v0, %v2763_v25 }
 0xecd   :  { %v2765_v20 = vpop.permute.xlu1 %2764  ;;  %v2840_v0 = vmul.f32 %v2767_v42, %v8100_v21 }
 0xece   :  { %v2766_v8 = vsel %vm45_vm5, %v2763_v25, %v2765_v20  ;;  %v2769_v34 = vsel %vm45_vm5, %v2765_v20, %v2759_v18 }
 0xecf   :  { %v2771_v38 = vpop.permute.xlu0 %2770  ;;  %v2838_v35 = vmul.f32 %v2769_v34, %v8068_v15  ;;  %v2841_v18 = vmul.f32 %v2766_v8, %v8079_v41 }
 0xed1   :  { %v2773_v31 = vpop.permute.xlu1 %2772 }
 0xed2   :  { %v2780_v19 = vsel %vm48_vm6, %v2771_v38, %v2773_v31 }
 0xed3   :  { %v2843_v16 = vmul.f32 %v2780_v19, %v8060_v26  ;;  %v2775_v5 = vpop.permute.xlu0 %2774 }
 0xed4   :  { %v2779_v9 = vsel %vm48_vm6, %v2773_v31, %v2775_v5 }
 0xed5   :  { %v2777_v49 = vpop.permute.xlu1 %2776  ;;  %v2871_v22 = vpack.c.bf16 %v2843_v16, %v2839_v36  ;;  %v2844_v29 = vmul.f32 %v2779_v9, %v8074_v17 }
 0xed6   :  { %v2778_v30 = vsel %vm48_vm6, %v2775_v5, %v2777_v49  ;;  %v2781_v61 = vsel %vm48_vm6, %v2777_v49, %v2771_v38 }
 0xed7   :  { %v2842_v27 = vmul.f32 %v2781_v61, %v8090_v54  ;;  %v2845_v37 = vmul.f32 %v2778_v30, %v8095_v46  ;;  %v2735_v47 = vpop.permute.xlu0 %2734  ;;  %2898 = vmatprep.subr.bf16.mxu0 %v2871_v22  ;;  %v2872_v45 = vpack.c.bf16 %v2844_v29, %v2840_v0 }
 0xed9   :  { %v2870_v51 = vpack.c.bf16 %v2842_v27, %v2838_v35  ;;  %v2737_v25 = vpop.permute.xlu1 %2736  ;;  %v2873_v20 = vpack.c.bf16 %v2845_v37, %v2841_v18 }
 0xeda   :  { %v2744_v36 = vsel %vm39_vm7, %v2735_v47, %v2737_v25 }
 0xedb   :  { %2939 = vmatprep.subr.bf16.mxu1 %v2873_v20  ;;  %v2739_v31 = vpop.permute.xlu0 %2738  ;;  %2899 = vmatpush1.bf16.msra.mxu0 %v2870_v51  ;;  %v2831_v8 = vmul.f32 %v2744_v36, %v8117_v23  ;;  %v10256_v51 = vld [vmem:[#allocation9_spill] sm:$0xff]  ;;  %v4921_v36 = vld [vmem:[%s10176_s0 + $0x188] sm:$0xff] }
 0xedc   :  { %2940 = vmatpush1.bf16.msra.mxu1 %v2872_v45  ;;  %v2743_v29 = vsel %vm39_vm7, %v2737_v25, %v2739_v31 }
 0xedd   :  { %v2741_v38 = vpop.permute.xlu1 %2740  ;;  %v2832_v25 = vmul.f32 %v2743_v29, %v10256_v51 }
 0xede   :  { %v2742_v42 = vsel %vm39_vm7, %v2739_v31, %v2741_v38  ;;  %v2745_v49 = vsel %vm39_vm7, %v2741_v38, %v2735_v47  ;;  %v8396_v38 = vld [vmem:[%s10177_s3] sm:$0xf] }
 0xedf   :  { %v2747_v19 = vpop.permute.xlu0 %2746  ;;  %v2830_v27 = vmul.f32 %v2745_v49, %v8138_v57  ;;  %v2833_v37 = vmul.f32 %v2742_v42, %v8143_v32  ;;  %v10260_v42 = vld [vmem:[#allocation2_spill] sm:$0xff] }
 0xee0   :  { %v2633_v49 = vadd.f32 %v4921_v36, %v10260_v42  ;;  %v4929_v36 = vld [vmem:[%s10176_s0 + $0x1c8] sm:$0xff] }
 0xee1   :  { %v2749_v16 = vpop.permute.xlu1 %2748 }
 0xee2   :  { %v2756_v5 = vsel %vm42_vm8, %v2747_v19, %v2749_v16 }
 0xee3   :  { %v2835_v34 = vmul.f32 %v8127_v14, %v2756_v5  ;;  %v2751_v9 = vpop.permute.xlu0 %2750 }
 0xee4   :  { %v2755_v22 = vsel %vm42_vm8, %v2749_v16, %v2751_v9  ;;  %v10258_v16 = vld [vmem:[#allocation7_spill] sm:$0xff] }
 0xee5   :  { %v2753_v30 = vpop.permute.xlu1 %2752  ;;  %v2867_v61 = vpack.c.bf16 %v2835_v34, %v2831_v8  ;;  %v2836_v35 = vmul.f32 %v2755_v22, %v8133_v56  ;;  %v4923_v8 = vld [vmem:[%s10176_s0 + $0x198] sm:$0xff]  ;;  %v10259_v34 = vld [vmem:[#allocation8_spill] sm:$0xff] }
 0xee6   :  { %v2754_v14 = vsel %vm42_vm8, %v2751_v9, %v2753_v30  ;;  %v2757_v18 = vsel %vm42_vm8, %v2753_v30, %v2747_v19  ;;  %v4922_v19 = vld [vmem:[%s10176_s0 + $0x190] sm:$0xff]  ;;  %v10261_v22 = vld [vmem:[#allocation5_spill] sm:$0xff] }
 0xee7   :  { %v2834_v47 = vmul.f32 %v8168_v60, %v2757_v18  ;;  %v2837_v0 = vmul.f32 %v8174_v40, %v2754_v14  ;;  %2900 = vmatprep.subr.bf16.mxu0 %v2867_v61  ;;  %v2868_v31 = vpack.c.bf16 %v2836_v35, %v2832_v25  ;;  %v10257_v60 = vmov 0   ;;  %v4920_v40 = vld [vmem:[%s10176_s0 + $0x180] sm:$0xff] }
 0xee8   :  { %v2631_v5 = vadd.f32 %v4920_v40, %v10258_v16  ;;  %v2674_v9 = vadd.f32 %v4922_v19, %v10259_v34  ;;  %v2676_v29 = vadd.f32 %v4923_v8, %v10261_v22  ;;  %v4935_v35 = vmul.f32 -1.442695, %v2633_v49  ;;  %v4930_v40 = vld [vmem:[%s10176_s0 + $0x1d0] sm:$0xff]  ;;  %v4931_v8 = vld [vmem:[%s10176_s0 + $0x1d8] sm:$0xff] }
 0xee9   :  { %v2866_v20 = vpack.c.bf16 %v2834_v47, %v2830_v27  ;;  %v2869_v45 = vpack.c.bf16 %v2837_v0, %v2833_v37 }
 0xeea   :  { %v4934_v30 = vmul.f32 -1.442695, %v2631_v5  ;;  %v4936_v61 = vmul.f32 -1.442695, %v2674_v9  ;;  %v4937_v14 = vmul.f32 -1.442695, %v2676_v29 }
 0xeeb   :  { %2901 = vmatpush1.bf16.msra.mxu0 %v2866_v20  ;;  %2941 = vmatprep.subr.bf16.mxu1 %v2869_v45 }
 0xeec   :  { %2942 = vmatpush1.bf16.msra.mxu1 %v2868_v31  ;;  %5219 = vpow2.f32 %v4934_v30  ;;  %v4928_v31 = vld [vmem:[%s10176_s0 + $0x1c0] sm:$0xff] }
 0xeed   :  { %5221 = vpow2.f32 %v4936_v61 }
 0xeee   :  { %4942 = vmatmul.mubr.msk.bf16.vlgmr.msra.gmra.mxu0 %vm166_vm0, %v8396_v38  ;;  %5223 = vpow2.f32 %v4935_v35 }
 0xeef   :  { %4943 = vmatmul.mubr.msk.bf16.vlgmr.msra.gmra.mxu1 %vm166_vm0, %v8396_v38  ;;  %3234 = vmatprep.mubr.bf16.mxu0 %v10257_v60  ;;  %5225 = vpow2.f32 %v4937_v14 }
 0xef0   :  { %3277 = vmatprep.mubr.bf16.mxu1 %v10257_v60 }
 0xef9   :  { %v5220_v18 = vpop.eup %5219 }
 0xefa   :  { %v5222_v27 = vpop.eup %5221  ;;  %v2694_v0 = vadd.f32 1.0, %v5220_v18 }
 0xefb   :  { %v5224_v37 = vpop.eup %5223  ;;  %v2696_v25 = vadd.f32 1.0, %v5222_v27 }
 0xefc   :  { %v5226_v47 = vpop.eup %5225  ;;  %v2695_v20 = vadd.f32 1.0, %v5224_v37  ;;  %5227 = vrcp.f32 %v2694_v0 }
 0xefd   :  { %v2697_v45 = vadd.f32 1.0, %v5226_v47  ;;  %5229 = vrcp.f32 %v2696_v25 }
 0xefe   :  { %5231 = vrcp.f32 %v2695_v20 }
 0xeff   :  { %5233 = vrcp.f32 %v2697_v45 }
 0xf09   :  { %v5228_v14 = vpop.eup %5227 }
 0xf0a   :  { %v5230_v18 = vpop.eup %5229  ;;  %v2972_v47 = vsub.f32 1.0, %v5228_v14 }
 0xf0b   :  { %v5232_v27 = vpop.eup %5231  ;;  %v2974_v0 = vsub.f32 1.0, %v5230_v18 }
 0xf0c   :  { %v5234_v37 = vpop.eup %5233  ;;  %v2973_v25 = vsub.f32 1.0, %v5232_v27 }
 0xf0d   :  { %v2975_v45 = vsub.f32 1.0, %v5234_v37 }
 0xfae   :  { %v2920_v19 = vpop.f32.mrf.mxu0 }
 0xfaf   :  { %v2921_v16 = vadd.f32 %v4928_v31, %v2920_v19  ;;  %v2961_v5 = vpop.f32.mrf.mxu1 }
 0xfb0   :  { %v2962_v34 = vadd.f32 %v4930_v40, %v2961_v5  ;;  %v2922_v9 = vpop.f32.mrf.mxu0  ;;  %v2976_v40 = vmul.f32 %v2972_v47, %v7780_v62 }
 0xfb1   :  { %5235 = vtanh.f32 %v2921_v16  ;;  %v2923_v42 = vadd.f32 %v4929_v36, %v2922_v9  ;;  %v2963_v49 = vpop.f32.mrf.mxu1  ;;  %v2978_v16 = vmul.f32 %v2974_v0, %v7783_v58  ;;  %v2977_v9 = vmul.f32 %v2973_v25, %v7790_v48 }
 0xfb2   :  { %5237 = vtanh.f32 %v2962_v34  ;;  %v2964_v22 = vadd.f32 %v4931_v8, %v2963_v49  ;;  %v2924_v29 = vpop.f32.mrf.mxu0 }
 0xfb3   :  { %5239 = vtanh.f32 %v2923_v42  ;;  %v2965_v30 = vpop.f32.mrf.mxu1 }
 0xfb4   :  { %5241 = vtanh.f32 %v2964_v22  ;;  %v2925_v61 = vpop.f32.mrf.mxu0  ;;  %v2979_v22 = vmul.f32 %v2975_v45, %v7798_v3 }
 0xfb5   :  { %v2966_v35 = vpop.f32.mrf.mxu1 }
 0xfb6   :  { %v8529_v35 = vld [vmem:[%s10175_s1 + $0x100] sm:$0xff] }
 0xfbe   :  { %v5236_v20 = vpop.eup %5235 }
 0xfbf   :  { %v5238_v31 = vpop.eup %5237  ;;  %v2980_v19 = vmul.f32 %v5236_v20, %v5228_v14 }
 0xfc0   :  { %v5240_v36 = vpop.eup %5239  ;;  %v2982_v5 = vmul.f32 %v5238_v31, %v5230_v18 }
 0xfc1   :  { %v5242_v8 = vpop.eup %5241  ;;  %v8434_v34 = vadd.f32 %v2980_v19, %v2976_v40  ;;  %v2981_v42 = vmul.f32 %v5240_v36, %v5232_v27  ;;  %v8537_v27 = vld [vmem:[%s10175_s1 + $0x108] sm:$0xff] }
 0xfc2   :  { %v8437_v49 = vadd.f32 %v2982_v5, %v2978_v16  ;;  %v2983_v29 = vmul.f32 %v5242_v8, %v5234_v37 }
 0xfc3   :  { %4944 = vst [vmem:[%s10178_s4 + $0x80] sm:$0xff] %v8434_v34  ;;  %v8444_v62 = vadd.f32 %v2981_v42, %v2977_v9  ;;  %3090 = vrot.lane.b32.xlu0 %v8434_v34, %s5511_s18 }
 0xfc4   :  { %4946 = vst [vmem:[%s10178_s4 + $0x90] sm:$0xff] %v8437_v49  ;;  %v8452_v58 = vadd.f32 %v2983_v29, %v2979_v22 }
 0xfc5   :  { %4945 = vst [vmem:[%s10178_s4 + $0x88] sm:$0xff] %v8444_v62  ;;  %3092 = vrot.lane.b32.xlu1 %v8444_v62, %s5511_s18 }
 0xfc6   :  { %4947 = vst [vmem:[%s10178_s4 + $0x98] sm:$0xff] %v8452_v58 }
 0xfc7   :  { %3094 = vrot.lane.b32.xlu0 %v8437_v49, %s5511_s18 }
 0xfc9   :  { %3096 = vrot.lane.b32.xlu1 %v8452_v58, %s5511_s18 }
 0xfcb   :  { %3066 = vrot.lane.b32.xlu0 %v8434_v34, %s5513_s20 }
 0xfcd   :  { %3068 = vrot.lane.b32.xlu1 %v8444_v62, %s5513_s20 }
 0xfcf   :  { %3070 = vrot.lane.b32.xlu0 %v8437_v49, %s5513_s20 }
 0xfd1   :  { %3072 = vrot.lane.b32.xlu1 %v8452_v58, %s5513_s20 }
 0xfd3   :  { %3078 = vrot.lane.b32.xlu0 %v8434_v34, %s5512_s19 }
 0xfd5   :  { %3080 = vrot.lane.b32.xlu1 %v8444_v62, %s5512_s19 }
 0xfd7   :  { %3082 = vrot.lane.b32.xlu0 %v8437_v49, %s5512_s19 }
 0xfd9   :  { %3084 = vrot.lane.b32.xlu1 %v8452_v58, %s5512_s19 }
 0xfdb   :  { %3054 = vrot.lane.b32.xlu0 %v8434_v34, %s5514_s21 }
 0xfdd   :  { %3056 = vrot.lane.b32.xlu1 %v8444_v62, %s5514_s21 }
 0xfdf   :  { %3058 = vrot.lane.b32.xlu0 %v8437_v49, %s5514_s21 }
 0xfe1   :  { %3060 = vrot.lane.b32.xlu1 %v8452_v58, %s5514_s21 }
 0xfe3   :  { %3030 = vrot.lane.b32.xlu0 %v8434_v34, %s5516_s23 }
 0xfe5   :  { %3032 = vrot.lane.b32.xlu1 %v8444_v62, %s5516_s23 }
 0xfe7   :  { %3034 = vrot.lane.b32.xlu0 %v8437_v49, %s5516_s23 }
 0xfe9   :  { %3036 = vrot.lane.b32.xlu1 %v8452_v58, %s5516_s23 }
 0xfeb   :  { %3042 = vrot.lane.b32.xlu0 %v8434_v34, %s5515_s22 }
 0xfed   :  { %3044 = vrot.lane.b32.xlu1 %v8444_v62, %s5515_s22 }
 0xfef   :  { %3046 = vrot.lane.b32.xlu0 %v8437_v49, %s5515_s22 }
 0xff1   :  { %3048 = vrot.lane.b32.xlu1 %v8452_v58, %s5515_s22 }
 0xff3   :  { %3006 = vrot.lane.b32.xlu0 %v8434_v34, %s5519_s25 }
 0xff5   :  { %3008 = vrot.lane.b32.xlu1 %v8444_v62, %s5519_s25 }
 0xff7   :  { %3010 = vrot.lane.b32.xlu0 %v8437_v49, %s5519_s25 }
 0xff9   :  { %3012 = vrot.lane.b32.xlu1 %v8452_v58, %s5519_s25 }
 0xffb   :  { %3018 = vrot.lane.b32.xlu0 %v8434_v34, %s5518_s24 }
 0xffd   :  { %3020 = vrot.lane.b32.xlu1 %v8444_v62, %s5518_s24 }
 0xfff   :  { %3022 = vrot.lane.b32.xlu0 %v8437_v49, %s5518_s24 }
0x1001   :  { %3024 = vrot.lane.b32.xlu1 %v8452_v58, %s5518_s24 }
0x1035   :  { %v3091_v48 = vpop.permute.xlu0 %3090 }
0x1037   :  { %v3093_v3 = vpop.permute.xlu1 %3092 }
0x1038   :  { %v3100_v30 = vsel %vm60_vm1, %v3091_v48, %v3093_v3 }
0x1039   :  { %v3095_v61 = vpop.permute.xlu0 %3094  ;;  %v3174_v14 = vmul.f32 %v8529_v35, %v3100_v30 }
0x103a   :  { %v3099_v18 = vsel %vm60_vm1, %v3093_v3, %v3095_v61 }
0x103b   :  { %v3175_v37 = vmul.f32 %v8537_v27, %v3099_v18  ;;  %v3097_v47 = vpop.permute.xlu1 %3096  ;;  %v3198_v19 = vpack.c.bf16 %v7896_v13, %v3174_v14 }
0x103c   :  { %v3098_v0 = vsel %vm60_vm1, %v3095_v61, %v3097_v47  ;;  %v3101_v25 = vsel %vm60_vm1, %v3097_v47, %v3091_v48  ;;  %v10262_v61 = vld [vmem:[#allocation4_spill] sm:$0xff] }
0x103d   :  { %v3176_v20 = vmul.f32 %v3098_v0, %v7904_v4  ;;  %v3177_v45 = vmul.f32 %v3101_v25, %v7909_v59  ;;  %v3067_v31 = vpop.permute.xlu0 %3066  ;;  %v3199_v40 = vpack.c.bf16 %v7894_v1, %v3175_v37  ;;  %v10263_v37 = vld [vmem:[#allocation3_spill] sm:$0xff]  ;;  %v10264_v0 = vld [vmem:[#allocation6_spill] sm:$0xff] }
0x103f   :  { %v3200_v36 = vpack.c.bf16 %v7912_v10, %v3176_v20  ;;  %v3069_v16 = vpop.permute.xlu1 %3068  ;;  %3208 = vmatprep.subr.bf16.mxu0 %v3199_v40  ;;  %v3201_v5 = vpack.c.bf16 %v7914_v11, %v3177_v45 }
0x1040   :  { %3209 = vmatpush1.bf16.msra.mxu0 %v3198_v19  ;;  %v3076_v29 = vsel %vm54_vm3, %v3067_v31, %v3069_v16 }
0x1041   :  { %3251 = vmatprep.subr.bf16.mxu1 %v3201_v5  ;;  %v3071_v8 = vpop.permute.xlu0 %3070  ;;  %v3166_v45 = vmul.f32 %v3076_v29, %v7948_v63 }
0x1042   :  { %3252 = vmatpush1.bf16.msra.mxu1 %v3200_v36  ;;  %v3075_v59 = vsel %vm54_vm3, %v3069_v16, %v3071_v8 }
0x1043   :  { %v3073_v9 = vpop.permute.xlu1 %3072  ;;  %v3167_v47 = vmul.f32 %v3075_v59, %v10263_v37 }
0x1044   :  { %v3074_v48 = vsel %vm54_vm3, %v3071_v8, %v3073_v9  ;;  %v3077_v30 = vsel %vm54_vm3, %v3073_v9, %v3067_v31 }
0x1045   :  { %v3079_v42 = vpop.permute.xlu0 %3078  ;;  %v3168_v40 = vmul.f32 %v3074_v48, %v7955_v39  ;;  %v3169_v36 = vmul.f32 %v3077_v30, %v7962_v33  ;;  %v3159_v48 = vmul.f32 %v8444_v62, %v8005_v52  ;;  %v3160_v30 = vmul.f32 %v8437_v49, %v8015_v43 }
0x1046   :  { %v3161_v52 = vmul.f32 %v8452_v58, %v8033_v28 }
0x1047   :  { %v3081_v4 = vpop.permute.xlu1 %3080 }
0x1048   :  { %v3088_v22 = vsel %vm57_vm2, %v3079_v42, %v3081_v4 }
0x1049   :  { %v3083_v3 = vpop.permute.xlu0 %3082  ;;  %v3170_v14 = vmul.f32 %v3088_v22, %v10262_v61 }
0x104a   :  { %v3087_v18 = vsel %vm57_vm2, %v3081_v4, %v3083_v3 }
0x104b   :  { %v3171_v25 = vmul.f32 %v3087_v18, %v10264_v0  ;;  %v3085_v20 = vpop.permute.xlu1 %3084  ;;  %v3194_v4 = vpack.c.bf16 %v3170_v14, %v3166_v45 }
0x104c   :  { %v3086_v19 = vsel %vm57_vm2, %v3083_v3, %v3085_v20  ;;  %v3089_v31 = vsel %vm57_vm2, %v3085_v20, %v3079_v42  ;;  %v3158_v3 = vmul.f32 %v8434_v34, %v8010_v53 }
0x104d   :  { %v3172_v16 = vmul.f32 %v3086_v19, %v7972_v7  ;;  %v3173_v5 = vmul.f32 %v3089_v31, %v7977_v12  ;;  %v3055_v8 = vpop.permute.xlu0 %3054  ;;  %v3195_v9 = vpack.c.bf16 %v3171_v25, %v3167_v47 }
0x104f   :  { %v3196_v59 = vpack.c.bf16 %v3172_v16, %v3168_v40  ;;  %v3057_v22 = vpop.permute.xlu1 %3056  ;;  %3210 = vmatprep.subr.bf16.mxu0 %v3195_v9  ;;  %v3197_v63 = vpack.c.bf16 %v3173_v5, %v3169_v36 }
0x1050   :  { %v3064_v39 = vsel %vm51_vm4, %v3055_v8, %v3057_v22  ;;  %3211 = vmatpush1.bf16.msra.mxu0 %v3194_v4 }
0x1051   :  { %3253 = vmatprep.subr.bf16.mxu1 %v3197_v63  ;;  %v3059_v29 = vpop.permute.xlu0 %3058  ;;  %v3162_v42 = vmul.f32 %v3064_v39, %v7993_v50 }
0x1052   :  { %v3063_v33 = vsel %vm51_vm4, %v3057_v22, %v3059_v29  ;;  %3254 = vmatpush1.bf16.msra.mxu1 %v3196_v59 }
0x1053   :  { %v3163_v7 = vmul.f32 %v3063_v33, %v8000_v6  ;;  %v3061_v12 = vpop.permute.xlu1 %3060  ;;  %v3190_v47 = vpack.c.bf16 %v3162_v42, %v3158_v3 }
0x1054   :  { %v3062_v61 = vsel %vm51_vm4, %v3059_v29, %v3061_v12  ;;  %v3065_v50 = vsel %vm51_vm4, %v3061_v12, %v3055_v8 }
0x1055   :  { %v3164_v14 = vmul.f32 %v3062_v61, %v8023_v24  ;;  %v3165_v6 = vmul.f32 %v3065_v50, %v8028_v2  ;;  %v3031_v18 = vpop.permute.xlu0 %3030  ;;  %v3191_v37 = vpack.c.bf16 %v3163_v7, %v3159_v48 }
0x1057   :  { %v3192_v53 = vpack.c.bf16 %v3164_v14, %v3160_v30  ;;  %v3033_v0 = vpop.permute.xlu1 %3032  ;;  %3212 = vmatprep.subr.bf16.mxu0 %v3191_v37  ;;  %v3193_v43 = vpack.c.bf16 %v3165_v6, %v3161_v52  ;;  %v8638_v52 = vld [vmem:[%s10175_s1 + $0x20] sm:$0xff] }
0x1058   :  { %3213 = vmatpush1.bf16.msra.mxu0 %v3190_v47  ;;  %v3040_v24 = vsel %vm45_vm5, %v3031_v18, %v3033_v0 }
0x1059   :  { %3255 = vmatprep.subr.bf16.mxu1 %v3193_v43  ;;  %v3035_v25 = vpop.permute.xlu0 %3034  ;;  %v3151_v28 = vmul.f32 %v3040_v24, %v8053_v55 }
0x105a   :  { %3256 = vmatpush1.bf16.msra.mxu1 %v3192_v53  ;;  %v3039_v8 = vsel %vm45_vm5, %v3033_v0, %v3035_v25 }
0x105b   :  { %v3037_v20 = vpop.permute.xlu1 %3036  ;;  %v3152_v33 = vmul.f32 %v3039_v8, %v8100_v21  ;;  %v4954_v8 = vld [vmem:[%s10176_s0 + $0x210] sm:$0xff] }
0x105c   :  { %v3038_v36 = vsel %vm45_vm5, %v3035_v25, %v3037_v20  ;;  %v3041_v16 = vsel %vm45_vm5, %v3037_v20, %v3031_v18 }
0x105d   :  { %v3043_v45 = vpop.permute.xlu0 %3042  ;;  %v3150_v22 = vmul.f32 %v3041_v16, %v8068_v15  ;;  %v3153_v63 = vmul.f32 %v3038_v36, %v8079_v41  ;;  %v10265_v36 = vld [vmem:[#allocation10_spill] sm:$0xff] }
0x105e   :  { %v4952_v16 = vld [vmem:[%s10176_s0 + $0x200] sm:$0xff] }
0x105f   :  { %v3045_v2 = vpop.permute.xlu1 %3044 }
0x1060   :  { %v3052_v40 = vsel %vm48_vm6, %v3043_v45, %v3045_v2 }
0x1061   :  { %v3155_v19 = vmul.f32 %v3052_v40, %v8060_v26  ;;  %v3047_v31 = vpop.permute.xlu0 %3046 }
0x1062   :  { %v3051_v5 = vsel %vm48_vm6, %v3045_v2, %v3047_v31 }
0x1063   :  { %v3049_v9 = vpop.permute.xlu1 %3048  ;;  %v3187_v4 = vpack.c.bf16 %v3155_v19, %v3151_v28  ;;  %v3156_v59 = vmul.f32 %v3051_v5, %v8074_v17 }
0x1064   :  { %v3050_v55 = vsel %vm48_vm6, %v3047_v31, %v3049_v9  ;;  %v3053_v26 = vsel %vm48_vm6, %v3049_v9, %v3043_v45 }
0x1065   :  { %v3154_v39 = vmul.f32 %v3053_v26, %v8090_v54  ;;  %v3157_v29 = vmul.f32 %v3050_v55, %v8095_v46  ;;  %v3007_v42 = vpop.permute.xlu0 %3006  ;;  %3214 = vmatprep.subr.bf16.mxu0 %v3187_v4  ;;  %v3188_v48 = vpack.c.bf16 %v3156_v59, %v3152_v33  ;;  %v8623_v54 = vld [vmem:[%s10175_s1 + $0x28] sm:$0xff]  ;;  %v4955_v26 = vld [vmem:[%s10176_s0 + $0x218] sm:$0xff] }
0x1066   :  { %v4953_v4 = vld [vmem:[%s10176_s0 + $0x208] sm:$0xff] }
0x1067   :  { %v3186_v7 = vpack.c.bf16 %v3154_v39, %v3150_v22  ;;  %v3009_v17 = vpop.permute.xlu1 %3008  ;;  %v3189_v12 = vpack.c.bf16 %v3157_v29, %v3153_v63 }
0x1068   :  { %v3016_v41 = vsel %vm39_vm7, %v3007_v42, %v3009_v17 }
0x1069   :  { %3257 = vmatprep.subr.bf16.mxu1 %v3189_v12  ;;  %v3011_v3 = vpop.permute.xlu0 %3010  ;;  %3215 = vmatpush1.bf16.msra.mxu0 %v3186_v7  ;;  %v3143_v61 = vmul.f32 %v3016_v41, %v8117_v23  ;;  %v8643_v23 = vld [vmem:[%s10175_s1 + $0x38] sm:$0xff] }
0x106a   :  { %3258 = vmatpush1.bf16.msra.mxu1 %v3188_v48  ;;  %v3015_v47 = vsel %vm39_vm7, %v3009_v17, %v3011_v3 }
0x106b   :  { %v3013_v30 = vpop.permute.xlu1 %3012  ;;  %v3144_v28 = vmul.f32 %v3015_v47, %v10256_v51 }
0x106c   :  { %v3014_v6 = vsel %vm39_vm7, %v3011_v3, %v3013_v30  ;;  %v3017_v18 = vsel %vm39_vm7, %v3013_v30, %v3007_v42 }
0x106d   :  { %v3019_v15 = vpop.permute.xlu0 %3018  ;;  %v3142_v45 = vmul.f32 %v3017_v18, %v8138_v57  ;;  %v3145_v24 = vmul.f32 %v3014_v6, %v8143_v32 }
0x106f   :  { %v3021_v46 = vpop.permute.xlu1 %3020 }
0x1070   :  { %v3028_v21 = vsel %vm42_vm8, %v3019_v15, %v3021_v46 }
0x1071   :  { %v3147_v50 = vmul.f32 %v8623_v54, %v3028_v21  ;;  %v3023_v14 = vpop.permute.xlu0 %3022 }
0x1072   :  { %v3027_v37 = vsel %vm42_vm8, %v3021_v46, %v3023_v14 }
0x1073   :  { %v3025_v53 = vpop.permute.xlu1 %3024  ;;  %v3183_v0 = vpack.c.bf16 %v3147_v50, %v3143_v61  ;;  %v3148_v43 = vmul.f32 %v3027_v37, %v8133_v56 }
0x1074   :  { %v3026_v25 = vsel %vm42_vm8, %v3023_v14, %v3025_v53  ;;  %v3029_v20 = vsel %vm42_vm8, %v3025_v53, %v3019_v15 }
0x1075   :  { %v3146_v2 = vmul.f32 %v8638_v52, %v3029_v20  ;;  %v3149_v40 = vmul.f32 %v8643_v23, %v3026_v25  ;;  %3216 = vmatprep.subr.bf16.mxu0 %v3183_v0  ;;  %v3184_v56 = vpack.c.bf16 %v3148_v43, %v3144_v28 }
0x1077   :  { %v3182_v19 = vpack.c.bf16 %v3146_v2, %v3142_v45  ;;  %v3185_v31 = vpack.c.bf16 %v3149_v40, %v3145_v24 }
0x1079   :  { %3217 = vmatpush1.bf16.msra.mxu0 %v3182_v19  ;;  %3259 = vmatprep.subr.bf16.mxu1 %v3185_v31 }
0x107a   :  { %3260 = vmatpush1.bf16.msra.mxu1 %v3184_v56  ;;  %v5441_v56 = vld [vmem:[%s10175_s1 + $0x110] sm:$0xff] }
0x107c   :  { %4960 = vmatmul.mubr.msk.bf16.vlgmr.msra.gmra.mxu0 %vm166_vm0, %v10265_v36 }
0x107d   :  { %4961 = vmatmul.mubr.msk.bf16.vlgmr.msra.gmra.mxu1 %vm166_vm0, %v10265_v36  ;;  %3524 = vmatprep.mubr.bf16.mxu0 %v10257_v60 }
0x107e   :  { %3565 = vmatprep.mubr.bf16.mxu1 %v10257_v60 }
0x113c   :  { %v8663_v57 = vpop.f32.mrf.mxu0 }
0x113d   :  { %v8665_v32 = vpop.f32.mrf.mxu1 }
0x113e   :  { %v8667_v51 = vpop.f32.mrf.mxu0 }
0x113f   :  { %v8672_v5 = vpop.f32.mrf.mxu1 }
0x1140   :  { %v3240_v9 = vpop.f32.mrf.mxu0 }
0x1141   :  { %v3241_v59 = vadd.f32 %v4952_v16, %v3240_v9  ;;  %v3283_v55 = vpop.f32.mrf.mxu1 }
0x1142   :  { %v3284_v22 = vadd.f32 %v4954_v8, %v3283_v55  ;;  %v3242_v63 = vpop.f32.mrf.mxu0 }
0x1143   :  { %v4966_v39 = vmul.f32 -1.442695, %v3241_v59  ;;  %v3243_v29 = vadd.f32 %v4953_v4, %v3242_v63  ;;  %v3285_v42 = vpop.f32.mrf.mxu1 }
0x1144   :  { %v4968_v33 = vmul.f32 -1.442695, %v3284_v22  ;;  %v3286_v7 = vadd.f32 %v4955_v26, %v3285_v42 }
0x1145   :  { %5243 = vpow2.f32 %v4966_v39  ;;  %v4967_v17 = vmul.f32 -1.442695, %v3243_v29 }
0x1146   :  { %5245 = vpow2.f32 %v4968_v33  ;;  %v4969_v12 = vmul.f32 -1.442695, %v3286_v7  ;;  %v5443_v33 = vld [vmem:[%s10175_s1 + $0xe0] sm:$0xff] }
0x1147   :  { %5247 = vpow2.f32 %v4967_v17 }
0x1148   :  { %5249 = vpow2.f32 %v4969_v12  ;;  %v5444_v12 = vld [vmem:[%s10175_s1 + $0xc8] sm:$0xff] }
0x1152   :  { %v5244_v48 = vpop.eup %5243 }
0x1153   :  { %v5246_v3 = vpop.eup %5245  ;;  %v3324_v30 = vadd.f32 1.0, %v5244_v48 }
0x1154   :  { %v5248_v15 = vpop.eup %5247  ;;  %v3326_v41 = vadd.f32 1.0, %v5246_v3  ;;  %v5445_v3 = vld [vmem:[%s10175_s1 + $0xe8] sm:$0xff] }
0x1155   :  { %v5250_v46 = vpop.eup %5249  ;;  %5251 = vrcp.f32 %v3324_v30  ;;  %v3325_v21 = vadd.f32 1.0, %v5248_v15 }
0x1156   :  { %5253 = vrcp.f32 %v3326_v41  ;;  %v3327_v61 = vadd.f32 1.0, %v5250_v46  ;;  %v5446_v41 = vld [vmem:[%s10175_s1 + $0xc0] sm:$0xff] }
0x1157   :  { %5255 = vrcp.f32 %v3325_v21  ;;  %v5447_v21 = vld [vmem:[%s10175_s1 + $0xd0] sm:$0xff] }
0x1158   :  { %5257 = vrcp.f32 %v3327_v61 }
0x1162   :  { %v5252_v50 = vpop.eup %5251 }
0x1163   :  { %v5254_v14 = vpop.eup %5253  ;;  %v8684_v6 = vmul.f32 %v5252_v50, %v8434_v34 }
0x1164   :  { %v5256_v18 = vpop.eup %5255  ;;  %v8692_v53 = vmul.f32 %v5254_v14, %v8437_v49 }
0x1165   :  { %v8687_v37 = vmul.f32 %v5256_v18, %v8444_v62  ;;  %3424 = vrot.lane.b32.xlu0 %v8684_v6, %s5511_s18  ;;  %v5258_v47 = vpop.eup %5257  ;;  %v5448_v18 = vld [vmem:[%s10175_s1 + $0xd8] sm:$0xff] }
0x1166   :  { %v8697_v0 = vmul.f32 %v5258_v47, %v8452_v58 }
0x1167   :  { %3426 = vrot.lane.b32.xlu1 %v8687_v37, %s5511_s18 }
0x1169   :  { %3428 = vrot.lane.b32.xlu0 %v8692_v53, %s5511_s18 }
0x116b   :  { %3430 = vrot.lane.b32.xlu1 %v8697_v0, %s5511_s18 }
0x116d   :  { %3400 = vrot.lane.b32.xlu0 %v8684_v6, %s5513_s20 }
0x116f   :  { %3402 = vrot.lane.b32.xlu1 %v8687_v37, %s5513_s20 }
0x1171   :  { %3404 = vrot.lane.b32.xlu0 %v8692_v53, %s5513_s20 }
0x1173   :  { %3406 = vrot.lane.b32.xlu1 %v8697_v0, %s5513_s20 }
0x1175   :  { %3412 = vrot.lane.b32.xlu0 %v8684_v6, %s5512_s19 }
0x1177   :  { %3414 = vrot.lane.b32.xlu1 %v8687_v37, %s5512_s19 }
0x1179   :  { %3416 = vrot.lane.b32.xlu0 %v8692_v53, %s5512_s19 }
0x117b   :  { %3418 = vrot.lane.b32.xlu1 %v8697_v0, %s5512_s19 }
0x117d   :  { %3388 = vrot.lane.b32.xlu0 %v8684_v6, %s5514_s21 }
0x117f   :  { %3390 = vrot.lane.b32.xlu1 %v8687_v37, %s5514_s21 }
0x1181   :  { %3392 = vrot.lane.b32.xlu0 %v8692_v53, %s5514_s21 }
0x1183   :  { %3394 = vrot.lane.b32.xlu1 %v8697_v0, %s5514_s21 }
0x1185   :  { %3364 = vrot.lane.b32.xlu0 %v8684_v6, %s5516_s23 }
0x1187   :  { %3366 = vrot.lane.b32.xlu1 %v8687_v37, %s5516_s23 }
0x1189   :  { %3368 = vrot.lane.b32.xlu0 %v8692_v53, %s5516_s23 }
0x118b   :  { %3370 = vrot.lane.b32.xlu1 %v8697_v0, %s5516_s23 }
0x118d   :  { %3376 = vrot.lane.b32.xlu0 %v8684_v6, %s5515_s22 }
0x118f   :  { %3378 = vrot.lane.b32.xlu1 %v8687_v37, %s5515_s22 }
0x1191   :  { %3380 = vrot.lane.b32.xlu0 %v8692_v53, %s5515_s22 }
0x1193   :  { %3382 = vrot.lane.b32.xlu1 %v8697_v0, %s5515_s22 }
0x1195   :  { %3340 = vrot.lane.b32.xlu0 %v8684_v6, %s5519_s25 }
0x1197   :  { %3342 = vrot.lane.b32.xlu1 %v8687_v37, %s5519_s25 }
0x1199   :  { %3344 = vrot.lane.b32.xlu0 %v8692_v53, %s5519_s25 }
0x119b   :  { %3346 = vrot.lane.b32.xlu1 %v8697_v0, %s5519_s25 }
0x119d   :  { %3352 = vrot.lane.b32.xlu0 %v8684_v6, %s5518_s24 }
0x119f   :  { %3354 = vrot.lane.b32.xlu1 %v8687_v37, %s5518_s24 }
0x11a1   :  { %3356 = vrot.lane.b32.xlu0 %v8692_v53, %s5518_s24 }
0x11a3   :  { %3358 = vrot.lane.b32.xlu1 %v8697_v0, %s5518_s24 }
0x11d7   :  { %v3425_v43 = vpop.permute.xlu0 %3424 }
0x11d9   :  { %v3427_v25 = vpop.permute.xlu1 %3426 }
0x11da   :  { %v3434_v20 = vsel %vm60_vm1, %v3425_v43, %v3427_v25 }
0x11db   :  { %v3429_v45 = vpop.permute.xlu0 %3428  ;;  %v3468_v24 = vmul.f32 %v8529_v35, %v3434_v20  ;;  %v5442_v35 = vld [vmem:[%s10175_s1 + $0x118] sm:$0xff] }
0x11dc   :  { %v3433_v2 = vsel %vm60_vm1, %v3427_v25, %v3429_v45  ;;  %v5450_v20 = vld [vmem:[%s10175_s1 + $0xf8] sm:$0xff] }
0x11dd   :  { %v3469_v40 = vmul.f32 %v8537_v27, %v3433_v2  ;;  %v3431_v28 = vpop.permute.xlu1 %3430  ;;  %v3488_v9 = vpack.c.bf16 %v7896_v13, %v3468_v24 }
0x11de   :  { %v3432_v19 = vsel %vm60_vm1, %v3429_v45, %v3431_v28  ;;  %v3435_v31 = vsel %vm60_vm1, %v3431_v28, %v3425_v43  ;;  %v5449_v43 = vld [vmem:[%s10175_s1 + $0xf0] sm:$0xff] }
0x11df   :  { %v3470_v36 = vmul.f32 %v5441_v56, %v3432_v19  ;;  %v3471_v16 = vmul.f32 %v5442_v35, %v3435_v31  ;;  %v3401_v8 = vpop.permute.xlu0 %3400  ;;  %v3489_v27 = vpack.c.bf16 %v7894_v1, %v3469_v40  ;;  %v5451_v35 = vld [vmem:[%s10175_s1 + $0xa0] sm:$0xff] }
0x11e1   :  { %v3490_v4 = vpack.c.bf16 %v7912_v10, %v3470_v36  ;;  %v3403_v59 = vpop.permute.xlu1 %3402  ;;  %3498 = vmatprep.subr.bf16.mxu0 %v3489_v27  ;;  %v3491_v55 = vpack.c.bf16 %v7914_v11, %v3471_v16  ;;  %v5452_v27 = vld [vmem:[%s10175_s1 + $0xa8] sm:$0xff] }
0x11e2   :  { %3499 = vmatpush1.bf16.msra.mxu0 %v3488_v9  ;;  %v3410_v13 = vsel %vm54_vm3, %v3401_v8, %v3403_v59 }
0x11e3   :  { %3539 = vmatprep.subr.bf16.mxu1 %v3491_v55  ;;  %v3405_v26 = vpop.permute.xlu0 %3404  ;;  %v3460_v46 = vmul.f32 %v5446_v41, %v3410_v13 }
0x11e4   :  { %3540 = vmatpush1.bf16.msra.mxu1 %v3490_v4  ;;  %v3409_v29 = vsel %vm54_vm3, %v3403_v59, %v3405_v26  ;;  %v5453_v59 = vld [vmem:[%s10175_s1 + $0x88] sm:$0xff] }
0x11e5   :  { %v3407_v22 = vpop.permute.xlu1 %3406  ;;  %v3461_v48 = vmul.f32 %v5444_v12, %v3409_v29  ;;  %v3453_v55 = vmul.f32 %v5453_v59, %v8687_v37  ;;  %v5456_v37 = vld [vmem:[%s10175_s1 + $0xb0] sm:$0xff] }
0x11e6   :  { %v3408_v10 = vsel %vm54_vm3, %v3405_v26, %v3407_v22  ;;  %v3411_v42 = vsel %vm54_vm3, %v3407_v22, %v3401_v8  ;;  %v5454_v26 = vld [vmem:[%s10175_s1 + $0x80] sm:$0xff]  ;;  %v5466_v59 = vld [vmem:[%s10175_s1 + $0x50] sm:$0xff] }
0x11e7   :  { %v3413_v63 = vpop.permute.xlu0 %3412  ;;  %v3462_v61 = vmul.f32 %v5447_v21, %v3408_v10  ;;  %v3463_v47 = vmul.f32 %v5448_v18, %v3411_v42  ;;  %v3452_v22 = vmul.f32 %v5454_v26, %v8684_v6  ;;  %v5457_v6 = vld [vmem:[%s10175_s1 + $0xb8] sm:$0xff] }
0x11e9   :  { %v3415_v39 = vpop.permute.xlu1 %3414 }
0x11ea   :  { %v3422_v1 = vsel %vm57_vm2, %v3413_v63, %v3415_v39 }
0x11eb   :  { %v3417_v11 = vpop.permute.xlu0 %3416  ;;  %v3464_v7 = vmul.f32 %v5443_v33, %v3422_v1 }
0x11ec   :  { %v3421_v17 = vsel %vm57_vm2, %v3415_v39, %v3417_v11 }
0x11ed   :  { %v3465_v30 = vmul.f32 %v5445_v3, %v3421_v17  ;;  %v3419_v15 = vpop.permute.xlu1 %3418  ;;  %v3484_v40 = vpack.c.bf16 %v3464_v7, %v3460_v46 }
0x11ee   :  { %v3420_v50 = vsel %vm57_vm2, %v3417_v11, %v3419_v15  ;;  %v3423_v14 = vsel %vm57_vm2, %v3419_v15, %v3413_v63  ;;  %v5455_v63 = vld [vmem:[%s10175_s1 + $0x90] sm:$0xff] }
0x11ef   :  { %v3466_v25 = vmul.f32 %v5449_v43, %v3420_v50  ;;  %v3467_v45 = vmul.f32 %v5450_v20, %v3423_v14  ;;  %v3389_v24 = vpop.permute.xlu0 %3388  ;;  %v3485_v2 = vpack.c.bf16 %v3465_v30, %v3461_v48  ;;  %v3454_v39 = vmul.f32 %v5455_v63, %v8692_v53  ;;  %v5458_v53 = vld [vmem:[%s10175_s1 + $0x98] sm:$0xff]  ;;  %v5460_v50 = vld [vmem:[%s10175_s1 + $0x68] sm:$0xff] }
0x11f0   :  { %v3455_v33 = vmul.f32 %v5458_v53, %v8697_v0  ;;  %v5459_v0 = vld [vmem:[%s10175_s1 + $0x48] sm:$0xff] }
0x11f1   :  { %v3486_v28 = vpack.c.bf16 %v3466_v25, %v3462_v61  ;;  %v3391_v19 = vpop.permute.xlu1 %3390  ;;  %3500 = vmatprep.subr.bf16.mxu0 %v3485_v2  ;;  %v3487_v31 = vpack.c.bf16 %v3467_v45, %v3463_v47  ;;  %v5461_v2 = vld [vmem:[%s10175_s1 + $0x70] sm:$0xff] }
0x11f2   :  { %v3398_v56 = vsel %vm51_vm4, %v3389_v24, %v3391_v19  ;;  %3501 = vmatpush1.bf16.msra.mxu0 %v3484_v40 }
0x11f3   :  { %3541 = vmatprep.subr.bf16.mxu1 %v3487_v31  ;;  %v3393_v36 = vpop.permute.xlu0 %3392  ;;  %v3456_v16 = vmul.f32 %v5451_v35, %v3398_v56  ;;  %v5462_v31 = vld [vmem:[%s10175_s1 + $0x40] sm:$0xff] }
0x11f4   :  { %v3397_v8 = vsel %vm51_vm4, %v3391_v19, %v3393_v36  ;;  %3542 = vmatpush1.bf16.msra.mxu1 %v3486_v28 }
0x11f5   :  { %v3457_v9 = vmul.f32 %v5452_v27, %v3397_v8  ;;  %v3395_v4 = vpop.permute.xlu1 %3394  ;;  %v3480_v7 = vpack.c.bf16 %v3456_v16, %v3452_v22  ;;  %v5464_v16 = vld [vmem:[%s10175_s1 + $0x60] sm:$0xff]  ;;  %v5465_v27 = vld [vmem:[%s10175_s1 + $0x78] sm:$0xff] }
0x11f6   :  { %v3396_v29 = vsel %vm51_vm4, %v3393_v36, %v3395_v4  ;;  %v3399_v1 = vsel %vm51_vm4, %v3395_v4, %v3389_v24  ;;  %v5463_v36 = vld [vmem:[%s10175_s1 + $0x58] sm:$0xff] }
0x11f7   :  { %v3458_v13 = vmul.f32 %v5456_v37, %v3396_v29  ;;  %v3459_v10 = vmul.f32 %v5457_v6, %v3399_v1  ;;  %v3365_v11 = vpop.permute.xlu0 %3364  ;;  %v3481_v42 = vpack.c.bf16 %v3457_v9, %v3453_v55 }
0x11f9   :  { %v3482_v17 = vpack.c.bf16 %v3458_v13, %v3454_v39  ;;  %v3367_v12 = vpop.permute.xlu1 %3366  ;;  %3502 = vmatprep.subr.bf16.mxu0 %v3481_v42  ;;  %v3483_v48 = vpack.c.bf16 %v3459_v10, %v3455_v33 }
0x11fa   :  { %3503 = vmatpush1.bf16.msra.mxu0 %v3480_v7  ;;  %v3374_v41 = vsel %vm45_vm5, %v3365_v11, %v3367_v12 }
0x11fb   :  { %3543 = vmatprep.subr.bf16.mxu1 %v3483_v48  ;;  %v3369_v3 = vpop.permute.xlu0 %3368  ;;  %v3445_v61 = vmul.f32 %v5459_v0, %v3374_v41 }
0x11fc   :  { %3544 = vmatpush1.bf16.msra.mxu1 %v3482_v17  ;;  %v3373_v20 = vsel %vm45_vm5, %v3367_v12, %v3369_v3 }
0x11fd   :  { %v3371_v30 = vpop.permute.xlu1 %3370  ;;  %v3446_v55 = vmul.f32 %v5466_v59, %v3373_v20 }
0x11fe   :  { %v3372_v47 = vsel %vm45_vm5, %v3369_v3, %v3371_v30  ;;  %v3375_v43 = vsel %vm45_vm5, %v3371_v30, %v3365_v11  ;;  %v5467_v11 = vld [vmem:[%s10175_s1 + $0x8] sm:$0xff] }
0x11ff   :  { %v3377_v15 = vpop.permute.xlu0 %3376  ;;  %v3444_v56 = vmul.f32 %v5462_v31, %v3375_v43  ;;  %v3447_v35 = vmul.f32 %v5463_v36, %v3372_v47  ;;  %v5471_v47 = vld [vmem:[%s10175_s1 + $0x10] sm:$0xff] }
0x1201   :  { %v3379_v46 = vpop.permute.xlu1 %3378 }
0x1202   :  { %v3386_v21 = vsel %vm48_vm6, %v3377_v15, %v3379_v46 }
0x1203   :  { %v3449_v14 = vmul.f32 %v5460_v50, %v3386_v21  ;;  %v3381_v18 = vpop.permute.xlu0 %3380  ;;  %v5469_v21 = vld [vmem:[%s10175_s1] sm:$0xff] }
0x1204   :  { %v3385_v25 = vsel %vm48_vm6, %v3379_v46, %v3381_v18 }
0x1205   :  { %v3383_v45 = vpop.permute.xlu1 %3382  ;;  %v3477_v24 = vpack.c.bf16 %v3449_v14, %v3445_v61  ;;  %v3450_v40 = vmul.f32 %v5461_v2, %v3385_v25  ;;  %v5470_v61 = vld [vmem:[%s10175_s1 + $0x18] sm:$0xff] }
0x1206   :  { %v3384_v28 = vsel %vm48_vm6, %v3381_v18, %v3383_v45  ;;  %v3387_v19 = vsel %vm48_vm6, %v3383_v45, %v3377_v15  ;;  %v5468_v15 = vld [vmem:[%s10175_s1 + $0x30] sm:$0xff] }
0x1207   :  { %v3448_v8 = vmul.f32 %v5464_v16, %v3387_v19  ;;  %v3451_v9 = vmul.f32 %v5465_v27, %v3384_v28  ;;  %v3341_v4 = vpop.permute.xlu0 %3340  ;;  %3504 = vmatprep.subr.bf16.mxu0 %v3477_v24  ;;  %v3478_v39 = vpack.c.bf16 %v3450_v40, %v3446_v55  ;;  %v4949_v24 = vld [vmem:[%s10176_s0 + $0x1e8] sm:$0xff] }
0x1208   :  { %v3239_v28 = vadd.f32 %v4949_v24, %v8667_v51  ;;  %v4956_v51 = vld [vmem:[%s10176_s0 + $0x220] sm:$0xff] }
0x1209   :  { %v3476_v26 = vpack.c.bf16 %v3448_v8, %v3444_v56  ;;  %v3343_v22 = vpop.permute.xlu1 %3342  ;;  %v3479_v63 = vpack.c.bf16 %v3451_v9, %v3447_v35 }
0x120a   :  { %v3350_v13 = vsel %vm39_vm7, %v3341_v4, %v3343_v22  ;;  %v4963_v36 = vmul.f32 -1.442695, %v3239_v28  ;;  %v3747_v28 = vld [vmem:[%s10175_s1 + $0x138] sm:$0xff] }
0x120b   :  { %3545 = vmatprep.subr.bf16.mxu1 %v3479_v63  ;;  %v3345_v29 = vpop.permute.xlu0 %3344  ;;  %3505 = vmatpush1.bf16.msra.mxu0 %v3476_v26  ;;  %v3437_v42 = vmul.f32 %v5467_v11, %v3350_v13  ;;  %v4957_v26 = vld [vmem:[%s10176_s0 + $0x228] sm:$0xff] }
0x120c   :  { %3546 = vmatpush1.bf16.msra.mxu1 %v3478_v39  ;;  %v3349_v48 = vsel %vm39_vm7, %v3343_v22, %v3345_v29  ;;  %v4959_v39 = vld [vmem:[%s10176_s0 + $0x238] sm:$0xff] }
0x120d   :  { %v3347_v1 = vpop.permute.xlu1 %3346  ;;  %v3438_v43 = vmul.f32 %v5471_v47, %v3349_v48 }
0x120e   :  { %v3348_v7 = vsel %vm39_vm7, %v3345_v29, %v3347_v1  ;;  %v3351_v17 = vsel %vm39_vm7, %v3347_v1, %v3341_v4 }
0x120f   :  { %v3353_v37 = vpop.permute.xlu0 %3352  ;;  %v3436_v0 = vmul.f32 %v5469_v21, %v3351_v17  ;;  %v3439_v50 = vmul.f32 %v5470_v61, %v3348_v7 }
0x1211   :  { %v3355_v6 = vpop.permute.xlu1 %3354 }
0x1212   :  { %v3362_v10 = vsel %vm42_vm8, %v3353_v37, %v3355_v6 }
0x1213   :  { %v3441_v53 = vmul.f32 %v3362_v10, %v8623_v54  ;;  %v3357_v33 = vpop.permute.xlu0 %3356 }
0x1214   :  { %v3361_v12 = vsel %vm42_vm8, %v3355_v6, %v3357_v33 }
0x1215   :  { %v3359_v3 = vpop.permute.xlu1 %3358  ;;  %v3473_v30 = vpack.c.bf16 %v3441_v53, %v3437_v42  ;;  %v3442_v54 = vmul.f32 %v5468_v15, %v3361_v12 }
0x1216   :  { %v3360_v41 = vsel %vm42_vm8, %v3357_v33, %v3359_v3  ;;  %v3363_v46 = vsel %vm42_vm8, %v3359_v3, %v3353_v37 }
0x1217   :  { %v3440_v14 = vmul.f32 %v3363_v46, %v8638_v52  ;;  %v3443_v18 = vmul.f32 %v3360_v41, %v8643_v23  ;;  %3506 = vmatprep.subr.bf16.mxu0 %v3473_v30  ;;  %v3474_v45 = vpack.c.bf16 %v3442_v54, %v3438_v43  ;;  %v4948_v52 = vld [vmem:[%s10176_s0 + $0x1e0] sm:$0xff]  ;;  %v4950_v23 = vld [vmem:[%s10176_s0 + $0x1f0] sm:$0xff] }
0x1218   :  { %v3237_v2 = vadd.f32 %v4948_v52, %v8663_v57  ;;  %v3280_v40 = vadd.f32 %v4950_v23, %v8665_v32  ;;  %v9061_v52 = vld [vmem:[%s10175_s1 + $0x100] sm:$0xff] }
0x1219   :  { %v3472_v25 = vpack.c.bf16 %v3440_v14, %v3436_v0  ;;  %v3475_v20 = vpack.c.bf16 %v3443_v18, %v3439_v50  ;;  %v3744_v23 = vld [vmem:[%s10175_s1 + $0x120] sm:$0xff] }
0x121a   :  { %v4962_v31 = vmul.f32 -1.442695, %v3237_v2  ;;  %v4964_v56 = vmul.f32 -1.442695, %v3280_v40  ;;  %v3746_v40 = vld [vmem:[%s10175_s1 + $0x130] sm:$0xff] }
0x121b   :  { %3507 = vmatpush1.bf16.msra.mxu0 %v3472_v25  ;;  %3547 = vmatprep.subr.bf16.mxu1 %v3475_v20 }
0x121c   :  { %3548 = vmatpush1.bf16.msra.mxu1 %v3474_v45  ;;  %5259 = vpow2.f32 %v4962_v31 }
0x121d   :  { %5261 = vpow2.f32 %v4964_v56  ;;  %v9081_v56 = vmul.f32 0.0, %v3744_v23 }
0x121e   :  { %4970 = vmatmul.mubr.msk.bf16.vlgmr.msra.gmra.mxu0 %vm166_vm0, %v8396_v38  ;;  %5263 = vpow2.f32 %v4963_v36 }
0x121f   :  { %4971 = vmatmul.mubr.msk.bf16.vlgmr.msra.gmra.mxu1 %vm166_vm0, %v8396_v38  ;;  %3840 = vmatprep.mubr.bf16.mxu0 %v10257_v60  ;;  %v4951_v38 = vld [vmem:[%s10176_s0 + $0x1f8] sm:$0xff] }
0x1220   :  { %3883 = vmatprep.mubr.bf16.mxu1 %v10257_v60  ;;  %v3282_v19 = vadd.f32 %v4951_v38, %v8672_v5  ;;  %v4958_v5 = vld [vmem:[%s10176_s0 + $0x230] sm:$0xff]  ;;  %v9071_v38 = vld [vmem:[%s10175_s1 + $0x108] sm:$0xff] }
0x1222   :  { %v4965_v35 = vmul.f32 -1.442695, %v3282_v19 }
0x1224   :  { %5265 = vpow2.f32 %v4965_v35 }
0x1229   :  { %v5260_v16 = vpop.eup %5259 }
0x122a   :  { %v5262_v57 = vpop.eup %5261  ;;  %v3300_v9 = vadd.f32 1.0, %v5260_v16  ;;  %v9089_v16 = vld [vmem:[%s10175_s1 + $0x110] sm:$0xff] }
0x122b   :  { %v5264_v8 = vpop.eup %5263  ;;  %v3302_v4 = vadd.f32 1.0, %v5262_v57  ;;  %v9094_v57 = vld [vmem:[%s10175_s1 + $0x118] sm:$0xff] }
0x122c   :  { %v3301_v59 = vadd.f32 1.0, %v5264_v8  ;;  %5267 = vrcp.f32 %v3300_v9 }
0x122d   :  { %5269 = vrcp.f32 %v3302_v4  ;;  %v9099_v4 = vmul.f32 0.0, %v3747_v28  ;;  %v9178_v28 = vld [vmem:[%s10175_s1 + $0xa0] sm:$0xff] }
0x122e   :  { %5271 = vrcp.f32 %v3301_v59 }
0x1231   :  { %v5266_v27 = vpop.eup %5265 }
0x1232   :  { %v3303_v32 = vadd.f32 1.0, %v5266_v27  ;;  %v9097_v27 = vmul.f32 0.0, %v3746_v40 }
0x1234   :  { %5273 = vrcp.f32 %v3303_v32 }
0x1239   :  { %v5268_v33 = vpop.eup %5267 }
0x123a   :  { %v5270_v7 = vpop.eup %5269  ;;  %v3578_v48 = vsub.f32 1.0, %v5268_v33 }
0x123b   :  { %v5272_v17 = vpop.eup %5271  ;;  %v3580_v3 = vsub.f32 1.0, %v5270_v7 }
0x123c   :  { %v3579_v30 = vsub.f32 1.0, %v5272_v17  ;;  %v3582_v46 = vmul.f32 %v3578_v48, %v8434_v34 }
0x123d   :  { %v3584_v61 = vmul.f32 %v3580_v3, %v8437_v49 }
0x123e   :  { %v3583_v47 = vmul.f32 %v3579_v30, %v8444_v62  ;;  %v9147_v30 = vld [vmem:[%s10175_s1 + $0xd8] sm:$0xff] }
0x1241   :  { %v5274_v12 = vpop.eup %5273 }
0x1242   :  { %v3581_v54 = vsub.f32 1.0, %v5274_v12 }
0x1244   :  { %v3585_v20 = vmul.f32 %v3581_v54, %v8452_v58  ;;  %v3745_v58 = vld [vmem:[%s10175_s1 + $0x128] sm:$0xff] }
0x1245   :  { %v9079_v31 = vmul.f32 0.0, %v3745_v58 }
0x12de   :  { %v3526_v55 = vpop.f32.mrf.mxu0 }
0x12df   :  { %v3527_v22 = vadd.f32 %v4956_v51, %v3526_v55  ;;  %v3567_v63 = vpop.f32.mrf.mxu1 }
0x12e0   :  { %v3568_v29 = vadd.f32 %v4958_v5, %v3567_v63  ;;  %v3528_v1 = vpop.f32.mrf.mxu0 }
0x12e1   :  { %5275 = vtanh.f32 %v3527_v22  ;;  %v3529_v37 = vadd.f32 %v4957_v26, %v3528_v1  ;;  %v3569_v13 = vpop.f32.mrf.mxu1 }
0x12e2   :  { %5277 = vtanh.f32 %v3568_v29  ;;  %v3570_v6 = vadd.f32 %v4959_v39, %v3569_v13  ;;  %v3530_v10 = vpop.f32.mrf.mxu0 }
0x12e3   :  { %5279 = vtanh.f32 %v3529_v37  ;;  %v3571_v11 = vpop.f32.mrf.mxu1 }
0x12e4   :  { %5281 = vtanh.f32 %v3570_v6  ;;  %v3531_v42 = vpop.f32.mrf.mxu0  ;;  %v9114_v6 = vld [vmem:[%s10175_s1 + $0xe0] sm:$0xff]  ;;  %v9119_v11 = vld [vmem:[%s10175_s1 + $0xc8] sm:$0xff] }
0x12e5   :  { %v3572_v53 = vpop.f32.mrf.mxu1  ;;  %10266 = vst [vmem:[#allocation9_spill] sm:$0xff] %v9114_v6  ;;  %10267 = vst [vmem:[#allocation7_spill] sm:$0xff] %v9119_v11 }
0x12ee   :  { %v5276_v15 = vpop.eup %5275 }
0x12ef   :  { %v5278_v41 = vpop.eup %5277  ;;  %v3586_v21 = vmul.f32 %v5276_v15, %v5268_v33  ;;  %v9128_v33 = vld [vmem:[%s10175_s1 + $0xe8] sm:$0xff] }
0x12f0   :  { %v5280_v0 = vpop.eup %5279  ;;  %v3588_v50 = vmul.f32 %v5278_v41, %v5270_v7  ;;  %10268 = vst [vmem:[#allocation8_spill] sm:$0xff] %v9128_v33  ;;  %v9133_v7 = vld [vmem:[%s10175_s1 + $0xc0] sm:$0xff] }
0x12f1   :  { %v5282_v14 = vpop.eup %5281  ;;  %v8965_v18 = vadd.f32 %v3586_v21, %v3582_v46  ;;  %v3587_v43 = vmul.f32 %v5280_v0, %v5272_v17  ;;  %v9157_v46 = vld [vmem:[%s10175_s1 + $0xf0] sm:$0xff]  ;;  %v9162_v21 = vld [vmem:[%s10175_s1 + $0xf8] sm:$0xff] }
0x12f2   :  { %v8968_v25 = vadd.f32 %v3588_v50, %v3584_v61  ;;  %v3589_v45 = vmul.f32 %v5282_v14, %v5274_v12  ;;  %v9140_v12 = vld [vmem:[%s10175_s1 + $0xd0] sm:$0xff] }
0x12f3   :  { %4972 = vst [vmem:[%s10178_s4 + $0xa0] sm:$0xff] %v8965_v18  ;;  %v8975_v34 = vadd.f32 %v3587_v43, %v3583_v47  ;;  %3696 = vrot.lane.b32.xlu0 %v8965_v18, %s5511_s18 }
0x12f4   :  { %4974 = vst [vmem:[%s10178_s4 + $0xb0] sm:$0xff] %v8968_v25  ;;  %v8983_v49 = vadd.f32 %v3589_v45, %v3585_v20 }
0x12f5   :  { %4973 = vst [vmem:[%s10178_s4 + $0xa8] sm:$0xff] %v8975_v34  ;;  %3698 = vrot.lane.b32.xlu1 %v8975_v34, %s5511_s18 }
0x12f6   :  { %4975 = vst [vmem:[%s10178_s4 + $0xb8] sm:$0xff] %v8983_v49 }
0x12f7   :  { %3700 = vrot.lane.b32.xlu0 %v8968_v25, %s5511_s18 }
0x12f9   :  { %3702 = vrot.lane.b32.xlu1 %v8983_v49, %s5511_s18 }
0x12fb   :  { %3672 = vrot.lane.b32.xlu0 %v8965_v18, %s5513_s20 }
0x12fd   :  { %3674 = vrot.lane.b32.xlu1 %v8975_v34, %s5513_s20 }
0x12ff   :  { %3676 = vrot.lane.b32.xlu0 %v8968_v25, %s5513_s20 }
0x1301   :  { %3678 = vrot.lane.b32.xlu1 %v8983_v49, %s5513_s20 }
0x1303   :  { %3684 = vrot.lane.b32.xlu0 %v8965_v18, %s5512_s19 }
0x1305   :  { %3686 = vrot.lane.b32.xlu1 %v8975_v34, %s5512_s19 }
0x1307   :  { %3688 = vrot.lane.b32.xlu0 %v8968_v25, %s5512_s19 }
0x1309   :  { %3690 = vrot.lane.b32.xlu1 %v8983_v49, %s5512_s19 }
0x130b   :  { %3660 = vrot.lane.b32.xlu0 %v8965_v18, %s5514_s21 }
0x130d   :  { %3662 = vrot.lane.b32.xlu1 %v8975_v34, %s5514_s21 }
0x130f   :  { %3664 = vrot.lane.b32.xlu0 %v8968_v25, %s5514_s21 }
0x1311   :  { %3666 = vrot.lane.b32.xlu1 %v8983_v49, %s5514_s21 }
0x1313   :  { %3636 = vrot.lane.b32.xlu0 %v8965_v18, %s5516_s23 }
0x1315   :  { %3638 = vrot.lane.b32.xlu1 %v8975_v34, %s5516_s23 }
0x1317   :  { %3640 = vrot.lane.b32.xlu0 %v8968_v25, %s5516_s23 }
0x1319   :  { %3642 = vrot.lane.b32.xlu1 %v8983_v49, %s5516_s23 }
0x131b   :  { %3648 = vrot.lane.b32.xlu0 %v8965_v18, %s5515_s22 }
0x131d   :  { %3650 = vrot.lane.b32.xlu1 %v8975_v34, %s5515_s22 }
0x131f   :  { %3652 = vrot.lane.b32.xlu0 %v8968_v25, %s5515_s22 }
0x1321   :  { %3654 = vrot.lane.b32.xlu1 %v8983_v49, %s5515_s22 }
0x1323   :  { %3612 = vrot.lane.b32.xlu0 %v8965_v18, %s5519_s25 }
0x1325   :  { %3614 = vrot.lane.b32.xlu1 %v8975_v34, %s5519_s25 }
0x1327   :  { %3616 = vrot.lane.b32.xlu0 %v8968_v25, %s5519_s25 }
0x1329   :  { %3618 = vrot.lane.b32.xlu1 %v8983_v49, %s5519_s25 }
0x132b   :  { %3624 = vrot.lane.b32.xlu0 %v8965_v18, %s5518_s24 }
0x132d   :  { %3626 = vrot.lane.b32.xlu1 %v8975_v34, %s5518_s24 }
0x132f   :  { %3628 = vrot.lane.b32.xlu0 %v8968_v25, %s5518_s24 }
0x1331   :  { %3630 = vrot.lane.b32.xlu1 %v8983_v49, %s5518_s24 }
0x1365   :  { %v3697_v62 = vpop.permute.xlu0 %3696 }
0x1367   :  { %v3699_v24 = vpop.permute.xlu1 %3698 }
0x1368   :  { %v3706_v2 = vsel %vm60_vm1, %v3697_v62, %v3699_v24 }
0x1369   :  { %v3701_v19 = vpop.permute.xlu0 %3700  ;;  %v3780_v36 = vmul.f32 %v9061_v52, %v3706_v2 }
0x136a   :  { %v3705_v35 = vsel %vm60_vm1, %v3699_v24, %v3701_v19 }
0x136b   :  { %v3781_v8 = vmul.f32 %v9071_v38, %v3705_v35  ;;  %v3703_v9 = vpop.permute.xlu1 %3702  ;;  %v3804_v22 = vpack.c.bf16 %v9081_v56, %v3780_v36 }
0x136c   :  { %v3704_v59 = vsel %vm60_vm1, %v3701_v19, %v3703_v9  ;;  %v3707_v32 = vsel %vm60_vm1, %v3703_v9, %v3697_v62  ;;  %v9190_v9 = vld [vmem:[%s10175_s1 + $0x88] sm:$0xff] }
0x136d   :  { %v3782_v51 = vmul.f32 %v9089_v16, %v3704_v59  ;;  %v3783_v5 = vmul.f32 %v9094_v57, %v3707_v32  ;;  %v3673_v55 = vpop.permute.xlu0 %3672  ;;  %v3805_v26 = vpack.c.bf16 %v9079_v31, %v3781_v8  ;;  %v9185_v8 = vld [vmem:[%s10175_s1 + $0xa8] sm:$0xff]  ;;  %v9195_v59 = vld [vmem:[%s10175_s1 + $0x80] sm:$0xff] }
0x136f   :  { %v3806_v63 = vpack.c.bf16 %v9097_v27, %v3782_v51  ;;  %v3675_v39 = vpop.permute.xlu1 %3674  ;;  %3814 = vmatprep.subr.bf16.mxu0 %v3805_v26  ;;  %v3807_v29 = vpack.c.bf16 %v9099_v4, %v3783_v5  ;;  %v9200_v51 = vld [vmem:[%s10175_s1 + $0x90] sm:$0xff] }
0x1370   :  { %3815 = vmatpush1.bf16.msra.mxu0 %v3804_v22  ;;  %v3682_v17 = vsel %vm54_vm3, %v3673_v55, %v3675_v39  ;;  %v9208_v26 = vld [vmem:[%s10175_s1 + $0xb0] sm:$0xff]  ;;  %v9213_v22 = vld [vmem:[%s10175_s1 + $0xb8] sm:$0xff] }
0x1371   :  { %3857 = vmatprep.subr.bf16.mxu1 %v3807_v29  ;;  %v3677_v1 = vpop.permute.xlu0 %3676  ;;  %v3772_v14 = vmul.f32 %v9133_v7, %v3682_v17 }
0x1372   :  { %3858 = vmatpush1.bf16.msra.mxu1 %v3806_v63  ;;  %v3681_v42 = vsel %vm54_vm3, %v3675_v39, %v3677_v1  ;;  %v9218_v63 = vld [vmem:[%s10175_s1 + $0x98] sm:$0xff] }
0x1373   :  { %v3679_v37 = vpop.permute.xlu1 %3678  ;;  %v3773_v0 = vmul.f32 %v9119_v11, %v3681_v42 }
0x1374   :  { %v3680_v48 = vsel %vm54_vm3, %v3677_v1, %v3679_v37  ;;  %v3683_v15 = vsel %vm54_vm3, %v3679_v37, %v3673_v55  ;;  %v3765_v1 = vmul.f32 %v9190_v9, %v8975_v34  ;;  %v3764_v37 = vmul.f32 %v9195_v59, %v8965_v18 }
0x1375   :  { %v3685_v13 = vpop.permute.xlu0 %3684  ;;  %v3774_v47 = vmul.f32 %v9140_v12, %v3680_v48  ;;  %v3775_v45 = vmul.f32 %v9147_v30, %v3683_v15  ;;  %v3767_v15 = vmul.f32 %v9218_v63, %v8983_v49 }
0x1377   :  { %v3687_v10 = vpop.permute.xlu1 %3686 }
0x1378   :  { %v3694_v53 = vsel %vm57_vm2, %v3685_v13, %v3687_v10 }
0x1379   :  { %v3689_v3 = vpop.permute.xlu0 %3688  ;;  %v3776_v54 = vmul.f32 %v9114_v6, %v3694_v53 }
0x137a   :  { %v3693_v41 = vsel %vm57_vm2, %v3687_v10, %v3689_v3 }
0x137b   :  { %v3777_v61 = vmul.f32 %v9128_v33, %v3693_v41  ;;  %v3691_v50 = vpop.permute.xlu1 %3690  ;;  %v3800_v2 = vpack.c.bf16 %v3776_v54, %v3772_v14 }
0x137c   :  { %v3692_v43 = vsel %vm57_vm2, %v3689_v3, %v3691_v50  ;;  %v3695_v20 = vsel %vm57_vm2, %v3691_v50, %v3685_v13  ;;  %v3766_v13 = vmul.f32 %v9200_v51, %v8968_v25 }
0x137d   :  { %v3778_v62 = vmul.f32 %v9157_v46, %v3692_v43  ;;  %v3779_v58 = vmul.f32 %v9162_v21, %v3695_v20  ;;  %v3661_v23 = vpop.permute.xlu0 %3660  ;;  %v3801_v24 = vpack.c.bf16 %v3777_v61, %v3773_v0  ;;  %v9238_v43 = vld [vmem:[%s10175_s1 + $0x48] sm:$0xff] }
0x137f   :  { %v3802_v40 = vpack.c.bf16 %v3778_v62, %v3774_v47  ;;  %v3663_v19 = vpop.permute.xlu1 %3662  ;;  %3816 = vmatprep.subr.bf16.mxu0 %v3801_v24  ;;  %v3803_v36 = vpack.c.bf16 %v3779_v58, %v3775_v45  ;;  %v9245_v45 = vld [vmem:[%s10175_s1 + $0x68] sm:$0xff]  ;;  %v9253_v24 = vld [vmem:[%s10175_s1 + $0x40] sm:$0xff] }
0x1380   :  { %v3670_v35 = vsel %vm51_vm4, %v3661_v23, %v3663_v19  ;;  %3817 = vmatpush1.bf16.msra.mxu0 %v3800_v2 }
0x1381   :  { %3859 = vmatprep.subr.bf16.mxu1 %v3803_v36  ;;  %v3665_v32 = vpop.permute.xlu0 %3664  ;;  %v3768_v5 = vmul.f32 %v9178_v28, %v3670_v35  ;;  %v9264_v36 = vld [vmem:[%s10175_s1 + $0x58] sm:$0xff] }
0x1382   :  { %v3669_v55 = vsel %vm51_vm4, %v3663_v19, %v3665_v32  ;;  %3860 = vmatpush1.bf16.msra.mxu1 %v3802_v40  ;;  %v9259_v40 = vld [vmem:[%s10175_s1 + $0x70] sm:$0xff] }
0x1383   :  { %v3769_v39 = vmul.f32 %v9185_v8, %v3669_v55  ;;  %v3667_v29 = vpop.permute.xlu1 %3666  ;;  %v3796_v54 = vpack.c.bf16 %v3768_v5, %v3764_v37  ;;  %v9275_v55 = vld [vmem:[%s10175_s1 + $0x60] sm:$0xff] }
0x1384   :  { %v3668_v10 = vsel %vm51_vm4, %v3665_v32, %v3667_v29  ;;  %v3671_v42 = vsel %vm51_vm4, %v3667_v29, %v3661_v23  ;;  %v9285_v29 = vld [vmem:[%s10175_s1 + $0x50] sm:$0xff] }
0x1385   :  { %v3770_v53 = vmul.f32 %v9208_v26, %v3668_v10  ;;  %v3771_v17 = vmul.f32 %v9213_v22, %v3671_v42  ;;  %v3637_v48 = vpop.permute.xlu0 %3636  ;;  %v3797_v3 = vpack.c.bf16 %v3769_v39, %v3765_v1  ;;  %v9280_v39 = vld [vmem:[%s10175_s1 + $0x78] sm:$0xff] }
0x1387   :  { %v3798_v41 = vpack.c.bf16 %v3770_v53, %v3766_v13  ;;  %v3639_v0 = vpop.permute.xlu1 %3638  ;;  %3818 = vmatprep.subr.bf16.mxu0 %v3797_v3  ;;  %v3799_v61 = vpack.c.bf16 %v3771_v17, %v3767_v15 }
0x1388   :  { %3819 = vmatpush1.bf16.msra.mxu0 %v3796_v54  ;;  %v3646_v20 = vsel %vm45_vm5, %v3637_v48, %v3639_v0 }
0x1389   :  { %3861 = vmatprep.subr.bf16.mxu1 %v3799_v61  ;;  %v3641_v50 = vpop.permute.xlu0 %3640  ;;  %v3757_v23 = vmul.f32 %v9238_v43, %v3646_v20 }
0x138a   :  { %3862 = vmatpush1.bf16.msra.mxu1 %v3798_v41  ;;  %v3645_v1 = vsel %vm45_vm5, %v3639_v0, %v3641_v50 }
0x138b   :  { %v3643_v14 = vpop.permute.xlu1 %3642  ;;  %v3758_v41 = vmul.f32 %v9285_v29, %v3645_v1  ;;  %v9318_v1 = vld [vmem:[%s10175_s1 + $0x30] sm:$0xff] }
0x138c   :  { %v3644_v35 = vsel %vm45_vm5, %v3641_v50, %v3643_v14  ;;  %v3647_v32 = vsel %vm45_vm5, %v3643_v14, %v3637_v48 }
0x138d   :  { %v3649_v47 = vpop.permute.xlu0 %3648  ;;  %v3756_v17 = vmul.f32 %v9253_v24, %v3647_v32  ;;  %v3759_v48 = vmul.f32 %v9264_v36, %v3644_v35  ;;  %v9312_v32 = vld [vmem:[%s10175_s1 + $0x28] sm:$0xff] }
0x138f   :  { %v3651_v62 = vpop.permute.xlu1 %3650 }
0x1390   :  { %v3658_v58 = vsel %vm48_vm6, %v3649_v47, %v3651_v62 }
0x1391   :  { %v3761_v2 = vmul.f32 %v9245_v45, %v3658_v58  ;;  %v3653_v19 = vpop.permute.xlu0 %3652  ;;  %v9302_v58 = vld [vmem:[%s10175_s1 + $0x8] sm:$0xff] }
0x1392   :  { %v3657_v5 = vsel %vm48_vm6, %v3651_v62, %v3653_v19 }
0x1393   :  { %v3655_v37 = vpop.permute.xlu1 %3654  ;;  %v3793_v13 = vpack.c.bf16 %v3761_v2, %v3757_v23  ;;  %v3762_v10 = vmul.f32 %v9259_v40, %v3657_v5 }
0x1394   :  { %v3656_v42 = vsel %vm48_vm6, %v3653_v19, %v3655_v37  ;;  %v3659_v53 = vsel %vm48_vm6, %v3655_v37, %v3649_v47 }
0x1395   :  { %v3760_v3 = vmul.f32 %v9275_v55, %v3659_v53  ;;  %v3763_v15 = vmul.f32 %v9280_v39, %v3656_v42  ;;  %v3613_v54 = vpop.permute.xlu0 %3612  ;;  %3820 = vmatprep.subr.bf16.mxu0 %v3793_v13  ;;  %v3794_v14 = vpack.c.bf16 %v3762_v10, %v3758_v41  ;;  %v9323_v13 = vld [vmem:[%s10175_s1] sm:$0xff]  ;;  %v9328_v10 = vld [vmem:[%s10175_s1 + $0x18] sm:$0xff] }
0x1397   :  { %v3792_v0 = vpack.c.bf16 %v3760_v3, %v3756_v17  ;;  %v3615_v61 = vpop.permute.xlu1 %3614  ;;  %v3795_v50 = vpack.c.bf16 %v3763_v15, %v3759_v48  ;;  %v9339_v48 = vld [vmem:[%s10175_s1 + $0x10] sm:$0xff] }
0x1398   :  { %v3622_v23 = vsel %vm39_vm7, %v3613_v54, %v3615_v61  ;;  %10269 = vst [vmem:[#allocation2_spill] sm:$0xff] %v9339_v48 }
0x1399   :  { %3863 = vmatprep.subr.bf16.mxu1 %v3795_v50  ;;  %v3617_v20 = vpop.permute.xlu0 %3616  ;;  %3821 = vmatpush1.bf16.msra.mxu0 %v3792_v0  ;;  %v3749_v35 = vmul.f32 %v9302_v58, %v3622_v23  ;;  %v9353_v23 = vld [vmem:[%s10175_s1 + $0x20] sm:$0xff] }
0x139a   :  { %3864 = vmatpush1.bf16.msra.mxu1 %v3794_v14  ;;  %v3621_v3 = vsel %vm39_vm7, %v3615_v61, %v3617_v20 }
0x139b   :  { %v3619_v47 = vpop.permute.xlu1 %3618 }
0x139c   :  { %v3620_v42 = vsel %vm39_vm7, %v3617_v20, %v3619_v47  ;;  %v3623_v53 = vsel %vm39_vm7, %v3619_v47, %v3613_v54  ;;  %v9359_v20 = vld [vmem:[%s10175_s1 + $0x38] sm:$0xff] }
0x139d   :  { %v3625_v62 = vpop.permute.xlu0 %3624  ;;  %v3748_v14 = vmul.f32 %v9323_v13, %v3623_v53  ;;  %v3751_v47 = vmul.f32 %v9328_v10, %v3620_v42 }
0x139f   :  { %v3627_v2 = vpop.permute.xlu1 %3626 }
0x13a0   :  { %v3634_v19 = vsel %vm42_vm8, %v3625_v62, %v3627_v2 }
0x13a1   :  { %v3753_v5 = vmul.f32 %v9312_v32, %v3634_v19  ;;  %v3629_v37 = vpop.permute.xlu0 %3628 }
0x13a2   :  { %v3633_v17 = vsel %vm42_vm8, %v3627_v2, %v3629_v37 }
0x13a3   :  { %v3631_v15 = vpop.permute.xlu1 %3630  ;;  %v3789_v41 = vpack.c.bf16 %v3753_v5, %v3749_v35  ;;  %v3754_v0 = vmul.f32 %v9318_v1, %v3633_v17 }
0x13a4   :  { %v3632_v50 = vsel %vm42_vm8, %v3629_v37, %v3631_v15  ;;  %v3635_v54 = vsel %vm42_vm8, %v3631_v15, %v3625_v62  ;;  %v3750_v62 = vmul.f32 %v9339_v48, %v3621_v3  ;;  %v9366_v37 = vld [vmem:[%s10174_s2] sm:$0xff]  }
0x13a5   :  { %v3752_v61 = vmul.f32 %v9353_v23, %v3635_v54  ;;  %v3755_v2 = vmul.f32 %v9359_v20, %v3632_v50  ;;  %3822 = vmatprep.subr.bf16.mxu0 %v3789_v41  ;;  %10270 = vst [vmem:[#allocation5_spill] sm:$0xff] %v9366_v37  ;;  %v4980_v3 = vld [vmem:[%s10176_s0 + $0x260] sm:$0xff]  ;;  %v4982_v41 = vld [vmem:[%s10176_s0 + $0x270] sm:$0xff]  ;;  %v4981_v50 = vld [vmem:[%s10176_s0 + $0x268] sm:$0xff] }
0x13a6   :  { %v3790_v5 = vpack.c.bf16 %v3754_v0, %v3750_v62 }
0x13a7   :  { %v3788_v19 = vpack.c.bf16 %v3752_v61, %v3748_v14  ;;  %v3791_v35 = vpack.c.bf16 %v3755_v2, %v3751_v47  ;;  %v4983_v47 = vld [vmem:[%s10176_s0 + $0x278] sm:$0xff] }
0x13a9   :  { %3823 = vmatpush1.bf16.msra.mxu0 %v3788_v19  ;;  %3865 = vmatprep.subr.bf16.mxu1 %v3791_v35 }
0x13aa   :  { %3866 = vmatpush1.bf16.msra.mxu1 %v3790_v5 }
0x13ac   :  { %4988 = vmatmul.mubr.msk.bf16.vlgmr.msra.gmra.mxu0 %vm166_vm0, %v9366_v37 }
0x13ad   :  { %4989 = vmatmul.mubr.msk.bf16.vlgmr.msra.gmra.mxu1 %vm166_vm0, %v9366_v37  ;;  %4130 = vmatprep.mubr.bf16.mxu0 %v10257_v60 }
0x13ae   :  { %4171 = vmatprep.mubr.bf16.mxu1 %v10257_v60 }
0x146c   :  { %v9374_v42 = vpop.f32.mrf.mxu0 }
0x146d   :  { %10271 = vst [vmem:[#allocation4_spill] sm:$0xff] %v9374_v42  ;;  %v9376_v53 = vpop.f32.mrf.mxu1 }
0x146e   :  { %10272 = vst [vmem:[#allocation3_spill] sm:$0xff] %v9376_v53  ;;  %v9378_v17 = vpop.f32.mrf.mxu0 }
0x146f   :  { %10273 = vst [vmem:[#allocation6_spill] sm:$0xff] %v9378_v17  ;;  %v9383_v15 = vpop.f32.mrf.mxu1 }
0x1470   :  { %10274 = vst [vmem:[#allocation10_spill] sm:$0xff] %v9383_v15  ;;  %v3846_v0 = vpop.f32.mrf.mxu0 }
0x1471   :  { %v3847_v54 = vadd.f32 %v4980_v3, %v3846_v0  ;;  %v3889_v14 = vpop.f32.mrf.mxu1 }
0x1472   :  { %v3890_v61 = vadd.f32 %v4982_v41, %v3889_v14  ;;  %v3848_v2 = vpop.f32.mrf.mxu0 }
0x1473   :  { %v4994_v62 = vmul.f32 -1.442695, %v3847_v54  ;;  %v3849_v19 = vadd.f32 %v4981_v50, %v3848_v2  ;;  %v3891_v35 = vpop.f32.mrf.mxu1 }
0x1474   :  { %v4996_v5 = vmul.f32 -1.442695, %v3890_v61  ;;  %v3892_v37 = vadd.f32 %v4983_v47, %v3891_v35 }
0x1475   :  { %5283 = vpow2.f32 %v4994_v62  ;;  %v4995_v15 = vmul.f32 -1.442695, %v3849_v19 }
0x1476   :  { %5285 = vpow2.f32 %v4996_v5  ;;  %v4997_v17 = vmul.f32 -1.442695, %v3892_v37 }
0x1477   :  { %5287 = vpow2.f32 %v4995_v15 }
0x1478   :  { %5289 = vpow2.f32 %v4997_v17 }
0x1482   :  { %v5284_v53 = vpop.eup %5283 }
0x1483   :  { %v5286_v3 = vpop.eup %5285  ;;  %v3930_v0 = vadd.f32 1.0, %v5284_v53 }
0x1484   :  { %v5288_v42 = vpop.eup %5287  ;;  %v3932_v60 = vadd.f32 1.0, %v5286_v3 }
0x1485   :  { %v5290_v48 = vpop.eup %5289  ;;  %5291 = vrcp.f32 %v3930_v0  ;;  %v3931_v41 = vadd.f32 1.0, %v5288_v42 }
0x1486   :  { %5293 = vrcp.f32 %v3932_v60  ;;  %v3933_v54 = vadd.f32 1.0, %v5290_v48 }
0x1487   :  { %5295 = vrcp.f32 %v3931_v41 }
0x1488   :  { %5297 = vrcp.f32 %v3933_v54 }
0x1492   :  { %v5292_v50 = vpop.eup %5291 }
0x1493   :  { %v5294_v14 = vpop.eup %5293  ;;  %v9395_v47 = vmul.f32 %v5292_v50, %v8965_v18 }
0x1494   :  { %v5296_v37 = vpop.eup %5295  ;;  %v9403_v15 = vmul.f32 %v5294_v14, %v8968_v25 }
0x1495   :  { %v9398_v17 = vmul.f32 %v5296_v37, %v8975_v34  ;;  %4030 = vrot.lane.b32.xlu0 %v9395_v47, %s5511_s18  ;;  %v5298_v53 = vpop.eup %5297 }
0x1496   :  { %v9408_v60 = vmul.f32 %v5298_v53, %v8983_v49 }
0x1497   :  { %4032 = vrot.lane.b32.xlu1 %v9398_v17, %s5511_s18 }
0x1499   :  { %4034 = vrot.lane.b32.xlu0 %v9403_v15, %s5511_s18 }
0x149b   :  { %4036 = vrot.lane.b32.xlu1 %v9408_v60, %s5511_s18 }
0x149d   :  { %4006 = vrot.lane.b32.xlu0 %v9395_v47, %s5513_s20 }
0x149f   :  { %4008 = vrot.lane.b32.xlu1 %v9398_v17, %s5513_s20 }
0x14a1   :  { %4010 = vrot.lane.b32.xlu0 %v9403_v15, %s5513_s20 }
0x14a3   :  { %4012 = vrot.lane.b32.xlu1 %v9408_v60, %s5513_s20 }
0x14a5   :  { %4018 = vrot.lane.b32.xlu0 %v9395_v47, %s5512_s19 }
0x14a7   :  { %4020 = vrot.lane.b32.xlu1 %v9398_v17, %s5512_s19 }
0x14a9   :  { %4022 = vrot.lane.b32.xlu0 %v9403_v15, %s5512_s19 }
0x14ab   :  { %4024 = vrot.lane.b32.xlu1 %v9408_v60, %s5512_s19 }
0x14ad   :  { %3994 = vrot.lane.b32.xlu0 %v9395_v47, %s5514_s21 }
0x14af   :  { %3996 = vrot.lane.b32.xlu1 %v9398_v17, %s5514_s21 }
0x14b1   :  { %3998 = vrot.lane.b32.xlu0 %v9403_v15, %s5514_s21 }
0x14b3   :  { %4000 = vrot.lane.b32.xlu1 %v9408_v60, %s5514_s21 }
0x14b5   :  { %3970 = vrot.lane.b32.xlu0 %v9395_v47, %s5516_s23 }
0x14b7   :  { %3972 = vrot.lane.b32.xlu1 %v9398_v17, %s5516_s23 }
0x14b9   :  { %3974 = vrot.lane.b32.xlu0 %v9403_v15, %s5516_s23 }
0x14bb   :  { %3976 = vrot.lane.b32.xlu1 %v9408_v60, %s5516_s23 }
0x14bd   :  { %3982 = vrot.lane.b32.xlu0 %v9395_v47, %s5515_s22 }
0x14bf   :  { %3984 = vrot.lane.b32.xlu1 %v9398_v17, %s5515_s22 }
0x14c1   :  { %3986 = vrot.lane.b32.xlu0 %v9403_v15, %s5515_s22 }
0x14c3   :  { %3988 = vrot.lane.b32.xlu1 %v9408_v60, %s5515_s22 }
0x14c5   :  { %3946 = vrot.lane.b32.xlu0 %v9395_v47, %s5519_s25 }
0x14c7   :  { %3948 = vrot.lane.b32.xlu1 %v9398_v17, %s5519_s25 }
0x14c9   :  { %3950 = vrot.lane.b32.xlu0 %v9403_v15, %s5519_s25 }
0x14cb   :  { %3952 = vrot.lane.b32.xlu1 %v9408_v60, %s5519_s25 }
0x14cd   :  { %3958 = vrot.lane.b32.xlu0 %v9395_v47, %s5518_s24 }
0x14cf   :  { %3960 = vrot.lane.b32.xlu1 %v9398_v17, %s5518_s24 }
0x14d1   :  { %3962 = vrot.lane.b32.xlu0 %v9403_v15, %s5518_s24 }
0x14d3   :  { %3964 = vrot.lane.b32.xlu1 %v9408_v60, %s5518_s24 }
0x1507   :  { %v4031_v48 = vpop.permute.xlu0 %4030 }
0x1509   :  { %v4033_v42 = vpop.permute.xlu1 %4032 }
0x150a   :  { %v4040_v61 = vsel %vm60_vm1, %v4031_v48, %v4033_v42 }
0x150b   :  { %v4035_v2 = vpop.permute.xlu0 %4034  ;;  %v4074_v62 = vmul.f32 %v4040_v61, %v9061_v52 }
0x150c   :  { %v4039_v19 = vsel %vm60_vm1, %v4033_v42, %v4035_v2 }
0x150d   :  { %v4075_v35 = vmul.f32 %v4039_v19, %v9071_v38  ;;  %v4037_v5 = vpop.permute.xlu1 %4036  ;;  %v4094_v52 = vpack.c.bf16 %v9081_v56, %v4074_v62 }
0x150e   :  { %v4038_v3 = vsel %vm60_vm1, %v4035_v2, %v4037_v5  ;;  %v4041_v0 = vsel %vm60_vm1, %v4037_v5, %v4031_v48 }
0x150f   :  { %v4076_v41 = vmul.f32 %v4038_v3, %v9089_v16  ;;  %v4077_v54 = vmul.f32 %v4041_v0, %v9094_v57  ;;  %v4007_v50 = vpop.permute.xlu0 %4006  ;;  %v4095_v14 = vpack.c.bf16 %v9079_v31, %v4075_v35 }
0x1511   :  { %v4096_v37 = vpack.c.bf16 %v9097_v27, %v4076_v41  ;;  %v4009_v53 = vpop.permute.xlu1 %4008  ;;  %4104 = vmatprep.subr.bf16.mxu0 %v4095_v14  ;;  %v4097_v38 = vpack.c.bf16 %v9099_v4, %v4077_v54 }
0x1512   :  { %4105 = vmatpush1.bf16.msra.mxu0 %v4094_v52  ;;  %v4016_v62 = vsel %vm54_vm3, %v4007_v50, %v4009_v53 }
0x1513   :  { %4145 = vmatprep.subr.bf16.mxu1 %v4097_v38  ;;  %v4011_v42 = vpop.permute.xlu0 %4010  ;;  %v4066_v38 = vmul.f32 %v4016_v62, %v9133_v7 }
0x1514   :  { %4146 = vmatpush1.bf16.msra.mxu1 %v4096_v37  ;;  %v4015_v19 = vsel %vm54_vm3, %v4009_v53, %v4011_v42 }
0x1515   :  { %v4013_v48 = vpop.permute.xlu1 %4012  ;;  %v4067_v14 = vmul.f32 %v4015_v19, %v9119_v11 }
0x1516   :  { %v4014_v5 = vsel %vm54_vm3, %v4011_v42, %v4013_v48  ;;  %v4017_v0 = vsel %vm54_vm3, %v4013_v48, %v4007_v50 }
0x1517   :  { %v4019_v61 = vpop.permute.xlu0 %4018  ;;  %v4068_v53 = vmul.f32 %v4014_v5, %v9140_v12  ;;  %v4069_v48 = vmul.f32 %v4017_v0, %v9147_v30 }
0x1519   :  { %v4021_v2 = vpop.permute.xlu1 %4020 }
0x151a   :  { %v4028_v35 = vsel %vm57_vm2, %v4019_v61, %v4021_v2 }
0x151b   :  { %v4023_v3 = vpop.permute.xlu0 %4022  ;;  %v4070_v41 = vmul.f32 %v4028_v35, %v9114_v6 }
0x151c   :  { %v4027_v54 = vsel %vm57_vm2, %v4021_v2, %v4023_v3 }
0x151d   :  { %v4071_v52 = vmul.f32 %v4027_v54, %v9128_v33  ;;  %v4025_v37 = vpop.permute.xlu1 %4024  ;;  %v4090_v54 = vpack.c.bf16 %v4070_v41, %v4066_v38  ;;  %v4059_v41 = vmul.f32 %v9398_v17, %v9190_v9  ;;  %v4061_v17 = vmul.f32 %v9408_v60, %v9218_v63 }
0x151e   :  { %v4026_v42 = vsel %vm57_vm2, %v4023_v3, %v4025_v37  ;;  %v4029_v50 = vsel %vm57_vm2, %v4025_v37, %v4019_v61 }
0x151f   :  { %v4072_v35 = vmul.f32 %v4026_v42, %v9157_v46  ;;  %v4073_v2 = vmul.f32 %v4029_v50, %v9162_v21  ;;  %v3995_v19 = vpop.permute.xlu0 %3994  ;;  %v4091_v11 = vpack.c.bf16 %v4071_v52, %v4067_v14  ;;  %v4060_v52 = vmul.f32 %v9403_v15, %v9200_v51 }
0x1521   :  { %v4092_v33 = vpack.c.bf16 %v4072_v35, %v4068_v53  ;;  %v3997_v6 = vpop.permute.xlu1 %3996  ;;  %4106 = vmatprep.subr.bf16.mxu0 %v4091_v11  ;;  %v4093_v62 = vpack.c.bf16 %v4073_v2, %v4069_v48  ;;  %v4058_v11 = vmul.f32 %v9395_v47, %v9195_v59 }
0x1522   :  { %v4004_v5 = vsel %vm51_vm4, %v3995_v19, %v3997_v6  ;;  %4107 = vmatpush1.bf16.msra.mxu0 %v4090_v54 }
0x1523   :  { %4147 = vmatprep.subr.bf16.mxu1 %v4093_v62  ;;  %v3999_v3 = vpop.permute.xlu0 %3998  ;;  %v4062_v61 = vmul.f32 %v4004_v5, %v9178_v28 }
0x1524   :  { %v4003_v0 = vsel %vm51_vm4, %v3997_v6, %v3999_v3  ;;  %4148 = vmatpush1.bf16.msra.mxu1 %v4092_v33 }
0x1525   :  { %v4063_v37 = vmul.f32 %v4003_v0, %v9185_v8  ;;  %v4001_v14 = vpop.permute.xlu1 %4000  ;;  %v4086_v48 = vpack.c.bf16 %v4062_v61, %v4058_v11 }
0x1526   :  { %v4002_v38 = vsel %vm51_vm4, %v3999_v3, %v4001_v14  ;;  %v4005_v53 = vsel %vm51_vm4, %v4001_v14, %v3995_v19 }
0x1527   :  { %v4064_v6 = vmul.f32 %v4002_v38, %v9208_v26  ;;  %v4065_v33 = vmul.f32 %v4005_v53, %v9213_v22  ;;  %v3971_v42 = vpop.permute.xlu0 %3970  ;;  %v4087_v50 = vpack.c.bf16 %v4063_v37, %v4059_v41 }
0x1529   :  { %v4088_v47 = vpack.c.bf16 %v4064_v6, %v4060_v52  ;;  %v3973_v35 = vpop.permute.xlu1 %3972  ;;  %4108 = vmatprep.subr.bf16.mxu0 %v4087_v50  ;;  %v4089_v15 = vpack.c.bf16 %v4065_v33, %v4061_v17 }
0x152a   :  { %4109 = vmatpush1.bf16.msra.mxu0 %v4086_v48  ;;  %v3980_v62 = vsel %vm45_vm5, %v3971_v42, %v3973_v35 }
0x152b   :  { %4149 = vmatprep.subr.bf16.mxu1 %v4089_v15  ;;  %v3975_v2 = vpop.permute.xlu0 %3974  ;;  %v4051_v60 = vmul.f32 %v3980_v62, %v9238_v43 }
0x152c   :  { %4150 = vmatpush1.bf16.msra.mxu1 %v4088_v47  ;;  %v3979_v11 = vsel %vm45_vm5, %v3973_v35, %v3975_v2 }
0x152d   :  { %v3977_v54 = vpop.permute.xlu1 %3976  ;;  %v4052_v35 = vmul.f32 %v3979_v11, %v9285_v29 }
0x152e   :  { %v3978_v37 = vsel %vm45_vm5, %v3975_v2, %v3977_v54  ;;  %v3981_v14 = vsel %vm45_vm5, %v3977_v54, %v3971_v42 }
0x152f   :  { %v3983_v19 = vpop.permute.xlu0 %3982  ;;  %v4050_v50 = vmul.f32 %v3981_v14, %v9253_v24  ;;  %v4053_v42 = vmul.f32 %v3978_v37, %v9264_v36 }
0x1531   :  { %v3985_v5 = vpop.permute.xlu1 %3984 }
0x1532   :  { %v3992_v3 = vsel %vm48_vm6, %v3983_v19, %v3985_v5 }
0x1533   :  { %v4055_v61 = vmul.f32 %v3992_v3, %v9245_v45  ;;  %v3987_v0 = vpop.permute.xlu0 %3986 }
0x1534   :  { %v3991_v41 = vsel %vm48_vm6, %v3985_v5, %v3987_v0 }
0x1535   :  { %v3989_v52 = vpop.permute.xlu1 %3988  ;;  %v4083_v38 = vpack.c.bf16 %v4055_v61, %v4051_v60  ;;  %v4056_v53 = vmul.f32 %v3991_v41, %v9259_v40 }
0x1536   :  { %v3990_v6 = vsel %vm48_vm6, %v3987_v0, %v3989_v52  ;;  %v3993_v33 = vsel %vm48_vm6, %v3989_v52, %v3983_v19 }
0x1537   :  { %v4054_v17 = vmul.f32 %v3993_v33, %v9275_v55  ;;  %v4057_v48 = vmul.f32 %v3990_v6, %v9280_v39  ;;  %v3947_v47 = vpop.permute.xlu0 %3946  ;;  %4110 = vmatprep.subr.bf16.mxu0 %v4083_v38  ;;  %v4084_v62 = vpack.c.bf16 %v4056_v53, %v4052_v35 }
0x1539   :  { %v4082_v15 = vpack.c.bf16 %v4054_v17, %v4050_v50  ;;  %v3949_v2 = vpop.permute.xlu1 %3948  ;;  %v4085_v54 = vpack.c.bf16 %v4057_v48, %v4053_v42 }
0x153a   :  { %v3956_v60 = vsel %vm39_vm7, %v3947_v47, %v3949_v2 }
0x153b   :  { %4151 = vmatprep.subr.bf16.mxu1 %v4085_v54  ;;  %v3951_v5 = vpop.permute.xlu0 %3950  ;;  %4111 = vmatpush1.bf16.msra.mxu0 %v4082_v15  ;;  %v4043_v37 = vmul.f32 %v3956_v60, %v9302_v58  ;;  %v10275_v15 = vld [vmem:[#allocation2_spill] sm:$0xff]  ;;  %v4977_v60 = vld [vmem:[%s10176_s0 + $0x248] sm:$0xff] }
0x153c   :  { %4152 = vmatpush1.bf16.msra.mxu1 %v4084_v62  ;;  %v3955_v53 = vsel %vm39_vm7, %v3949_v2, %v3951_v5 }
0x153d   :  { %v3953_v19 = vpop.permute.xlu1 %3952  ;;  %v4044_v2 = vmul.f32 %v3955_v53, %v10275_v15 }
0x153e   :  { %v3954_v11 = vsel %vm39_vm7, %v3951_v5, %v3953_v19  ;;  %v3957_v52 = vsel %vm39_vm7, %v3953_v19, %v3947_v47  ;;  %v9581_v19 = vld [vmem:[%s10177_s3] sm:$0xf] }
0x153f   :  { %v3959_v3 = vpop.permute.xlu0 %3958  ;;  %v4042_v17 = vmul.f32 %v3957_v52, %v9323_v13  ;;  %v4045_v48 = vmul.f32 %v3954_v11, %v9328_v10  ;;  %v10279_v11 = vld [vmem:[#allocation6_spill] sm:$0xff] }
0x1540   :  { %v3845_v52 = vadd.f32 %v4977_v60, %v10279_v11  ;;  %v4985_v60 = vld [vmem:[%s10176_s0 + $0x288] sm:$0xff] }
0x1541   :  { %v3961_v61 = vpop.permute.xlu1 %3960 }
0x1542   :  { %v3968_v0 = vsel %vm42_vm8, %v3959_v3, %v3961_v61 }
0x1543   :  { %v4047_v14 = vmul.f32 %v9312_v32, %v3968_v0  ;;  %v3963_v41 = vpop.permute.xlu0 %3962 }
0x1544   :  { %v3967_v38 = vsel %vm42_vm8, %v3961_v61, %v3963_v41  ;;  %v10277_v61 = vld [vmem:[#allocation4_spill] sm:$0xff] }
0x1545   :  { %v3965_v6 = vpop.permute.xlu1 %3964  ;;  %v4079_v33 = vpack.c.bf16 %v4047_v14, %v4043_v37  ;;  %v4048_v50 = vmul.f32 %v3967_v38, %v9318_v1  ;;  %v4979_v37 = vld [vmem:[%s10176_s0 + $0x258] sm:$0xff]  ;;  %v10278_v14 = vld [vmem:[#allocation3_spill] sm:$0xff]  ;;  %v10280_v38 = vld [vmem:[#allocation10_spill] sm:$0xff] }
0x1546   :  { %v3966_v32 = vsel %vm42_vm8, %v3963_v41, %v3965_v6  ;;  %v3969_v42 = vsel %vm42_vm8, %v3965_v6, %v3959_v3  ;;  %v4978_v3 = vld [vmem:[%s10176_s0 + $0x250] sm:$0xff]  ;;  %v3888_v53 = vadd.f32 %v4979_v37, %v10280_v38  ;;  %v4987_v37 = vld [vmem:[%s10176_s0 + $0x298] sm:$0xff] }
0x1547   :  { %v4046_v47 = vmul.f32 %v9353_v23, %v3969_v42  ;;  %v4049_v35 = vmul.f32 %v9359_v20, %v3966_v32  ;;  %4112 = vmatprep.subr.bf16.mxu0 %v4079_v33  ;;  %v4080_v5 = vpack.c.bf16 %v4048_v50, %v4044_v2  ;;  %v10276_v23 = vmov 0   ;;  %v4976_v20 = vld [vmem:[%s10176_s0 + $0x240] sm:$0xff] }
0x1548   :  { %v3843_v0 = vadd.f32 %v4976_v20, %v10277_v61  ;;  %v3886_v41 = vadd.f32 %v4978_v3, %v10278_v14  ;;  %v4991_v50 = vmul.f32 -1.442695, %v3845_v52  ;;  %v4993_v32 = vmul.f32 -1.442695, %v3888_v53  ;;  %v4986_v20 = vld [vmem:[%s10176_s0 + $0x290] sm:$0xff] }
0x1549   :  { %v4078_v54 = vpack.c.bf16 %v4046_v47, %v4042_v17  ;;  %v4081_v62 = vpack.c.bf16 %v4049_v35, %v4045_v48 }
0x154a   :  { %v4990_v6 = vmul.f32 -1.442695, %v3843_v0  ;;  %v4992_v33 = vmul.f32 -1.442695, %v3886_v41 }
0x154b   :  { %4113 = vmatpush1.bf16.msra.mxu0 %v4078_v54  ;;  %4153 = vmatprep.subr.bf16.mxu1 %v4081_v62 }
0x154c   :  { %4154 = vmatpush1.bf16.msra.mxu1 %v4080_v5  ;;  %5299 = vpow2.f32 %v4990_v6  ;;  %v4984_v5 = vld [vmem:[%s10176_s0 + $0x280] sm:$0xff] }
0x154d   :  { %5301 = vpow2.f32 %v4992_v33 }
0x154e   :  { %4998 = vmatmul.mubr.msk.bf16.vlgmr.msra.gmra.mxu0 %vm166_vm0, %v9581_v19  ;;  %5303 = vpow2.f32 %v4991_v50 }
0x154f   :  { %4999 = vmatmul.mubr.msk.bf16.vlgmr.msra.gmra.mxu1 %vm166_vm0, %v9581_v19  ;;  %4446 = vmatprep.mubr.bf16.mxu0 %v10276_v23  ;;  %5305 = vpow2.f32 %v4993_v32 }
0x1550   :  { %4489 = vmatprep.mubr.bf16.mxu1 %v10276_v23 }
0x1559   :  { %v5300_v42 = vpop.eup %5299 }
0x155a   :  { %v5302_v17 = vpop.eup %5301  ;;  %v3906_v35 = vadd.f32 1.0, %v5300_v42 }
0x155b   :  { %v5304_v48 = vpop.eup %5303  ;;  %v3908_v2 = vadd.f32 1.0, %v5302_v17 }
0x155c   :  { %v5306_v47 = vpop.eup %5305  ;;  %v3907_v54 = vadd.f32 1.0, %v5304_v48  ;;  %5307 = vrcp.f32 %v3906_v35 }
0x155d   :  { %v3909_v62 = vadd.f32 1.0, %v5306_v47  ;;  %5309 = vrcp.f32 %v3908_v2 }
0x155e   :  { %5311 = vrcp.f32 %v3907_v54 }
0x155f   :  { %5313 = vrcp.f32 %v3909_v62 }
0x1569   :  { %v5308_v32 = vpop.eup %5307 }
0x156a   :  { %v5310_v42 = vpop.eup %5309  ;;  %v4184_v47 = vsub.f32 1.0, %v5308_v32 }
0x156b   :  { %v5312_v17 = vpop.eup %5311  ;;  %v4186_v35 = vsub.f32 1.0, %v5310_v42 }
0x156c   :  { %v5314_v48 = vpop.eup %5313  ;;  %v4185_v2 = vsub.f32 1.0, %v5312_v17 }
0x156d   :  { %v4187_v62 = vsub.f32 1.0, %v5314_v48 }
0x160e   :  { %v4132_v3 = vpop.f32.mrf.mxu0 }
0x160f   :  { %v4133_v61 = vadd.f32 %v4984_v5, %v4132_v3  ;;  %v4173_v0 = vpop.f32.mrf.mxu1 }
0x1610   :  { %v4174_v14 = vadd.f32 %v4986_v20, %v4173_v0  ;;  %v4134_v41 = vpop.f32.mrf.mxu0  ;;  %v4188_v20 = vmul.f32 %v4184_v47, %v8965_v18 }
0x1611   :  { %5315 = vtanh.f32 %v4133_v61  ;;  %v4135_v11 = vadd.f32 %v4985_v60, %v4134_v41  ;;  %v4175_v52 = vpop.f32.mrf.mxu1  ;;  %v4190_v61 = vmul.f32 %v4186_v35, %v8968_v25  ;;  %v4189_v41 = vmul.f32 %v4185_v2, %v8975_v34 }
0x1612   :  { %5317 = vtanh.f32 %v4174_v14  ;;  %v4176_v38 = vadd.f32 %v4987_v37, %v4175_v52  ;;  %v4136_v53 = vpop.f32.mrf.mxu0 }
0x1613   :  { %5319 = vtanh.f32 %v4135_v11  ;;  %v4177_v6 = vpop.f32.mrf.mxu1 }
0x1614   :  { %5321 = vtanh.f32 %v4176_v38  ;;  %v4137_v33 = vpop.f32.mrf.mxu0  ;;  %v4191_v38 = vmul.f32 %v4187_v62, %v8983_v49 }
0x1615   :  { %v4178_v50 = vpop.f32.mrf.mxu1 }
0x1616   :  { %v9714_v50 = vld [vmem:[%s10175_s1 + $0x100] sm:$0xff] }
0x161e   :  { %v5316_v54 = vpop.eup %5315 }
0x161f   :  { %v5318_v5 = vpop.eup %5317  ;;  %v4192_v3 = vmul.f32 %v5316_v54, %v5308_v32 }
0x1620   :  { %v5320_v60 = vpop.eup %5319  ;;  %v4194_v0 = vmul.f32 %v5318_v5, %v5310_v42 }
0x1621   :  { %v5322_v37 = vpop.eup %5321  ;;  %v9619_v14 = vadd.f32 %v4192_v3, %v4188_v20  ;;  %v4193_v11 = vmul.f32 %v5320_v60, %v5312_v17  ;;  %v9722_v17 = vld [vmem:[%s10175_s1 + $0x108] sm:$0xff] }
0x1622   :  { %v9622_v52 = vadd.f32 %v4194_v0, %v4190_v61  ;;  %v4195_v53 = vmul.f32 %v5322_v37, %v5314_v48 }
0x1623   :  { %5000 = vst [vmem:[%s10178_s4 + $0xc0] sm:$0xff] %v9619_v14  ;;  %v9629_v18 = vadd.f32 %v4193_v11, %v4189_v41  ;;  %4302 = vrot.lane.b32.xlu0 %v9619_v14, %s5511_s18 }
0x1624   :  { %5002 = vst [vmem:[%s10178_s4 + $0xd0] sm:$0xff] %v9622_v52  ;;  %v9637_v25 = vadd.f32 %v4195_v53, %v4191_v38 }
0x1625   :  { %5001 = vst [vmem:[%s10178_s4 + $0xc8] sm:$0xff] %v9629_v18  ;;  %4304 = vrot.lane.b32.xlu1 %v9629_v18, %s5511_s18 }
0x1626   :  { %5003 = vst [vmem:[%s10178_s4 + $0xd8] sm:$0xff] %v9637_v25 }
0x1627   :  { %4306 = vrot.lane.b32.xlu0 %v9622_v52, %s5511_s18 }
0x1629   :  { %4308 = vrot.lane.b32.xlu1 %v9637_v25, %s5511_s18 }
0x162b   :  { %4278 = vrot.lane.b32.xlu0 %v9619_v14, %s5513_s20 }
0x162d   :  { %4280 = vrot.lane.b32.xlu1 %v9629_v18, %s5513_s20 }
0x162f   :  { %4282 = vrot.lane.b32.xlu0 %v9622_v52, %s5513_s20 }
0x1631   :  { %4284 = vrot.lane.b32.xlu1 %v9637_v25, %s5513_s20 }
0x1633   :  { %4290 = vrot.lane.b32.xlu0 %v9619_v14, %s5512_s19 }
0x1635   :  { %4292 = vrot.lane.b32.xlu1 %v9629_v18, %s5512_s19 }
0x1637   :  { %4294 = vrot.lane.b32.xlu0 %v9622_v52, %s5512_s19 }
0x1639   :  { %4296 = vrot.lane.b32.xlu1 %v9637_v25, %s5512_s19 }
0x163b   :  { %4266 = vrot.lane.b32.xlu0 %v9619_v14, %s5514_s21 }
0x163d   :  { %4268 = vrot.lane.b32.xlu1 %v9629_v18, %s5514_s21 }
0x163f   :  { %4270 = vrot.lane.b32.xlu0 %v9622_v52, %s5514_s21 }
0x1641   :  { %4272 = vrot.lane.b32.xlu1 %v9637_v25, %s5514_s21 }
0x1643   :  { %4242 = vrot.lane.b32.xlu0 %v9619_v14, %s5516_s23 }
0x1645   :  { %4244 = vrot.lane.b32.xlu1 %v9629_v18, %s5516_s23 }
0x1647   :  { %4246 = vrot.lane.b32.xlu0 %v9622_v52, %s5516_s23 }
0x1649   :  { %4248 = vrot.lane.b32.xlu1 %v9637_v25, %s5516_s23 }
0x164b   :  { %4254 = vrot.lane.b32.xlu0 %v9619_v14, %s5515_s22 }
0x164d   :  { %4256 = vrot.lane.b32.xlu1 %v9629_v18, %s5515_s22 }
0x164f   :  { %4258 = vrot.lane.b32.xlu0 %v9622_v52, %s5515_s22 }
0x1651   :  { %4260 = vrot.lane.b32.xlu1 %v9637_v25, %s5515_s22 }
0x1653   :  { %4218 = vrot.lane.b32.xlu0 %v9619_v14, %s5519_s25 }
0x1655   :  { %4220 = vrot.lane.b32.xlu1 %v9629_v18, %s5519_s25 }
0x1657   :  { %4222 = vrot.lane.b32.xlu0 %v9622_v52, %s5519_s25 }
0x1659   :  { %4224 = vrot.lane.b32.xlu1 %v9637_v25, %s5519_s25 }
0x165b   :  { %4230 = vrot.lane.b32.xlu0 %v9619_v14, %s5518_s24 }
0x165d   :  { %4232 = vrot.lane.b32.xlu1 %v9629_v18, %s5518_s24 }
0x165f   :  { %4234 = vrot.lane.b32.xlu0 %v9622_v52, %s5518_s24 }
0x1661   :  { %4236 = vrot.lane.b32.xlu1 %v9637_v25, %s5518_s24 }
0x1695   :  { %v4303_v34 = vpop.permute.xlu0 %4302 }
0x1697   :  { %v4305_v49 = vpop.permute.xlu1 %4304 }
0x1698   :  { %v4312_v6 = vsel %vm60_vm1, %v4303_v34, %v4305_v49 }
0x1699   :  { %v4307_v33 = vpop.permute.xlu0 %4306  ;;  %v4386_v32 = vmul.f32 %v9714_v50, %v4312_v6 }
0x169a   :  { %v4311_v42 = vsel %vm60_vm1, %v4305_v49, %v4307_v33 }
0x169b   :  { %v4387_v48 = vmul.f32 %v9722_v17, %v4311_v42  ;;  %v4309_v47 = vpop.permute.xlu1 %4308  ;;  %v4410_v3 = vpack.c.bf16 %v9081_v56, %v4386_v32 }
0x169c   :  { %v4310_v35 = vsel %vm60_vm1, %v4307_v33, %v4309_v47  ;;  %v4313_v2 = vsel %vm60_vm1, %v4309_v47, %v4303_v34  ;;  %v10281_v33 = vld [vmem:[#allocation9_spill] sm:$0xff] }
0x169d   :  { %v4388_v54 = vmul.f32 %v4310_v35, %v9089_v16  ;;  %v4389_v62 = vmul.f32 %v4313_v2, %v9094_v57  ;;  %v4279_v5 = vpop.permute.xlu0 %4278  ;;  %v4411_v20 = vpack.c.bf16 %v9079_v31, %v4387_v48  ;;  %v10282_v48 = vld [vmem:[#allocation7_spill] sm:$0xff]  ;;  %v10283_v35 = vld [vmem:[#allocation8_spill] sm:$0xff] }
0x169f   :  { %v4412_v60 = vpack.c.bf16 %v9097_v27, %v4388_v54  ;;  %v4281_v61 = vpop.permute.xlu1 %4280  ;;  %4420 = vmatprep.subr.bf16.mxu0 %v4411_v20  ;;  %v4413_v0 = vpack.c.bf16 %v9099_v4, %v4389_v62 }
0x16a0   :  { %4421 = vmatpush1.bf16.msra.mxu0 %v4410_v3  ;;  %v4288_v53 = vsel %vm54_vm3, %v4279_v5, %v4281_v61 }
0x16a1   :  { %4463 = vmatprep.subr.bf16.mxu1 %v4413_v0  ;;  %v4283_v37 = vpop.permute.xlu0 %4282  ;;  %v4378_v62 = vmul.f32 %v4288_v53, %v9133_v7 }
0x16a2   :  { %4464 = vmatpush1.bf16.msra.mxu1 %v4412_v60  ;;  %v4287_v57 = vsel %vm54_vm3, %v4281_v61, %v4283_v37 }
0x16a3   :  { %v4285_v41 = vpop.permute.xlu1 %4284  ;;  %v4379_v47 = vmul.f32 %v4287_v57, %v10282_v48 }
0x16a4   :  { %v4286_v34 = vsel %vm54_vm3, %v4283_v37, %v4285_v41  ;;  %v4289_v6 = vsel %vm54_vm3, %v4285_v41, %v4279_v5 }
0x16a5   :  { %v4291_v11 = vpop.permute.xlu0 %4290  ;;  %v4380_v20 = vmul.f32 %v4286_v34, %v9140_v12  ;;  %v4381_v60 = vmul.f32 %v4289_v6, %v9147_v30  ;;  %v4371_v34 = vmul.f32 %v9629_v18, %v9190_v9  ;;  %v4372_v6 = vmul.f32 %v9622_v52, %v9200_v51 }
0x16a6   :  { %v4373_v9 = vmul.f32 %v9637_v25, %v9218_v63 }
0x16a7   :  { %v4293_v16 = vpop.permute.xlu1 %4292 }
0x16a8   :  { %v4300_v38 = vsel %vm57_vm2, %v4291_v11, %v4293_v16 }
0x16a9   :  { %v4295_v49 = vpop.permute.xlu0 %4294  ;;  %v4382_v32 = vmul.f32 %v4300_v38, %v10281_v33 }
0x16aa   :  { %v4299_v42 = vsel %vm57_vm2, %v4293_v16, %v4295_v49 }
0x16ab   :  { %v4383_v2 = vmul.f32 %v4299_v42, %v10283_v35  ;;  %v4297_v54 = vpop.permute.xlu1 %4296  ;;  %v4406_v16 = vpack.c.bf16 %v4382_v32, %v4378_v62 }
0x16ac   :  { %v4298_v3 = vsel %vm57_vm2, %v4295_v49, %v4297_v54  ;;  %v4301_v5 = vsel %vm57_vm2, %v4297_v54, %v4291_v11  ;;  %v4370_v49 = vmul.f32 %v9619_v14, %v9195_v59 }
0x16ad   :  { %v4384_v61 = vmul.f32 %v4298_v3, %v9157_v46  ;;  %v4385_v0 = vmul.f32 %v4301_v5, %v9162_v21  ;;  %v4267_v37 = vpop.permute.xlu0 %4266  ;;  %v4407_v41 = vpack.c.bf16 %v4383_v2, %v4379_v47 }
0x16af   :  { %v4408_v57 = vpack.c.bf16 %v4384_v61, %v4380_v20  ;;  %v4269_v38 = vpop.permute.xlu1 %4268  ;;  %4422 = vmatprep.subr.bf16.mxu0 %v4407_v41  ;;  %v4409_v7 = vpack.c.bf16 %v4385_v0, %v4381_v60 }
0x16b0   :  { %v4276_v12 = vsel %vm51_vm4, %v4267_v37, %v4269_v38  ;;  %4423 = vmatpush1.bf16.msra.mxu0 %v4406_v16 }
0x16b1   :  { %4465 = vmatprep.subr.bf16.mxu1 %v4409_v7  ;;  %v4271_v53 = vpop.permute.xlu0 %4270  ;;  %v4374_v11 = vmul.f32 %v4276_v12, %v9178_v28 }
0x16b2   :  { %v4275_v30 = vsel %vm51_vm4, %v4269_v38, %v4271_v53  ;;  %4466 = vmatpush1.bf16.msra.mxu1 %v4408_v57 }
0x16b3   :  { %v4375_v46 = vmul.f32 %v4275_v30, %v9185_v8  ;;  %v4273_v21 = vpop.permute.xlu1 %4272  ;;  %v4402_v47 = vpack.c.bf16 %v4374_v11, %v4370_v49 }
0x16b4   :  { %v4274_v33 = vsel %vm51_vm4, %v4271_v53, %v4273_v21  ;;  %v4277_v28 = vsel %vm51_vm4, %v4273_v21, %v4267_v37 }
0x16b5   :  { %v4376_v32 = vmul.f32 %v4274_v33, %v9208_v26  ;;  %v4377_v8 = vmul.f32 %v4277_v28, %v9213_v22  ;;  %v4243_v42 = vpop.permute.xlu0 %4242  ;;  %v4403_v48 = vpack.c.bf16 %v4375_v46, %v4371_v34 }
0x16b7   :  { %v4404_v59 = vpack.c.bf16 %v4376_v32, %v4372_v6  ;;  %v4245_v35 = vpop.permute.xlu1 %4244  ;;  %4424 = vmatprep.subr.bf16.mxu0 %v4403_v48  ;;  %v4405_v51 = vpack.c.bf16 %v4377_v8, %v4373_v9  ;;  %v9823_v9 = vld [vmem:[%s10175_s1 + $0x20] sm:$0xff] }
0x16b8   :  { %4425 = vmatpush1.bf16.msra.mxu0 %v4402_v47  ;;  %v4252_v26 = vsel %vm45_vm5, %v4243_v42, %v4245_v35 }
0x16b9   :  { %4467 = vmatprep.subr.bf16.mxu1 %v4405_v51  ;;  %v4247_v2 = vpop.permute.xlu0 %4246  ;;  %v4363_v63 = vmul.f32 %v4252_v26, %v9238_v43 }
0x16ba   :  { %4468 = vmatpush1.bf16.msra.mxu1 %v4404_v59  ;;  %v4251_v37 = vsel %vm45_vm5, %v4245_v35, %v4247_v2 }
0x16bb   :  { %v4249_v54 = vpop.permute.xlu1 %4248  ;;  %v4364_v30 = vmul.f32 %v4251_v37, %v9285_v29  ;;  %v5010_v37 = vld [vmem:[%s10176_s0 + $0x2d0] sm:$0xff] }
0x16bc   :  { %v4250_v60 = vsel %vm45_vm5, %v4247_v2, %v4249_v54  ;;  %v4253_v61 = vsel %vm45_vm5, %v4249_v54, %v4243_v42 }
0x16bd   :  { %v4255_v62 = vpop.permute.xlu0 %4254  ;;  %v4362_v38 = vmul.f32 %v4253_v61, %v9253_v24  ;;  %v4365_v7 = vmul.f32 %v4250_v60, %v9264_v36  ;;  %v10284_v60 = vld [vmem:[#allocation5_spill] sm:$0xff]  ;;  %v5008_v61 = vld [vmem:[%s10176_s0 + $0x2c0] sm:$0xff] }
0x16bf   :  { %v4257_v22 = vpop.permute.xlu1 %4256 }
0x16c0   :  { %v4264_v20 = vsel %vm48_vm6, %v4255_v62, %v4257_v22 }
0x16c1   :  { %v4367_v3 = vmul.f32 %v4264_v20, %v9245_v45  ;;  %v4259_v5 = vpop.permute.xlu0 %4258 }
0x16c2   :  { %v4263_v0 = vsel %vm48_vm6, %v4257_v22, %v4259_v5 }
0x16c3   :  { %v4261_v41 = vpop.permute.xlu1 %4260  ;;  %v4399_v16 = vpack.c.bf16 %v4367_v3, %v4363_v63  ;;  %v4368_v57 = vmul.f32 %v4263_v0, %v9259_v40 }
0x16c4   :  { %v4262_v43 = vsel %vm48_vm6, %v4259_v5, %v4261_v41  ;;  %v4265_v45 = vsel %vm48_vm6, %v4261_v41, %v4255_v62 }
0x16c5   :  { %v4366_v12 = vmul.f32 %v4265_v45, %v9275_v55  ;;  %v4369_v53 = vmul.f32 %v4262_v43, %v9280_v39  ;;  %v4219_v11 = vpop.permute.xlu0 %4218  ;;  %4426 = vmatprep.subr.bf16.mxu0 %v4399_v16  ;;  %v4400_v34 = vpack.c.bf16 %v4368_v57, %v4364_v30  ;;  %v9808_v55 = vld [vmem:[%s10175_s1 + $0x28] sm:$0xff]  ;;  %v5011_v43 = vld [vmem:[%s10176_s0 + $0x2d8] sm:$0xff] }
0x16c7   :  { %v4398_v46 = vpack.c.bf16 %v4366_v12, %v4362_v38  ;;  %v4221_v40 = vpop.permute.xlu1 %4220  ;;  %v4401_v21 = vpack.c.bf16 %v4369_v53, %v4365_v7 }
0x16c8   :  { %v4228_v36 = vsel %vm39_vm7, %v4219_v11, %v4221_v40 }
0x16c9   :  { %4469 = vmatprep.subr.bf16.mxu1 %v4401_v21  ;;  %v4223_v49 = vpop.permute.xlu0 %4222  ;;  %4427 = vmatpush1.bf16.msra.mxu0 %v4398_v46  ;;  %v4355_v33 = vmul.f32 %v4228_v36, %v9302_v58  ;;  %v9828_v58 = vld [vmem:[%s10175_s1 + $0x38] sm:$0xff] }
0x16ca   :  { %4470 = vmatpush1.bf16.msra.mxu1 %v4400_v34  ;;  %v4227_v47 = vsel %vm39_vm7, %v4221_v40, %v4223_v49 }
0x16cb   :  { %v4225_v6 = vpop.permute.xlu1 %4224  ;;  %v4356_v63 = vmul.f32 %v4227_v47, %v10275_v15 }
0x16cc   :  { %v4226_v8 = vsel %vm39_vm7, %v4223_v49, %v4225_v6  ;;  %v4229_v42 = vsel %vm39_vm7, %v4225_v6, %v4219_v11 }
0x16cd   :  { %v4231_v24 = vpop.permute.xlu0 %4230  ;;  %v4354_v62 = vmul.f32 %v4229_v42, %v9323_v13  ;;  %v4357_v26 = vmul.f32 %v4226_v8, %v9328_v10 }
0x16cf   :  { %v4233_v39 = vpop.permute.xlu1 %4232 }
0x16d0   :  { %v4240_v29 = vsel %vm42_vm8, %v4231_v24, %v4233_v39 }
0x16d1   :  { %v4359_v28 = vmul.f32 %v9808_v55, %v4240_v29  ;;  %v4235_v32 = vpop.permute.xlu0 %4234 }
0x16d2   :  { %v4239_v48 = vsel %vm42_vm8, %v4233_v39, %v4235_v32 }
0x16d3   :  { %v4237_v59 = vpop.permute.xlu1 %4236  ;;  %v4395_v35 = vpack.c.bf16 %v4359_v28, %v4355_v33  ;;  %v4360_v51 = vmul.f32 %v4239_v48, %v9318_v1 }
0x16d4   :  { %v4238_v2 = vsel %vm42_vm8, %v4235_v32, %v4237_v59  ;;  %v4241_v54 = vsel %vm42_vm8, %v4237_v59, %v4231_v24 }
0x16d5   :  { %v4358_v22 = vmul.f32 %v9823_v9, %v4241_v54  ;;  %v4361_v20 = vmul.f32 %v9828_v58, %v4238_v2  ;;  %4428 = vmatprep.subr.bf16.mxu0 %v4395_v35  ;;  %v4396_v1 = vpack.c.bf16 %v4360_v51, %v4356_v63 }
0x16d7   :  { %v4394_v3 = vpack.c.bf16 %v4358_v22, %v4354_v62  ;;  %v4397_v5 = vpack.c.bf16 %v4361_v20, %v4357_v26 }
0x16d9   :  { %4429 = vmatpush1.bf16.msra.mxu0 %v4394_v3  ;;  %4471 = vmatprep.subr.bf16.mxu1 %v4397_v5  ;;  %v5479_v5 = vld [vmem:[%s10175_s1 + $0x110] sm:$0xff] }
0x16da   :  { %4472 = vmatpush1.bf16.msra.mxu1 %v4396_v1 }
0x16dc   :  { %5016 = vmatmul.mubr.msk.bf16.vlgmr.msra.gmra.mxu0 %vm166_vm0, %v10284_v60 }
0x16dd   :  { %5017 = vmatmul.mubr.msk.bf16.vlgmr.msra.gmra.mxu1 %vm166_vm0, %v10284_v60  ;;  %4736 = vmatprep.mubr.bf16.mxu0 %v10276_v23 }
0x16de   :  { %4777 = vmatprep.mubr.bf16.mxu1 %v10276_v23  ;;  %v5009_v23 = vld [vmem:[%s10176_s0 + $0x2c8] sm:$0xff] }
0x179c   :  { %v9848_v13 = vpop.f32.mrf.mxu0 }
0x179d   :  { %v9850_v10 = vpop.f32.mrf.mxu1 }
0x179e   :  { %v9852_v15 = vpop.f32.mrf.mxu0 }
0x179f   :  { %v9857_v0 = vpop.f32.mrf.mxu1 }
0x17a0   :  { %v4452_v41 = vpop.f32.mrf.mxu0 }
0x17a1   :  { %v4453_v16 = vadd.f32 %v5008_v61, %v4452_v41  ;;  %v4495_v57 = vpop.f32.mrf.mxu1 }
0x17a2   :  { %v4496_v45 = vadd.f32 %v5010_v37, %v4495_v57  ;;  %v4454_v38 = vpop.f32.mrf.mxu0 }
0x17a3   :  { %v5022_v7 = vmul.f32 -1.442695, %v4453_v16  ;;  %v4455_v12 = vadd.f32 %v5009_v23, %v4454_v38  ;;  %v4497_v53 = vpop.f32.mrf.mxu1 }
0x17a4   :  { %v5024_v11 = vmul.f32 -1.442695, %v4496_v45  ;;  %v4498_v30 = vadd.f32 %v5011_v43, %v4497_v53  ;;  %v5481_v53 = vld [vmem:[%s10175_s1 + $0xe0] sm:$0xff] }
0x17a5   :  { %5323 = vpow2.f32 %v5022_v7  ;;  %v5023_v46 = vmul.f32 -1.442695, %v4455_v12 }
0x17a6   :  { %5325 = vpow2.f32 %v5024_v11  ;;  %v5025_v40 = vmul.f32 -1.442695, %v4498_v30 }
0x17a7   :  { %5327 = vpow2.f32 %v5023_v46  ;;  %v5482_v46 = vld [vmem:[%s10175_s1 + $0xc8] sm:$0xff] }
0x17a8   :  { %5329 = vpow2.f32 %v5025_v40 }
0x17b2   :  { %v5324_v21 = vpop.eup %5323 }
0x17b3   :  { %v5326_v34 = vpop.eup %5325  ;;  %v4536_v49 = vadd.f32 1.0, %v5324_v21  ;;  %v5483_v21 = vld [vmem:[%s10175_s1 + $0xe8] sm:$0xff] }
0x17b4   :  { %v5328_v6 = vpop.eup %5327  ;;  %v4538_v24 = vadd.f32 1.0, %v5326_v34 }
0x17b5   :  { %v5330_v36 = vpop.eup %5329  ;;  %5331 = vrcp.f32 %v4536_v49  ;;  %v4537_v39 = vadd.f32 1.0, %v5328_v6  ;;  %v5484_v6 = vld [vmem:[%s10175_s1 + $0xc0] sm:$0xff] }
0x17b6   :  { %5333 = vrcp.f32 %v4538_v24  ;;  %v4539_v29 = vadd.f32 1.0, %v5330_v36  ;;  %v5485_v36 = vld [vmem:[%s10175_s1 + $0xd0] sm:$0xff] }
0x17b7   :  { %5335 = vrcp.f32 %v4537_v39 }
0x17b8   :  { %5337 = vrcp.f32 %v4539_v29 }
0x17c2   :  { %v5332_v33 = vpop.eup %5331 }
0x17c3   :  { %v5334_v28 = vpop.eup %5333  ;;  %v9869_v32 = vmul.f32 %v5332_v33, %v9619_v14 }
0x17c4   :  { %v5336_v8 = vpop.eup %5335  ;;  %v9877_v47 = vmul.f32 %v5334_v28, %v9622_v52  ;;  %v5486_v28 = vld [vmem:[%s10175_s1 + $0xd8] sm:$0xff] }
0x17c5   :  { %v9872_v42 = vmul.f32 %v5336_v8, %v9629_v18  ;;  %4636 = vrot.lane.b32.xlu0 %v9869_v32, %s5511_s18  ;;  %v5338_v48 = vpop.eup %5337 }
0x17c6   :  { %v9882_v59 = vmul.f32 %v5338_v48, %v9637_v25  ;;  %v5487_v48 = vld [vmem:[%s10175_s1 + $0xf0] sm:$0xff] }
0x17c7   :  { %4638 = vrot.lane.b32.xlu1 %v9872_v42, %s5511_s18 }
0x17c9   :  { %4640 = vrot.lane.b32.xlu0 %v9877_v47, %s5511_s18 }
0x17cb   :  { %4642 = vrot.lane.b32.xlu1 %v9882_v59, %s5511_s18 }
0x17cd   :  { %4612 = vrot.lane.b32.xlu0 %v9869_v32, %s5513_s20 }
0x17cf   :  { %4614 = vrot.lane.b32.xlu1 %v9872_v42, %s5513_s20 }
0x17d1   :  { %4616 = vrot.lane.b32.xlu0 %v9877_v47, %s5513_s20 }
0x17d3   :  { %4618 = vrot.lane.b32.xlu1 %v9882_v59, %s5513_s20 }
0x17d5   :  { %4624 = vrot.lane.b32.xlu0 %v9869_v32, %s5512_s19 }
0x17d7   :  { %4626 = vrot.lane.b32.xlu1 %v9872_v42, %s5512_s19 }
0x17d9   :  { %4628 = vrot.lane.b32.xlu0 %v9877_v47, %s5512_s19 }
0x17db   :  { %4630 = vrot.lane.b32.xlu1 %v9882_v59, %s5512_s19 }
0x17dd   :  { %4600 = vrot.lane.b32.xlu0 %v9869_v32, %s5514_s21 }
0x17df   :  { %4602 = vrot.lane.b32.xlu1 %v9872_v42, %s5514_s21 }
0x17e1   :  { %4604 = vrot.lane.b32.xlu0 %v9877_v47, %s5514_s21 }
0x17e3   :  { %4606 = vrot.lane.b32.xlu1 %v9882_v59, %s5514_s21 }
0x17e5   :  { %4576 = vrot.lane.b32.xlu0 %v9869_v32, %s5516_s23 }
0x17e7   :  { %4578 = vrot.lane.b32.xlu1 %v9872_v42, %s5516_s23 }
0x17e9   :  { %4580 = vrot.lane.b32.xlu0 %v9877_v47, %s5516_s23 }
0x17eb   :  { %4582 = vrot.lane.b32.xlu1 %v9882_v59, %s5516_s23 }
0x17ed   :  { %4588 = vrot.lane.b32.xlu0 %v9869_v32, %s5515_s22 }
0x17ef   :  { %4590 = vrot.lane.b32.xlu1 %v9872_v42, %s5515_s22 }
0x17f1   :  { %4592 = vrot.lane.b32.xlu0 %v9877_v47, %s5515_s22 }
0x17f3   :  { %4594 = vrot.lane.b32.xlu1 %v9882_v59, %s5515_s22 }
0x17f5   :  { %4552 = vrot.lane.b32.xlu0 %v9869_v32, %s5519_s25 }
0x17f7   :  { %4554 = vrot.lane.b32.xlu1 %v9872_v42, %s5519_s25 }
0x17f9   :  { %4556 = vrot.lane.b32.xlu0 %v9877_v47, %s5519_s25 }
0x17fb   :  { %4558 = vrot.lane.b32.xlu1 %v9882_v59, %s5519_s25 }
0x17fd   :  { %4564 = vrot.lane.b32.xlu0 %v9869_v32, %s5518_s24 }
0x17ff   :  { %4566 = vrot.lane.b32.xlu1 %v9872_v42, %s5518_s24 }
0x1801   :  { %4568 = vrot.lane.b32.xlu0 %v9877_v47, %s5518_s24 }
0x1803   :  { %4570 = vrot.lane.b32.xlu1 %v9882_v59, %s5518_s24 }
0x1837   :  { %v4637_v35 = vpop.permute.xlu0 %4636 }
0x1839   :  { %v4639_v51 = vpop.permute.xlu1 %4638 }
0x183a   :  { %v4646_v2 = vsel %vm60_vm1, %v4637_v35, %v4639_v51 }
0x183b   :  { %v4641_v54 = vpop.permute.xlu0 %4640  ;;  %v4680_v62 = vmul.f32 %v9714_v50, %v4646_v2  ;;  %v5480_v50 = vld [vmem:[%s10175_s1 + $0x118] sm:$0xff] }
0x183c   :  { %v4645_v26 = vsel %vm60_vm1, %v4639_v51, %v4641_v54  ;;  %v5488_v51 = vld [vmem:[%s10175_s1 + $0xf8] sm:$0xff] }
0x183d   :  { %v4681_v22 = vmul.f32 %v9722_v17, %v4645_v26  ;;  %v4643_v20 = vpop.permute.xlu1 %4642  ;;  %v4700_v37 = vpack.c.bf16 %v9081_v56, %v4680_v62 }
0x183e   :  { %v4644_v63 = vsel %vm60_vm1, %v4641_v54, %v4643_v20  ;;  %v4647_v3 = vsel %vm60_vm1, %v4643_v20, %v4637_v35 }
0x183f   :  { %v4682_v1 = vmul.f32 %v5479_v5, %v4644_v63  ;;  %v4683_v60 = vmul.f32 %v5480_v50, %v4647_v3  ;;  %v4613_v61 = vpop.permute.xlu0 %4612  ;;  %v4701_v17 = vpack.c.bf16 %v9079_v31, %v4681_v22 }
0x1841   :  { %v4702_v41 = vpack.c.bf16 %v9097_v27, %v4682_v1  ;;  %v4615_v23 = vpop.permute.xlu1 %4614  ;;  %4710 = vmatprep.subr.bf16.mxu0 %v4701_v17  ;;  %v4703_v16 = vpack.c.bf16 %v9099_v4, %v4683_v60  ;;  %v5489_v1 = vld [vmem:[%s10175_s1 + $0xa0] sm:$0xff] }
0x1842   :  { %4711 = vmatpush1.bf16.msra.mxu0 %v4700_v37  ;;  %v4622_v56 = vsel %vm54_vm3, %v4613_v61, %v4615_v23 }
0x1843   :  { %4751 = vmatprep.subr.bf16.mxu1 %v4703_v16  ;;  %v4617_v57 = vpop.permute.xlu0 %4616  ;;  %v4672_v24 = vmul.f32 %v5484_v6, %v4622_v56  ;;  %v5492_v16 = vld [vmem:[%s10175_s1 + $0x80] sm:$0xff] }
0x1844   :  { %4752 = vmatpush1.bf16.msra.mxu1 %v4702_v41  ;;  %v4621_v7 = vsel %vm54_vm3, %v4615_v23, %v4617_v57  ;;  %v5491_v41 = vld [vmem:[%s10175_s1 + $0x88] sm:$0xff] }
0x1845   :  { %v4619_v43 = vpop.permute.xlu1 %4618  ;;  %v4673_v40 = vmul.f32 %v5482_v46, %v4621_v7  ;;  %v4665_v23 = vmul.f32 %v5491_v41, %v9872_v42  ;;  %v5494_v42 = vld [vmem:[%s10175_s1 + $0xb0] sm:$0xff] }
0x1846   :  { %v4620_v27 = vsel %vm54_vm3, %v4617_v57, %v4619_v43  ;;  %v4623_v12 = vsel %vm54_vm3, %v4619_v43, %v4613_v61  ;;  %v5490_v61 = vld [vmem:[%s10175_s1 + $0xa8] sm:$0xff]  ;;  %v4664_v57 = vmul.f32 %v5492_v16, %v9869_v32  ;;  %v5493_v43 = vld [vmem:[%s10175_s1 + $0x90] sm:$0xff]  ;;  %v5495_v32 = vld [vmem:[%s10175_s1 + $0xb8] sm:$0xff] }
0x1847   :  { %v4625_v45 = vpop.permute.xlu0 %4624  ;;  %v4674_v39 = vmul.f32 %v5485_v36, %v4620_v27  ;;  %v4675_v8 = vmul.f32 %v5486_v28, %v4623_v12 }
0x1849   :  { %v4627_v38 = vpop.permute.xlu1 %4626 }
0x184a   :  { %v4634_v31 = vsel %vm57_vm2, %v4625_v45, %v4627_v38 }
0x184b   :  { %v4629_v4 = vpop.permute.xlu0 %4628  ;;  %v4676_v11 = vmul.f32 %v5481_v53, %v4634_v31 }
0x184c   :  { %v4633_v30 = vsel %vm57_vm2, %v4627_v38, %v4629_v4 }
0x184d   :  { %v4677_v34 = vmul.f32 %v5483_v21, %v4633_v30  ;;  %v4631_v49 = vpop.permute.xlu1 %4630  ;;  %v4696_v26 = vpack.c.bf16 %v4676_v11, %v4672_v24 }
0x184e   :  { %v4632_v29 = vsel %vm57_vm2, %v4629_v4, %v4631_v49  ;;  %v4635_v33 = vsel %vm57_vm2, %v4631_v49, %v4625_v45  ;;  %v4666_v45 = vmul.f32 %v5493_v43, %v9877_v47  ;;  %v5496_v47 = vld [vmem:[%s10175_s1 + $0x98] sm:$0xff] }
0x184f   :  { %v4678_v35 = vmul.f32 %v5487_v48, %v4632_v29  ;;  %v4679_v2 = vmul.f32 %v5488_v51, %v4635_v33  ;;  %v4601_v54 = vpop.permute.xlu0 %4600  ;;  %v4697_v62 = vpack.c.bf16 %v4677_v34, %v4673_v40  ;;  %v4667_v12 = vmul.f32 %v5496_v47, %v9882_v59  ;;  %v5497_v59 = vld [vmem:[%s10175_s1 + $0x48] sm:$0xff] }
0x1851   :  { %v4698_v22 = vpack.c.bf16 %v4678_v35, %v4674_v39  ;;  %v4603_v20 = vpop.permute.xlu1 %4602  ;;  %4712 = vmatprep.subr.bf16.mxu0 %v4697_v62  ;;  %v4699_v63 = vpack.c.bf16 %v4679_v2, %v4675_v8  ;;  %v5498_v39 = vld [vmem:[%s10175_s1 + $0x68] sm:$0xff] }
0x1852   :  { %v4610_v3 = vsel %vm51_vm4, %v4601_v54, %v4603_v20  ;;  %4713 = vmatpush1.bf16.msra.mxu0 %v4696_v26 }
0x1853   :  { %4753 = vmatprep.subr.bf16.mxu1 %v4699_v63  ;;  %v4605_v5 = vpop.permute.xlu0 %4604  ;;  %v4668_v50 = vmul.f32 %v5489_v1, %v4610_v3  ;;  %v5501_v3 = vld [vmem:[%s10175_s1 + $0x58] sm:$0xff]  ;;  %v5502_v1 = vld [vmem:[%s10175_s1 + $0x60] sm:$0xff] }
0x1854   :  { %v4609_v60 = vsel %vm51_vm4, %v4603_v20, %v4605_v5  ;;  %4754 = vmatpush1.bf16.msra.mxu1 %v4698_v22  ;;  %v5500_v20 = vld [vmem:[%s10175_s1 + $0x40] sm:$0xff] }
0x1855   :  { %v4669_v17 = vmul.f32 %v5490_v61, %v4609_v60  ;;  %v4607_v37 = vpop.permute.xlu1 %4606  ;;  %v4692_v53 = vpack.c.bf16 %v4668_v50, %v4664_v57  ;;  %v5503_v60 = vld [vmem:[%s10175_s1 + $0x78] sm:$0xff] }
0x1856   :  { %v4608_v38 = vsel %vm51_vm4, %v4605_v5, %v4607_v37  ;;  %v4611_v7 = vsel %vm51_vm4, %v4607_v37, %v4601_v54  ;;  %v5499_v54 = vld [vmem:[%s10175_s1 + $0x70] sm:$0xff] }
0x1857   :  { %v4670_v31 = vmul.f32 %v5494_v42, %v4608_v38  ;;  %v4671_v56 = vmul.f32 %v5495_v32, %v4611_v7  ;;  %v4577_v27 = vpop.permute.xlu0 %4576  ;;  %v4693_v4 = vpack.c.bf16 %v4669_v17, %v4665_v23  ;;  %v5504_v37 = vld [vmem:[%s10175_s1 + $0x50] sm:$0xff] }
0x1859   :  { %v4694_v11 = vpack.c.bf16 %v4670_v31, %v4666_v45  ;;  %v4579_v30 = vpop.permute.xlu1 %4578  ;;  %4714 = vmatprep.subr.bf16.mxu0 %v4693_v4  ;;  %v4695_v46 = vpack.c.bf16 %v4671_v56, %v4667_v12  ;;  %v5505_v56 = vld [vmem:[%s10175_s1 + $0x8] sm:$0xff] }
0x185a   :  { %4715 = vmatpush1.bf16.msra.mxu0 %v4692_v53  ;;  %v4586_v49 = vsel %vm45_vm5, %v4577_v27, %v4579_v30 }
0x185b   :  { %4755 = vmatprep.subr.bf16.mxu1 %v4695_v46  ;;  %v4581_v40 = vpop.permute.xlu0 %4580  ;;  %v4657_v36 = vmul.f32 %v5497_v59, %v4586_v49  ;;  %v5508_v59 = vld [vmem:[%s10175_s1 + $0x18] sm:$0xff] }
0x185c   :  { %4756 = vmatpush1.bf16.msra.mxu1 %v4694_v11  ;;  %v4585_v35 = vsel %vm45_vm5, %v4579_v30, %v4581_v40 }
0x185d   :  { %v4583_v21 = vpop.permute.xlu1 %4582  ;;  %v4658_v41 = vmul.f32 %v5504_v37, %v4585_v35  ;;  %v5005_v35 = vld [vmem:[%s10176_s0 + $0x2a8] sm:$0xff] }
0x185e   :  { %v4584_v28 = vsel %vm45_vm5, %v4581_v40, %v4583_v21  ;;  %v4587_v8 = vsel %vm45_vm5, %v4583_v21, %v4577_v27  ;;  %v5506_v21 = vld [vmem:[%s10175_s1 + $0x30] sm:$0xff]  ;;  %v5013_v37 = vld [vmem:[%s10176_s0 + $0x2e8] sm:$0xff] }
0x185f   :  { %v4589_v34 = vpop.permute.xlu0 %4588  ;;  %v4656_v63 = vmul.f32 %v5500_v20, %v4587_v8  ;;  %v4659_v5 = vmul.f32 %v5501_v3, %v4584_v28 }
0x1861   :  { %v4591_v6 = vpop.permute.xlu1 %4590 }
0x1862   :  { %v4598_v24 = vsel %vm48_vm6, %v4589_v34, %v4591_v6 }
0x1863   :  { %v4661_v29 = vmul.f32 %v5498_v39, %v4598_v24  ;;  %v4593_v33 = vpop.permute.xlu0 %4592 }
0x1864   :  { %v4597_v48 = vsel %vm48_vm6, %v4591_v6, %v4593_v33  ;;  %v5507_v6 = vld [vmem:[%s10175_s1] sm:$0xff] }
0x1865   :  { %v4595_v51 = vpop.permute.xlu1 %4594  ;;  %v4689_v2 = vpack.c.bf16 %v4661_v29, %v4657_v36  ;;  %v4662_v62 = vmul.f32 %v5499_v54, %v4597_v48  ;;  %v4451_v54 = vadd.f32 %v5005_v35, %v9852_v15  ;;  %v5012_v15 = vld [vmem:[%s10176_s0 + $0x2e0] sm:$0xff] }
0x1866   :  { %v4596_v26 = vsel %vm48_vm6, %v4593_v33, %v4595_v51  ;;  %v4599_v22 = vsel %vm48_vm6, %v4595_v51, %v4589_v34 }
0x1867   :  { %v4660_v50 = vmul.f32 %v5502_v1, %v4599_v22  ;;  %v4663_v61 = vmul.f32 %v5503_v60, %v4596_v26  ;;  %v4553_v17 = vpop.permute.xlu0 %4552  ;;  %4716 = vmatprep.subr.bf16.mxu0 %v4689_v2  ;;  %v4690_v43 = vpack.c.bf16 %v4662_v62, %v4658_v41  ;;  %v5007_v2 = vld [vmem:[%s10176_s0 + $0x2b8] sm:$0xff]  ;;  %v5019_v20 = vmul.f32 -1.442695, %v4451_v54 }
0x1868   :  { %v4494_v62 = vadd.f32 %v5007_v2, %v9857_v0  ;;  %v5014_v0 = vld [vmem:[%s10176_s0 + $0x2f0] sm:$0xff] }
0x1869   :  { %v4688_v23 = vpack.c.bf16 %v4660_v50, %v4656_v63  ;;  %v4555_v16 = vpop.permute.xlu1 %4554  ;;  %v4691_v57 = vpack.c.bf16 %v4663_v61, %v4659_v5 }
0x186a   :  { %v4562_v42 = vsel %vm39_vm7, %v4553_v17, %v4555_v16  ;;  %v5021_v63 = vmul.f32 -1.442695, %v4494_v62 }
0x186b   :  { %4757 = vmatprep.subr.bf16.mxu1 %v4691_v57  ;;  %v4557_v45 = vpop.permute.xlu0 %4556  ;;  %4717 = vmatpush1.bf16.msra.mxu0 %v4688_v23  ;;  %v4649_v27 = vmul.f32 %v5505_v56, %v4562_v42 }
0x186c   :  { %4758 = vmatpush1.bf16.msra.mxu1 %v4690_v43  ;;  %v4561_v30 = vsel %vm39_vm7, %v4555_v16, %v4557_v45  ;;  %v5015_v16 = vld [vmem:[%s10176_s0 + $0x2f8] sm:$0xff] }
0x186d   :  { %v4559_v38 = vpop.permute.xlu1 %4558  ;;  %v4650_v33 = vmul.f32 %v5509_v44, %v4561_v30 }
0x186e   :  { %v4560_v12 = vsel %vm39_vm7, %v4557_v45, %v4559_v38  ;;  %v4563_v53 = vsel %vm39_vm7, %v4559_v38, %v4553_v17 }
0x186f   :  { %v4565_v7 = vpop.permute.xlu0 %4564  ;;  %v4648_v24 = vmul.f32 %v5507_v6, %v4563_v53  ;;  %v4651_v36 = vmul.f32 %v5508_v59, %v4560_v12 }
0x1871   :  { %v4567_v31 = vpop.permute.xlu1 %4566 }
0x1872   :  { %v4574_v32 = vsel %vm42_vm8, %v4565_v7, %v4567_v31 }
0x1873   :  { %v4653_v4 = vmul.f32 %v4574_v32, %v9808_v55  ;;  %v4569_v47 = vpop.permute.xlu0 %4568 }
0x1874   :  { %v4573_v11 = vsel %vm42_vm8, %v4567_v31, %v4569_v47 }
0x1875   :  { %v4571_v46 = vpop.permute.xlu1 %4570  ;;  %v4685_v40 = vpack.c.bf16 %v4653_v4, %v4649_v27  ;;  %v4654_v55 = vmul.f32 %v5506_v21, %v4573_v11 }
0x1876   :  { %v4572_v34 = vsel %vm42_vm8, %v4569_v47, %v4571_v46  ;;  %v4575_v49 = vsel %vm42_vm8, %v4571_v46, %v4565_v7 }
0x1877   :  { %v4652_v39 = vmul.f32 %v4575_v49, %v9823_v9  ;;  %v4655_v29 = vmul.f32 %v4572_v34, %v9828_v58  ;;  %4718 = vmatprep.subr.bf16.mxu0 %v4685_v40  ;;  %v4686_v48 = vpack.c.bf16 %v4654_v55, %v4650_v33  ;;  %v5004_v9 = vld [vmem:[%s10176_s0 + $0x2a0] sm:$0xff]  ;;  %v5006_v58 = vld [vmem:[%s10176_s0 + $0x2b0] sm:$0xff] }
0x1878   :  { %v4449_v51 = vadd.f32 %v5004_v9, %v9848_v13 }
0x1879   :  { %v4684_v28 = vpack.c.bf16 %v4652_v39, %v4648_v24  ;;  %v4687_v8 = vpack.c.bf16 %v4655_v29, %v4651_v36 }
0x187a   :  { %v5018_v26 = vmul.f32 -1.442695, %v4449_v51 }
0x187b   :  { %4719 = vmatpush1.bf16.msra.mxu0 %v4684_v28  ;;  %4759 = vmatprep.subr.bf16.mxu1 %v4687_v8 }
0x187c   :  { %4760 = vmatpush1.bf16.msra.mxu1 %v4686_v48  ;;  %5339 = vpow2.f32 %v5018_v26 }
0x187e   :  { %5026 = vmatmul.mubr.msk.bf16.vlgmr.msra.gmra.mxu0 %vm166_vm0, %v9581_v19 }
0x187f   :  { %5027 = vmatmul.mubr.msk.bf16.vlgmr.msra.gmra.mxu1 %vm166_vm0, %v9581_v19  ;;  %v4492_v19 = vadd.f32 %v5006_v58, %v9850_v10 }
0x1881   :  { %v5020_v22 = vmul.f32 -1.442695, %v4492_v19 }
0x1883   :  { %5341 = vpow2.f32 %v5020_v22 }
0x1884   :  { %5343 = vpow2.f32 %v5019_v20 }
0x1885   :  { %5345 = vpow2.f32 %v5021_v63 }
0x1889   :  { %v5340_v3 = vpop.eup %5339 }
0x188a   :  { %v4512_v50 = vadd.f32 1.0, %v5340_v3 }
0x188c   :  { %5347 = vrcp.f32 %v4512_v50 }
0x1890   :  { %v5342_v13 = vpop.eup %5341 }
0x1891   :  { %v5344_v5 = vpop.eup %5343  ;;  %v4514_v60 = vadd.f32 1.0, %v5342_v13 }
0x1892   :  { %v5346_v1 = vpop.eup %5345  ;;  %v4513_v61 = vadd.f32 1.0, %v5344_v5 }
0x1893   :  { %v4515_v10 = vadd.f32 1.0, %v5346_v1  ;;  %5349 = vrcp.f32 %v4514_v60 }
0x1894   :  { %5351 = vrcp.f32 %v4513_v61 }
0x1895   :  { %5353 = vrcp.f32 %v4515_v10 }
0x1899   :  { %v5348_v27 = vpop.eup %5347 }
0x189a   :  { %v4790_v53 = vsub.f32 1.0, %v5348_v27 }
0x189c   :  { %v4794_v55 = vmul.f32 %v4790_v53, %v9619_v14 }
0x18a0   :  { %v5350_v4 = vpop.eup %5349 }
0x18a1   :  { %v5352_v47 = vpop.eup %5351  ;;  %v4792_v11 = vsub.f32 1.0, %v5350_v4 }
0x18a2   :  { %v5354_v12 = vpop.eup %5353  ;;  %v4791_v30 = vsub.f32 1.0, %v5352_v47 }
0x18a3   :  { %v4793_v40 = vsub.f32 1.0, %v5354_v12  ;;  %v4796_v6 = vmul.f32 %v4792_v11, %v9622_v52 }
0x18a4   :  { %v4795_v39 = vmul.f32 %v4791_v30, %v9629_v18 }
0x18a5   :  { %v4797_v33 = vmul.f32 %v4793_v40, %v9637_v25 }
0x193e   :  { %v4738_v17 = vpop.f32.mrf.mxu0 }
0x193f   :  { %v4739_v41 = vadd.f32 %v5012_v15, %v4738_v17  ;;  %v4779_v23 = vpop.f32.mrf.mxu1 }
0x1940   :  { %v4780_v57 = vadd.f32 %v5014_v0, %v4779_v23  ;;  %v4740_v43 = vpop.f32.mrf.mxu0 }
0x1941   :  { %5355 = vtanh.f32 %v4739_v41  ;;  %v4741_v45 = vadd.f32 %v5013_v37, %v4740_v43  ;;  %v4781_v38 = vpop.f32.mrf.mxu1 }
0x1942   :  { %5357 = vtanh.f32 %v4780_v57  ;;  %v4782_v7 = vadd.f32 %v5015_v16, %v4781_v38  ;;  %v4742_v42 = vpop.f32.mrf.mxu0 }
0x1943   :  { %5359 = vtanh.f32 %v4741_v45  ;;  %v4783_v31 = vpop.f32.mrf.mxu1 }
0x1944   :  { %5361 = vtanh.f32 %v4782_v7  ;;  %v4743_v32 = vpop.f32.mrf.mxu0 }
0x1945   :  { %v4784_v56 = vpop.f32.mrf.mxu1 }
0x194e   :  { %v5356_v46 = vpop.eup %5355 }
0x194f   :  { %v5358_v21 = vpop.eup %5357  ;;  %v4798_v34 = vmul.f32 %v5356_v46, %v5348_v27 }
0x1950   :  { %v5360_v49 = vpop.eup %5359  ;;  %v4800_v24 = vmul.f32 %v5358_v21, %v5350_v4 }
0x1951   :  { %v5362_v59 = vpop.eup %5361  ;;  %v4802_v36 = vadd.f32 %v4798_v34, %v4794_v55  ;;  %v4799_v29 = vmul.f32 %v5360_v49, %v5352_v47 }
0x1952   :  { %v4804_v44 = vadd.f32 %v4800_v24, %v4796_v6  ;;  %v4801_v28 = vmul.f32 %v5362_v59, %v5354_v12 }
0x1953   :  { %5028 = vst [vmem:[%s10178_s4 + $0xe0] sm:$0xff] %v4802_v36  ;;  %4811 = vst [vmem:[%s10179_s5] sm:$0xff] %v4802_v36  ;;  %v4803_v14 = vadd.f32 %v4799_v29, %v4795_v39 }
0x1954   :  { %5030 = vst [vmem:[%s10178_s4 + $0xf0] sm:$0xff] %v4804_v44  ;;  %4813 = vst [vmem:[%s10179_s5 + $0x10] sm:$0xff] %v4804_v44  ;;  %v4805_v52 = vadd.f32 %v4801_v28, %v4797_v33 }
0x1955   :  { %5029 = vst [vmem:[%s10178_s4 + $0xe8] sm:$0xff] %v4803_v14  ;;  %4812 = vst [vmem:[%s10179_s5 + $0x8] sm:$0xff] %v4803_v14 }
0x1956   :  { %5031 = vst [vmem:[%s10178_s4 + $0xf8] sm:$0xff] %v4805_v52  ;;  %4814 = vst [vmem:[%s10179_s5 + $0x18] sm:$0xff] %v4805_v52 }

</bundles_post_ra>
